<compile_context>
chip_gen: v6e
topology: v6e:2x2x1
jax: 0.10.0
libtpu: 0.0.40
codegen_flags: <defaults>
</compile_context>

<pallas_src>
import math

import jax
import jax.numpy as jnp
from jax.experimental import pallas as pl
from jax.experimental.pallas import tpu as pltpu

C_SIZE = 4       # image channels
DIM = 32         # hidden width of the gated blocks
NUM_LAYERS = 14  # num_blocks=1, num_layers_per_block=14, dilation=1
TM = 256         # pixel rows (N*H*W) per MXU tile


def _round_up(x, m):
    return (x + m - 1) // m * m


# ----------------------------- Pallas kernels -------------------------------

def _vconv_gated_kernel(a_ref, w_ref, b_ref, pre_ref, g_ref):
    """Vertical stack: pre = im2col_v @ wv + bv ; vx = tanh(a)*sigmoid(b).
    Gate halves are contiguous (weight columns permuted at init)."""
    pre = jnp.dot(a_ref[...], w_ref[...],
                  preferred_element_type=jnp.float32) + b_ref[...]
    pre_ref[...] = pre.astype(pre_ref.dtype)
    half = pre.shape[-1] // 2
    g_ref[...] = (jnp.tanh(pre[:, :half]) *
                  jax.nn.sigmoid(pre[:, half:])).astype(g_ref.dtype)


def _hconv_gated_res_kernel(ah_ref, vp_ref, wh_ref, wv2h_ref, bh_ref,
                            wha_ref, bha_ref, res_ref, o_ref):
    """Horizontal stack, fully fused:
    pre = im2col_h @ [wh_conv; wh_mask] + v_conv_pre @ wv2h + bh
    hx  = gated(pre) @ wha + bha + residual."""
    pre = (jnp.dot(ah_ref[...], wh_ref[...], preferred_element_type=jnp.float32)
           + jnp.dot(vp_ref[...], wv2h_ref[...], preferred_element_type=jnp.float32)
           + bh_ref[...])
    half = pre.shape[-1] // 2
    g = jnp.tanh(pre[:, :half]) * jax.nn.sigmoid(pre[:, half:])
    h = jnp.dot(g.astype(wha_ref.dtype), wha_ref[...],
                preferred_element_type=jnp.float32) + bha_ref[...]
    o_ref[...] = (h + res_ref[...]).astype(o_ref.dtype)


def _head_kernel(x_ref, w1t_ref, w1b_ref, b1_ref, w2t_ref, w2b_ref, b2_ref,
                 o_ref):
    """Output head: ConcatReLU -> masked 1x1 -> ConcatReLU -> masked 1x1.
    ConcatReLU's interleave is folded into split weights (rows permuted at
    init):  interleave(relu(x), relu(-x)) @ W == relu(x)@Wt + relu(-x)@Wb."""
    x = x_ref[...]
    xp = jnp.maximum(x, 0.0).astype(w1t_ref.dtype)
    xn = jnp.maximum(-x, 0.0).astype(w1t_ref.dtype)
    y = (jnp.dot(xp, w1t_ref[...], preferred_element_type=jnp.float32)
         + jnp.dot(xn, w1b_ref[...], preferred_element_type=jnp.float32)
         + b1_ref[...])
    yp = jnp.maximum(y, 0.0).astype(w2t_ref.dtype)
    yn = jnp.maximum(-y, 0.0).astype(w2t_ref.dtype)
    o_ref[...] = (jnp.dot(yp, w2t_ref[...], preferred_element_type=jnp.float32)
                  + jnp.dot(yn, w2b_ref[...], preferred_element_type=jnp.float32)
                  + b2_ref[...]).astype(o_ref.dtype)


# ----------------------------- pallas_call wrappers --------------------------

def _row_spec(tm, c):
    return pl.BlockSpec((tm, c), lambda i: (i, 0))


def _full_spec(shape):
    return pl.BlockSpec(shape, lambda i: (0, 0))


_PARALLEL = pltpu.CompilerParams(dimension_semantics=("parallel",))


def _call_vertical(a, wv, bv, tm):
    mp, kv = a.shape
    dim = wv.shape[1]
    return pl.pallas_call(
        _vconv_gated_kernel,
        out_shape=(jax.ShapeDtypeStruct((mp, dim), jnp.bfloat16),
                   jax.ShapeDtypeStruct((mp, dim // 2), jnp.bfloat16)),
        grid_spec=pltpu.PrefetchScalarGridSpec(
            num_scalar_prefetch=0,
            grid=(mp // tm,),
            in_specs=[_row_spec(tm, kv), _full_spec(wv.shape),
                      _full_spec(bv.shape)],
            out_specs=[_row_spec(tm, dim), _row_spec(tm, dim // 2)]),
        compiler_params=_PARALLEL,
    )(a, wv, bv)


def _call_horizontal(ah, vpre, wh, wv2h, bh, wha, bha, res, tm):
    mp, kh = ah.shape
    dim = wh.shape[1]
    half = dim // 2
    return pl.pallas_call(
        _hconv_gated_res_kernel,
        out_shape=jax.ShapeDtypeStruct((mp, half), jnp.float32),
        grid_spec=pltpu.PrefetchScalarGridSpec(
            num_scalar_prefetch=0,
            grid=(mp // tm,),
            in_specs=[_row_spec(tm, kh), _row_spec(tm, dim),
                      _full_spec(wh.shape), _full_spec(wv2h.shape),
                      _full_spec(bh.shape), _full_spec(wha.shape),
                      _full_spec(bha.shape), _row_spec(tm, half)],
            out_specs=_row_spec(tm, half)),
        compiler_params=_PARALLEL,
    )(ah, vpre, wh, wv2h, bh, wha, bha, res)


def _call_head(hx, w1t, w1b, b1, w2t, w2b, b2, tm):
    mp, half = hx.shape
    nout = w2t.shape[1]
    return pl.pallas_call(
        _head_kernel,
        out_shape=jax.ShapeDtypeStruct((mp, nout), jnp.float32),
        grid_spec=pltpu.PrefetchScalarGridSpec(
            num_scalar_prefetch=0,
            grid=(mp // tm,),
            in_specs=[_row_spec(tm, half),
                      _full_spec(w1t.shape), _full_spec(w1b.shape),
                      _full_spec(b1.shape),
                      _full_spec(w2t.shape), _full_spec(w2b.shape),
                      _full_spec(b2.shape)],
            out_specs=_row_spec(tm, nout)),
        compiler_params=_PARALLEL,
    )(hx, w1t, w1b, b1, w2t, w2b, b2)


# ----------------------------- im2col glue (XLA) -----------------------------

def _shift2d(x, dy, dx):
    """out[n, h, w, c] = x[n, h + dy, w + dx, c], zero outside bounds."""
    n, h, w, c = x.shape
    pt, pb = max(-dy, 0), max(dy, 0)
    pleft, pright = max(-dx, 0), max(dx, 0)
    xp = jnp.pad(x, ((0, 0), (pt, pb), (pleft, pright), (0, 0)))
    hs, ws = max(dy, 0), max(dx, 0)
    return xp[:, hs:hs + h, ws:ws + w, :]


def _im2col_vertical(x, k):
    # rows h-(k-1)..h, cols w-k//2..w+k//2 : Conv2d(pad=(k-1, k//2)) on the
    # row-shifted vx, cropped to the first H rows.
    cols = []
    for ky in range(k):
        dy = ky - (k - 1)
        for kx in range(k):
            cols.append(_shift2d(x, dy, kx - (k // 2)))
    return jnp.concatenate(cols, axis=-1)


def _im2col_horizontal(x, k):
    # strictly-left columns w-(k-1)..w-1 (causal (1,k-1) conv), plus the
    # current pixel (rows that the masked sub-pixel 1x1 consumes).
    cols = [_shift2d(x, 0, kx - (k - 1)) for kx in range(k - 1)]
    cols.append(x)
    return jnp.concatenate(cols, axis=-1)


def _flat(x):
    return x.reshape(-1, x.shape[-1])


def _pad_rows(x, mp):
    m = x.shape[0]
    return x if m == mp else jnp.pad(x, ((0, mp - m), (0, 0)))


# ----------------------------- parameters -----------------------------------

def _xavier(key, shape, fan_in, fan_out):
    std = math.sqrt(2.0 / (fan_in + fan_out))
    return std * jax.random.normal(key, shape, dtype=jnp.float32)


def _masked_dense(key, in_dim, out_dim, c_size, mask_type):
    """MaskedConv2d's per-group sub-pixel 1x1 convs folded into a single dense
    (in_dim, out_dim) channels-last matrix (reference channel ordering),
    with per-group xavier init matching nn.Conv2d(in_sub*(i+1), out_sub, 1)."""
    in_sub = in_dim // c_size
    out_sub = out_dim // c_size
    n_convs = c_size - (1 if mask_type == 'A' else 0)
    base = out_sub if mask_type == 'A' else 0
    w = jnp.zeros((in_dim, out_dim), jnp.float32)
    keys = jax.random.split(key, max(n_convs, 1))
    for i in range(n_convs):
        fan_in = in_sub * (i + 1)
        blk = _xavier(keys[i], (fan_in, out_sub), fan_in, out_sub)
        w = w.at[:fan_in, base + out_sub * i: base + out_sub * (i + 1)].set(blk)
    return w


def init_params(key, c_size=C_SIZE, dim=DIM, num_layers=NUM_LAYERS):
    """Weights are built in the PyTorch reference layout, then permuted / fused
    once so the forward needs no strided-lane slices or interleaves:
      * gate halves made contiguous (even cols first, odd cols second),
      * wh_conv / wh_mask fused row-wise; wv2h rows+cols follow the gate perm,
      * ConcatReLU consumers split into (relu(x), relu(-x)) row blocks."""
    half = dim // 2
    perm = jnp.concatenate([jnp.arange(0, dim, 2), jnp.arange(1, dim, 2)])
    params = {'layers': []}
    input_dim = c_size + 1
    for j in range(num_layers):
        k = 7 if j == 0 else 3
        key, k1, k2, k3, k4, k5 = jax.random.split(key, 6)
        wv = _xavier(k1, (k * k * input_dim, dim),
                     input_dim * k * k, dim * k * k)
        wh_conv = _xavier(k2, ((k - 1) * input_dim, dim),
                          input_dim * (k - 1), dim * (k - 1))
        wh_mask = _masked_dense(k3, input_dim, dim, c_size,
                                'A' if j == 0 else 'B')
        wh = jnp.concatenate([wh_conv, wh_mask], axis=0)
        wv2h = _xavier(k4, (dim, dim), dim, dim)
        wha = _masked_dense(k5, half, half, c_size, 'B')
        params['layers'].append({
            'wv': wv[:, perm].astype(jnp.bfloat16),
            'bv': jnp.zeros((1, dim), jnp.float32),
            'wh': wh[:, perm].astype(jnp.bfloat16),
            'bh': jnp.zeros((1, dim), jnp.float32),
            'wv2h': wv2h[perm][:, perm].astype(jnp.bfloat16),
            'wha': wha.astype(jnp.bfloat16),
            'bha': jnp.zeros((1, half), jnp.float32),
        })
        input_dim = half
    key, ko1, ko2 = jax.random.split(key, 3)
    w1 = _masked_dense(ko1, 2 * half, half, c_size, 'B')          # interleaved rows
    w2 = _masked_dense(ko2, 2 * half, c_size * 256, c_size, 'B')
    params.update({
        'w1t': w1[0::2].astype(jnp.bfloat16),   # rows multiplying relu(x)
        'w1b': w1[1::2].astype(jnp.bfloat16),   # rows multiplying relu(-x)
        'b1': jnp.zeros((1, half), jnp.float32),
        'w2t': w2[0::2].astype(jnp.bfloat16),
        'w2b': w2[1::2].astype(jnp.bfloat16),
        'b2': jnp.zeros((1, c_size * 256), jnp.float32),
    })
    return params


# ----------------------------- forward ---------------------------------------

def pixelcnn_forward(params, x_nchw, c_size=C_SIZE, dim=DIM, tm=TM):
    x = jnp.transpose(x_nchw.astype(jnp.float32), (0, 2, 3, 1))   # NCHW -> NHWC
    n, h, w, _ = x.shape
    half = dim // 2
    m = n * h * w
    mp = _round_up(m, tm)

    x = x / 127.5 - 1.0
    # F.pad(x, (0,0,0,0,0,1), value=1.0): append one constant-1.0 channel
    x = jnp.concatenate([x, jnp.ones((n, h, w, 1), jnp.float32)], axis=-1)
    hx_sp = x.astype(jnp.bfloat16)
    # x2vx: shift rows down by one, zero top row
    vx_sp = jnp.concatenate(
        [jnp.zeros((n, 1, w, hx_sp.shape[-1]), jnp.bfloat16), hx_sp[:, :-1]],
        axis=1)
    res = jnp.zeros((mp, half), jnp.float32)     # residual carried in f32

    for j, lp in enumerate(params['layers']):
        k = 7 if j == 0 else 3
        # vertical stack (pre-activation + gated output from one kernel)
        a_v = _pad_rows(_flat(_im2col_vertical(vx_sp, k)), mp)
        v_pre, vx_flat = _call_vertical(a_v, lp['wv'], lp['bv'], tm)
        vx_sp = vx_flat[:m].reshape(n, h, w, half)
        # horizontal stack (causal conv + masked 1x1 + v2h + gate + h_act +
        # residual, all in one kernel)
        a_h = _pad_rows(_flat(_im2col_horizontal(hx_sp, k)), mp)
        hx_flat = _call_horizontal(a_h, v_pre, lp['wh'], lp['wv2h'], lp['bh'],
                                   lp['wha'], lp['bha'], res, tm)
        res = hx_flat
        hx_sp = hx_flat[:m].reshape(n, h, w, half).astype(jnp.bfloat16)

    logits = _call_head(res, params['w1t'], params['w1b'], params['b1'],
                        params['w2t'], params['w2b'], params['b2'], tm)[:m]
    # lane-dense (M, c*256) slab -> (N, 256, c, H, W), single transpose at end
    out = jnp.transpose(logits.reshape(n, h, w, c_size, 256), (0, 4, 3, 1, 2))
    return out


if __name__ == "__main__":
    key = jax.random.PRNGKey(0)
    kp, kx = jax.random.split(key)
    params = init_params(kp)

    N, H, W = 2, 16, 16
    x = jax.random.uniform(kx, (N, C_SIZE, H, W), jnp.float32, 0.0, 255.0)

    fwd = jax.jit(pixelcnn_forward)
    out = jax.block_until_ready(fwd(params, x))

    assert out.shape == (N, 256, C_SIZE, H, W), out.shape
    assert bool(jnp.all(jnp.isfinite(out)))
    print("KERNEL_OK")
</pallas_src>

<mosaic_0001>
module attributes {stable_mosaic.version = 11 : i64} {
  func.func @_vconv_gated_kernel(%arg0: i32, %arg1: memref<256x245xbf16, #tpu.memory_space<vmem>>, %arg2: memref<245x32xbf16, #tpu.memory_space<vmem>>, %arg3: memref<1x32xf32, #tpu.memory_space<vmem>>, %arg4: memref<256x32xbf16, #tpu.memory_space<vmem>>, %arg5: memref<256x16xbf16, #tpu.memory_space<vmem>>) attributes {dimension_semantics = [#tpu.dimension_semantics<parallel>], iteration_bounds = array<i64: 2>, scalar_prefetch = 0 : i64, scratch_operands = 0 : i64, tpu.core_type = #tpu.core_type<tc>, window_params = [{transform_indices = @transform_0, window_bounds = array<i64: 256, 245>}, {pipeline_mode = #tpu.pipeline_mode<synchronous>, transform_indices = @transform_1, window_bounds = array<i64: 245, 32>}, {pipeline_mode = #tpu.pipeline_mode<synchronous>, transform_indices = @transform_2, window_bounds = array<i64: 1, 32>}, {transform_indices = @transform_3, window_bounds = array<i64: 256, 32>}, {transform_indices = @transform_4, window_bounds = array<i64: 256, 16>}]} {
    %c0 = arith.constant 0 : index
    %c0_0 = arith.constant 0 : index
    %0 = vector.load %arg1[%c0, %c0_0] : memref<256x245xbf16, #tpu.memory_space<vmem>>, vector<256x245xbf16>
    %c0_1 = arith.constant 0 : index
    %c0_2 = arith.constant 0 : index
    %1 = vector.load %arg2[%c0_1, %c0_2] : memref<245x32xbf16, #tpu.memory_space<vmem>>, vector<245x32xbf16>
    %cst = arith.constant dense<0.000000e+00> : vector<256x32xf32>
    %2 = tpu.matmul %0, %1, %cst {dimension_numbers = #tpu.dot_dimension_numbers<[1], [0], [0], [1], [0, 0, 1, 1], [], []>} : vector<256x245xbf16>, vector<245x32xbf16>, vector<256x32xf32> -> vector<256x32xf32>
    %c0_3 = arith.constant 0 : index
    %c0_4 = arith.constant 0 : index
    %3 = vector.load %arg3[%c0_3, %c0_4] : memref<1x32xf32, #tpu.memory_space<vmem>>, vector<1x32xf32>
    %4 = vector.broadcast %3 : vector<1x32xf32> to vector<256x32xf32>
    %5 = arith.addf %2, %4 : vector<256x32xf32>
    %6 = arith.truncf %5 : vector<256x32xf32> to vector<256x32xbf16>
    %c0_5 = arith.constant 0 : index
    %c0_6 = arith.constant 0 : index
    %7 = vector.load %arg4[%c0_5, %c0_6] : memref<256x32xbf16, #tpu.memory_space<vmem>>, vector<256x32xbf16>
    tpu.vector_store %arg4[%c0_5, %c0_6], %6 {strides = array<i32>} : memref<256x32xbf16, #tpu.memory_space<vmem>>, vector<256x32xbf16>,
    %8 = vector.extract_strided_slice %5 {offsets = [0, 0], sizes = [256, 16], strides = [1, 1]} : vector<256x32xf32> to vector<256x16xf32>
    %9 = math.tanh %8 : vector<256x16xf32>
    %10 = vector.extract_strided_slice %5 {offsets = [0, 16], sizes = [256, 16], strides = [1, 1]} : vector<256x32xf32> to vector<256x16xf32>
    %11 = arith.negf %10 : vector<256x16xf32>
    %12 = math.exp %11 : vector<256x16xf32>
    %cst_7 = arith.constant 1.000000e+00 : f32
    %13 = vector.broadcast %cst_7 : f32 to vector<256x16xf32>
    %14 = arith.addf %13, %12 : vector<256x16xf32>
    %15 = arith.divf %13, %14 : vector<256x16xf32>
    %16 = arith.mulf %9, %15 : vector<256x16xf32>
    %17 = arith.truncf %16 : vector<256x16xf32> to vector<256x16xbf16>
    %c0_8 = arith.constant 0 : index
    %c0_9 = arith.constant 0 : index
    %18 = vector.load %arg5[%c0_8, %c0_9] : memref<256x16xbf16, #tpu.memory_space<vmem>>, vector<256x16xbf16>
    tpu.vector_store %arg5[%c0_8, %c0_9], %17 {strides = array<i32>} : memref<256x16xbf16, #tpu.memory_space<vmem>>, vector<256x16xbf16>,
    return
  }
  func.func @transform_0(%arg0: i32) -> (i32, i32) {
    %c0_i32 = arith.constant 0 : i32
    %c0_i32_0 = arith.constant 0 : i32
    return %arg0, %c0_i32 : i32, i32
  }
  func.func @transform_1(%arg0: i32) -> (i32, i32) {
    %c0_i32 = arith.constant 0 : i32
    %c0_i32_0 = arith.constant 0 : i32
    %c0_i32_1 = arith.constant 0 : i32
    return %c0_i32, %c0_i32_0 : i32, i32
  }
  func.func @transform_2(%arg0: i32) -> (i32, i32) {
    %c0_i32 = arith.constant 0 : i32
    %c0_i32_0 = arith.constant 0 : i32
    %c0_i32_1 = arith.constant 0 : i32
    return %c0_i32, %c0_i32_0 : i32, i32
  }
  func.func @transform_3(%arg0: i32) -> (i32, i32) {
    %c0_i32 = arith.constant 0 : i32
    %c0_i32_0 = arith.constant 0 : i32
    return %arg0, %c0_i32 : i32, i32
  }
  func.func @transform_4(%arg0: i32) -> (i32, i32) {
    %c0_i32 = arith.constant 0 : i32
    %c0_i32_0 = arith.constant 0 : i32
    return %arg0, %c0_i32 : i32, i32
  }
}

module attributes {stable_mosaic.version = 11 : i64} {
  func.func @_vconv_gated_kernel(%arg0: i32, %arg1: memref<256x144xbf16, #tpu.memory_space<vmem>>, %arg2: memref<144x32xbf16, #tpu.memory_space<vmem>>, %arg3: memref<1x32xf32, #tpu.memory_space<vmem>>, %arg4: memref<256x32xbf16, #tpu.memory_space<vmem>>, %arg5: memref<256x16xbf16, #tpu.memory_space<vmem>>) attributes {dimension_semantics = [#tpu.dimension_semantics<parallel>], iteration_bounds = array<i64: 2>, scalar_prefetch = 0 : i64, scratch_operands = 0 : i64, tpu.core_type = #tpu.core_type<tc>, window_params = [{transform_indices = @transform_0, window_bounds = array<i64: 256, 144>}, {pipeline_mode = #tpu.pipeline_mode<synchronous>, transform_indices = @transform_1, window_bounds = array<i64: 144, 32>}, {pipeline_mode = #tpu.pipeline_mode<synchronous>, transform_indices = @transform_2, window_bounds = array<i64: 1, 32>}, {transform_indices = @transform_3, window_bounds = array<i64: 256, 32>}, {transform_indices = @transform_4, window_bounds = array<i64: 256, 16>}]} {
    %c0 = arith.constant 0 : index
    %c0_0 = arith.constant 0 : index
    %0 = vector.load %arg1[%c0, %c0_0] : memref<256x144xbf16, #tpu.memory_space<vmem>>, vector<256x144xbf16>
    %c0_1 = arith.constant 0 : index
    %c0_2 = arith.constant 0 : index
    %1 = vector.load %arg2[%c0_1, %c0_2] : memref<144x32xbf16, #tpu.memory_space<vmem>>, vector<144x32xbf16>
    %cst = arith.constant dense<0.000000e+00> : vector<256x32xf32>
    %2 = tpu.matmul %0, %1, %cst {dimension_numbers = #tpu.dot_dimension_numbers<[1], [0], [0], [1], [0, 0, 1, 1], [], []>} : vector<256x144xbf16>, vector<144x32xbf16>, vector<256x32xf32> -> vector<256x32xf32>
    %c0_3 = arith.constant 0 : index
    %c0_4 = arith.constant 0 : index
    %3 = vector.load %arg3[%c0_3, %c0_4] : memref<1x32xf32, #tpu.memory_space<vmem>>, vector<1x32xf32>
    %4 = vector.broadcast %3 : vector<1x32xf32> to vector<256x32xf32>
    %5 = arith.addf %2, %4 : vector<256x32xf32>
    %6 = arith.truncf %5 : vector<256x32xf32> to vector<256x32xbf16>
    %c0_5 = arith.constant 0 : index
    %c0_6 = arith.constant 0 : index
    %7 = vector.load %arg4[%c0_5, %c0_6] : memref<256x32xbf16, #tpu.memory_space<vmem>>, vector<256x32xbf16>
    tpu.vector_store %arg4[%c0_5, %c0_6], %6 {strides = array<i32>} : memref<256x32xbf16, #tpu.memory_space<vmem>>, vector<256x32xbf16>,
    %8 = vector.extract_strided_slice %5 {offsets = [0, 0], sizes = [256, 16], strides = [1, 1]} : vector<256x32xf32> to vector<256x16xf32>
    %9 = math.tanh %8 : vector<256x16xf32>
    %10 = vector.extract_strided_slice %5 {offsets = [0, 16], sizes = [256, 16], strides = [1, 1]} : vector<256x32xf32> to vector<256x16xf32>
    %11 = arith.negf %10 : vector<256x16xf32>
    %12 = math.exp %11 : vector<256x16xf32>
    %cst_7 = arith.constant 1.000000e+00 : f32
    %13 = vector.broadcast %cst_7 : f32 to vector<256x16xf32>
    %14 = arith.addf %13, %12 : vector<256x16xf32>
    %15 = arith.divf %13, %14 : vector<256x16xf32>
    %16 = arith.mulf %9, %15 : vector<256x16xf32>
    %17 = arith.truncf %16 : vector<256x16xf32> to vector<256x16xbf16>
    %c0_8 = arith.constant 0 : index
    %c0_9 = arith.constant 0 : index
    %18 = vector.load %arg5[%c0_8, %c0_9] : memref<256x16xbf16, #tpu.memory_space<vmem>>, vector<256x16xbf16>
    tpu.vector_store %arg5[%c0_8, %c0_9], %17 {strides = array<i32>} : memref<256x16xbf16, #tpu.memory_space<vmem>>, vector<256x16xbf16>,
    return
  }
  func.func @transform_0(%arg0: i32) -> (i32, i32) {
    %c0_i32 = arith.constant 0 : i32
    %c0_i32_0 = arith.constant 0 : i32
    return %arg0, %c0_i32 : i32, i32
  }
  func.func @transform_1(%arg0: i32) -> (i32, i32) {
    %c0_i32 = arith.constant 0 : i32
    %c0_i32_0 = arith.constant 0 : i32
    %c0_i32_1 = arith.constant 0 : i32
    return %c0_i32, %c0_i32_0 : i32, i32
  }
  func.func @transform_2(%arg0: i32) -> (i32, i32) {
    %c0_i32 = arith.constant 0 : i32
    %c0_i32_0 = arith.constant 0 : i32
    %c0_i32_1 = arith.constant 0 : i32
    return %c0_i32, %c0_i32_0 : i32, i32
  }
  func.func @transform_3(%arg0: i32) -> (i32, i32) {
    %c0_i32 = arith.constant 0 : i32
    %c0_i32_0 = arith.constant 0 : i32
    return %arg0, %c0_i32 : i32, i32
  }
  func.func @transform_4(%arg0: i32) -> (i32, i32) {
    %c0_i32 = arith.constant 0 : i32
    %c0_i32_0 = arith.constant 0 : i32
    return %arg0, %c0_i32 : i32, i32
  }
}

module attributes {stable_mosaic.version = 11 : i64} {
  func.func @_vconv_gated_kernel(%arg0: i32, %arg1: memref<256x144xbf16, #tpu.memory_space<vmem>>, %arg2: memref<144x32xbf16, #tpu.memory_space<vmem>>, %arg3: memref<1x32xf32, #tpu.memory_space<vmem>>, %arg4: memref<256x32xbf16, #tpu.memory_space<vmem>>, %arg5: memref<256x16xbf16, #tpu.memory_space<vmem>>) attributes {dimension_semantics = [#tpu.dimension_semantics<parallel>], iteration_bounds = array<i64: 2>, scalar_prefetch = 0 : i64, scratch_operands = 0 : i64, tpu.core_type = #tpu.core_type<tc>, window_params = [{transform_indices = @transform_0, window_bounds = array<i64: 256, 144>}, {pipeline_mode = #tpu.pipeline_mode<synchronous>, transform_indices = @transform_1, window_bounds = array<i64: 144, 32>}, {pipeline_mode = #tpu.pipeline_mode<synchronous>, transform_indices = @transform_2, window_bounds = array<i64: 1, 32>}, {transform_indices = @transform_3, window_bounds = array<i64: 256, 32>}, {transform_indices = @transform_4, window_bounds = array<i64: 256, 16>}]} {
    %c0 = arith.constant 0 : index
    %c0_0 = arith.constant 0 : index
    %0 = vector.load %arg1[%c0, %c0_0] : memref<256x144xbf16, #tpu.memory_space<vmem>>, vector<256x144xbf16>
    %c0_1 = arith.constant 0 : index
    %c0_2 = arith.constant 0 : index
    %1 = vector.load %arg2[%c0_1, %c0_2] : memref<144x32xbf16, #tpu.memory_space<vmem>>, vector<144x32xbf16>
    %cst = arith.constant dense<0.000000e+00> : vector<256x32xf32>
    %2 = tpu.matmul %0, %1, %cst {dimension_numbers = #tpu.dot_dimension_numbers<[1], [0], [0], [1], [0, 0, 1, 1], [], []>} : vector<256x144xbf16>, vector<144x32xbf16>, vector<256x32xf32> -> vector<256x32xf32>
    %c0_3 = arith.constant 0 : index
    %c0_4 = arith.constant 0 : index
    %3 = vector.load %arg3[%c0_3, %c0_4] : memref<1x32xf32, #tpu.memory_space<vmem>>, vector<1x32xf32>
    %4 = vector.broadcast %3 : vector<1x32xf32> to vector<256x32xf32>
    %5 = arith.addf %2, %4 : vector<256x32xf32>
    %6 = arith.truncf %5 : vector<256x32xf32> to vector<256x32xbf16>
    %c0_5 = arith.constant 0 : index
    %c0_6 = arith.constant 0 : index
    %7 = vector.load %arg4[%c0_5, %c0_6] : memref<256x32xbf16, #tpu.memory_space<vmem>>, vector<256x32xbf16>
    tpu.vector_store %arg4[%c0_5, %c0_6], %6 {strides = array<i32>} : memref<256x32xbf16, #tpu.memory_space<vmem>>, vector<256x32xbf16>,
    %8 = vector.extract_strided_slice %5 {offsets = [0, 0], sizes = [256, 16], strides = [1, 1]} : vector<256x32xf32> to vector<256x16xf32>
    %9 = math.tanh %8 : vector<256x16xf32>
    %10 = vector.extract_strided_slice %5 {offsets = [0, 16], sizes = [256, 16], strides = [1, 1]} : vector<256x32xf32> to vector<256x16xf32>
    %11 = arith.negf %10 : vector<256x16xf32>
    %12 = math.exp %11 : vector<256x16xf32>
    %cst_7 = arith.constant 1.000000e+00 : f32
    %13 = vector.broadcast %cst_7 : f32 to vector<256x16xf32>
    %14 = arith.addf %13, %12 : vector<256x16xf32>
    %15 = arith.divf %13, %14 : vector<256x16xf32>
    %16 = arith.mulf %9, %15 : vector<256x16xf32>
    %17 = arith.truncf %16 : vector<256x16xf32> to vector<256x16xbf16>
    %c0_8 = arith.constant 0 : index
    %c0_9 = arith.constant 0 : index
    %18 = vector.load %arg5[%c0_8, %c0_9] : memref<256x16xbf16, #tpu.memory_space<vmem>>, vector<256x16xbf16>
    tpu.vector_store %arg5[%c0_8, %c0_9], %17 {strides = array<i32>} : memref<256x16xbf16, #tpu.memory_space<vmem>>, vector<256x16xbf16>,
    return
  }
  func.func @transform_0(%arg0: i32) -> (i32, i32) {
    %c0_i32 = arith.constant 0 : i32
    %c0_i32_0 = arith.constant 0 : i32
    return %arg0, %c0_i32 : i32, i32
  }
  func.func @transform_1(%arg0: i32) -> (i32, i32) {
    %c0_i32 = arith.constant 0 : i32
    %c0_i32_0 = arith.constant 0 : i32
    %c0_i32_1 = arith.constant 0 : i32
    return %c0_i32, %c0_i32_0 : i32, i32
  }
  func.func @transform_2(%arg0: i32) -> (i32, i32) {
    %c0_i32 = arith.constant 0 : i32
    %c0_i32_0 = arith.constant 0 : i32
    %c0_i32_1 = arith.constant 0 : i32
    return %c0_i32, %c0_i32_0 : i32, i32
  }
  func.func @transform_3(%arg0: i32) -> (i32, i32) {
    %c0_i32 = arith.constant 0 : i32
    %c0_i32_0 = arith.constant 0 : i32
    return %arg0, %c0_i32 : i32, i32
  }
  func.func @transform_4(%arg0: i32) -> (i32, i32) {
    %c0_i32 = arith.constant 0 : i32
    %c0_i32_0 = arith.constant 0 : i32
    return %arg0, %c0_i32 : i32, i32
  }
}

module attributes {stable_mosaic.version = 11 : i64} {
  func.func @_hconv_gated_res_kernel(%arg0: i32, %arg1: memref<256x35xbf16, #tpu.memory_space<vmem>>, %arg2: memref<256x32xbf16, #tpu.memory_space<vmem>>, %arg3: memref<35x32xbf16, #tpu.memory_space<vmem>>, %arg4: memref<32x32xbf16, #tpu.memory_space<vmem>>, %arg5: memref<1x32xf32, #tpu.memory_space<vmem>>, %arg6: memref<16x16xbf16, #tpu.memory_space<vmem>>, %arg7: memref<1x16xf32, #tpu.memory_space<vmem>>, %arg8: memref<256x16xf32, #tpu.memory_space<vmem>>, %arg9: memref<256x16xf32, #tpu.memory_space<vmem>>) attributes {dimension_semantics = [#tpu.dimension_semantics<parallel>], iteration_bounds = array<i64: 2>, scalar_prefetch = 0 : i64, scratch_operands = 0 : i64, tpu.core_type = #tpu.core_type<tc>, window_params = [{transform_indices = @transform_0, window_bounds = array<i64: 256, 35>}, {transform_indices = @transform_1, window_bounds = array<i64: 256, 32>}, {pipeline_mode = #tpu.pipeline_mode<synchronous>, transform_indices = @transform_2, window_bounds = array<i64: 35, 32>}, {pipeline_mode = #tpu.pipeline_mode<synchronous>, transform_indices = @transform_3, window_bounds = array<i64: 32, 32>}, {pipeline_mode = #tpu.pipeline_mode<synchronous>, transform_indices = @transform_4, window_bounds = array<i64: 1, 32>}, {pipeline_mode = #tpu.pipeline_mode<synchronous>, transform_indices = @transform_5, window_bounds = array<i64: 16, 16>}, {pipeline_mode = #tpu.pipeline_mode<synchronous>, transform_indices = @transform_6, window_bounds = array<i64: 1, 16>}, {transform_indices = @transform_7, window_bounds = array<i64: 256, 16>}, {transform_indices = @transform_8, window_bounds = array<i64: 256, 16>}]} {
    %c0 = arith.constant 0 : index
    %c0_0 = arith.constant 0 : index
    %0 = vector.load %arg1[%c0, %c0_0] : memref<256x35xbf16, #tpu.memory_space<vmem>>, vector<256x35xbf16>
    %c0_1 = arith.constant 0 : index
    %c0_2 = arith.constant 0 : index
    %1 = vector.load %arg3[%c0_1, %c0_2] : memref<35x32xbf16, #tpu.memory_space<vmem>>, vector<35x32xbf16>
    %cst = arith.constant dense<0.000000e+00> : vector<256x32xf32>
    %2 = tpu.matmul %0, %1, %cst {dimension_numbers = #tpu.dot_dimension_numbers<[1], [0], [0], [1], [0, 0, 1, 1], [], []>} : vector<256x35xbf16>, vector<35x32xbf16>, vector<256x32xf32> -> vector<256x32xf32>
    %c0_3 = arith.constant 0 : index
    %c0_4 = arith.constant 0 : index
    %3 = vector.load %arg2[%c0_3, %c0_4] : memref<256x32xbf16, #tpu.memory_space<vmem>>, vector<256x32xbf16>
    %c0_5 = arith.constant 0 : index
    %c0_6 = arith.constant 0 : index
    %4 = vector.load %arg4[%c0_5, %c0_6] : memref<32x32xbf16, #tpu.memory_space<vmem>>, vector<32x32xbf16>
    %cst_7 = arith.constant dense<0.000000e+00> : vector<256x32xf32>
    %5 = tpu.matmul %3, %4, %cst_7 {dimension_numbers = #tpu.dot_dimension_numbers<[1], [0], [0], [1], [0, 0, 1, 1], [], []>} : vector<256x32xbf16>, vector<32x32xbf16>, vector<256x32xf32> -> vector<256x32xf32>
    %6 = arith.addf %2, %5 : vector<256x32xf32>
    %c0_8 = arith.constant 0 : index
    %c0_9 = arith.constant 0 : index
    %7 = vector.load %arg5[%c0_8, %c0_9] : memref<1x32xf32, #tpu.memory_space<vmem>>, vector<1x32xf32>
    %8 = vector.broadcast %7 : vector<1x32xf32> to vector<256x32xf32>
    %9 = arith.addf %6, %8 : vector<256x32xf32>
    %10 = vector.extract_strided_slice %9 {offsets = [0, 0], sizes = [256, 16], strides = [1, 1]} : vector<256x32xf32> to vector<256x16xf32>
    %11 = math.tanh %10 : vector<256x16xf32>
    %12 = vector.extract_strided_slice %9 {offsets = [0, 16], sizes = [256, 16], strides = [1, 1]} : vector<256x32xf32> to vector<256x16xf32>
    %13 = arith.negf %12 : vector<256x16xf32>
    %14 = math.exp %13 : vector<256x16xf32>
    %cst_10 = arith.constant 1.000000e+00 : f32
    %15 = vector.broadcast %cst_10 : f32 to vector<256x16xf32>
    %16 = arith.addf %15, %14 : vector<256x16xf32>
    %17 = arith.divf %15, %16 : vector<256x16xf32>
    %18 = arith.mulf %11, %17 : vector<256x16xf32>
    %19 = arith.truncf %18 : vector<256x16xf32> to vector<256x16xbf16>
    %c0_11 = arith.constant 0 : index
    %c0_12 = arith.constant 0 : index
    %20 = vector.load %arg6[%c0_11, %c0_12] : memref<16x16xbf16, #tpu.memory_space<vmem>>, vector<16x16xbf16>
    %cst_13 = arith.constant dense<0.000000e+00> : vector<256x16xf32>
    %21 = tpu.matmul %19, %20, %cst_13 {dimension_numbers = #tpu.dot_dimension_numbers<[1], [0], [0], [1], [0, 0, 1, 1], [], []>} : vector<256x16xbf16>, vector<16x16xbf16>, vector<256x16xf32> -> vector<256x16xf32>
    %c0_14 = arith.constant 0 : index
    %c0_15 = arith.constant 0 : index
    %22 = vector.load %arg7[%c0_14, %c0_15] : memref<1x16xf32, #tpu.memory_space<vmem>>, vector<1x16xf32>
    %23 = vector.broadcast %22 : vector<1x16xf32> to vector<256x16xf32>
    %24 = arith.addf %21, %23 : vector<256x16xf32>
    %c0_16 = arith.constant 0 : index
    %c0_17 = arith.constant 0 : index
    %25 = vector.load %arg8[%c0_16, %c0_17] : memref<256x16xf32, #tpu.memory_space<vmem>>, vector<256x16xf32>
    %26 = arith.addf %24, %25 : vector<256x16xf32>
    %c0_18 = arith.constant 0 : index
    %c0_19 = arith.constant 0 : index
    %27 = vector.load %arg9[%c0_18, %c0_19] : memref<256x16xf32, #tpu.memory_space<vmem>>, vector<256x16xf32>
    tpu.vector_store %arg9[%c0_18, %c0_19], %26 {strides = array<i32>} : memref<256x16xf32, #tpu.memory_space<vmem>>, vector<256x16xf32>,
    return
  }
  func.func @transform_0(%arg0: i32) -> (i32, i32) {
    %c0_i32 = arith.constant 0 : i32
    %c0_i32_0 = arith.constant 0 : i32
    return %arg0, %c0_i32 : i32, i32
  }
  func.func @transform_1(%arg0: i32) -> (i32, i32) {
    %c0_i32 = arith.constant 0 : i32
    %c0_i32_0 = arith.constant 0 : i32
    return %arg0, %c0_i32 : i32, i32
  }
  func.func @transform_2(%arg0: i32) -> (i32, i32) {
    %c0_i32 = arith.constant 0 : i32
    %c0_i32_0 = arith.constant 0 : i32
    %c0_i32_1 = arith.constant 0 : i32
    return %c0_i32, %c0_i32_0 : i32, i32
  }
  func.func @transform_3(%arg0: i32) -> (i32, i32) {
    %c0_i32 = arith.constant 0 : i32
    %c0_i32_0 = arith.constant 0 : i32
    %c0_i32_1 = arith.constant 0 : i32
    return %c0_i32, %c0_i32_0 : i32, i32
  }
  func.func @transform_4(%arg0: i32) -> (i32, i32) {
    %c0_i32 = arith.constant 0 : i32
    %c0_i32_0 = arith.constant 0 : i32
    %c0_i32_1 = arith.constant 0 : i32
    return %c0_i32, %c0_i32_0 : i32, i32
  }
  func.func @transform_5(%arg0: i32) -> (i32, i32) {
    %c0_i32 = arith.constant 0 : i32
    %c0_i32_0 = arith.constant 0 : i32
    %c0_i32_1 = arith.constant 0 : i32
    return %c0_i32, %c0_i32_0 : i32, i32
  }
  func.func @transform_6(%arg0: i32) -> (i32, i32) {
    %c0_i32 = arith.constant 0 : i32
    %c0_i32_0 = arith.constant 0 : i32
    %c0_i32_1 = arith.constant 0 : i32
    return %c0_i32, %c0_i32_0 : i32, i32
  }
  func.func @transform_7(%arg0: i32) -> (i32, i32) {
    %c0_i32 = arith.constant 0 : i32
    %c0_i32_0 = arith.constant 0 : i32
    return %arg0, %c0_i32 : i32, i32
  }
  func.func @transform_8(%arg0: i32) -> (i32, i32) {
    %c0_i32 = arith.constant 0 : i32
    %c0_i32_0 = arith.constant 0 : i32
    return %arg0, %c0_i32 : i32, i32
  }
}

module attributes {stable_mosaic.version = 11 : i64} {
  func.func @_hconv_gated_res_kernel(%arg0: i32, %arg1: memref<256x48xbf16, #tpu.memory_space<vmem>>, %arg2: memref<256x32xbf16, #tpu.memory_space<vmem>>, %arg3: memref<48x32xbf16, #tpu.memory_space<vmem>>, %arg4: memref<32x32xbf16, #tpu.memory_space<vmem>>, %arg5: memref<1x32xf32, #tpu.memory_space<vmem>>, %arg6: memref<16x16xbf16, #tpu.memory_space<vmem>>, %arg7: memref<1x16xf32, #tpu.memory_space<vmem>>, %arg8: memref<256x16xf32, #tpu.memory_space<vmem>>, %arg9: memref<256x16xf32, #tpu.memory_space<vmem>>) attributes {dimension_semantics = [#tpu.dimension_semantics<parallel>], iteration_bounds = array<i64: 2>, scalar_prefetch = 0 : i64, scratch_operands = 0 : i64, tpu.core_type = #tpu.core_type<tc>, window_params = [{transform_indices = @transform_0, window_bounds = array<i64: 256, 48>}, {transform_indices = @transform_1, window_bounds = array<i64: 256, 32>}, {pipeline_mode = #tpu.pipeline_mode<synchronous>, transform_indices = @transform_2, window_bounds = array<i64: 48, 32>}, {pipeline_mode = #tpu.pipeline_mode<synchronous>, transform_indices = @transform_3, window_bounds = array<i64: 32, 32>}, {pipeline_mode = #tpu.pipeline_mode<synchronous>, transform_indices = @transform_4, window_bounds = array<i64: 1, 32>}, {pipeline_mode = #tpu.pipeline_mode<synchronous>, transform_indices = @transform_5, window_bounds = array<i64: 16, 16>}, {pipeline_mode = #tpu.pipeline_mode<synchronous>, transform_indices = @transform_6, window_bounds = array<i64: 1, 16>}, {transform_indices = @transform_7, window_bounds = array<i64: 256, 16>}, {transform_indices = @transform_8, window_bounds = array<i64: 256, 16>}]} {
    %c0 = arith.constant 0 : index
    %c0_0 = arith.constant 0 : index
    %0 = vector.load %arg1[%c0, %c0_0] : memref<256x48xbf16, #tpu.memory_space<vmem>>, vector<256x48xbf16>
    %c0_1 = arith.constant 0 : index
    %c0_2 = arith.constant 0 : index
    %1 = vector.load %arg3[%c0_1, %c0_2] : memref<48x32xbf16, #tpu.memory_space<vmem>>, vector<48x32xbf16>
    %cst = arith.constant dense<0.000000e+00> : vector<256x32xf32>
    %2 = tpu.matmul %0, %1, %cst {dimension_numbers = #tpu.dot_dimension_numbers<[1], [0], [0], [1], [0, 0, 1, 1], [], []>} : vector<256x48xbf16>, vector<48x32xbf16>, vector<256x32xf32> -> vector<256x32xf32>
    %c0_3 = arith.constant 0 : index
    %c0_4 = arith.constant 0 : index
    %3 = vector.load %arg2[%c0_3, %c0_4] : memref<256x32xbf16, #tpu.memory_space<vmem>>, vector<256x32xbf16>
    %c0_5 = arith.constant 0 : index
    %c0_6 = arith.constant 0 : index
    %4 = vector.load %arg4[%c0_5, %c0_6] : memref<32x32xbf16, #tpu.memory_space<vmem>>, vector<32x32xbf16>
    %cst_7 = arith.constant dense<0.000000e+00> : vector<256x32xf32>
    %5 = tpu.matmul %3, %4, %cst_7 {dimension_numbers = #tpu.dot_dimension_numbers<[1], [0], [0], [1], [0, 0, 1, 1], [], []>} : vector<256x32xbf16>, vector<32x32xbf16>, vector<256x32xf32> -> vector<256x32xf32>
    %6 = arith.addf %2, %5 : vector<256x32xf32>
    %c0_8 = arith.constant 0 : index
    %c0_9 = arith.constant 0 : index
    %7 = vector.load %arg5[%c0_8, %c0_9] : memref<1x32xf32, #tpu.memory_space<vmem>>, vector<1x32xf32>
    %8 = vector.broadcast %7 : vector<1x32xf32> to vector<256x32xf32>
    %9 = arith.addf %6, %8 : vector<256x32xf32>
    %10 = vector.extract_strided_slice %9 {offsets = [0, 0], sizes = [256, 16], strides = [1, 1]} : vector<256x32xf32> to vector<256x16xf32>
    %11 = math.tanh %10 : vector<256x16xf32>
    %12 = vector.extract_strided_slice %9 {offsets = [0, 16], sizes = [256, 16], strides = [1, 1]} : vector<256x32xf32> to vector<256x16xf32>
    %13 = arith.negf %12 : vector<256x16xf32>
    %14 = math.exp %13 : vector<256x16xf32>
    %cst_10 = arith.constant 1.000000e+00 : f32
    %15 = vector.broadcast %cst_10 : f32 to vector<256x16xf32>
    %16 = arith.addf %15, %14 : vector<256x16xf32>
    %17 = arith.divf %15, %16 : vector<256x16xf32>
    %18 = arith.mulf %11, %17 : vector<256x16xf32>
    %19 = arith.truncf %18 : vector<256x16xf32> to vector<256x16xbf16>
    %c0_11 = arith.constant 0 : index
    %c0_12 = arith.constant 0 : index
    %20 = vector.load %arg6[%c0_11, %c0_12] : memref<16x16xbf16, #tpu.memory_space<vmem>>, vector<16x16xbf16>
    %cst_13 = arith.constant dense<0.000000e+00> : vector<256x16xf32>
    %21 = tpu.matmul %19, %20, %cst_13 {dimension_numbers = #tpu.dot_dimension_numbers<[1], [0], [0], [1], [0, 0, 1, 1], [], []>} : vector<256x16xbf16>, vector<16x16xbf16>, vector<256x16xf32> -> vector<256x16xf32>
    %c0_14 = arith.constant 0 : index
    %c0_15 = arith.constant 0 : index
    %22 = vector.load %arg7[%c0_14, %c0_15] : memref<1x16xf32, #tpu.memory_space<vmem>>, vector<1x16xf32>
    %23 = vector.broadcast %22 : vector<1x16xf32> to vector<256x16xf32>
    %24 = arith.addf %21, %23 : vector<256x16xf32>
    %c0_16 = arith.constant 0 : index
    %c0_17 = arith.constant 0 : index
    %25 = vector.load %arg8[%c0_16, %c0_17] : memref<256x16xf32, #tpu.memory_space<vmem>>, vector<256x16xf32>
    %26 = arith.addf %24, %25 : vector<256x16xf32>
    %c0_18 = arith.constant 0 : index
    %c0_19 = arith.constant 0 : index
    %27 = vector.load %arg9[%c0_18, %c0_19] : memref<256x16xf32, #tpu.memory_space<vmem>>, vector<256x16xf32>
    tpu.vector_store %arg9[%c0_18, %c0_19], %26 {strides = array<i32>} : memref<256x16xf32, #tpu.memory_space<vmem>>, vector<256x16xf32>,
    return
  }
  func.func @transform_0(%arg0: i32) -> (i32, i32) {
    %c0_i32 = arith.constant 0 : i32
    %c0_i32_0 = arith.constant 0 : i32
    return %arg0, %c0_i32 : i32, i32
  }
  func.func @transform_1(%arg0: i32) -> (i32, i32) {
    %c0_i32 = arith.constant 0 : i32
    %c0_i32_0 = arith.constant 0 : i32
    return %arg0, %c0_i32 : i32, i32
  }
  func.func @transform_2(%arg0: i32) -> (i32, i32) {
    %c0_i32 = arith.constant 0 : i32
    %c0_i32_0 = arith.constant 0 : i32
    %c0_i32_1 = arith.constant 0 : i32
    return %c0_i32, %c0_i32_0 : i32, i32
  }
  func.func @transform_3(%arg0: i32) -> (i32, i32) {
    %c0_i32 = arith.constant 0 : i32
    %c0_i32_0 = arith.constant 0 : i32
    %c0_i32_1 = arith.constant 0 : i32
    return %c0_i32, %c0_i32_0 : i32, i32
  }
  func.func @transform_4(%arg0: i32) -> (i32, i32) {
    %c0_i32 = arith.constant 0 : i32
    %c0_i32_0 = arith.constant 0 : i32
    %c0_i32_1 = arith.constant 0 : i32
    return %c0_i32, %c0_i32_0 : i32, i32
  }
  func.func @transform_5(%arg0: i32) -> (i32, i32) {
    %c0_i32 = arith.constant 0 : i32
    %c0_i32_0 = arith.constant 0 : i32
    %c0_i32_1 = arith.constant 0 : i32
    return %c0_i32, %c0_i32_0 : i32, i32
  }
  func.func @transform_6(%arg0: i32) -> (i32, i32) {
    %c0_i32 = arith.constant 0 : i32
    %c0_i32_0 = arith.constant 0 : i32
    %c0_i32_1 = arith.constant 0 : i32
    return %c0_i32, %c0_i32_0 : i32, i32
  }
  func.func @transform_7(%arg0: i32) -> (i32, i32) {
    %c0_i32 = arith.constant 0 : i32
    %c0_i32_0 = arith.constant 0 : i32
    return %arg0, %c0_i32 : i32, i32
  }
  func.func @transform_8(%arg0: i32) -> (i32, i32) {
    %c0_i32 = arith.constant 0 : i32
    %c0_i32_0 = arith.constant 0 : i32
    return %arg0, %c0_i32 : i32, i32
  }
}

module attributes {stable_mosaic.version = 11 : i64} {
  func.func @_head_kernel(%arg0: i32, %arg1: memref<256x16xf32, #tpu.memory_space<vmem>>, %arg2: memref<16x16xbf16, #tpu.memory_space<vmem>>, %arg3: memref<16x16xbf16, #tpu.memory_space<vmem>>, %arg4: memref<1x16xf32, #tpu.memory_space<vmem>>, %arg5: memref<16x1024xbf16, #tpu.memory_space<vmem>>, %arg6: memref<16x1024xbf16, #tpu.memory_space<vmem>>, %arg7: memref<1x1024xf32, #tpu.memory_space<vmem>>, %arg8: memref<256x1024xf32, #tpu.memory_space<vmem>>) attributes {dimension_semantics = [#tpu.dimension_semantics<parallel>], iteration_bounds = array<i64: 2>, scalar_prefetch = 0 : i64, scratch_operands = 0 : i64, tpu.core_type = #tpu.core_type<tc>, window_params = [{transform_indices = @transform_0, window_bounds = array<i64: 256, 16>}, {pipeline_mode = #tpu.pipeline_mode<synchronous>, transform_indices = @transform_1, window_bounds = array<i64: 16, 16>}, {pipeline_mode = #tpu.pipeline_mode<synchronous>, transform_indices = @transform_2, window_bounds = array<i64: 16, 16>}, {pipeline_mode = #tpu.pipeline_mode<synchronous>, transform_indices = @transform_3, window_bounds = array<i64: 1, 16>}, {pipeline_mode = #tpu.pipeline_mode<synchronous>, transform_indices = @transform_4, window_bounds = array<i64: 16, 1024>}, {pipeline_mode = #tpu.pipeline_mode<synchronous>, transform_indices = @transform_5, window_bounds = array<i64: 16, 1024>}, {pipeline_mode = #tpu.pipeline_mode<synchronous>, transform_indices = @transform_6, window_bounds = array<i64: 1, 1024>}, {transform_indices = @transform_7, window_bounds = array<i64: 256, 1024>}]} {
    %c0 = arith.constant 0 : index
    %c0_0 = arith.constant 0 : index
    %0 = vector.load %arg1[%c0, %c0_0] : memref<256x16xf32, #tpu.memory_space<vmem>>, vector<256x16xf32>
    %cst = arith.constant 0.000000e+00 : f32
    %1 = vector.broadcast %cst : f32 to vector<256x16xf32>
    %2 = arith.maximumf %0, %1 : vector<256x16xf32>
    %3 = arith.truncf %2 : vector<256x16xf32> to vector<256x16xbf16>
    %cst_1 = arith.constant 0.000000e+00 : f32
    %4 = vector.broadcast %cst_1 : f32 to vector<256x16xf32>
    %5 = arith.subf %4, %0 : vector<256x16xf32>
    %cst_2 = arith.constant 0.000000e+00 : f32
    %6 = vector.broadcast %cst_2 : f32 to vector<256x16xf32>
    %7 = arith.maximumf %5, %6 : vector<256x16xf32>
    %8 = arith.truncf %7 : vector<256x16xf32> to vector<256x16xbf16>
    %c0_3 = arith.constant 0 : index
    %c0_4 = arith.constant 0 : index
    %9 = vector.load %arg2[%c0_3, %c0_4] : memref<16x16xbf16, #tpu.memory_space<vmem>>, vector<16x16xbf16>
    %cst_5 = arith.constant dense<0.000000e+00> : vector<256x16xf32>
    %10 = tpu.matmul %3, %9, %cst_5 {dimension_numbers = #tpu.dot_dimension_numbers<[1], [0], [0], [1], [0, 0, 1, 1], [], []>} : vector<256x16xbf16>, vector<16x16xbf16>, vector<256x16xf32> -> vector<256x16xf32>
    %c0_6 = arith.constant 0 : index
    %c0_7 = arith.constant 0 : index
    %11 = vector.load %arg3[%c0_6, %c0_7] : memref<16x16xbf16, #tpu.memory_space<vmem>>, vector<16x16xbf16>
    %cst_8 = arith.constant dense<0.000000e+00> : vector<256x16xf32>
    %12 = tpu.matmul %8, %11, %cst_8 {dimension_numbers = #tpu.dot_dimension_numbers<[1], [0], [0], [1], [0, 0, 1, 1], [], []>} : vector<256x16xbf16>, vector<16x16xbf16>, vector<256x16xf32> -> vector<256x16xf32>
    %13 = arith.addf %10, %12 : vector<256x16xf32>
    %c0_9 = arith.constant 0 : index
    %c0_10 = arith.constant 0 : index
    %14 = vector.load %arg4[%c0_9, %c0_10] : memref<1x16xf32, #tpu.memory_space<vmem>>, vector<1x16xf32>
    %15 = vector.broadcast %14 : vector<1x16xf32> to vector<256x16xf32>
    %16 = arith.addf %13, %15 : vector<256x16xf32>
    %cst_11 = arith.constant 0.000000e+00 : f32
    %17 = vector.broadcast %cst_11 : f32 to vector<256x16xf32>
    %18 = arith.maximumf %16, %17 : vector<256x16xf32>
    %19 = arith.truncf %18 : vector<256x16xf32> to vector<256x16xbf16>
    %cst_12 = arith.constant 0.000000e+00 : f32
    %20 = vector.broadcast %cst_12 : f32 to vector<256x16xf32>
    %21 = arith.subf %20, %16 : vector<256x16xf32>
    %cst_13 = arith.constant 0.000000e+00 : f32
    %22 = vector.broadcast %cst_13 : f32 to vector<256x16xf32>
    %23 = arith.maximumf %21, %22 : vector<256x16xf32>
    %24 = arith.truncf %23 : vector<256x16xf32> to vector<256x16xbf16>
    %c0_14 = arith.constant 0 : index
    %c0_15 = arith.constant 0 : index
    %25 = vector.load %arg5[%c0_14, %c0_15] : memref<16x1024xbf16, #tpu.memory_space<vmem>>, vector<16x1024xbf16>
    %cst_16 = arith.constant dense<0.000000e+00> : vector<256x1024xf32>
    %26 = tpu.matmul %19, %25, %cst_16 {dimension_numbers = #tpu.dot_dimension_numbers<[1], [0], [0], [1], [0, 0, 1, 1], [], []>} : vector<256x16xbf16>, vector<16x1024xbf16>, vector<256x1024xf32> -> vector<256x1024xf32>
    %c0_17 = arith.constant 0 : index
    %c0_18 = arith.constant 0 : index
    %27 = vector.load %arg6[%c0_17, %c0_18] : memref<16x1024xbf16, #tpu.memory_space<vmem>>, vector<16x1024xbf16>
    %cst_19 = arith.constant dense<0.000000e+00> : vector<256x1024xf32>
    %28 = tpu.matmul %24, %27, %cst_19 {dimension_numbers = #tpu.dot_dimension_numbers<[1], [0], [0], [1], [0, 0, 1, 1], [], []>} : vector<256x16xbf16>, vector<16x1024xbf16>, vector<256x1024xf32> -> vector<256x1024xf32>
    %29 = arith.addf %26, %28 : vector<256x1024xf32>
    %c0_20 = arith.constant 0 : index
    %c0_21 = arith.constant 0 : index
    %30 = vector.load %arg7[%c0_20, %c0_21] : memref<1x1024xf32, #tpu.memory_space<vmem>>, vector<1x1024xf32>
    %31 = vector.broadcast %30 : vector<1x1024xf32> to vector<256x1024xf32>
    %32 = arith.addf %29, %31 : vector<256x1024xf32>
    %c0_22 = arith.constant 0 : index
    %c0_23 = arith.constant 0 : index
    %33 = vector.load %arg8[%c0_22, %c0_23] : memref<256x1024xf32, #tpu.memory_space<vmem>>, vector<256x1024xf32>
    tpu.vector_store %arg8[%c0_22, %c0_23], %32 {strides = array<i32>} : memref<256x1024xf32, #tpu.memory_space<vmem>>, vector<256x1024xf32>,
    return
  }
  func.func @transform_0(%arg0: i32) -> (i32, i32) {
    %c0_i32 = arith.constant 0 : i32
    %c0_i32_0 = arith.constant 0 : i32
    return %arg0, %c0_i32 : i32, i32
  }
  func.func @transform_1(%arg0: i32) -> (i32, i32) {
    %c0_i32 = arith.constant 0 : i32
    %c0_i32_0 = arith.constant 0 : i32
    %c0_i32_1 = arith.constant 0 : i32
    return %c0_i32, %c0_i32_0 : i32, i32
  }
  func.func @transform_2(%arg0: i32) -> (i32, i32) {
    %c0_i32 = arith.constant 0 : i32
    %c0_i32_0 = arith.constant 0 : i32
    %c0_i32_1 = arith.constant 0 : i32
    return %c0_i32, %c0_i32_0 : i32, i32
  }
  func.func @transform_3(%arg0: i32) -> (i32, i32) {
    %c0_i32 = arith.constant 0 : i32
    %c0_i32_0 = arith.constant 0 : i32
    %c0_i32_1 = arith.constant 0 : i32
    return %c0_i32, %c0_i32_0 : i32, i32
  }
  func.func @transform_4(%arg0: i32) -> (i32, i32) {
    %c0_i32 = arith.constant 0 : i32
    %c0_i32_0 = arith.constant 0 : i32
    %c0_i32_1 = arith.constant 0 : i32
    return %c0_i32, %c0_i32_0 : i32, i32
  }
  func.func @transform_5(%arg0: i32) -> (i32, i32) {
    %c0_i32 = arith.constant 0 : i32
    %c0_i32_0 = arith.constant 0 : i32
    %c0_i32_1 = arith.constant 0 : i32
    return %c0_i32, %c0_i32_0 : i32, i32
  }
  func.func @transform_6(%arg0: i32) -> (i32, i32) {
    %c0_i32 = arith.constant 0 : i32
    %c0_i32_0 = arith.constant 0 : i32
    %c0_i32_1 = arith.constant 0 : i32
    return %c0_i32, %c0_i32_0 : i32, i32
  }
  func.func @transform_7(%arg0: i32) -> (i32, i32) {
    %c0_i32 = arith.constant 0 : i32
    %c0_i32_0 = arith.constant 0 : i32
    return %arg0, %c0_i32 : i32, i32
  }
}

</mosaic_0001>

<bundles_post_ra>
// kernel: pixelcnn_forward.29
= control target key start
LH: loop header
LB: loop body
LE: loop exit
PB: predicated region body
PF: predicated region fallthrough
CT: control target
= control target key end

     0   :  { %s2208_s15 = smov 0   ;;  %s2727_s0 = inlined_call_operand.vmem [shape: bf16[512,245], index: 0, kind: input, shape index: {}]   ;;  %s2728_s1 = inlined_call_operand.vmem [shape: bf16[245,32], index: 1, kind: input, shape index: {}]   ;;  %s2729_s2 = inlined_call_operand.vmem [shape: f32[1,32], index: 2, kind: input, shape index: {}]   ;;  %s2730_s3 = inlined_call_operand.vmem [shape: bf16[512,32], index: 3, kind: output, shape index: {0}]   ;;  %s2731_s4 = inlined_call_operand.vmem [shape: bf16[512,16], index: 4, kind: output, shape index: {1}]  }
   0x1 LB: > { %s1539_s16 = sadd.s32 4294967295, %s2179_s15   ;;  %p1543_p0 = scmp.ge.s32.totalorder %s2179_s15, 1  ;;  %s2179_s15 = sphi %s2208_s15, %s15_s15  }
   0x2   : > { %p167_p1 = scmp.lt.s32.totalorder %s2179_s15, 3 }
   0x4   : > { %p168_p2 = pnand %p1543_p0, %p167_p1 }
   0x5   : > { %s1544_s23 = sshll.u32 (!%p168_p2), %s1539_s16, 5  ;;  %s2182_s10 = smov (!%p168_p2), 112  }
   0x6   : > { %171 = sbr.rel (%p168_p2) target bundleno = 484 (0x1e4), region = 32  ;;  %p200_p3 = scmp.lt.s32.totalorder (!%p168_p2), %s1544_s23, 63 }
   0xb   : > { %v1917_v0 = vld [vmem:[%s2728_s1 + $0x78] ss:$0 sps:$4 sm:$0x77]   ;;  %vm575_vm0 = vcmask 1041408   ;;  %vm576_vm1 = vcmask 1042432   ;;  %v2181_v1 = vmov 65535  }
   0xc   : > { %v577_v2 = vsel %vm575_vm0, 4294967295, %v2181_v1  ;;  %v1918_v4 = vld [vmem:[%s2728_s1 + $0x38] sm:$0xff]   ;;  %v1919_v6 = vld [vmem:[%s2728_s1 + $0x70] sm:$0xff]   ;;  %s2733_s23 = smov (!%p200_p3, %s1544_s23), 63  ;;  %v1921_v8 = vld [vmem:[%s2728_s1 + $0x68] sm:$0xff]   ;;  %vm526_vm2 = vcmask 957440  }
   0xd   : > { %v578_v3 = vsel %vm576_vm1, %v577_v2, 0  ;;  %v1920_v7 = vld [vmem:[%s2728_s1 + $0x30] sm:$0xff]   ;;  %v1922_v9 = vld [vmem:[%s2728_s1 + $0x28] sm:$0xff]   ;;  %s1714_s30 = sshll.u32 %s2733_s23, 3  ;;  %v1923_v10 = vld [vmem:[%s2728_s1 + $0x60] sm:$0xff]   ;;  %s1548_s6 = sshll.u32 %s2733_s23, 2 }
   0xe   : > { %v580_v5 = vand.u32 %v1917_v0, %v578_v3  ;;  %s2243_s9 = scalar_lea.vmem %s2727_s0, %s1714_s30  ;;  %v1924_v11 = vld [vmem:[%s2728_s1 + $0x20] sm:$0xff]   ;;  %v1925_v12 = vld [vmem:[%s2728_s1 + $0x58] sm:$0xff]   ;;  %v1927_v16 = vld [vmem:[%s2728_s1 + $0x50] sm:$0xff]   ;;  %vm871_vm3 = vcmask 257024   ;;  %s2633_s13 = scalar_lea.vmem %s2731_s4, %s1548_s6  ;;  %vm1416_vm4 = vcmask 125952  }
   0xf   : > { %v1935_v13 = vld [vmem:[%s2243_s9 + $0x4] ss:$8 sps:$4 sm:$0xff]   ;;  %v1926_v15 = vld [vmem:[%s2728_s1 + $0x18] sm:$0xff]   ;;  %v1928_v17 = vld [vmem:[%s2728_s1 + $0x10] sm:$0xff]  }
  0x10   : > { %1779 = vmatprep.subr.bf16.mxu0 %v580_v5  ;;  %1891 = vmatprep.subr.bf16.mxu1 %v580_v5  ;;  %v1938_v14 = vld [vmem:[%s2243_s9 + $0x84] ss:$8 sps:$4 sm:$0xff]   ;;  %v1933_v22 = vld [vmem:[%s2243_s9] ss:$8 sps:$4 sm:$0xff]   ;;  %v1939_v24 = vld [vmem:[%s2243_s9 + $0x14] ss:$8 sps:$4 sm:$0xff]  }
  0x11   : > { %1780 = vmatpush3.bf16.msra.mxu0 %v1918_v4  ;;  %1899 = vmatpush3.bf16.msra.mxu1 %v1918_v4  ;;  %v1929_v18 = vld [vmem:[%s2728_s1 + $0x48] sm:$0xff]   ;;  %v1931_v20 = vld [vmem:[%s2728_s1 + $0x40] sm:$0xff]   ;;  %v1941_v25 = vld [vmem:[%s2243_s9 + $0x94] ss:$8 sps:$4 sm:$0xff]  }
  0x12   : > { %1781 = vmatprep.subr.bf16.mxu0 %v1919_v6  ;;  %1892 = vmatprep.subr.bf16.mxu1 %v1919_v6  ;;  %v1930_v19 = vld [vmem:[%s2728_s1 + $0x8] sm:$0xff]   ;;  %v1932_v21 = vld [vmem:[%s2728_s1] sm:$0xff]   ;;  %v1943_v26 = vld [vmem:[%s2243_s9 + $0x10] ss:$8 sps:$4 sm:$0xff]  }
  0x13   : > { %1600 = vmatprep.mubr.msk.bf16.mxu0 %vm526_vm2, %v1935_v13  ;;  %1608 = vmatprep.mubr.msk.bf16.mxu1 %vm526_vm2, %v1938_v14  ;;  %v1936_v23 = vld [vmem:[%s2243_s9 + $0x80] ss:$8 sps:$4 sm:$0xff]   ;;  %v1944_v27 = vld [vmem:[%s2243_s9 + $0x90] ss:$8 sps:$4 sm:$0xff]   ;;  %v1945_v28 = vld [vmem:[%s2243_s9 + $0x24] ss:$8 sps:$4 sm:$0xff]  }
  0x14   : > { %v1947_v29 = vld [vmem:[%s2243_s9 + $0xa4] ss:$8 sps:$4 sm:$0xff]   ;;  %v1949_v30 = vld [vmem:[%s2243_s9 + $0x20] ss:$8 sps:$4 sm:$0xff]   ;;  %v1951_v32 = vld [vmem:[%s2243_s9 + $0x34] ss:$8 sps:$4 sm:$0xff]  }
  0x15   : > { %1782 = vmatpush3.bf16.msra.mxu0 %v1920_v7  ;;  %1900 = vmatpush3.bf16.msra.mxu1 %v1920_v7  ;;  %v1950_v31 = vld [vmem:[%s2243_s9 + $0xa0] ss:$8 sps:$4 sm:$0xff]   ;;  %v1953_v33 = vld [vmem:[%s2243_s9 + $0xb4] ss:$8 sps:$4 sm:$0xff]   ;;  %v1955_v34 = vld [vmem:[%s2243_s9 + $0x30] ss:$8 sps:$4 sm:$0xff]  }
  0x16   : > { %1783 = vmatprep.subr.bf16.mxu0 %v1921_v8  ;;  %1893 = vmatprep.subr.bf16.mxu1 %v1921_v8  ;;  %v1956_v35 = vld [vmem:[%s2243_s9 + $0xb0] ss:$8 sps:$4 sm:$0xff]   ;;  %v1957_v36 = vld [vmem:[%s2243_s9 + $0x44] ss:$8 sps:$4 sm:$0xff]   ;;  %v1961_v38 = vld [vmem:[%s2243_s9 + $0x40] ss:$8 sps:$4 sm:$0xff]  }
  0x17   : > { %v1959_v37 = vld [vmem:[%s2243_s9 + $0xc4] ss:$8 sps:$4 sm:$0xff]   ;;  %v1962_v39 = vld [vmem:[%s2243_s9 + $0xc0] ss:$8 sps:$4 sm:$0xff]   ;;  %v1963_v40 = vld [vmem:[%s2243_s9 + $0x54] ss:$8 sps:$4 sm:$0xff]  }
  0x18   : > { %v1965_v41 = vld [vmem:[%s2243_s9 + $0xd4] ss:$8 sps:$4 sm:$0xff]   ;;  %v1967_v42 = vld [vmem:[%s2243_s9 + $0x50] ss:$8 sps:$4 sm:$0xff]   ;;  %v1969_v44 = vld [vmem:[%s2243_s9 + $0x64] ss:$8 sps:$4 sm:$0xff]  }
  0x19   : > { %1784 = vmatpush3.bf16.msra.mxu0 %v1922_v9  ;;  %1901 = vmatpush3.bf16.msra.mxu1 %v1922_v9  ;;  %v1968_v43 = vld [vmem:[%s2243_s9 + $0xd0] ss:$8 sps:$4 sm:$0xff]   ;;  %v1971_v45 = vld [vmem:[%s2243_s9 + $0xe4] ss:$8 sps:$4 sm:$0xff]   ;;  %v1973_v46 = vld [vmem:[%s2243_s9 + $0x60] ss:$8 sps:$4 sm:$0xff]  }
  0x1a   : > { %1785 = vmatprep.subr.bf16.mxu0 %v1923_v10  ;;  %1894 = vmatprep.subr.bf16.mxu1 %v1923_v10  ;;  %v1974_v47 = vld [vmem:[%s2243_s9 + $0xe0] ss:$8 sps:$4 sm:$0xff]   ;;  %v1975_v48 = vld [vmem:[%s2243_s9 + $0x74] ss:$8 sps:$4 sm:$0xff]   ;;  %v1979_v50 = vld [vmem:[%s2243_s9 + $0x70] ss:$8 sps:$4 sm:$0xff]  }
  0x1b   : > { %v1977_v49 = vld [vmem:[%s2243_s9 + $0xf4] ss:$8 sps:$4 sm:$0xff]   ;;  %v1980_v51 = vld [vmem:[%s2243_s9 + $0xf0] ss:$8 sps:$4 sm:$0xff]   ;;  %v2323_v54 = vld [vmem:[%s2729_s2] ss:$0 sm:$0xff]  ;;  %s2337_s9 = scalar_lea.vmem %s2730_s3, %s1548_s6 }
  0x1d   : > { %1786 = vmatpush3.bf16.msra.mxu0 %v1924_v11  ;;  %1902 = vmatpush3.bf16.msra.mxu1 %v1924_v11 }
  0x1e   : > { %1787 = vmatprep.subr.bf16.mxu0 %v1925_v12  ;;  %1895 = vmatprep.subr.bf16.mxu1 %v1925_v12 }
  0x21   : > { %1788 = vmatpush3.bf16.msra.mxu0 %v1926_v15  ;;  %1903 = vmatpush3.bf16.msra.mxu1 %v1926_v15 }
  0x22   : > { %1789 = vmatprep.subr.bf16.mxu0 %v1927_v16  ;;  %1896 = vmatprep.subr.bf16.mxu1 %v1927_v16 }
  0x25   : > { %1790 = vmatpush3.bf16.msra.mxu0 %v1928_v17  ;;  %1904 = vmatpush3.bf16.msra.mxu1 %v1928_v17 }
  0x26   : > { %1791 = vmatprep.subr.bf16.mxu0 %v1929_v18  ;;  %1897 = vmatprep.subr.bf16.mxu1 %v1929_v18 }
  0x29   : > { %1792 = vmatpush3.bf16.msra.mxu0 %v1930_v19  ;;  %1905 = vmatpush3.bf16.msra.mxu1 %v1930_v19 }
  0x2a   : > { %1793 = vmatprep.subr.bf16.mxu0 %v1931_v20  ;;  %1898 = vmatprep.subr.bf16.mxu1 %v1931_v20 }
  0x2d   : > { %1794 = vmatpush3.bf16.msra.mxu0 %v1932_v21  ;;  %1906 = vmatpush3.bf16.msra.mxu1 %v1932_v21 }
  0x30   : > { %615 = vmatmul.mubr.bf16.vlgmr.msra.gmra.mxu0 %v1933_v22  ;;  %679 = vmatmul.mubr.bf16.vlgmr.msra.gmra.mxu1 %v1936_v23 }
  0x31   : > { %1601 = vmatprep.mubr.msk.bf16.mxu0 %vm526_vm2, %v1939_v24  ;;  %1609 = vmatprep.mubr.msk.bf16.mxu1 %vm526_vm2, %v1941_v25 }
  0x38   : > { %623 = vmatmul.mubr.bf16.gmra.mxu0 %v1943_v26  ;;  %687 = vmatmul.mubr.bf16.gmra.mxu1 %v1944_v27 }
  0x39   : > { %1602 = vmatprep.mubr.msk.bf16.mxu0 %vm526_vm2, %v1945_v28  ;;  %1610 = vmatprep.mubr.msk.bf16.mxu1 %vm526_vm2, %v1947_v29 }
  0x40   : > { %631 = vmatmul.mubr.bf16.gmra.mxu0 %v1949_v30  ;;  %695 = vmatmul.mubr.bf16.gmra.mxu1 %v1950_v31 }
  0x41   : > { %1603 = vmatprep.mubr.msk.bf16.mxu0 %vm526_vm2, %v1951_v32  ;;  %1611 = vmatprep.mubr.msk.bf16.mxu1 %vm526_vm2, %v1953_v33 }
  0x48   : > { %639 = vmatmul.mubr.bf16.gmra.mxu0 %v1955_v34  ;;  %703 = vmatmul.mubr.bf16.gmra.mxu1 %v1956_v35 }
  0x49   : > { %1604 = vmatprep.mubr.msk.bf16.mxu0 %vm526_vm2, %v1957_v36  ;;  %1612 = vmatprep.mubr.msk.bf16.mxu1 %vm526_vm2, %v1959_v37 }
  0x50   : > { %647 = vmatmul.mubr.bf16.gmra.mxu0 %v1961_v38  ;;  %711 = vmatmul.mubr.bf16.gmra.mxu1 %v1962_v39 }
  0x51   : > { %1605 = vmatprep.mubr.msk.bf16.mxu0 %vm526_vm2, %v1963_v40  ;;  %1613 = vmatprep.mubr.msk.bf16.mxu1 %vm526_vm2, %v1965_v41 }
  0x58   : > { %655 = vmatmul.mubr.bf16.gmra.mxu0 %v1967_v42  ;;  %719 = vmatmul.mubr.bf16.gmra.mxu1 %v1968_v43 }
  0x59   : > { %1606 = vmatprep.mubr.msk.bf16.mxu0 %vm526_vm2, %v1969_v44  ;;  %1614 = vmatprep.mubr.msk.bf16.mxu1 %vm526_vm2, %v1971_v45 }
  0x60   : > { %663 = vmatmul.mubr.bf16.gmra.mxu0 %v1973_v46  ;;  %727 = vmatmul.mubr.bf16.gmra.mxu1 %v1974_v47 }
  0x61   : > { %1607 = vmatprep.mubr.msk.bf16.mxu0 %vm526_vm2, %v1975_v48  ;;  %1615 = vmatprep.mubr.msk.bf16.mxu1 %vm526_vm2, %v1977_v49 }
  0x68   : > { %671 = vmatmul.mubr.bf16.gmra.mxu0 %v1979_v50  ;;  %735 = vmatmul.mubr.bf16.gmra.mxu1 %v1980_v51 }
  0xf0   : > { %v1795_v52 = vpop.f32.mrf.mxu0  ;;  %v1843_v53 = vpop.f32.mrf.mxu1 }
  0xf2   : > { %v1796_v55 = vpop.f32.mrf.mxu0  ;;  %v1844_v56 = vpop.f32.mrf.mxu1 }
  0xf3   : > { %v1797_v57 = vadd.f32 %v1796_v55, %v1795_v52  ;;  %v1845_v58 = vadd.f32 %v1844_v56, %v1843_v53 }
  0xf4   : > { %v1798_v59 = vpop.f32.mrf.mxu0  ;;  %v1846_v60 = vpop.f32.mrf.mxu1 }
  0xf5   : > { %v2327_v61 = vadd.f32 %v1797_v57, %v2323_v54  ;;  %v2330_v62 = vadd.f32 %v1845_v58, %v2323_v54 }
  0xf6   : > { %v1799_v63 = vpop.f32.mrf.mxu0  ;;  %v1847_v0 = vpop.f32.mrf.mxu1 }
  0xf7   : > { %v1715_v1 = vpack.c.bf16 %v2327_v61, %v2327_v61  ;;  %v1648_v2 = vmul.f32 -1.442695, %v2327_v61  ;;  %v1731_v3 = vpack.c.bf16 %v2330_v62, %v2330_v62  ;;  %v1664_v4 = vmul.f32 -1.442695, %v2330_v62 }
  0xf8   : > { %v1800_v5 = vadd.f32 %v1799_v63, %v1798_v59  ;;  %v1848_v6 = vadd.f32 %v1847_v0, %v1846_v60  ;;  %v1801_v7 = vpop.f32.mrf.mxu0  ;;  %v1849_v8 = vpop.f32.mrf.mxu1 }
  0xf9   : > { %872 = vst.msk [vmem:[%s2337_s9] sm:$0xf] %vm871_vm3, %v1715_v1  ;;  %1981 = vpow2.f32 %v1648_v2  ;;  %888 = vst.msk [vmem:[%s2337_s9 + $0x40] sm:$0xf] %vm871_vm3, %v1731_v3 }
  0xfa   : > { %1983 = vpow2.f32 %v1664_v4  ;;  %v2350_v9 = vadd.f32 %v1800_v5, %v2323_v54  ;;  %v2353_v10 = vadd.f32 %v1848_v6, %v2323_v54  ;;  %v1802_v11 = vpop.f32.mrf.mxu0  ;;  %v1850_v12 = vpop.f32.mrf.mxu1 }
  0xfb   : > { %v1803_v13 = vadd.f32 %v1802_v11, %v1801_v7  ;;  %v1851_v14 = vadd.f32 %v1850_v12, %v1849_v8 }
  0xfc   : > { %v1716_v15 = vpack.c.bf16 %v2350_v9, %v2350_v9  ;;  %v1649_v16 = vmul.f32 -1.442695, %v2350_v9  ;;  %v1732_v17 = vpack.c.bf16 %v2353_v10, %v2353_v10  ;;  %v1804_v18 = vpop.f32.mrf.mxu0  ;;  %v1852_v19 = vpop.f32.mrf.mxu1  ;;  %v1665_v20 = vmul.f32 -1.442695, %v2353_v10 }
  0xfd   : > { %v2362_v21 = vadd.f32 %v1803_v13, %v2323_v54  ;;  %v2365_v22 = vadd.f32 %v1851_v14, %v2323_v54 }
  0xfe   : > { %873 = vst.msk [vmem:[%s2337_s9 + $0x4] sm:$0xf] %vm871_vm3, %v1716_v15  ;;  %1985 = vpow2.f32 %v1649_v16  ;;  %889 = vst.msk [vmem:[%s2337_s9 + $0x44] sm:$0xf] %vm871_vm3, %v1732_v17  ;;  %v1805_v23 = vpop.f32.mrf.mxu0  ;;  %v1853_v24 = vpop.f32.mrf.mxu1 }
  0xff   : > { %1987 = vpow2.f32 %v1665_v20  ;;  %v1717_v25 = vpack.c.bf16 %v2362_v21, %v2362_v21  ;;  %v1650_v26 = vmul.f32 -1.442695, %v2362_v21  ;;  %v1733_v27 = vpack.c.bf16 %v2365_v22, %v2365_v22 }
 0x100   : > { %v1666_v28 = vmul.f32 -1.442695, %v2365_v22  ;;  %v1806_v29 = vadd.f32 %v1805_v23, %v1804_v18  ;;  %v1854_v30 = vadd.f32 %v1853_v24, %v1852_v19  ;;  %v1807_v31 = vpop.f32.mrf.mxu0  ;;  %v1855_v32 = vpop.f32.mrf.mxu1 }
 0x101   : > { %874 = vst.msk [vmem:[%s2337_s9 + $0x8] sm:$0xf] %vm871_vm3, %v1717_v25  ;;  %1989 = vpow2.f32 %v1650_v26  ;;  %890 = vst.msk [vmem:[%s2337_s9 + $0x48] sm:$0xf] %vm871_vm3, %v1733_v27 }
 0x102   : > { %v2382_v33 = vadd.f32 %v1806_v29, %v2323_v54  ;;  %v2385_v34 = vadd.f32 %v1854_v30, %v2323_v54  ;;  %v1808_v35 = vpop.f32.mrf.mxu0  ;;  %v1856_v36 = vpop.f32.mrf.mxu1  ;;  %1991 = vpow2.f32 %v1666_v28 }
 0x103   : > { %v1809_v37 = vadd.f32 %v1808_v35, %v1807_v31  ;;  %v1857_v38 = vadd.f32 %v1856_v36, %v1855_v32 }
 0x104   : > { %v1718_v39 = vpack.c.bf16 %v2382_v33, %v2382_v33  ;;  %v1651_v40 = vmul.f32 -1.442695, %v2382_v33  ;;  %v1734_v41 = vpack.c.bf16 %v2385_v34, %v2385_v34  ;;  %v1810_v42 = vpop.f32.mrf.mxu0  ;;  %v1858_v43 = vpop.f32.mrf.mxu1  ;;  %v1667_v44 = vmul.f32 -1.442695, %v2385_v34 }
 0x105   : > { %v2394_v45 = vadd.f32 %v1809_v37, %v2323_v54  ;;  %v2397_v46 = vadd.f32 %v1857_v38, %v2323_v54 }
 0x106   : > { %v1982_v47 = vpop.eup %1981  ;;  %875 = vst.msk [vmem:[%s2337_s9 + $0xc] sm:$0xf] %vm871_vm3, %v1718_v39  ;;  %1993 = vpow2.f32 %v1651_v40  ;;  %891 = vst.msk [vmem:[%s2337_s9 + $0x4c] sm:$0xf] %vm871_vm3, %v1734_v41  ;;  %v1811_v48 = vpop.f32.mrf.mxu0 }
 0x107   : > { %v1859_v49 = vpop.f32.mrf.mxu1  ;;  %v1984_v50 = vpop.eup %1983  ;;  %v1032_v51 = vadd.f32 1.0, %v1982_v47  ;;  %1995 = vpow2.f32 %v1667_v44  ;;  %v1719_v52 = vpack.c.bf16 %v2394_v45, %v2394_v45  ;;  %v1652_v53 = vmul.f32 -1.442695, %v2394_v45 }
 0x108   : > { %v1048_v55 = vadd.f32 1.0, %v1984_v50  ;;  %v1735_v56 = vpack.c.bf16 %v2397_v46, %v2397_v46  ;;  %v1813_v57 = vpop.f32.mrf.mxu0  ;;  %v1668_v59 = vmul.f32 -1.442695, %v2397_v46  ;;  %v1812_v60 = vadd.f32 %v1811_v48, %v1810_v42 }
 0x109   : > { %v1861_v58 = vpop.f32.mrf.mxu1  ;;  %1997 = vrcp.f32 %v1032_v51  ;;  %876 = vst.msk [vmem:[%s2337_s9 + $0x10] sm:$0xf] %vm871_vm3, %v1719_v52  ;;  %v1860_v63 = vadd.f32 %v1859_v49, %v1858_v43 }
 0x10a   : > { %892 = vst.msk [vmem:[%s2337_s9 + $0x50] sm:$0xf] %vm871_vm3, %v1735_v56  ;;  %v1814_v0 = vpop.f32.mrf.mxu0  ;;  %1999 = vpow2.f32 %v1652_v53  ;;  %v2414_v3 = vadd.f32 %v1812_v60, %v2323_v54 }
 0x10b   : > { %v1862_v1 = vpop.f32.mrf.mxu1  ;;  %v1986_v2 = vpop.eup %1985  ;;  %v2417_v4 = vadd.f32 %v1860_v63, %v2323_v54  ;;  %v1815_v5 = vadd.f32 %v1814_v0, %v1813_v57  ;;  %2001 = vrcp.f32 %v1048_v55 }
 0x10c   : > { %v1988_v6 = vpop.eup %1987  ;;  %v1033_v7 = vadd.f32 1.0, %v1986_v2  ;;  %v1863_v8 = vadd.f32 %v1862_v1, %v1861_v58  ;;  %v1816_v11 = vpop.f32.mrf.mxu0  ;;  %2003 = vpow2.f32 %v1668_v59  ;;  %v1720_v14 = vpack.c.bf16 %v2414_v3, %v2414_v3 }
 0x10d   : > { %v1864_v12 = vpop.f32.mrf.mxu1  ;;  %v1049_v13 = vadd.f32 1.0, %v1988_v6  ;;  %v1653_v16 = vmul.f32 -1.442695, %v2414_v3  ;;  %v1736_v17 = vpack.c.bf16 %v2417_v4, %v2417_v4  ;;  %v2425_v18 = vadd.f32 %v1815_v5, %v2323_v54 }
 0x10e   : > { %v1990_v15 = vpop.eup %1989  ;;  %v1817_v19 = vpop.f32.mrf.mxu0  ;;  %877 = vst.msk [vmem:[%s2337_s9 + $0x14] sm:$0xf] %vm871_vm3, %v1720_v14  ;;  %v2430_v24 = vadd.f32 %v1863_v8, %v2323_v54  ;;  %v1669_v32 = vmul.f32 -1.442695, %v2417_v4 }
 0x10f   : > { %v1865_v20 = vpop.f32.mrf.mxu1  ;;  %2005 = vrcp.f32 %v1049_v13  ;;  %v1034_v23 = vadd.f32 1.0, %v1990_v15  ;;  %v1818_v25 = vadd.f32 %v1817_v19, %v1816_v11  ;;  %v1992_v26 = vpop.eup %1991  ;;  %893 = vst.msk [vmem:[%s2337_s9 + $0x54] sm:$0xf] %vm871_vm3, %v1736_v17  ;;  %v1721_v27 = vpack.c.bf16 %v2425_v18, %v2425_v18 }
 0x110   : > { %2007 = vrcp.f32 %v1033_v7  ;;  %v1866_v28 = vadd.f32 %v1865_v20, %v1864_v12  ;;  %v1819_v29 = vpop.f32.mrf.mxu0  ;;  %v1050_v31 = vadd.f32 1.0, %v1992_v26  ;;  %v1737_v35 = vpack.c.bf16 %v2430_v24, %v2430_v24 }
 0x111   : > { %v1867_v30 = vpop.f32.mrf.mxu1  ;;  %2009 = vrcp.f32 %v1034_v23  ;;  %878 = vst.msk [vmem:[%s2337_s9 + $0x18] sm:$0xf] %vm871_vm3, %v1721_v27  ;;  %v2442_v36 = vadd.f32 %v1818_v25, %v2323_v54  ;;  %v1654_v50 = vmul.f32 -1.442695, %v2425_v18  ;;  %v1670_v0 = vmul.f32 -1.442695, %v2430_v24 }
 0x112   : > { %2011 = vpow2.f32 %v1653_v16  ;;  %v2445_v37 = vadd.f32 %v1866_v28, %v2323_v54  ;;  %v1820_v38 = vpop.f32.mrf.mxu0  ;;  %894 = vst.msk [vmem:[%s2337_s9 + $0x58] sm:$0xf] %vm871_vm3, %v1737_v35 }
 0x113   : > { %v1868_v39 = vpop.f32.mrf.mxu1  ;;  %v1994_v40 = vpop.eup %1993  ;;  %v1821_v41 = vadd.f32 %v1820_v38, %v1819_v29  ;;  %2013 = vrcp.f32 %v1050_v31  ;;  %v1722_v47 = vpack.c.bf16 %v2442_v36, %v2442_v36  ;;  %v1655_v17 = vmul.f32 -1.442695, %v2442_v36 }
 0x114   : > { %v1869_v42 = vadd.f32 %v1868_v39, %v1867_v30  ;;  %v1996_v43 = vpop.eup %1995  ;;  %v1035_v44 = vadd.f32 1.0, %v1994_v40  ;;  %v1822_v48 = vpop.f32.mrf.mxu0  ;;  %2015 = vpow2.f32 %v1669_v32  ;;  %v1738_v51 = vpack.c.bf16 %v2445_v37, %v2445_v37 }
 0x115   : > { %v1870_v49 = vpop.f32.mrf.mxu1  ;;  %v1051_v53 = vadd.f32 1.0, %v1996_v43  ;;  %879 = vst.msk [vmem:[%s2337_s9 + $0x1c] sm:$0xf] %vm871_vm3, %v1722_v47  ;;  %v2457_v55 = vadd.f32 %v1821_v41, %v2323_v54  ;;  %v1671_v29 = vmul.f32 -1.442695, %v2445_v37 }
 0x116   : > { %v1998_v52 = vpop.eup %1997  ;;  %2017 = vrcp.f32 %v1035_v44  ;;  %v2460_v56 = vadd.f32 %v1869_v42, %v2323_v54  ;;  %v1823_v57 = vpop.f32.mrf.mxu0  ;;  %895 = vst.msk [vmem:[%s2337_s9 + $0x5c] sm:$0xf] %vm871_vm3, %v1738_v51 }
 0x117   : > { %v1871_v58 = vpop.f32.mrf.mxu1  ;;  %v1824_v59 = vadd.f32 %v1823_v57, %v1822_v48  ;;  %1160 = vrot.lane.b32.xlu0 %v1998_v52, %s2182_s10  ;;  %v2000_v63 = vpop.eup %1999  ;;  %v1723_v1 = vpack.c.bf16 %v2457_v55, %v2457_v55  ;;  %2019 = vpow2.f32 %v1654_v50  ;;  %v1656_v44 = vmul.f32 -1.442695, %v2457_v55 }
 0x118   : > { %v1872_v60 = vadd.f32 %v1871_v58, %v1870_v49  ;;  %v1739_v2 = vpack.c.bf16 %v2460_v56, %v2460_v56  ;;  %v1825_v5 = vpop.f32.mrf.mxu0  ;;  %v2002_v7 = vpop.eup %2001  ;;  %v1036_v8 = vadd.f32 1.0, %v2000_v63  ;;  %2021 = vrcp.f32 %v1051_v53 }
 0x119   : > { %v1873_v6 = vpop.f32.mrf.mxu1  ;;  %v2471_v11 = vadd.f32 %v1824_v59, %v2323_v54  ;;  %v2004_v12 = vpop.eup %2003  ;;  %880 = vst.msk [vmem:[%s2337_s9 + $0x20] sm:$0xf] %vm871_vm3, %v1723_v1 }
 0x11a   : > { %896 = vst.msk [vmem:[%s2337_s9 + $0x60] sm:$0xf] %vm871_vm3, %v1739_v2  ;;  %v2478_v13 = vadd.f32 %v1872_v60, %v2323_v54  ;;  %v1826_v14 = vpop.f32.mrf.mxu0  ;;  %2023 = vrcp.f32 %v1036_v8  ;;  %v1052_v16 = vadd.f32 1.0, %v2004_v12 }
 0x11b   : > { %v1874_v15 = vpop.f32.mrf.mxu1  ;;  %v1724_v19 = vpack.c.bf16 %v2471_v11, %v2471_v11  ;;  %1192 = vrot.lane.b32.xlu0 %v2002_v7, %s2182_s10  ;;  %2025 = vpow2.f32 %v1670_v0  ;;  %v1827_v25 = vadd.f32 %v1826_v14, %v1825_v5  ;;  %v1672_v0 = vmul.f32 -1.442695, %v2460_v56 }
 0x11c   : > { %v2006_v20 = vpop.eup %2005  ;;  %v1740_v23 = vpack.c.bf16 %v2478_v13, %v2478_v13  ;;  %v1828_v26 = vpop.f32.mrf.mxu0  ;;  %v1875_v30 = vadd.f32 %v1874_v15, %v1873_v6  ;;  %2027 = vrcp.f32 %v1052_v16  ;;  %v1657_v14 = vmul.f32 -1.442695, %v2471_v11 }
 0x11d   : > { %v1876_v27 = vpop.f32.mrf.mxu1  ;;  %v2008_v28 = vpop.eup %2007  ;;  %881 = vst.msk [vmem:[%s2337_s9 + $0x24] sm:$0xf] %vm871_vm3, %v1724_v19  ;;  %1194 = vrot.lane.b32.xlu1 %v2006_v20, %s2182_s10  ;;  %v2493_v32 = vadd.f32 %v1827_v25, %v2323_v54  ;;  %2029 = vpow2.f32 %v1655_v17 }
 0x11e   : > { %v2010_v31 = vpop.eup %2009  ;;  %897 = vst.msk [vmem:[%s2337_s9 + $0x64] sm:$0xf] %vm871_vm3, %v1740_v23  ;;  %v1829_v35 = vpop.f32.mrf.mxu0  ;;  %v2496_v40 = vadd.f32 %v1875_v30, %v2323_v54  ;;  %2031 = vpow2.f32 %v1671_v29 }
 0x11f   : > { %v1877_v38 = vpop.f32.mrf.mxu1  ;;  %v2012_v39 = vpop.eup %2011  ;;  %v1830_v41 = vadd.f32 %v1829_v35, %v1828_v26  ;;  %1162 = vrot.lane.b32.xlu0 %v2008_v28, %s2182_s10  ;;  %v1725_v47 = vpack.c.bf16 %v2493_v32, %v2493_v32  ;;  %v1673_v35 = vmul.f32 -1.442695, %v2478_v13 }
 0x120   : > { %v1878_v42 = vadd.f32 %v1877_v38, %v1876_v27  ;;  %v1037_v43 = vadd.f32 1.0, %v2012_v39  ;;  %v1831_v48 = vpop.f32.mrf.mxu0  ;;  %v2014_v50 = vpop.eup %2013  ;;  %v1741_v51 = vpack.c.bf16 %v2496_v40, %v2496_v40 }
 0x121   : > { %v1879_v49 = vpop.f32.mrf.mxu1  ;;  %v2505_v52 = vadd.f32 %v1830_v41, %v2323_v54  ;;  %1164 = vrot.lane.b32.xlu1 %v2010_v31, %s2182_s10  ;;  %v2016_v53 = vpop.eup %2015  ;;  %882 = vst.msk [vmem:[%s2337_s9 + $0x28] sm:$0xf] %vm871_vm3, %v1725_v47 }
 0x122   : > { %2033 = vrcp.f32 %v1037_v43  ;;  %v2511_v57 = vadd.f32 %v1878_v42, %v2323_v54  ;;  %v1832_v58 = vpop.f32.mrf.mxu0  ;;  %v1053_v63 = vadd.f32 1.0, %v2016_v53  ;;  %898 = vst.msk [vmem:[%s2337_s9 + $0x68] sm:$0xf] %vm871_vm3, %v1741_v51  ;;  %v1658_v51 = vmul.f32 -1.442695, %v2493_v32 }
 0x123   : > { %v1880_v59 = vpop.f32.mrf.mxu1  ;;  %v2018_v60 = vpop.eup %2017  ;;  %v1726_v1 = vpack.c.bf16 %v2505_v52, %v2505_v52  ;;  %1196 = vrot.lane.b32.xlu0 %v2014_v50, %s2182_s10  ;;  %2035 = vpow2.f32 %v1656_v44  ;;  %v1833_v5 = vadd.f32 %v1832_v58, %v1831_v48 }
 0x124   : > { %v1742_v2 = vpack.c.bf16 %v2511_v57, %v2511_v57  ;;  %v1834_v6 = vpop.f32.mrf.mxu0  ;;  %v1881_v8 = vadd.f32 %v1880_v59, %v1879_v49  ;;  %v2020_v12 = vpop.eup %2019  ;;  %2037 = vrcp.f32 %v1053_v63 }
 0x125   : > { %v1882_v7 = vpop.f32.mrf.mxu1  ;;  %883 = vst.msk [vmem:[%s2337_s9 + $0x2c] sm:$0xf] %vm871_vm3, %v1726_v1  ;;  %1166 = vrot.lane.b32.xlu1 %v2018_v60, %s2182_s10  ;;  %v2528_v15 = vadd.f32 %v1833_v5, %v2323_v54  ;;  %v2022_v19 = vpop.eup %2021  ;;  %v1038_v20 = vadd.f32 1.0, %v2020_v12  ;;  %2039 = vpow2.f32 %v1672_v0  ;;  %v1674_v12 = vmul.f32 -1.442695, %v2496_v40 }
 0x126   : > { %899 = vst.msk [vmem:[%s2337_s9 + $0x6c] sm:$0xf] %vm871_vm3, %v1742_v2  ;;  %v1835_v16 = vpop.f32.mrf.mxu0  ;;  %v2531_v23 = vadd.f32 %v1881_v8, %v2323_v54 }
 0x127   : > { %v1883_v17 = vpop.f32.mrf.mxu1  ;;  %v1836_v25 = vadd.f32 %v1835_v16, %v1834_v6  ;;  %v2024_v26 = vpop.eup %2023  ;;  %v1727_v27 = vpack.c.bf16 %v2528_v15, %v2528_v15  ;;  %2041 = vrcp.f32 %v1038_v20 }
 0x128   : > { %v1884_v28 = vadd.f32 %v1883_v17, %v1882_v7  ;;  %v1837_v29 = vpop.f32.mrf.mxu0  ;;  %v2026_v31 = vpop.eup %2025  ;;  %v1743_v38 = vpack.c.bf16 %v2531_v23, %v2531_v23  ;;  %1168 = vrot.lane.b32.xlu0 %v2024_v26, %s2182_s10  ;;  %2043 = vpow2.f32 %v1657_v14  ;;  %v1659_v26 = vmul.f32 -1.442695, %v2505_v52 }
 0x129   : > { %v1885_v30 = vpop.f32.mrf.mxu1  ;;  %v2539_v39 = vadd.f32 %v1836_v25, %v2323_v54  ;;  %1198 = vrot.lane.b32.xlu1 %v2022_v19, %s2182_s10  ;;  %v1054_v41 = vadd.f32 1.0, %v2026_v31  ;;  %884 = vst.msk [vmem:[%s2337_s9 + $0x30] sm:$0xf] %vm871_vm3, %v1727_v27  ;;  %v2028_v47 = vpop.eup %2027 }
 0x12a   : > { %v2546_v42 = vadd.f32 %v1884_v28, %v2323_v54  ;;  %v1838_v43 = vpop.f32.mrf.mxu0  ;;  %900 = vst.msk [vmem:[%s2337_s9 + $0x70] sm:$0xf] %vm871_vm3, %v1743_v38  ;;  %v2030_v50 = vpop.eup %2029  ;;  %v1675_v38 = vmul.f32 -1.442695, %v2511_v57 }
 0x12b   : > { %v1886_v44 = vpop.f32.mrf.mxu1  ;;  %v1728_v48 = vpack.c.bf16 %v2539_v39, %v2539_v39  ;;  %v1839_v49 = vadd.f32 %v1838_v43, %v1837_v29  ;;  %2045 = vrcp.f32 %v1054_v41  ;;  %v1039_v63 = vadd.f32 1.0, %v2030_v50  ;;  %v2032_v1 = vpop.eup %2031 }
 0x12c   : > { %v1744_v53 = vpack.c.bf16 %v2546_v42, %v2546_v42  ;;  %v1887_v58 = vadd.f32 %v1886_v44, %v1885_v30  ;;  %v1840_v59 = vpop.f32.mrf.mxu0  ;;  %2047 = vpow2.f32 %v1673_v35  ;;  %1200 = vrot.lane.b32.xlu0 %v2028_v47, %s2182_s10  ;;  %v1055_v8 = vadd.f32 1.0, %v2032_v1 }
 0x12d   : > { %v1888_v60 = vpop.f32.mrf.mxu1  ;;  %885 = vst.msk [vmem:[%s2337_s9 + $0x34] sm:$0xf] %vm871_vm3, %v1728_v48  ;;  %v2558_v0 = vadd.f32 %v1839_v49, %v2323_v54  ;;  %2049 = vrcp.f32 %v1039_v63  ;;  %v1660_v47 = vmul.f32 -1.442695, %v2528_v15 }
 0x12e   : > { %901 = vst.msk [vmem:[%s2337_s9 + $0x74] sm:$0xf] %vm871_vm3, %v1744_v53  ;;  %v2564_v2 = vadd.f32 %v1887_v58, %v2323_v54  ;;  %v1841_v5 = vpop.f32.mrf.mxu0  ;;  %2051 = vpow2.f32 %v1658_v51  ;;  %v1676_v51 = vmul.f32 -1.442695, %v2531_v23 }
 0x12f   : > { %v1889_v6 = vpop.f32.mrf.mxu1  ;;  %v2034_v7 = vpop.eup %2033  ;;  %v1729_v14 = vpack.c.bf16 %v2558_v0, %v2558_v0  ;;  %v1842_v17 = vadd.f32 %v1841_v5, %v1840_v59  ;;  %2053 = vrcp.f32 %v1055_v8 }
 0x130   : > { %v1745_v16 = vpack.c.bf16 %v2564_v2, %v2564_v2  ;;  %1170 = vrot.lane.b32.xlu1 %v2034_v7, %s2182_s10  ;;  %v2036_v19 = vpop.eup %2035  ;;  %v1890_v20 = vadd.f32 %v1889_v6, %v1888_v60  ;;  %2055 = vpow2.f32 %v1674_v12  ;;  %v1661_v60 = vmul.f32 -1.442695, %v2539_v39 }
 0x131   : > { %886 = vst.msk [vmem:[%s2337_s9 + $0x38] sm:$0xf] %vm871_vm3, %v1729_v14  ;;  %v1040_v25 = vadd.f32 1.0, %v2036_v19  ;;  %v2578_v27 = vadd.f32 %v1842_v17, %v2323_v54  ;;  %v2038_v28 = vpop.eup %2037  ;;  %v1677_v7 = vmul.f32 -1.442695, %v2546_v42 }
 0x132   : > { %902 = vst.msk [vmem:[%s2337_s9 + $0x78] sm:$0xf] %vm871_vm3, %v1745_v16  ;;  %v2581_v29 = vadd.f32 %v1890_v20, %v2323_v54  ;;  %v2040_v30 = vpop.eup %2039  ;;  %v1662_v14 = vmul.f32 -1.442695, %v2558_v0 }
 0x133   : > { %2057 = vrcp.f32 %v1040_v25  ;;  %v1730_v31 = vpack.c.bf16 %v2578_v27, %v2578_v27  ;;  %v1056_v35 = vadd.f32 1.0, %v2040_v30  ;;  %v1678_v25 = vmul.f32 -1.442695, %v2564_v2 }
 0x134   : > { %1202 = vrot.lane.b32.xlu1 %v2038_v28, %s2182_s10  ;;  %v1746_v41 = vpack.c.bf16 %v2581_v29, %v2581_v29  ;;  %v2042_v43 = vpop.eup %2041  ;;  %2059 = vpow2.f32 %v1659_v26  ;;  %v1663_v30 = vmul.f32 -1.442695, %v2578_v27 }
 0x135   : > { %887 = vst.msk [vmem:[%s2337_s9 + $0x3c] sm:$0xf] %vm871_vm3, %v1730_v31  ;;  %v2044_v44 = vpop.eup %2043  ;;  %1172 = vrot.lane.b32.xlu0 %v2042_v43, %s2182_s10  ;;  %2061 = vrcp.f32 %v1056_v35  ;;  %v1679_v43 = vmul.f32 -1.442695, %v2581_v29 }
 0x136   : > { %903 = vst.msk [vmem:[%s2337_s9 + $0x7c] sm:$0xf] %vm871_vm3, %v1746_v41  ;;  %v1041_v54 = vadd.f32 1.0, %v2044_v44  ;;  %2063 = vpow2.f32 %v1675_v38 }
 0x138   : > { %v2046_v48 = vpop.eup %2045  ;;  %2065 = vrcp.f32 %v1041_v54 }
 0x139   : > { %v2048_v49 = vpop.eup %2047  ;;  %1204 = vrot.lane.b32.xlu0 %v2046_v48, %s2182_s10  ;;  %2067 = vpow2.f32 %v1660_v47 }
 0x13a   : > { %v1057_v50 = vadd.f32 1.0, %v2048_v49  ;;  %v2050_v53 = vpop.eup %2049 }
 0x13b   : > { %v2052_v58 = vpop.eup %2051  ;;  %1174 = vrot.lane.b32.xlu1 %v2050_v53, %s2182_s10 }
 0x13c   : > { %2069 = vrcp.f32 %v1057_v50  ;;  %v1042_v59 = vadd.f32 1.0, %v2052_v58  ;;  %v2054_v63 = vpop.eup %2053 }
 0x13d   : > { %2071 = vpow2.f32 %v1676_v51  ;;  %v2056_v1 = vpop.eup %2055 }
 0x13e   : > { %2073 = vrcp.f32 %v1042_v59  ;;  %v1058_v6 = vadd.f32 1.0, %v2056_v1 }
 0x13f   : > { %1206 = vrot.lane.b32.xlu1 %v2054_v63, %s2182_s10  ;;  %2075 = vpow2.f32 %v1661_v60 }
 0x140   : > { %v2058_v5 = vpop.eup %2057  ;;  %2077 = vrcp.f32 %v1058_v6 }
 0x141   : > { %1176 = vrot.lane.b32.xlu0 %v2058_v5, %s2182_s10  ;;  %v2060_v8 = vpop.eup %2059  ;;  %2079 = vpow2.f32 %v1677_v7 }
 0x142   : > { %v1043_v12 = vadd.f32 1.0, %v2060_v8  ;;  %v2062_v16 = vpop.eup %2061 }
 0x143   : > { %v2064_v17 = vpop.eup %2063 }
 0x144   : > { %2081 = vrcp.f32 %v1043_v12  ;;  %v1059_v20 = vadd.f32 1.0, %v2064_v17 }
 0x145   : > { %1208 = vrot.lane.b32.xlu0 %v2062_v16, %s2182_s10  ;;  %v2066_v19 = vpop.eup %2065  ;;  %2083 = vpow2.f32 %v1662_v14 }
 0x146   : > { %1178 = vrot.lane.b32.xlu1 %v2066_v19, %s2182_s10  ;;  %v2068_v26 = vpop.eup %2067  ;;  %2085 = vrcp.f32 %v1059_v20 }
 0x147   : > { %v1044_v28 = vadd.f32 1.0, %v2068_v26  ;;  %2087 = vpow2.f32 %v1678_v25 }
 0x149   : > { %v2070_v31 = vpop.eup %2069  ;;  %2089 = vrcp.f32 %v1044_v28 }
 0x14a   : > { %v2072_v35 = vpop.eup %2071  ;;  %1210 = vrot.lane.b32.xlu1 %v2070_v31, %s2182_s10  ;;  %2091 = vpow2.f32 %v1663_v30 }
 0x14b   : > { %v2074_v38 = vpop.eup %2073  ;;  %v1060_v41 = vadd.f32 1.0, %v2072_v35 }
 0x14c   : > { %1180 = vrot.lane.b32.xlu0 %v2074_v38, %s2182_s10  ;;  %v2076_v44 = vpop.eup %2075 }
 0x14d   : > { %2093 = vrcp.f32 %v1060_v41  ;;  %v1045_v54 = vadd.f32 1.0, %v2076_v44  ;;  %v2078_v47 = vpop.eup %2077 }
 0x14e   : > { %2095 = vpow2.f32 %v1679_v43  ;;  %v2080_v48 = vpop.eup %2079 }
 0x14f   : > { %2097 = vrcp.f32 %v1045_v54  ;;  %v1061_v50 = vadd.f32 1.0, %v2080_v48 }
 0x150   : > { %1212 = vrot.lane.b32.xlu0 %v2078_v47, %s2182_s10 }
 0x151   : > { %v2082_v49 = vpop.eup %2081  ;;  %2099 = vrcp.f32 %v1061_v50 }
 0x152   : > { %1182 = vrot.lane.b32.xlu1 %v2082_v49, %s2182_s10  ;;  %v2084_v51 = vpop.eup %2083 }
 0x153   : > { %v1046_v53 = vadd.f32 1.0, %v2084_v51  ;;  %v2086_v58 = vpop.eup %2085 }
 0x154   : > { %v2088_v59 = vpop.eup %2087 }
 0x155   : > { %2101 = vrcp.f32 %v1046_v53  ;;  %v1062_v63 = vadd.f32 1.0, %v2088_v59 }
 0x156   : > { %1214 = vrot.lane.b32.xlu1 %v2086_v58, %s2182_s10  ;;  %v2090_v60 = vpop.eup %2089 }
 0x157   : > { %1184 = vrot.lane.b32.xlu0 %v2090_v60, %s2182_s10  ;;  %v2092_v1 = vpop.eup %2091  ;;  %2103 = vrcp.f32 %v1062_v63 }
 0x158   : > { %v1047_v5 = vadd.f32 1.0, %v2092_v1 }
 0x15a   : > { %v2094_v6 = vpop.eup %2093  ;;  %2105 = vrcp.f32 %v1047_v5 }
 0x15b   : > { %v2096_v7 = vpop.eup %2095  ;;  %1216 = vrot.lane.b32.xlu0 %v2094_v6, %s2182_s10 }
 0x15c   : > { %v2098_v8 = vpop.eup %2097  ;;  %v1063_v12 = vadd.f32 1.0, %v2096_v7 }
 0x15d   : > { %1186 = vrot.lane.b32.xlu1 %v2098_v8, %s2182_s10 }
 0x15e   : > { %2107 = vrcp.f32 %v1063_v12  ;;  %v2100_v14 = vpop.eup %2099 }
 0x15f   : > { %2109 = vtanh.f32 %v2327_v61 }
 0x160   : > { %2111 = vtanh.f32 %v2330_v62 }
 0x161   : > { %1218 = vrot.lane.b32.xlu1 %v2100_v14, %s2182_s10  ;;  %2113 = vtanh.f32 %v2353_v10 }
 0x162   : > { %v2102_v16 = vpop.eup %2101  ;;  %2115 = vtanh.f32 %v2350_v9 }
 0x163   : > { %1188 = vrot.lane.b32.xlu0 %v2102_v16, %s2182_s10  ;;  %2117 = vtanh.f32 %v2362_v21 }
 0x164   : > { %v2104_v17 = vpop.eup %2103  ;;  %2119 = vtanh.f32 %v2365_v22 }
 0x165   : > { %2121 = vtanh.f32 %v2382_v33 }
 0x166   : > { %2123 = vtanh.f32 %v2385_v34 }
 0x167   : > { %1220 = vrot.lane.b32.xlu0 %v2104_v17, %s2182_s10  ;;  %v2106_v19 = vpop.eup %2105  ;;  %2125 = vtanh.f32 %v2394_v45 }
 0x168   : > { %1190 = vrot.lane.b32.xlu1 %v2106_v19, %s2182_s10  ;;  %2127 = vtanh.f32 %v2397_v46 }
 0x169   : > { %2129 = vtanh.f32 %v2414_v3 }
 0x16a   : > { %2131 = vtanh.f32 %v2417_v4 }
 0x16b   : > { %v2108_v20 = vpop.eup %2107  ;;  %2133 = vtanh.f32 %v2425_v18 }
 0x16c   : > { %1222 = vrot.lane.b32.xlu1 %v2108_v20, %s2182_s10  ;;  %v2110_v25 = vpop.eup %2109  ;;  %2135 = vtanh.f32 %v2430_v24 }
 0x16d   : > { %v2112_v62 = vpop.eup %2111  ;;  %2137 = vtanh.f32 %v2442_v36 }
 0x16e   : > { %v2114_v21 = vpop.eup %2113  ;;  %2139 = vtanh.f32 %v2445_v37 }
 0x16f   : > { %v2116_v31 = vpop.eup %2115  ;;  %2141 = vtanh.f32 %v2457_v55 }
 0x170   : > { %v2118_v41 = vpop.eup %2117  ;;  %2143 = vtanh.f32 %v2460_v56 }
 0x171   : > { %v2120_v54 = vpop.eup %2119  ;;  %2145 = vtanh.f32 %v2471_v11 }
 0x172   : > { %v2122_v49 = vpop.eup %2121  ;;  %2147 = vtanh.f32 %v2478_v13 }
 0x173   : > { %v2124_v58 = vpop.eup %2123  ;;  %2149 = vtanh.f32 %v2493_v32 }
 0x174   : > { %v2126_v3 = vpop.eup %2125  ;;  %2151 = vtanh.f32 %v2496_v40 }
 0x175   : > { %v2128_v8 = vpop.eup %2127  ;;  %2153 = vtanh.f32 %v2505_v52 }
 0x176   : > { %v2130_v14 = vpop.eup %2129  ;;  %2155 = vtanh.f32 %v2511_v57 }
 0x177   : > { %v2132_v20 = vpop.eup %2131  ;;  %2157 = vtanh.f32 %v2528_v15 }
 0x178   : > { %2159 = vtanh.f32 %v2531_v23 }
 0x179   : > { %2161 = vtanh.f32 %v2539_v39 }
 0x17a   : > { %2163 = vtanh.f32 %v2546_v42 }
 0x189   : > { %v1161_v26 = vpop.permute.xlu0 %1160 }
 0x18a   : > { %v1256_v28 = vmul.f32 %v2110_v25, %v1161_v26  ;;  %v2134_v26 = vpop.eup %2133  ;;  %2165 = vtanh.f32 %v2558_v0 }
 0x18c   : > { %v1747_v61 = vpack.c.bf16 %v1256_v28, %v1256_v28 }
 0x18d   : > { %v1193_v9 = vpop.permute.xlu0 %1192 }
 0x18e   : > { %1417 = vst.msk [vmem:[%s2633_s13] sm:$0xf] %vm1416_vm4, %v1747_v61  ;;  %v1272_v10 = vmul.f32 %v2112_v62, %v1193_v9  ;;  %v2136_v9 = vpop.eup %2135  ;;  %2167 = vtanh.f32 %v2564_v2 }
 0x18f   : > { %v1195_v22 = vpop.permute.xlu1 %1194 }
 0x190   : > { %v1273_v33 = vmul.f32 %v2114_v21, %v1195_v22  ;;  %v1763_v30 = vpack.c.bf16 %v1272_v10, %v1272_v10  ;;  %v2138_v10 = vpop.eup %2137  ;;  %2169 = vtanh.f32 %v2578_v27 }
 0x191   : > { %v1163_v35 = vpop.permute.xlu0 %1162  ;;  %v2140_v56 = vpop.eup %2139  ;;  %2171 = vtanh.f32 %v2581_v29 }
 0x192   : > { %v1764_v38 = vpack.c.bf16 %v1273_v33, %v1273_v33  ;;  %1433 = vst.msk [vmem:[%s2633_s13 + $0x40] sm:$0xf] %vm1416_vm4, %v1763_v30  ;;  %v1257_v34 = vmul.f32 %v2116_v31, %v1163_v35  ;;  %v2142_v11 = vpop.eup %2141 }
 0x193   : > { %v1165_v43 = vpop.permute.xlu1 %1164  ;;  %v2144_v13 = vpop.eup %2143 }
 0x194   : > { %1434 = vst.msk [vmem:[%s2633_s13 + $0x44] sm:$0xf] %vm1416_vm4, %v1764_v38  ;;  %v1258_v45 = vmul.f32 %v2118_v41, %v1165_v43  ;;  %v1748_v44 = vpack.c.bf16 %v1257_v34, %v1257_v34 }
 0x195   : > { %v1197_v47 = vpop.permute.xlu0 %1196 }
 0x196   : > { %v1749_v48 = vpack.c.bf16 %v1258_v45, %v1258_v45  ;;  %1418 = vst.msk [vmem:[%s2633_s13 + $0x4] sm:$0xf] %vm1416_vm4, %v1748_v44  ;;  %v1274_v46 = vmul.f32 %v2120_v54, %v1197_v47  ;;  %v2146_v44 = vpop.eup %2145 }
 0x197   : > { %v1167_v50 = vpop.permute.xlu1 %1166  ;;  %v2148_v40 = vpop.eup %2147 }
 0x198   : > { %1419 = vst.msk [vmem:[%s2633_s13 + $0x8] sm:$0xf] %vm1416_vm4, %v1749_v48  ;;  %v1259_v51 = vmul.f32 %v2122_v49, %v1167_v50  ;;  %v1765_v53 = vpack.c.bf16 %v1274_v46, %v1274_v46  ;;  %v2150_v50 = vpop.eup %2149 }
 0x19a   : > { %v1750_v59 = vpack.c.bf16 %v1259_v51, %v1259_v51  ;;  %1435 = vst.msk [vmem:[%s2633_s13 + $0x48] sm:$0xf] %vm1416_vm4, %v1765_v53  ;;  %v1169_v63 = vpop.permute.xlu0 %1168 }
 0x19b   : > { %v1199_v60 = vpop.permute.xlu1 %1198  ;;  %v1260_v5 = vmul.f32 %v2126_v3, %v1169_v63 }
 0x19c   : > { %1420 = vst.msk [vmem:[%s2633_s13 + $0xc] sm:$0xf] %vm1416_vm4, %v1750_v59  ;;  %v1275_v1 = vmul.f32 %v2124_v58, %v1199_v60  ;;  %v2152_v59 = vpop.eup %2151 }
 0x19d   : > { %v1751_v7 = vpack.c.bf16 %v1260_v5, %v1260_v5  ;;  %v2154_v60 = vpop.eup %2153 }
 0x19e   : > { %v1766_v6 = vpack.c.bf16 %v1275_v1, %v1275_v1  ;;  %v1201_v4 = vpop.permute.xlu0 %1200  ;;  %v2156_v23 = vpop.eup %2155 }
 0x19f   : > { %1421 = vst.msk [vmem:[%s2633_s13 + $0x10] sm:$0xf] %vm1416_vm4, %v1751_v7  ;;  %v1276_v12 = vmul.f32 %v2128_v8, %v1201_v4  ;;  %v2158_v8 = vpop.eup %2157 }
 0x1a0   : > { %1436 = vst.msk [vmem:[%s2633_s13 + $0x4c] sm:$0xf] %vm1416_vm4, %v1766_v6 }
 0x1a1   : > { %v1767_v16 = vpack.c.bf16 %v1276_v12, %v1276_v12 }
 0x1a2   : > { %v1171_v18 = vpop.permute.xlu1 %1170 }
 0x1a3   : > { %v1261_v17 = vmul.f32 %v2130_v14, %v1171_v18  ;;  %1437 = vst.msk [vmem:[%s2633_s13 + $0x50] sm:$0xf] %vm1416_vm4, %v1767_v16  ;;  %v2160_v18 = vpop.eup %2159 }
 0x1a5   : > { %v1752_v19 = vpack.c.bf16 %v1261_v17, %v1261_v17  ;;  %v2162_v17 = vpop.eup %2161 }
 0x1a6   : > { %v1203_v24 = vpop.permute.xlu1 %1202 }
 0x1a7   : > { %1422 = vst.msk [vmem:[%s2633_s13 + $0x14] sm:$0xf] %vm1416_vm4, %v1752_v19  ;;  %v1277_v25 = vmul.f32 %v2132_v20, %v1203_v24  ;;  %v1173_v36 = vpop.permute.xlu0 %1172 }
 0x1a8   : > { %v1262_v61 = vmul.f32 %v2134_v26, %v1173_v36 }
 0x1a9   : > { %v1768_v28 = vpack.c.bf16 %v1277_v25, %v1277_v25  ;;  %v2164_v25 = vpop.eup %2163 }
 0x1aa   : > { %v1753_v62 = vpack.c.bf16 %v1262_v61, %v1262_v61  ;;  %v2166_v27 = vpop.eup %2165 }
 0x1ab   : > { %1438 = vst.msk [vmem:[%s2633_s13 + $0x54] sm:$0xf] %vm1416_vm4, %v1768_v28  ;;  %v1205_v37 = vpop.permute.xlu0 %1204 }
 0x1ac   : > { %1423 = vst.msk [vmem:[%s2633_s13 + $0x18] sm:$0xf] %vm1416_vm4, %v1753_v62  ;;  %v1278_v55 = vmul.f32 %v2136_v9, %v1205_v37  ;;  %v2168_v37 = vpop.eup %2167 }
 0x1ad   : > { %v1175_v21 = vpop.permute.xlu1 %1174 }
 0x1ae   : > { %v1263_v22 = vmul.f32 %v2138_v10, %v1175_v21  ;;  %v1769_v33 = vpack.c.bf16 %v1278_v55, %v1278_v55  ;;  %v2170_v10 = vpop.eup %2169 }
 0x1b0   : > { %v1754_v30 = vpack.c.bf16 %v1263_v22, %v1263_v22  ;;  %1439 = vst.msk [vmem:[%s2633_s13 + $0x58] sm:$0xf] %vm1416_vm4, %v1769_v33 }
 0x1b1   : > { %v1207_v31 = vpop.permute.xlu1 %1206 }
 0x1b2   : > { %1424 = vst.msk [vmem:[%s2633_s13 + $0x1c] sm:$0xf] %vm1416_vm4, %v1754_v30  ;;  %v1279_v35 = vmul.f32 %v2140_v56, %v1207_v31  ;;  %v2172_v56 = vpop.eup %2171 }
 0x1b3   : > { %v1177_v38 = vpop.permute.xlu0 %1176 }
 0x1b4   : > { %v1264_v34 = vmul.f32 %v2142_v11, %v1177_v38  ;;  %v1770_v41 = vpack.c.bf16 %v1279_v35, %v1279_v35 }
 0x1b6   : > { %v1755_v43 = vpack.c.bf16 %v1264_v34, %v1264_v34  ;;  %1440 = vst.msk [vmem:[%s2633_s13 + $0x5c] sm:$0xf] %vm1416_vm4, %v1770_v41 }
 0x1b7   : > { %v1209_v45 = vpop.permute.xlu0 %1208 }
 0x1b8   : > { %1425 = vst.msk [vmem:[%s2633_s13 + $0x20] sm:$0xf] %vm1416_vm4, %v1755_v43  ;;  %v1280_v32 = vmul.f32 %v2144_v13, %v1209_v45  ;;  %v1179_v54 = vpop.permute.xlu1 %1178 }
 0x1b9   : > { %v1265_v47 = vmul.f32 %v2146_v44, %v1179_v54 }
 0x1ba   : > { %v1771_v48 = vpack.c.bf16 %v1280_v32, %v1280_v32 }
 0x1bb   : > { %v1756_v46 = vpack.c.bf16 %v1265_v47, %v1265_v47 }
 0x1bc   : > { %1441 = vst.msk [vmem:[%s2633_s13 + $0x60] sm:$0xf] %vm1416_vm4, %v1771_v48  ;;  %v1211_v49 = vpop.permute.xlu1 %1210 }
 0x1bd   : > { %1426 = vst.msk [vmem:[%s2633_s13 + $0x24] sm:$0xf] %vm1416_vm4, %v1756_v46  ;;  %v1281_v52 = vmul.f32 %v2148_v40, %v1211_v49 }
 0x1be   : > { %v1181_v51 = vpop.permute.xlu0 %1180 }
 0x1bf   : > { %v1772_v53 = vpack.c.bf16 %v1281_v52, %v1281_v52  ;;  %v1266_v58 = vmul.f32 %v2150_v50, %v1181_v51 }
 0x1c1   : > { %1442 = vst.msk [vmem:[%s2633_s13 + $0x64] sm:$0xf] %vm1416_vm4, %v1772_v53  ;;  %v1757_v57 = vpack.c.bf16 %v1266_v58, %v1266_v58 }
 0x1c2   : > { %v1213_v3 = vpop.permute.xlu0 %1212 }
 0x1c3   : > { %1427 = vst.msk [vmem:[%s2633_s13 + $0x28] sm:$0xf] %vm1416_vm4, %v1757_v57  ;;  %v1282_v15 = vmul.f32 %v2152_v59, %v1213_v3 }
 0x1c4   : > { %v1183_v63 = vpop.permute.xlu1 %1182 }
 0x1c5   : > { %v1267_v1 = vmul.f32 %v2154_v60, %v1183_v63  ;;  %v1773_v5 = vpack.c.bf16 %v1282_v15, %v1282_v15 }
 0x1c7   : > { %v1758_v6 = vpack.c.bf16 %v1267_v1, %v1267_v1  ;;  %1443 = vst.msk [vmem:[%s2633_s13 + $0x68] sm:$0xf] %vm1416_vm4, %v1773_v5 }
 0x1c8   : > { %v1215_v7 = vpop.permute.xlu1 %1214 }
 0x1c9   : > { %1428 = vst.msk [vmem:[%s2633_s13 + $0x2c] sm:$0xf] %vm1416_vm4, %v1758_v6  ;;  %v1283_v39 = vmul.f32 %v2156_v23, %v1215_v7  ;;  %v1185_v4 = vpop.permute.xlu0 %1184 }
 0x1ca   : > { %v1268_v14 = vmul.f32 %v2158_v8, %v1185_v4 }
 0x1cb   : > { %v1774_v12 = vpack.c.bf16 %v1283_v39, %v1283_v39 }
 0x1cc   : > { %v1759_v42 = vpack.c.bf16 %v1268_v14, %v1268_v14 }
 0x1cd   : > { %1444 = vst.msk [vmem:[%s2633_s13 + $0x6c] sm:$0xf] %vm1416_vm4, %v1774_v12  ;;  %v1217_v16 = vpop.permute.xlu0 %1216 }
 0x1ce   : > { %1429 = vst.msk [vmem:[%s2633_s13 + $0x30] sm:$0xf] %vm1416_vm4, %v1759_v42  ;;  %v1284_v0 = vmul.f32 %v2160_v18, %v1217_v16 }
 0x1cf   : > { %v1187_v19 = vpop.permute.xlu1 %1186 }
 0x1d0   : > { %v1269_v20 = vmul.f32 %v2162_v17, %v1187_v19  ;;  %v1775_v24 = vpack.c.bf16 %v1284_v0, %v1284_v0 }
 0x1d2   : > { %v1760_v2 = vpack.c.bf16 %v1269_v20, %v1269_v20  ;;  %1445 = vst.msk [vmem:[%s2633_s13 + $0x70] sm:$0xf] %vm1416_vm4, %v1775_v24 }
 0x1d3   : > { %v1219_v26 = vpop.permute.xlu1 %1218 }
 0x1d4   : > { %1430 = vst.msk [vmem:[%s2633_s13 + $0x34] sm:$0xf] %vm1416_vm4, %v1760_v2  ;;  %v1285_v28 = vmul.f32 %v2164_v25, %v1219_v26 }
 0x1d5   : > { %v1189_v36 = vpop.permute.xlu0 %1188 }
 0x1d6   : > { %v1776_v61 = vpack.c.bf16 %v1285_v28, %v1285_v28  ;;  %v1270_v62 = vmul.f32 %v2166_v27, %v1189_v36 }
 0x1d8   : > { %1446 = vst.msk [vmem:[%s2633_s13 + $0x74] sm:$0xf] %vm1416_vm4, %v1776_v61  ;;  %v1761_v9 = vpack.c.bf16 %v1270_v62, %v1270_v62 }
 0x1d9   : > { %v1221_v29 = vpop.permute.xlu0 %1220 }
 0x1da   : > { %1431 = vst.msk [vmem:[%s2633_s13 + $0x38] sm:$0xf] %vm1416_vm4, %v1761_v9  ;;  %v1286_v55 = vmul.f32 %v2168_v37, %v1221_v29  ;;  %v1191_v21 = vpop.permute.xlu1 %1190 }
 0x1db   : > { %v1271_v22 = vmul.f32 %v2170_v10, %v1191_v21 }
 0x1dc   : > { %v1777_v33 = vpack.c.bf16 %v1286_v55, %v1286_v55 }
 0x1dd   : > { %v1762_v30 = vpack.c.bf16 %v1271_v22, %v1271_v22 }
 0x1de   : > { %1447 = vst.msk [vmem:[%s2633_s13 + $0x78] sm:$0xf] %vm1416_vm4, %v1777_v33  ;;  %v1223_v31 = vpop.permute.xlu1 %1222 }
 0x1df   : > { %1432 = vst.msk [vmem:[%s2633_s13 + $0x3c] sm:$0xf] %vm1416_vm4, %v1762_v30  ;;  %v1287_v11 = vmul.f32 %v2172_v56, %v1223_v31 }
 0x1e1   : > { %v1778_v35 = vpack.c.bf16 %v1287_v11, %v1287_v11 }
 0x1e3   : > { %1448 = vst.msk [vmem:[%s2633_s13 + $0x7c] sm:$0xf] %vm1416_vm4, %v1778_v35 }
 0x1e4 PF: > { %s15_s15 = sadd.s32 1, %s2179_s15  }
 0x1e5   : > { %p12_p4 = scmp.ge.s32.totalorder %s15_s15, 4  }
 0x1e7   :  { %14 = sbr.rel (!%p12_p4) target bundleno = 1 (0x1), region = 74 }

// kernel: pixelcnn_forward.31
= control target key start
LH: loop header
LB: loop body
LE: loop exit
PB: predicated region body
PF: predicated region fallthrough
CT: control target
= control target key end

     0   :  { %s2025_s15 = smov 0   ;;  %s2523_s0 = inlined_call_operand.vmem [shape: bf16[512,144], index: 0, kind: input, shape index: {}]   ;;  %s2524_s1 = inlined_call_operand.vmem [shape: bf16[144,32], index: 1, kind: input, shape index: {}]   ;;  %s2525_s2 = inlined_call_operand.vmem [shape: f32[1,32], index: 2, kind: input, shape index: {}]   ;;  %s2526_s3 = inlined_call_operand.vmem [shape: bf16[512,32], index: 3, kind: output, shape index: {0}]   ;;  %s2527_s4 = inlined_call_operand.vmem [shape: bf16[512,16], index: 4, kind: output, shape index: {1}]  }
   0x1 LB: > { %s1480_s16 = sadd.s32 4294967295, %s1996_s15   ;;  %p1484_p0 = scmp.ge.s32.totalorder %s1996_s15, 1  ;;  %s1996_s15 = sphi %s2025_s15, %s15_s15  }
   0x2   : > { %p167_p1 = scmp.lt.s32.totalorder %s1996_s15, 3 }
   0x4   : > { %p168_p2 = pnand %p1484_p0, %p167_p1 }
   0x5   : > { %s1485_s19 = sshll.u32 (!%p168_p2), %s1480_s16, 5  ;;  %s1999_s22 = smov (!%p168_p2), 112  }
   0x6   : > { %171 = sbr.rel (%p168_p2) target bundleno = 479 (0x1df), region = 32  ;;  %p200_p3 = scmp.lt.s32.totalorder (!%p168_p2), %s1485_s19, 63 }
   0xb   : > { %v1741_v0 = vld [vmem:[%s2524_s1 + $0x38] sm:$0xff]   ;;  %v1998_v1 = vmov 0   ;;  %v1742_v2 = vld [vmem:[%s2524_s1 + $0x30] sm:$0xff]   ;;  %s2529_s19 = smov (!%p200_p3, %s1485_s19), 63  ;;  %v1743_v3 = vld [vmem:[%s2524_s1 + $0x28] sm:$0xff]   ;;  %vm474_vm0 = vcmask 130048  }
   0xc   : > { %523 = vmatprep.subr.bf16.mxu0 %v1998_v1  ;;  %1713 = vmatprep.subr.bf16.mxu1 %v1998_v1  ;;  %s1648_s24 = sshll.u32 %s2529_s19, 3  ;;  %v1744_v4 = vld [vmem:[%s2524_s1 + $0x20] sm:$0xff]   ;;  %v1745_v7 = vld [vmem:[%s2524_s1 + $0x18] sm:$0xff]   ;;  %v1746_v8 = vld [vmem:[%s2524_s1 + $0x10] sm:$0xff]   ;;  %s1489_s17 = sshll.u32 %s2529_s19, 2  ;;  %vm812_vm1 = vcmask 257024  }
   0xd   : > { %524 = vmatpush1.bf16.msra.mxu0 %v1741_v0  ;;  %1722 = vmatpush1.bf16.msra.mxu1 %v1741_v0  ;;  %s2048_s27 = scalar_lea.vmem %s2523_s0, %s1648_s24  ;;  %v1747_v9 = vld [vmem:[%s2524_s1 + $0x8] sm:$0xff]   ;;  %v1748_v10 = vld [vmem:[%s2524_s1] sm:$0xff]   ;;  %s2133_s21 = scalar_lea.vmem %s2526_s3, %s1489_s17  ;;  %vm1357_vm2 = vcmask 125952  }
   0xe   : > { %525 = vmatprep.subr.bf16.mxu0 %v1998_v1  ;;  %1714 = vmatprep.subr.bf16.mxu1 %v1998_v1  ;;  %v1752_v5 = vld [vmem:[%s2048_s27 + $0x4] ss:$8 sps:$4 sm:$0xff]   ;;  %v1750_v12 = vld [vmem:[%s2048_s27] ss:$8 sps:$4 sm:$0xff]   ;;  %v1756_v14 = vld [vmem:[%s2048_s27 + $0x14] ss:$8 sps:$4 sm:$0xff]   ;;  %s2429_s25 = scalar_lea.vmem %s2527_s4, %s1489_s17 }
   0xf   : > { %v1755_v6 = vld [vmem:[%s2048_s27 + $0x84] ss:$8 sps:$4 sm:$0xff]   ;;  %1534 = vmatprep.mubr.msk.bf16.mxu0 %vm474_vm0, %v1752_v5  ;;  %v1753_v13 = vld [vmem:[%s2048_s27 + $0x80] ss:$8 sps:$4 sm:$0xff]   ;;  %v1758_v15 = vld [vmem:[%s2048_s27 + $0x94] ss:$8 sps:$4 sm:$0xff]  }
  0x10   : > { %1542 = vmatprep.mubr.msk.bf16.mxu1 %vm474_vm0, %v1755_v6  ;;  %v1749_v11 = vld [vmem:[%s2524_s1 + $0x40] sm:$0xff]   ;;  %v1760_v16 = vld [vmem:[%s2048_s27 + $0x10] ss:$8 sps:$4 sm:$0xff]   ;;  %v1768_v22 = vld [vmem:[%s2048_s27 + $0x34] ss:$8 sps:$4 sm:$0xff]  }
  0x11   : > { %526 = vmatpush1.bf16.msra.mxu0 %v1742_v2  ;;  %1723 = vmatpush1.bf16.msra.mxu1 %v1742_v2  ;;  %v1761_v17 = vld [vmem:[%s2048_s27 + $0x90] ss:$8 sps:$4 sm:$0xff]   ;;  %v1762_v18 = vld [vmem:[%s2048_s27 + $0x24] ss:$8 sps:$4 sm:$0xff]   ;;  %v1766_v20 = vld [vmem:[%s2048_s27 + $0x20] ss:$8 sps:$4 sm:$0xff]  }
  0x12   : > { %527 = vmatprep.subr.bf16.mxu0 %v1998_v1  ;;  %1715 = vmatprep.subr.bf16.mxu1 %v1998_v1  ;;  %v1764_v19 = vld [vmem:[%s2048_s27 + $0xa4] ss:$8 sps:$4 sm:$0xff]   ;;  %v1767_v21 = vld [vmem:[%s2048_s27 + $0xa0] ss:$8 sps:$4 sm:$0xff]   ;;  %v1770_v23 = vld [vmem:[%s2048_s27 + $0xb4] ss:$8 sps:$4 sm:$0xff]  }
  0x13   : > { %v1772_v24 = vld [vmem:[%s2048_s27 + $0x30] ss:$8 sps:$4 sm:$0xff]   ;;  %v1774_v26 = vld [vmem:[%s2048_s27 + $0x44] ss:$8 sps:$4 sm:$0xff]   ;;  %v1778_v28 = vld [vmem:[%s2048_s27 + $0x40] ss:$8 sps:$4 sm:$0xff]  }
  0x14   : > { %v1773_v25 = vld [vmem:[%s2048_s27 + $0xb0] ss:$8 sps:$4 sm:$0xff]   ;;  %v1776_v27 = vld [vmem:[%s2048_s27 + $0xc4] ss:$8 sps:$4 sm:$0xff]   ;;  %v1779_v29 = vld [vmem:[%s2048_s27 + $0xc0] ss:$8 sps:$4 sm:$0xff]  }
  0x15   : > { %528 = vmatpush1.bf16.msra.mxu0 %v1743_v3  ;;  %1724 = vmatpush1.bf16.msra.mxu1 %v1743_v3  ;;  %v1780_v30 = vld [vmem:[%s2048_s27 + $0x54] ss:$8 sps:$4 sm:$0xff]   ;;  %v1784_v32 = vld [vmem:[%s2048_s27 + $0x50] ss:$8 sps:$4 sm:$0xff]   ;;  %v1786_v34 = vld [vmem:[%s2048_s27 + $0x64] ss:$8 sps:$4 sm:$0xff]  }
  0x16   : > { %529 = vmatprep.subr.bf16.mxu0 %v1998_v1  ;;  %1716 = vmatprep.subr.bf16.mxu1 %v1998_v1  ;;  %v1782_v31 = vld [vmem:[%s2048_s27 + $0xd4] ss:$8 sps:$4 sm:$0xff]   ;;  %v1785_v33 = vld [vmem:[%s2048_s27 + $0xd0] ss:$8 sps:$4 sm:$0xff]   ;;  %v1788_v35 = vld [vmem:[%s2048_s27 + $0xe4] ss:$8 sps:$4 sm:$0xff]  }
  0x17   : > { %v1790_v36 = vld [vmem:[%s2048_s27 + $0x60] ss:$8 sps:$4 sm:$0xff]   ;;  %v1792_v38 = vld [vmem:[%s2048_s27 + $0x74] ss:$8 sps:$4 sm:$0xff]   ;;  %v1796_v40 = vld [vmem:[%s2048_s27 + $0x70] ss:$8 sps:$4 sm:$0xff]  }
  0x18   : > { %v1791_v37 = vld [vmem:[%s2048_s27 + $0xe0] ss:$8 sps:$4 sm:$0xff]   ;;  %v1794_v39 = vld [vmem:[%s2048_s27 + $0xf4] ss:$8 sps:$4 sm:$0xff]   ;;  %v1797_v41 = vld [vmem:[%s2048_s27 + $0xf0] ss:$8 sps:$4 sm:$0xff]  }
  0x19   : > { %530 = vmatpush1.bf16.msra.mxu0 %v1744_v4  ;;  %1725 = vmatpush1.bf16.msra.mxu1 %v1744_v4  ;;  %v2119_v42 = vld [vmem:[%s2525_s2] ss:$0 sm:$0xff] }
  0x1a   : > { %531 = vmatprep.subr.bf16.mxu0 %v1998_v1  ;;  %1717 = vmatprep.subr.bf16.mxu1 %v1998_v1 }
  0x1d   : > { %532 = vmatpush1.bf16.msra.mxu0 %v1745_v7  ;;  %1726 = vmatpush1.bf16.msra.mxu1 %v1745_v7 }
  0x1e   : > { %533 = vmatprep.subr.bf16.mxu0 %v1998_v1  ;;  %1718 = vmatprep.subr.bf16.mxu1 %v1998_v1 }
  0x21   : > { %534 = vmatpush1.bf16.msra.mxu0 %v1746_v8  ;;  %1727 = vmatpush1.bf16.msra.mxu1 %v1746_v8 }
  0x22   : > { %535 = vmatprep.subr.bf16.mxu0 %v1998_v1  ;;  %1719 = vmatprep.subr.bf16.mxu1 %v1998_v1 }
  0x25   : > { %536 = vmatpush1.bf16.msra.mxu0 %v1747_v9  ;;  %1728 = vmatpush1.bf16.msra.mxu1 %v1747_v9 }
  0x26   : > { %537 = vmatprep.subr.bf16.mxu0 %v1998_v1  ;;  %1720 = vmatprep.subr.bf16.mxu1 %v1998_v1 }
  0x29   : > { %538 = vmatpush1.bf16.msra.mxu0 %v1748_v10  ;;  %1729 = vmatpush1.bf16.msra.mxu1 %v1748_v10 }
  0x2a   : > { %553 = vmatprep.subr.bf16.mxu0 %v1998_v1  ;;  %1721 = vmatprep.subr.bf16.mxu1 %v1998_v1 }
  0x2d   : > { %554 = vmatpush2.bf16.msra.mxu0 %v1749_v11  ;;  %1730 = vmatpush2.bf16.msra.mxu1 %v1749_v11 }
  0x30   : > { %556 = vmatmul.mubr.bf16.vlgmr.msra.gmra.mxu0 %v1750_v12  ;;  %620 = vmatmul.mubr.bf16.vlgmr.msra.gmra.mxu1 %v1753_v13 }
  0x31   : > { %1535 = vmatprep.mubr.msk.bf16.mxu0 %vm474_vm0, %v1756_v14  ;;  %1543 = vmatprep.mubr.msk.bf16.mxu1 %vm474_vm0, %v1758_v15 }
  0x38   : > { %564 = vmatmul.mubr.bf16.gmra.mxu0 %v1760_v16  ;;  %628 = vmatmul.mubr.bf16.gmra.mxu1 %v1761_v17 }
  0x39   : > { %1536 = vmatprep.mubr.msk.bf16.mxu0 %vm474_vm0, %v1762_v18  ;;  %1544 = vmatprep.mubr.msk.bf16.mxu1 %vm474_vm0, %v1764_v19 }
  0x40   : > { %572 = vmatmul.mubr.bf16.gmra.mxu0 %v1766_v20  ;;  %636 = vmatmul.mubr.bf16.gmra.mxu1 %v1767_v21 }
  0x41   : > { %1537 = vmatprep.mubr.msk.bf16.mxu0 %vm474_vm0, %v1768_v22  ;;  %1545 = vmatprep.mubr.msk.bf16.mxu1 %vm474_vm0, %v1770_v23 }
  0x48   : > { %580 = vmatmul.mubr.bf16.gmra.mxu0 %v1772_v24  ;;  %644 = vmatmul.mubr.bf16.gmra.mxu1 %v1773_v25 }
  0x49   : > { %1538 = vmatprep.mubr.msk.bf16.mxu0 %vm474_vm0, %v1774_v26  ;;  %1546 = vmatprep.mubr.msk.bf16.mxu1 %vm474_vm0, %v1776_v27 }
  0x50   : > { %588 = vmatmul.mubr.bf16.gmra.mxu0 %v1778_v28  ;;  %652 = vmatmul.mubr.bf16.gmra.mxu1 %v1779_v29 }
  0x51   : > { %1539 = vmatprep.mubr.msk.bf16.mxu0 %vm474_vm0, %v1780_v30  ;;  %1547 = vmatprep.mubr.msk.bf16.mxu1 %vm474_vm0, %v1782_v31 }
  0x58   : > { %596 = vmatmul.mubr.bf16.gmra.mxu0 %v1784_v32  ;;  %660 = vmatmul.mubr.bf16.gmra.mxu1 %v1785_v33 }
  0x59   : > { %1540 = vmatprep.mubr.msk.bf16.mxu0 %vm474_vm0, %v1786_v34  ;;  %1548 = vmatprep.mubr.msk.bf16.mxu1 %vm474_vm0, %v1788_v35 }
  0x60   : > { %604 = vmatmul.mubr.bf16.gmra.mxu0 %v1790_v36  ;;  %668 = vmatmul.mubr.bf16.gmra.mxu1 %v1791_v37 }
  0x61   : > { %1541 = vmatprep.mubr.msk.bf16.mxu0 %vm474_vm0, %v1792_v38  ;;  %1549 = vmatprep.mubr.msk.bf16.mxu1 %vm474_vm0, %v1794_v39 }
  0x68   : > { %612 = vmatmul.mubr.bf16.gmra.mxu0 %v1796_v40  ;;  %676 = vmatmul.mubr.bf16.gmra.mxu1 %v1797_v41 }
  0xf0   : > { %v557_v43 = vpop.f32.mrf.mxu0  ;;  %v621_v44 = vpop.f32.mrf.mxu1 }
  0xf1   : > { %v2123_v45 = vadd.f32 %v2119_v42, %v557_v43  ;;  %v2126_v46 = vadd.f32 %v2119_v42, %v621_v44 }
  0xf2   : > { %v559_v47 = vpop.f32.mrf.mxu0  ;;  %v623_v48 = vpop.f32.mrf.mxu1 }
  0xf3   : > { %v1649_v49 = vpack.c.bf16 %v2123_v45, %v2123_v45  ;;  %v1582_v50 = vmul.f32 -1.442695, %v2123_v45  ;;  %v1665_v51 = vpack.c.bf16 %v2126_v46, %v2126_v46  ;;  %v1598_v52 = vmul.f32 -1.442695, %v2126_v46 }
  0xf4   : > { %v560_v53 = vpop.f32.mrf.mxu0  ;;  %v624_v54 = vpop.f32.mrf.mxu1 }
  0xf5   : > { %813 = vst.msk [vmem:[%s2133_s21] sm:$0xf] %vm812_vm1, %v1649_v49  ;;  %1798 = vpow2.f32 %v1582_v50  ;;  %829 = vst.msk [vmem:[%s2133_s21 + $0x40] sm:$0xf] %vm812_vm1, %v1665_v51  ;;  %v2146_v55 = vadd.f32 %v2119_v42, %v560_v53  ;;  %v2149_v56 = vadd.f32 %v2119_v42, %v624_v54 }
  0xf6   : > { %1800 = vpow2.f32 %v1598_v52  ;;  %v562_v57 = vpop.f32.mrf.mxu0  ;;  %v626_v58 = vpop.f32.mrf.mxu1 }
  0xf7   : > { %v1650_v59 = vpack.c.bf16 %v2146_v55, %v2146_v55  ;;  %v1583_v60 = vmul.f32 -1.442695, %v2146_v55  ;;  %v1666_v61 = vpack.c.bf16 %v2149_v56, %v2149_v56  ;;  %v1599_v62 = vmul.f32 -1.442695, %v2149_v56 }
  0xf8   : > { %v565_v63 = vpop.f32.mrf.mxu0  ;;  %v629_v0 = vpop.f32.mrf.mxu1 }
  0xf9   : > { %814 = vst.msk [vmem:[%s2133_s21 + $0x4] sm:$0xf] %vm812_vm1, %v1650_v59  ;;  %1802 = vpow2.f32 %v1583_v60  ;;  %830 = vst.msk [vmem:[%s2133_s21 + $0x44] sm:$0xf] %vm812_vm1, %v1666_v61  ;;  %v2162_v1 = vadd.f32 %v2119_v42, %v565_v63  ;;  %v2165_v2 = vadd.f32 %v2119_v42, %v629_v0 }
  0xfa   : > { %1804 = vpow2.f32 %v1599_v62  ;;  %v567_v3 = vpop.f32.mrf.mxu0  ;;  %v631_v4 = vpop.f32.mrf.mxu1 }
  0xfb   : > { %v1651_v5 = vpack.c.bf16 %v2162_v1, %v2162_v1  ;;  %v1584_v6 = vmul.f32 -1.442695, %v2162_v1  ;;  %v1667_v7 = vpack.c.bf16 %v2165_v2, %v2165_v2  ;;  %v1600_v8 = vmul.f32 -1.442695, %v2165_v2 }
  0xfc   : > { %v568_v9 = vpop.f32.mrf.mxu0  ;;  %v632_v10 = vpop.f32.mrf.mxu1 }
  0xfd   : > { %815 = vst.msk [vmem:[%s2133_s21 + $0x8] sm:$0xf] %vm812_vm1, %v1651_v5  ;;  %1806 = vpow2.f32 %v1584_v6  ;;  %831 = vst.msk [vmem:[%s2133_s21 + $0x48] sm:$0xf] %vm812_vm1, %v1667_v7  ;;  %v2178_v11 = vadd.f32 %v2119_v42, %v568_v9  ;;  %v2181_v12 = vadd.f32 %v2119_v42, %v632_v10 }
  0xfe   : > { %1808 = vpow2.f32 %v1600_v8  ;;  %v570_v13 = vpop.f32.mrf.mxu0  ;;  %v634_v14 = vpop.f32.mrf.mxu1 }
  0xff   : > { %v1652_v15 = vpack.c.bf16 %v2178_v11, %v2178_v11  ;;  %v1585_v16 = vmul.f32 -1.442695, %v2178_v11  ;;  %v1668_v17 = vpack.c.bf16 %v2181_v12, %v2181_v12  ;;  %v1601_v18 = vmul.f32 -1.442695, %v2181_v12 }
 0x100   : > { %v573_v19 = vpop.f32.mrf.mxu0  ;;  %v637_v20 = vpop.f32.mrf.mxu1 }
 0x101   : > { %816 = vst.msk [vmem:[%s2133_s21 + $0xc] sm:$0xf] %vm812_vm1, %v1652_v15  ;;  %1810 = vpow2.f32 %v1585_v16  ;;  %832 = vst.msk [vmem:[%s2133_s21 + $0x4c] sm:$0xf] %vm812_vm1, %v1668_v17  ;;  %v2194_v21 = vadd.f32 %v2119_v42, %v573_v19  ;;  %v2197_v22 = vadd.f32 %v2119_v42, %v637_v20 }
 0x102   : > { %v1799_v23 = vpop.eup %1798  ;;  %1812 = vpow2.f32 %v1601_v18  ;;  %v575_v24 = vpop.f32.mrf.mxu0 }
 0x103   : > { %v639_v25 = vpop.f32.mrf.mxu1  ;;  %v1801_v26 = vpop.eup %1800  ;;  %v973_v27 = vadd.f32 1.0, %v1799_v23  ;;  %v1653_v28 = vpack.c.bf16 %v2194_v21, %v2194_v21  ;;  %v1586_v29 = vmul.f32 -1.442695, %v2194_v21  ;;  %v1669_v30 = vpack.c.bf16 %v2197_v22, %v2197_v22 }
 0x104   : > { %v1602_v31 = vmul.f32 -1.442695, %v2197_v22  ;;  %v576_v32 = vpop.f32.mrf.mxu0  ;;  %v989_v34 = vadd.f32 1.0, %v1801_v26 }
 0x105   : > { %v640_v33 = vpop.f32.mrf.mxu1  ;;  %1814 = vrcp.f32 %v973_v27  ;;  %817 = vst.msk [vmem:[%s2133_s21 + $0x10] sm:$0xf] %vm812_vm1, %v1653_v28  ;;  %v2208_v35 = vadd.f32 %v2119_v42, %v576_v32  ;;  %833 = vst.msk [vmem:[%s2133_s21 + $0x50] sm:$0xf] %vm812_vm1, %v1669_v30 }
 0x106   : > { %v2211_v36 = vadd.f32 %v2119_v42, %v640_v33  ;;  %v1803_v37 = vpop.eup %1802  ;;  %v578_v38 = vpop.f32.mrf.mxu0  ;;  %1816 = vpow2.f32 %v1586_v29 }
 0x107   : > { %v642_v39 = vpop.f32.mrf.mxu1  ;;  %v1805_v40 = vpop.eup %1804  ;;  %v974_v41 = vadd.f32 1.0, %v1803_v37  ;;  %v1654_v43 = vpack.c.bf16 %v2208_v35, %v2208_v35  ;;  %1818 = vpow2.f32 %v1602_v31  ;;  %v1587_v47 = vmul.f32 -1.442695, %v2208_v35 }
 0x108   : > { %v990_v44 = vadd.f32 1.0, %v1805_v40  ;;  %v1670_v48 = vpack.c.bf16 %v2211_v36, %v2211_v36  ;;  %v581_v49 = vpop.f32.mrf.mxu0  ;;  %1820 = vrcp.f32 %v989_v34  ;;  %v1603_v62 = vmul.f32 -1.442695, %v2211_v36 }
 0x109   : > { %v645_v50 = vpop.f32.mrf.mxu1  ;;  %818 = vst.msk [vmem:[%s2133_s21 + $0x14] sm:$0xf] %vm812_vm1, %v1654_v43  ;;  %v2223_v51 = vadd.f32 %v2119_v42, %v581_v49 }
 0x10a   : > { %v2226_v52 = vadd.f32 %v2119_v42, %v645_v50  ;;  %v1807_v53 = vpop.eup %1806  ;;  %1822 = vrcp.f32 %v990_v44  ;;  %834 = vst.msk [vmem:[%s2133_s21 + $0x54] sm:$0xf] %vm812_vm1, %v1670_v48  ;;  %v583_v54 = vpop.f32.mrf.mxu0 }
 0x10b   : > { %v647_v57 = vpop.f32.mrf.mxu1  ;;  %v1809_v58 = vpop.eup %1808  ;;  %1824 = vrcp.f32 %v974_v41  ;;  %v975_v59 = vadd.f32 1.0, %v1807_v53  ;;  %v1655_v60 = vpack.c.bf16 %v2223_v51, %v2223_v51  ;;  %v1588_v14 = vmul.f32 -1.442695, %v2223_v51 }
 0x10c   : > { %v991_v61 = vadd.f32 1.0, %v1809_v58  ;;  %1826 = vpow2.f32 %v1587_v47  ;;  %v1671_v63 = vpack.c.bf16 %v2226_v52, %v2226_v52  ;;  %v584_v0 = vpop.f32.mrf.mxu0  ;;  %v1604_v24 = vmul.f32 -1.442695, %v2226_v52 }
 0x10d   : > { %v648_v3 = vpop.f32.mrf.mxu1  ;;  %1828 = vrcp.f32 %v975_v59  ;;  %819 = vst.msk [vmem:[%s2133_s21 + $0x18] sm:$0xf] %vm812_vm1, %v1655_v60  ;;  %v2238_v4 = vadd.f32 %v2119_v42, %v584_v0 }
 0x10e   : > { %v2241_v5 = vadd.f32 %v2119_v42, %v648_v3  ;;  %v1811_v6 = vpop.eup %1810  ;;  %835 = vst.msk [vmem:[%s2133_s21 + $0x58] sm:$0xf] %vm812_vm1, %v1671_v63  ;;  %v586_v7 = vpop.f32.mrf.mxu0  ;;  %1830 = vrcp.f32 %v991_v61 }
 0x10f   : > { %v650_v8 = vpop.f32.mrf.mxu1  ;;  %v1813_v9 = vpop.eup %1812  ;;  %v976_v10 = vadd.f32 1.0, %v1811_v6  ;;  %v1656_v13 = vpack.c.bf16 %v2238_v4, %v2238_v4  ;;  %1832 = vpow2.f32 %v1603_v62  ;;  %v1589_v40 = vmul.f32 -1.442695, %v2238_v4 }
 0x110   : > { %v1672_v15 = vpack.c.bf16 %v2241_v5, %v2241_v5  ;;  %v589_v16 = vpop.f32.mrf.mxu0  ;;  %v992_v18 = vadd.f32 1.0, %v1813_v9  ;;  %v1605_v57 = vmul.f32 -1.442695, %v2241_v5 }
 0x111   : > { %v653_v17 = vpop.f32.mrf.mxu1  ;;  %1834 = vrcp.f32 %v976_v10  ;;  %820 = vst.msk [vmem:[%s2133_s21 + $0x1c] sm:$0xf] %vm812_vm1, %v1656_v13  ;;  %v2253_v19 = vadd.f32 %v2119_v42, %v589_v16 }
 0x112   : > { %v2256_v20 = vadd.f32 %v2119_v42, %v653_v17  ;;  %v1815_v23 = vpop.eup %1814  ;;  %836 = vst.msk [vmem:[%s2133_s21 + $0x5c] sm:$0xf] %vm812_vm1, %v1672_v15  ;;  %v591_v25 = vpop.f32.mrf.mxu0  ;;  %1836 = vpow2.f32 %v1588_v14 }
 0x113   : > { %v655_v26 = vpop.f32.mrf.mxu1  ;;  %v1657_v27 = vpack.c.bf16 %v2253_v19, %v2253_v19  ;;  %1101 = vrot.lane.b32.xlu0 %v1815_v23, %s1999_s22  ;;  %v1817_v29 = vpop.eup %1816  ;;  %1838 = vrcp.f32 %v992_v18  ;;  %v1590_v0 = vmul.f32 -1.442695, %v2253_v19 }
 0x114   : > { %v1673_v28 = vpack.c.bf16 %v2256_v20, %v2256_v20  ;;  %v592_v30 = vpop.f32.mrf.mxu0  ;;  %v1819_v32 = vpop.eup %1818  ;;  %v977_v33 = vadd.f32 1.0, %v1817_v29  ;;  %1840 = vpow2.f32 %v1604_v24  ;;  %v1606_v17 = vmul.f32 -1.442695, %v2256_v20 }
 0x115   : > { %v656_v31 = vpop.f32.mrf.mxu1  ;;  %821 = vst.msk [vmem:[%s2133_s21 + $0x20] sm:$0xf] %vm812_vm1, %v1657_v27  ;;  %v2271_v34 = vadd.f32 %v2119_v42, %v592_v30  ;;  %v1821_v38 = vpop.eup %1820  ;;  %v993_v39 = vadd.f32 1.0, %v1819_v32 }
 0x116   : > { %837 = vst.msk [vmem:[%s2133_s21 + $0x60] sm:$0xf] %vm812_vm1, %v1673_v28  ;;  %v2274_v37 = vadd.f32 %v2119_v42, %v656_v31  ;;  %v594_v41 = vpop.f32.mrf.mxu0  ;;  %1842 = vrcp.f32 %v977_v33 }
 0x117   : > { %v658_v43 = vpop.f32.mrf.mxu1  ;;  %v1823_v44 = vpop.eup %1822  ;;  %v1658_v47 = vpack.c.bf16 %v2271_v34, %v2271_v34  ;;  %1133 = vrot.lane.b32.xlu0 %v1821_v38, %s1999_s22  ;;  %1844 = vrcp.f32 %v993_v39  ;;  %v1591_v29 = vmul.f32 -1.442695, %v2271_v34 }
 0x118   : > { %v1674_v48 = vpack.c.bf16 %v2274_v37, %v2274_v37  ;;  %v1825_v49 = vpop.eup %1824  ;;  %1135 = vrot.lane.b32.xlu1 %v1823_v44, %s1999_s22  ;;  %v597_v50 = vpop.f32.mrf.mxu0  ;;  %1846 = vpow2.f32 %v1589_v40 }
 0x119   : > { %v661_v53 = vpop.f32.mrf.mxu1  ;;  %v1827_v54 = vpop.eup %1826  ;;  %822 = vst.msk [vmem:[%s2133_s21 + $0x24] sm:$0xf] %vm812_vm1, %v1658_v47  ;;  %v2289_v58 = vadd.f32 %v2119_v42, %v597_v50 }
 0x11a   : > { %838 = vst.msk [vmem:[%s2133_s21 + $0x64] sm:$0xf] %vm812_vm1, %v1674_v48  ;;  %v2292_v59 = vadd.f32 %v2119_v42, %v661_v53  ;;  %v1829_v60 = vpop.eup %1828  ;;  %v978_v61 = vadd.f32 1.0, %v1827_v54  ;;  %v599_v62 = vpop.f32.mrf.mxu0  ;;  %v1607_v48 = vmul.f32 -1.442695, %v2274_v37 }
 0x11b   : > { %v663_v63 = vpop.f32.mrf.mxu1  ;;  %v1659_v3 = vpack.c.bf16 %v2289_v58, %v2289_v58  ;;  %1103 = vrot.lane.b32.xlu0 %v1825_v49, %s1999_s22  ;;  %v1831_v7 = vpop.eup %1830 }
 0x11c   : > { %v1675_v6 = vpack.c.bf16 %v2292_v59, %v2292_v59  ;;  %1848 = vrcp.f32 %v978_v61  ;;  %1105 = vrot.lane.b32.xlu1 %v1829_v60, %s1999_s22  ;;  %v600_v8 = vpop.f32.mrf.mxu0  ;;  %v1833_v10 = vpop.eup %1832  ;;  %v1592_v63 = vmul.f32 -1.442695, %v2289_v58 }
 0x11d   : > { %v664_v9 = vpop.f32.mrf.mxu1  ;;  %1850 = vpow2.f32 %v1605_v57  ;;  %823 = vst.msk [vmem:[%s2133_s21 + $0x28] sm:$0xf] %vm812_vm1, %v1659_v3  ;;  %v2306_v13 = vadd.f32 %v2119_v42, %v600_v8  ;;  %v994_v16 = vadd.f32 1.0, %v1833_v10 }
 0x11e   : > { %839 = vst.msk [vmem:[%s2133_s21 + $0x68] sm:$0xf] %vm812_vm1, %v1675_v6  ;;  %v2309_v14 = vadd.f32 %v2119_v42, %v664_v9  ;;  %v1835_v15 = vpop.eup %1834  ;;  %v602_v18 = vpop.f32.mrf.mxu0  ;;  %1852 = vpow2.f32 %v1590_v0 }
 0x11f   : > { %v666_v23 = vpop.f32.mrf.mxu1  ;;  %v1660_v24 = vpack.c.bf16 %v2306_v13, %v2306_v13  ;;  %1137 = vrot.lane.b32.xlu0 %v1831_v7, %s1999_s22  ;;  %1854 = vrcp.f32 %v994_v16  ;;  %v1837_v28 = vpop.eup %1836 }
 0x120   : > { %v1676_v25 = vpack.c.bf16 %v2309_v14, %v2309_v14  ;;  %1107 = vrot.lane.b32.xlu1 %v1835_v15, %s1999_s22  ;;  %v605_v26 = vpop.f32.mrf.mxu0  ;;  %v1839_v32 = vpop.eup %1838  ;;  %v979_v33 = vadd.f32 1.0, %v1837_v28  ;;  %1856 = vpow2.f32 %v1606_v17  ;;  %v1608_v17 = vmul.f32 -1.442695, %v2292_v59 }
 0x121   : > { %v669_v27 = vpop.f32.mrf.mxu1  ;;  %824 = vst.msk [vmem:[%s2133_s21 + $0x2c] sm:$0xf] %vm812_vm1, %v1660_v24  ;;  %v2324_v30 = vadd.f32 %v2119_v42, %v605_v26  ;;  %v1841_v40 = vpop.eup %1840 }
 0x122   : > { %840 = vst.msk [vmem:[%s2133_s21 + $0x6c] sm:$0xf] %vm812_vm1, %v1676_v25  ;;  %v2327_v31 = vadd.f32 %v2119_v42, %v669_v27  ;;  %v607_v38 = vpop.f32.mrf.mxu0  ;;  %1858 = vrcp.f32 %v979_v33  ;;  %v995_v47 = vadd.f32 1.0, %v1841_v40  ;;  %v1593_v27 = vmul.f32 -1.442695, %v2306_v13 }
 0x123   : > { %v671_v39 = vpop.f32.mrf.mxu1  ;;  %v1661_v41 = vpack.c.bf16 %v2324_v30, %v2324_v30  ;;  %v1843_v44 = vpop.eup %1842  ;;  %1860 = vpow2.f32 %v1591_v29 }
 0x124   : > { %v1677_v43 = vpack.c.bf16 %v2327_v31, %v2327_v31  ;;  %1139 = vrot.lane.b32.xlu1 %v1839_v32, %s1999_s22  ;;  %v608_v49 = vpop.f32.mrf.mxu0  ;;  %1109 = vrot.lane.b32.xlu0 %v1843_v44, %s1999_s22  ;;  %v1845_v57 = vpop.eup %1844  ;;  %1862 = vrcp.f32 %v995_v47 }
 0x125   : > { %v672_v50 = vpop.f32.mrf.mxu1  ;;  %825 = vst.msk [vmem:[%s2133_s21 + $0x30] sm:$0xf] %vm812_vm1, %v1661_v41  ;;  %v2341_v53 = vadd.f32 %v2119_v42, %v608_v49  ;;  %v1847_v62 = vpop.eup %1846  ;;  %1864 = vpow2.f32 %v1607_v48 }
 0x126   : > { %841 = vst.msk [vmem:[%s2133_s21 + $0x70] sm:$0xf] %vm812_vm1, %v1677_v43  ;;  %v2344_v54 = vadd.f32 %v2119_v42, %v672_v50  ;;  %v610_v60 = vpop.f32.mrf.mxu0  ;;  %v980_v6 = vadd.f32 1.0, %v1847_v62  ;;  %v1609_v50 = vmul.f32 -1.442695, %v2309_v14 }
 0x127   : > { %v674_v61 = vpop.f32.mrf.mxu1  ;;  %v1662_v0 = vpack.c.bf16 %v2341_v53, %v2341_v53  ;;  %v1594_v62 = vmul.f32 -1.442695, %v2324_v30 }
 0x128   : > { %v1678_v3 = vpack.c.bf16 %v2344_v54, %v2344_v54  ;;  %v613_v7 = vpop.f32.mrf.mxu0  ;;  %1141 = vrot.lane.b32.xlu0 %v1845_v57, %s1999_s22  ;;  %1866 = vrcp.f32 %v980_v6 }
 0x129   : > { %v677_v8 = vpop.f32.mrf.mxu1  ;;  %v1849_v9 = vpop.eup %1848  ;;  %826 = vst.msk [vmem:[%s2133_s21 + $0x34] sm:$0xf] %vm812_vm1, %v1662_v0  ;;  %v2357_v10 = vadd.f32 %v2119_v42, %v613_v7  ;;  %1868 = vpow2.f32 %v1592_v63 }
 0x12a   : > { %842 = vst.msk [vmem:[%s2133_s21 + $0x74] sm:$0xf] %vm812_vm1, %v1678_v3  ;;  %v2360_v15 = vadd.f32 %v2119_v42, %v677_v8  ;;  %v1851_v16 = vpop.eup %1850  ;;  %1111 = vrot.lane.b32.xlu1 %v1849_v9, %s1999_s22  ;;  %v615_v18 = vpop.f32.mrf.mxu0  ;;  %v1610_v3 = vmul.f32 -1.442695, %v2327_v31  ;;  %v1595_v9 = vmul.f32 -1.442695, %v2341_v53 }
 0x12b   : > { %v679_v23 = vpop.f32.mrf.mxu1  ;;  %v996_v24 = vadd.f32 1.0, %v1851_v16  ;;  %v1663_v25 = vpack.c.bf16 %v2357_v10, %v2357_v10  ;;  %v1853_v26 = vpop.eup %1852 }
 0x12c   : > { %v1679_v28 = vpack.c.bf16 %v2360_v15, %v2360_v15  ;;  %v616_v29 = vpop.f32.mrf.mxu0  ;;  %v1855_v33 = vpop.eup %1854  ;;  %v981_v38 = vadd.f32 1.0, %v1853_v26 }
 0x12d   : > { %v680_v32 = vpop.f32.mrf.mxu1  ;;  %1870 = vrcp.f32 %v996_v24  ;;  %827 = vst.msk [vmem:[%s2133_s21 + $0x38] sm:$0xf] %vm812_vm1, %v1663_v25  ;;  %v2372_v39 = vadd.f32 %v2119_v42, %v616_v29  ;;  %v1857_v44 = vpop.eup %1856  ;;  %v1611_v24 = vmul.f32 -1.442695, %v2344_v54 }
 0x12e   : > { %v2375_v40 = vadd.f32 %v2119_v42, %v680_v32  ;;  %1872 = vpow2.f32 %v1608_v17  ;;  %843 = vst.msk [vmem:[%s2133_s21 + $0x78] sm:$0xf] %vm812_vm1, %v1679_v28  ;;  %1143 = vrot.lane.b32.xlu1 %v1855_v33, %s1999_s22  ;;  %v618_v41 = vpop.f32.mrf.mxu0  ;;  %v997_v49 = vadd.f32 1.0, %v1857_v44  ;;  %v1596_v28 = vmul.f32 -1.442695, %v2357_v10 }
 0x12f   : > { %v682_v43 = vpop.f32.mrf.mxu1  ;;  %1874 = vrcp.f32 %v981_v38  ;;  %v1664_v47 = vpack.c.bf16 %v2372_v39, %v2372_v39  ;;  %v1859_v42 = vpop.eup %1858  ;;  %v1612_v38 = vmul.f32 -1.442695, %v2360_v15  ;;  %v1597_v44 = vmul.f32 -1.442695, %v2372_v39 }
 0x130   : > { %v1680_v48 = vpack.c.bf16 %v2375_v40, %v2375_v40  ;;  %1876 = vpow2.f32 %v1593_v27  ;;  %v1861_v57 = vpop.eup %1860  ;;  %1113 = vrot.lane.b32.xlu0 %v1859_v42, %s1999_s22  ;;  %v1613_v42 = vmul.f32 -1.442695, %v2375_v40 }
 0x131   : > { %828 = vst.msk [vmem:[%s2133_s21 + $0x3c] sm:$0xf] %vm812_vm1, %v1664_v47  ;;  %1878 = vrcp.f32 %v997_v49  ;;  %v1863_v60 = vpop.eup %1862  ;;  %v982_v61 = vadd.f32 1.0, %v1861_v57 }
 0x132   : > { %844 = vst.msk [vmem:[%s2133_s21 + $0x7c] sm:$0xf] %vm812_vm1, %v1680_v48  ;;  %1880 = vpow2.f32 %v1609_v50  ;;  %v1865_v63 = vpop.eup %1864 }
 0x133   : > { %1882 = vrcp.f32 %v982_v61  ;;  %v998_v0 = vadd.f32 1.0, %v1865_v63 }
 0x134   : > { %1145 = vrot.lane.b32.xlu0 %v1863_v60, %s1999_s22  ;;  %1884 = vpow2.f32 %v1594_v62 }
 0x135   : > { %v1867_v6 = vpop.eup %1866  ;;  %1886 = vrcp.f32 %v998_v0 }
 0x136   : > { %v1869_v7 = vpop.eup %1868  ;;  %1115 = vrot.lane.b32.xlu1 %v1867_v6, %s1999_s22  ;;  %1888 = vpow2.f32 %v1610_v3 }
 0x137   : > { %v983_v8 = vadd.f32 1.0, %v1869_v7 }
 0x139   : > { %1890 = vrcp.f32 %v983_v8 }
 0x13a   : > { %v1871_v16 = vpop.eup %1870  ;;  %1892 = vpow2.f32 %v1595_v9 }
 0x13b   : > { %v1873_v17 = vpop.eup %1872  ;;  %1147 = vrot.lane.b32.xlu1 %v1871_v16, %s1999_s22 }
 0x13c   : > { %v1875_v18 = vpop.eup %1874  ;;  %v999_v23 = vadd.f32 1.0, %v1873_v17 }
 0x13d   : > { %1117 = vrot.lane.b32.xlu0 %v1875_v18, %s1999_s22  ;;  %v1877_v25 = vpop.eup %1876 }
 0x13e   : > { %1894 = vrcp.f32 %v999_v23  ;;  %v1879_v26 = vpop.eup %1878  ;;  %v984_v27 = vadd.f32 1.0, %v1877_v25 }
 0x13f   : > { %1896 = vpow2.f32 %v1611_v24  ;;  %v1881_v29 = vpop.eup %1880 }
 0x140   : > { %1898 = vrcp.f32 %v984_v27  ;;  %v1883_v32 = vpop.eup %1882  ;;  %v1000_v33 = vadd.f32 1.0, %v1881_v29 }
 0x141   : > { %1149 = vrot.lane.b32.xlu0 %v1879_v26, %s1999_s22  ;;  %1900 = vpow2.f32 %v1596_v28  ;;  %1119 = vrot.lane.b32.xlu1 %v1883_v32, %s1999_s22  ;;  %v1885_v41 = vpop.eup %1884 }
 0x142   : > { %1902 = vrcp.f32 %v1000_v33  ;;  %v985_v43 = vadd.f32 1.0, %v1885_v41  ;;  %v1887_v47 = vpop.eup %1886 }
 0x143   : > { %1904 = vpow2.f32 %v1612_v38  ;;  %v1889_v48 = vpop.eup %1888 }
 0x144   : > { %1906 = vrcp.f32 %v985_v43  ;;  %v1001_v50 = vadd.f32 1.0, %v1889_v48 }
 0x145   : > { %1151 = vrot.lane.b32.xlu1 %v1887_v47, %s1999_s22  ;;  %1908 = vpow2.f32 %v1597_v44 }
 0x146   : > { %v1891_v49 = vpop.eup %1890  ;;  %1910 = vrcp.f32 %v1001_v50 }
 0x147   : > { %1121 = vrot.lane.b32.xlu0 %v1891_v49, %s1999_s22  ;;  %v1893_v57 = vpop.eup %1892  ;;  %1912 = vpow2.f32 %v1613_v42 }
 0x148   : > { %v986_v61 = vadd.f32 1.0, %v1893_v57 }
 0x14a   : > { %1914 = vrcp.f32 %v986_v61 }
 0x14b   : > { %v1895_v60 = vpop.eup %1894 }
 0x14c   : > { %v1897_v62 = vpop.eup %1896  ;;  %1153 = vrot.lane.b32.xlu0 %v1895_v60, %s1999_s22 }
 0x14d   : > { %v1899_v63 = vpop.eup %1898  ;;  %v1002_v0 = vadd.f32 1.0, %v1897_v62 }
 0x14e   : > { %1123 = vrot.lane.b32.xlu1 %v1899_v63, %s1999_s22  ;;  %v1901_v3 = vpop.eup %1900 }
 0x14f   : > { %1916 = vrcp.f32 %v1002_v0  ;;  %v987_v6 = vadd.f32 1.0, %v1901_v3  ;;  %v1903_v7 = vpop.eup %1902 }
 0x150   : > { %v1905_v8 = vpop.eup %1904 }
 0x151   : > { %1918 = vrcp.f32 %v987_v6  ;;  %v1907_v9 = vpop.eup %1906  ;;  %v1003_v16 = vadd.f32 1.0, %v1905_v8 }
 0x152   : > { %1155 = vrot.lane.b32.xlu1 %v1903_v7, %s1999_s22  ;;  %1125 = vrot.lane.b32.xlu0 %v1907_v9, %s1999_s22  ;;  %v1909_v17 = vpop.eup %1908 }
 0x153   : > { %1920 = vrcp.f32 %v1003_v16  ;;  %v1911_v18 = vpop.eup %1910  ;;  %v988_v23 = vadd.f32 1.0, %v1909_v17 }
 0x154   : > { %v1913_v24 = vpop.eup %1912 }
 0x155   : > { %1922 = vrcp.f32 %v988_v23  ;;  %v1004_v26 = vadd.f32 1.0, %v1913_v24 }
 0x156   : > { %1157 = vrot.lane.b32.xlu0 %v1911_v18, %s1999_s22 }
 0x157   : > { %v1915_v25 = vpop.eup %1914  ;;  %1924 = vrcp.f32 %v1004_v26 }
 0x158   : > { %1127 = vrot.lane.b32.xlu1 %v1915_v25, %s1999_s22  ;;  %1926 = vtanh.f32 %v2123_v45 }
 0x159   : > { %1928 = vtanh.f32 %v2126_v46 }
 0x15a   : > { %1930 = vtanh.f32 %v2149_v56 }
 0x15b   : > { %1932 = vtanh.f32 %v2146_v55 }
 0x15c   : > { %v1917_v27 = vpop.eup %1916  ;;  %1934 = vtanh.f32 %v2162_v1 }
 0x15d   : > { %1159 = vrot.lane.b32.xlu1 %v1917_v27, %s1999_s22  ;;  %1936 = vtanh.f32 %v2165_v2 }
 0x15e   : > { %v1919_v28 = vpop.eup %1918  ;;  %1938 = vtanh.f32 %v2178_v11 }
 0x15f   : > { %1129 = vrot.lane.b32.xlu0 %v1919_v28, %s1999_s22  ;;  %1940 = vtanh.f32 %v2181_v12 }
 0x160   : > { %v1921_v29 = vpop.eup %1920  ;;  %1942 = vtanh.f32 %v2194_v21 }
 0x161   : > { %1944 = vtanh.f32 %v2197_v22 }
 0x162   : > { %v1923_v32 = vpop.eup %1922  ;;  %1946 = vtanh.f32 %v2208_v35 }
 0x163   : > { %1161 = vrot.lane.b32.xlu0 %v1921_v29, %s1999_s22  ;;  %1131 = vrot.lane.b32.xlu1 %v1923_v32, %s1999_s22  ;;  %1948 = vtanh.f32 %v2211_v36 }
 0x164   : > { %v1925_v33 = vpop.eup %1924  ;;  %1950 = vtanh.f32 %v2223_v51 }
 0x165   : > { %v1927_v38 = vpop.eup %1926  ;;  %1952 = vtanh.f32 %v2226_v52 }
 0x166   : > { %v1929_v46 = vpop.eup %1928  ;;  %1954 = vtanh.f32 %v2238_v4 }
 0x167   : > { %1163 = vrot.lane.b32.xlu1 %v1925_v33, %s1999_s22  ;;  %v1931_v56 = vpop.eup %1930  ;;  %1956 = vtanh.f32 %v2241_v5 }
 0x168   : > { %v1933_v47 = vpop.eup %1932  ;;  %1958 = vtanh.f32 %v2253_v19 }
 0x169   : > { %v1935_v50 = vpop.eup %1934  ;;  %1960 = vtanh.f32 %v2256_v20 }
 0x16a   : > { %v1937_v60 = vpop.eup %1936  ;;  %1962 = vtanh.f32 %v2271_v34 }
 0x16b   : > { %v1939_v63 = vpop.eup %1938  ;;  %1964 = vtanh.f32 %v2274_v37 }
 0x16c   : > { %v1941_v7 = vpop.eup %1940  ;;  %1966 = vtanh.f32 %v2289_v58 }
 0x16d   : > { %v1943_v9 = vpop.eup %1942  ;;  %1968 = vtanh.f32 %v2292_v59 }
 0x16e   : > { %v1945_v24 = vpop.eup %1944  ;;  %1970 = vtanh.f32 %v2306_v13 }
 0x16f   : > { %v1947_v26 = vpop.eup %1946  ;;  %1972 = vtanh.f32 %v2309_v14 }
 0x170   : > { %v1949_v33 = vpop.eup %1948  ;;  %1974 = vtanh.f32 %v2324_v30 }
 0x171   : > { %1976 = vtanh.f32 %v2327_v31 }
 0x172   : > { %1978 = vtanh.f32 %v2341_v53 }
 0x173   : > { %1980 = vtanh.f32 %v2344_v54 }
 0x185   : > { %v1102_v41 = vpop.permute.xlu0 %1101 }
 0x186   : > { %v1197_v43 = vmul.f32 %v1927_v38, %v1102_v41 }
 0x188   : > { %v1681_v45 = vpack.c.bf16 %v1197_v43, %v1197_v43  ;;  %v1951_v43 = vpop.eup %1950  ;;  %1982 = vtanh.f32 %v2357_v10 }
 0x189   : > { %v1134_v55 = vpop.permute.xlu0 %1133 }
 0x18a   : > { %1358 = vst.msk [vmem:[%s2429_s25] sm:$0xf] %vm1357_vm2, %v1681_v45  ;;  %v1136_v1 = vpop.permute.xlu1 %1135  ;;  %v1213_v2 = vmul.f32 %v1929_v46, %v1134_v55  ;;  %v1953_v55 = vpop.eup %1952  ;;  %1984 = vtanh.f32 %v2360_v15 }
 0x18b   : > { %v1214_v11 = vmul.f32 %v1931_v56, %v1136_v1  ;;  %v1955_v1 = vpop.eup %1954  ;;  %1986 = vtanh.f32 %v2372_v39 }
 0x18c   : > { %v1697_v44 = vpack.c.bf16 %v1213_v2, %v1213_v2  ;;  %v1957_v20 = vpop.eup %1956  ;;  %1988 = vtanh.f32 %v2375_v40 }
 0x18d   : > { %v1698_v48 = vpack.c.bf16 %v1214_v11, %v1214_v11  ;;  %v1104_v49 = vpop.permute.xlu0 %1103  ;;  %v1959_v34 = vpop.eup %1958 }
 0x18e   : > { %1374 = vst.msk [vmem:[%s2429_s25 + $0x40] sm:$0xf] %vm1357_vm2, %v1697_v44  ;;  %v1106_v12 = vpop.permute.xlu1 %1105  ;;  %v1198_v42 = vmul.f32 %v1933_v47, %v1104_v49  ;;  %v1961_v37 = vpop.eup %1960 }
 0x18f   : > { %1375 = vst.msk [vmem:[%s2429_s25 + $0x44] sm:$0xf] %vm1357_vm2, %v1698_v48  ;;  %v1199_v21 = vmul.f32 %v1935_v50, %v1106_v12 }
 0x190   : > { %v1682_v57 = vpack.c.bf16 %v1198_v42, %v1198_v42 }
 0x191   : > { %v1683_v61 = vpack.c.bf16 %v1199_v21, %v1199_v21  ;;  %v1138_v62 = vpop.permute.xlu0 %1137 }
 0x192   : > { %1359 = vst.msk [vmem:[%s2429_s25 + $0x4] sm:$0xf] %vm1357_vm2, %v1682_v57  ;;  %v1108_v22 = vpop.permute.xlu1 %1107  ;;  %v1215_v0 = vmul.f32 %v1937_v60, %v1138_v62  ;;  %v1963_v57 = vpop.eup %1962 }
 0x193   : > { %1360 = vst.msk [vmem:[%s2429_s25 + $0x8] sm:$0xf] %vm1357_vm2, %v1683_v61  ;;  %v1200_v3 = vmul.f32 %v1939_v63, %v1108_v22  ;;  %v1965_v59 = vpop.eup %1964 }
 0x194   : > { %v1699_v35 = vpack.c.bf16 %v1215_v0, %v1215_v0  ;;  %v1967_v0 = vpop.eup %1966 }
 0x195   : > { %v1684_v6 = vpack.c.bf16 %v1200_v3, %v1200_v3 }
 0x196   : > { %1376 = vst.msk [vmem:[%s2429_s25 + $0x48] sm:$0xf] %vm1357_vm2, %v1699_v35  ;;  %v1140_v8 = vpop.permute.xlu1 %1139  ;;  %v1110_v17 = vpop.permute.xlu0 %1109 }
 0x197   : > { %1361 = vst.msk [vmem:[%s2429_s25 + $0xc] sm:$0xf] %vm1357_vm2, %v1684_v6  ;;  %v1216_v16 = vmul.f32 %v1941_v7, %v1140_v8  ;;  %v1201_v18 = vmul.f32 %v1943_v9, %v1110_v17  ;;  %v1969_v7 = vpop.eup %1968 }
 0x198   : > { %v1971_v9 = vpop.eup %1970 }
 0x199   : > { %v1700_v36 = vpack.c.bf16 %v1216_v16, %v1216_v16  ;;  %v1685_v23 = vpack.c.bf16 %v1201_v18, %v1201_v18  ;;  %v1973_v31 = vpop.eup %1972 }
 0x19a   : > { %v1142_v25 = vpop.permute.xlu0 %1141 }
 0x19b   : > { %1377 = vst.msk [vmem:[%s2429_s25 + $0x4c] sm:$0xf] %vm1357_vm2, %v1700_v36  ;;  %1362 = vst.msk [vmem:[%s2429_s25 + $0x10] sm:$0xf] %vm1357_vm2, %v1685_v23  ;;  %v1217_v51 = vmul.f32 %v1945_v24, %v1142_v25  ;;  %v1975_v24 = vpop.eup %1974 }
 0x19c   : > { %v1112_v27 = vpop.permute.xlu1 %1111 }
 0x19d   : > { %v1202_v28 = vmul.f32 %v1947_v26, %v1112_v27  ;;  %v1701_v29 = vpack.c.bf16 %v1217_v51, %v1217_v51  ;;  %v1977_v51 = vpop.eup %1976 }
 0x19f   : > { %v1686_v32 = vpack.c.bf16 %v1202_v28, %v1202_v28  ;;  %1378 = vst.msk [vmem:[%s2429_s25 + $0x50] sm:$0xf] %vm1357_vm2, %v1701_v29  ;;  %v1979_v29 = vpop.eup %1978 }
 0x1a0   : > { %v1144_v38 = vpop.permute.xlu1 %1143 }
 0x1a1   : > { %1363 = vst.msk [vmem:[%s2429_s25 + $0x14] sm:$0xf] %vm1357_vm2, %v1686_v32  ;;  %v1218_v52 = vmul.f32 %v1949_v33, %v1144_v38 }
 0x1a2   : > { %v1114_v45 = vpop.permute.xlu0 %1113 }
 0x1a3   : > { %v1702_v41 = vpack.c.bf16 %v1218_v52, %v1218_v52  ;;  %v1203_v4 = vmul.f32 %v1951_v43, %v1114_v45  ;;  %v1981_v52 = vpop.eup %1980 }
 0x1a4   : > { %v1983_v39 = vpop.eup %1982 }
 0x1a5   : > { %1379 = vst.msk [vmem:[%s2429_s25 + $0x54] sm:$0xf] %vm1357_vm2, %v1702_v41  ;;  %v1687_v46 = vpack.c.bf16 %v1203_v4, %v1203_v4 }
 0x1a6   : > { %v1146_v5 = vpop.permute.xlu0 %1145 }
 0x1a7   : > { %1364 = vst.msk [vmem:[%s2429_s25 + $0x18] sm:$0xf] %vm1357_vm2, %v1687_v46  ;;  %v1219_v56 = vmul.f32 %v1953_v55, %v1146_v5  ;;  %v1985_v5 = vpop.eup %1984 }
 0x1a8   : > { %v1116_v19 = vpop.permute.xlu1 %1115 }
 0x1a9   : > { %v1204_v2 = vmul.f32 %v1955_v1, %v1116_v19  ;;  %v1703_v11 = vpack.c.bf16 %v1219_v56, %v1219_v56  ;;  %v1987_v1 = vpop.eup %1986 }
 0x1ab   : > { %v1688_v44 = vpack.c.bf16 %v1204_v2, %v1204_v2  ;;  %1380 = vst.msk [vmem:[%s2429_s25 + $0x58] sm:$0xf] %vm1357_vm2, %v1703_v11 }
 0x1ad   : > { %v1148_v47 = vpop.permute.xlu1 %1147  ;;  %1365 = vst.msk [vmem:[%s2429_s25 + $0x1c] sm:$0xf] %vm1357_vm2, %v1688_v44 }
 0x1ae   : > { %v1220_v48 = vmul.f32 %v1957_v20, %v1148_v47  ;;  %v1989_v20 = vpop.eup %1988 }
 0x1af   : > { %v1118_v49 = vpop.permute.xlu0 %1117 }
 0x1b0   : > { %v1205_v50 = vmul.f32 %v1959_v34, %v1118_v49  ;;  %v1704_v12 = vpack.c.bf16 %v1220_v48, %v1220_v48 }
 0x1b2   : > { %v1689_v42 = vpack.c.bf16 %v1205_v50, %v1205_v50  ;;  %1381 = vst.msk [vmem:[%s2429_s25 + $0x5c] sm:$0xf] %vm1357_vm2, %v1704_v12 }
 0x1b3   : > { %v1150_v21 = vpop.permute.xlu0 %1149  ;;  %v1120_v60 = vpop.permute.xlu1 %1119 }
 0x1b4   : > { %1366 = vst.msk [vmem:[%s2429_s25 + $0x20] sm:$0xf] %vm1357_vm2, %v1689_v42  ;;  %v1221_v58 = vmul.f32 %v1961_v37, %v1150_v21  ;;  %v1206_v61 = vmul.f32 %v1963_v57, %v1120_v60 }
 0x1b6   : > { %v1705_v62 = vpack.c.bf16 %v1221_v58, %v1221_v58  ;;  %v1690_v63 = vpack.c.bf16 %v1206_v61, %v1206_v61 }
 0x1b7   : > { %v1152_v22 = vpop.permute.xlu1 %1151 }
 0x1b8   : > { %1382 = vst.msk [vmem:[%s2429_s25 + $0x60] sm:$0xf] %vm1357_vm2, %v1705_v62  ;;  %1367 = vst.msk [vmem:[%s2429_s25 + $0x24] sm:$0xf] %vm1357_vm2, %v1690_v63  ;;  %v1222_v13 = vmul.f32 %v1965_v59, %v1152_v22 }
 0x1b9   : > { %v1122_v3 = vpop.permute.xlu0 %1121 }
 0x1ba   : > { %v1706_v35 = vpack.c.bf16 %v1222_v13, %v1222_v13  ;;  %v1207_v6 = vmul.f32 %v1967_v0, %v1122_v3 }
 0x1bc   : > { %1383 = vst.msk [vmem:[%s2429_s25 + $0x64] sm:$0xf] %vm1357_vm2, %v1706_v35  ;;  %v1691_v14 = vpack.c.bf16 %v1207_v6, %v1207_v6 }
 0x1be   : > { %v1154_v8 = vpop.permute.xlu0 %1153  ;;  %1368 = vst.msk [vmem:[%s2429_s25 + $0x28] sm:$0xf] %vm1357_vm2, %v1691_v14 }
 0x1bf   : > { %v1223_v30 = vmul.f32 %v1969_v7, %v1154_v8 }
 0x1c0   : > { %v1124_v16 = vpop.permute.xlu1 %1123 }
 0x1c1   : > { %v1208_v17 = vmul.f32 %v1971_v9, %v1124_v16  ;;  %v1707_v18 = vpack.c.bf16 %v1223_v30, %v1223_v30 }
 0x1c3   : > { %v1692_v36 = vpack.c.bf16 %v1208_v17, %v1208_v17  ;;  %1384 = vst.msk [vmem:[%s2429_s25 + $0x68] sm:$0xf] %vm1357_vm2, %v1707_v18 }
 0x1c4   : > { %v1156_v23 = vpop.permute.xlu1 %1155  ;;  %v1126_v25 = vpop.permute.xlu0 %1125 }
 0x1c5   : > { %1369 = vst.msk [vmem:[%s2429_s25 + $0x2c] sm:$0xf] %vm1357_vm2, %v1692_v36  ;;  %v1224_v53 = vmul.f32 %v1973_v31, %v1156_v23  ;;  %v1209_v27 = vmul.f32 %v1975_v24, %v1126_v25 }
 0x1c7   : > { %v1708_v26 = vpack.c.bf16 %v1224_v53, %v1224_v53  ;;  %v1693_v54 = vpack.c.bf16 %v1209_v27, %v1209_v27 }
 0x1c8   : > { %v1158_v28 = vpop.permute.xlu0 %1157 }
 0x1c9   : > { %1385 = vst.msk [vmem:[%s2429_s25 + $0x6c] sm:$0xf] %vm1357_vm2, %v1708_v26  ;;  %1370 = vst.msk [vmem:[%s2429_s25 + $0x30] sm:$0xf] %vm1357_vm2, %v1693_v54  ;;  %v1225_v10 = vmul.f32 %v1977_v51, %v1158_v28 }
 0x1ca   : > { %v1128_v32 = vpop.permute.xlu1 %1127 }
 0x1cb   : > { %v1210_v33 = vmul.f32 %v1979_v29, %v1128_v32  ;;  %v1709_v38 = vpack.c.bf16 %v1225_v10, %v1225_v10 }
 0x1cd   : > { %v1694_v15 = vpack.c.bf16 %v1210_v33, %v1210_v33  ;;  %1386 = vst.msk [vmem:[%s2429_s25 + $0x70] sm:$0xf] %vm1357_vm2, %v1709_v38 }
 0x1cf   : > { %v1160_v41 = vpop.permute.xlu1 %1159  ;;  %1371 = vst.msk [vmem:[%s2429_s25 + $0x34] sm:$0xf] %vm1357_vm2, %v1694_v15 }
 0x1d0   : > { %v1226_v43 = vmul.f32 %v1981_v52, %v1160_v41 }
 0x1d1   : > { %v1130_v45 = vpop.permute.xlu0 %1129 }
 0x1d2   : > { %v1710_v4 = vpack.c.bf16 %v1226_v43, %v1226_v43  ;;  %v1211_v46 = vmul.f32 %v1983_v39, %v1130_v45 }
 0x1d4   : > { %1387 = vst.msk [vmem:[%s2429_s25 + $0x74] sm:$0xf] %vm1357_vm2, %v1710_v4  ;;  %v1695_v55 = vpack.c.bf16 %v1211_v46, %v1211_v46 }
 0x1d5   : > { %v1162_v40 = vpop.permute.xlu0 %1161  ;;  %v1132_v19 = vpop.permute.xlu1 %1131 }
 0x1d6   : > { %1372 = vst.msk [vmem:[%s2429_s25 + $0x38] sm:$0xf] %vm1357_vm2, %v1695_v55  ;;  %v1227_v56 = vmul.f32 %v1985_v5, %v1162_v40  ;;  %v1212_v2 = vmul.f32 %v1987_v1, %v1132_v19 }
 0x1d8   : > { %v1711_v11 = vpack.c.bf16 %v1227_v56, %v1227_v56  ;;  %v1696_v44 = vpack.c.bf16 %v1212_v2, %v1212_v2 }
 0x1d9   : > { %v1164_v47 = vpop.permute.xlu1 %1163 }
 0x1da   : > { %1388 = vst.msk [vmem:[%s2429_s25 + $0x78] sm:$0xf] %vm1357_vm2, %v1711_v11  ;;  %1373 = vst.msk [vmem:[%s2429_s25 + $0x3c] sm:$0xf] %vm1357_vm2, %v1696_v44  ;;  %v1228_v34 = vmul.f32 %v1989_v20, %v1164_v47 }
 0x1dc   : > { %v1712_v48 = vpack.c.bf16 %v1228_v34, %v1228_v34 }
 0x1de   : > { %1389 = vst.msk [vmem:[%s2429_s25 + $0x7c] sm:$0xf] %vm1357_vm2, %v1712_v48 }
 0x1df PF: > { %s15_s15 = sadd.s32 1, %s1996_s15  }
 0x1e0   : > { %p12_p4 = scmp.ge.s32.totalorder %s15_s15, 4  }
 0x1e2   :  { %14 = sbr.rel (!%p12_p4) target bundleno = 1 (0x1), region = 74 }

// kernel: pixelcnn_forward.55
= control target key start
LH: loop header
LB: loop body
LE: loop exit
PB: predicated region body
PF: predicated region fallthrough
CT: control target
= control target key end

     0   :  { %10 = vsyncpa [#allocation3], 0  ;;  %s2718_s0 = inlined_call_operand.vmem [shape: bf16[512,144], index: 0, kind: input, shape index: {}]   ;;  %s2719_s1 = inlined_call_operand.vmem [shape: bf16[144,32], index: 1, kind: input, shape index: {}]   ;;  %s2720_s2 = inlined_call_operand.vmem [shape: f32[1,32], index: 2, kind: input, shape index: {}]   ;;  %s2721_s3 = inlined_call_operand.vmem [shape: bf16[512,32], index: 3, kind: output, shape index: {0}]   ;;  %s2722_s4 = inlined_call_operand.hbm [shape: bf16[512,16], index: 4, kind: output, shape index: {1}]  }
   0x1   :  { %12 = vsyncpa [#allocation3 + $0x1], 0  ;;  %s2135_s15 = smov 0   ;;  %s2137_s16 = smov 0  }
   0x2   :  { %s2139_s17 = smov 0   ;;  %s2141_s18 = smov 0  }
   0x3 LB: > { %s2156_s19 = sadd.s32 4294967295, %s2103_s18   ;;  %s1498_s20 = sadd.s32 4294967294, %s2103_s18   ;;  %s2103_s18 = sphi %s2141_s18, %s2728_s18   ;;  %s2099_s17 = sphi %s2139_s17, %s2727_s17   ;;  %s2095_s16 = sphi %s2137_s16, %s2726_s16   ;;  %s2091_s15 = sphi %s2135_s15, %s2725_s15  }
   0x4   : > { %s2160_s21 = sadd.s32 1, %s2103_s18   ;;  %s119_s22 = sadd.s32 1, %s2099_s17 }
   0x5   : > { %s116_s23 = ssub.s32 %s2103_s18, %s2160_s21  ;;  %p129_p0 = scmp.ne.s32.totalorder %s2099_s17, %s2095_s16 }
   0x6   : > { %p117_p1 = scmp.eq.s32.totalorder %s116_s23, 0  ;;  %p130_p2 = scmp.eq.s32.totalorder %s2156_s19, 1 }
   0x7   : > { %p135_p3 = scmp.ne.s32.totalorder %s2095_s16, %s2091_s15  ;;  %p136_p4 = scmp.eq.s32.totalorder %s1498_s20, 1 }
   0x8   : > { %s2171_s24 = scalar_select %p117_p1, %s2099_s17, %s119_s22  }
   0x9   : > { %p2173_p5 = por %p130_p2, %p129_p0  ;;  %p2177_p6 = por %p136_p4, %p135_p3 }
   0xa   : > { %p1501_p7 = scmp.ge.s32.totalorder %s2103_s18, 1  ;;  %p170_p8 = scmp.lt.s32.totalorder %s2103_s18, 3 }
   0xc   : > { %p171_p9 = pnand %p1501_p7, %p170_p8 }
   0xd   : > { %s1503_s29 = sshll.u32 (!%p171_p9), %s2156_s19, 5  ;;  %s199_s14 = sand.u32 (!%p171_p9), 1, %s2095_s16  }
   0xe   : > { %174 = sbr.rel (%p171_p9) target bundleno = 500 (0x1f4), region = 32  ;;  %p203_p10 = scmp.lt.s32.totalorder (!%p171_p9), %s1503_s29, 63 }
   0xf   : > { %s1502_s20 = sshll.u32 (!%p171_p9), %s199_s14, 7  ;;  %s1732_s23 = sshll.u32 (!%p171_p9), %s2156_s19, 11 }
  0x10   : > { %s2578_s22 = scalar_lea.vmem (!%p171_p9), [#allocation2], %s1502_s20  ;;  %s2670_s5 = scalar_lea.hbm (!%p171_p9), %s2722_s4, %s1732_s23 }
  0x11   : > { %s1411_s27 = sshll.u32 (!%p171_p9), %s2578_s22, 4  ;;  %s2678_s19 = scalar_lea.sflag (!%p171_p9), [#allocation3], %s199_s14  ;;  %s2672_s27 = int_to_ptr.vmem [resolvable:$true] %s1411_s27 }
  0x12   : > { %s2043_s6 = scalar_lea.vmem (!%p171_p9), %s2672_s27, 2048  ;;  %s2107_s7 = smov (!%p171_p9), [#allocation2]  }
  0x13   : > { %v1794_v0 = vld [vmem:[%s2719_s1 + $0x38] sm:$0xff]   ;;  %v2105_v1 = vmov 0   ;;  %v1795_v2 = vld [vmem:[%s2719_s1 + $0x30] sm:$0xff]   ;;  %s2730_s29 = smov (!%p203_p10, %s1503_s29), 63  ;;  %v1796_v3 = vld [vmem:[%s2719_s1 + $0x28] sm:$0xff]   ;;  %vm472_vm0 = vcmask 130048   ;;  %p2044_p11 = scmp.ne.s32.totalorder %s2672_s27, %s2043_s6 }
  0x14   : > { %521 = vmatprep.subr.bf16.mxu0 %v2105_v1  ;;  %1733 = vmatprep.subr.bf16.mxu1 %v2105_v1  ;;  %s1667_s8 = sshll.u32 %s2730_s29, 3  ;;  %v1797_v4 = vld [vmem:[%s2719_s1 + $0x20] sm:$0xff]   ;;  %v1798_v7 = vld [vmem:[%s2719_s1 + $0x18] sm:$0xff]   ;;  %v1799_v8 = vld [vmem:[%s2719_s1 + $0x10] sm:$0xff]   ;;  %s1507_s10 = sshll.u32 %s2730_s29, 2  ;;  %vm810_vm1 = vcmask 257024  }
  0x15   : > { %522 = vmatpush1.bf16.msra.mxu0 %v1794_v0  ;;  %1742 = vmatpush1.bf16.msra.mxu1 %v1794_v0  ;;  %s2199_s11 = scalar_lea.vmem %s2718_s0, %s1667_s8  ;;  %v1800_v9 = vld [vmem:[%s2719_s1 + $0x8] sm:$0xff]   ;;  %v1801_v10 = vld [vmem:[%s2719_s1] sm:$0xff]   ;;  %s2106_s29 = smov 112   ;;  %vm1355_vm2 = vcmask 125952  }
  0x16   : > { %523 = vmatprep.subr.bf16.mxu0 %v2105_v1  ;;  %1734 = vmatprep.subr.bf16.mxu1 %v2105_v1  ;;  %v1805_v5 = vld [vmem:[%s2199_s11 + $0x4] ss:$8 sps:$4 sm:$0xff]   ;;  %v1803_v12 = vld [vmem:[%s2199_s11] ss:$8 sps:$4 sm:$0xff]   ;;  %v1809_v14 = vld [vmem:[%s2199_s11 + $0x14] ss:$8 sps:$4 sm:$0xff]   ;;  %p2045_p12 = pnand %p2044_p11, %p2173_p5 }
  0x17   : > { %v1808_v6 = vld [vmem:[%s2199_s11 + $0x84] ss:$8 sps:$4 sm:$0xff]   ;;  %1550 = vmatprep.mubr.msk.bf16.mxu0 %vm472_vm0, %v1805_v5  ;;  %v1806_v13 = vld [vmem:[%s2199_s11 + $0x80] ss:$8 sps:$4 sm:$0xff]   ;;  %v1811_v15 = vld [vmem:[%s2199_s11 + $0x94] ss:$8 sps:$4 sm:$0xff]  }
  0x18   : > { %1558 = vmatprep.mubr.msk.bf16.mxu1 %vm472_vm0, %v1808_v6  ;;  %v1802_v11 = vld [vmem:[%s2719_s1 + $0x40] sm:$0xff]   ;;  %v1813_v16 = vld [vmem:[%s2199_s11 + $0x10] ss:$8 sps:$4 sm:$0xff]   ;;  %v1821_v22 = vld [vmem:[%s2199_s11 + $0x34] ss:$8 sps:$4 sm:$0xff]   ;;  %p2046_p13 = pneg %p2045_p12  ;;  %s2047_s8 = sshll.u32 %s2107_s7, 4  ;;  %s2048_s8 = int_to_ptr.vmem [resolvable:$false] %s2047_s8 }
  0x19   : > { %524 = vmatpush1.bf16.msra.mxu0 %v1795_v2  ;;  %1743 = vmatpush1.bf16.msra.mxu1 %v1795_v2  ;;  %v1814_v17 = vld [vmem:[%s2199_s11 + $0x90] ss:$8 sps:$4 sm:$0xff]   ;;  %v1815_v18 = vld [vmem:[%s2199_s11 + $0x24] ss:$8 sps:$4 sm:$0xff]   ;;  %v1819_v20 = vld [vmem:[%s2199_s11 + $0x20] ss:$8 sps:$4 sm:$0xff]   ;;  %p2050_p0 = scmp.lt.s32.totalorder %s2672_s27, %s2048_s8 }
  0x1a   : > { %525 = vmatprep.subr.bf16.mxu0 %v2105_v1  ;;  %1735 = vmatprep.subr.bf16.mxu1 %v2105_v1  ;;  %v1817_v19 = vld [vmem:[%s2199_s11 + $0xa4] ss:$8 sps:$4 sm:$0xff]   ;;  %v1820_v21 = vld [vmem:[%s2199_s11 + $0xa0] ss:$8 sps:$4 sm:$0xff]   ;;  %v1823_v23 = vld [vmem:[%s2199_s11 + $0xb4] ss:$8 sps:$4 sm:$0xff]  }
  0x1b   : > { %v1825_v24 = vld [vmem:[%s2199_s11 + $0x30] ss:$8 sps:$4 sm:$0xff]   ;;  %v1827_v26 = vld [vmem:[%s2199_s11 + $0x44] ss:$8 sps:$4 sm:$0xff]   ;;  %v1831_v28 = vld [vmem:[%s2199_s11 + $0x40] ss:$8 sps:$4 sm:$0xff]  }
  0x1c   : > { %v1826_v25 = vld [vmem:[%s2199_s11 + $0xb0] ss:$8 sps:$4 sm:$0xff]   ;;  %v1829_v27 = vld [vmem:[%s2199_s11 + $0xc4] ss:$8 sps:$4 sm:$0xff]   ;;  %v1832_v29 = vld [vmem:[%s2199_s11 + $0xc0] ss:$8 sps:$4 sm:$0xff]  }
  0x1d   : > { %526 = vmatpush1.bf16.msra.mxu0 %v1796_v3  ;;  %1744 = vmatpush1.bf16.msra.mxu1 %v1796_v3  ;;  %v1833_v30 = vld [vmem:[%s2199_s11 + $0x54] ss:$8 sps:$4 sm:$0xff]   ;;  %v1837_v32 = vld [vmem:[%s2199_s11 + $0x50] ss:$8 sps:$4 sm:$0xff]   ;;  %v1839_v34 = vld [vmem:[%s2199_s11 + $0x64] ss:$8 sps:$4 sm:$0xff]  }
  0x1e   : > { %527 = vmatprep.subr.bf16.mxu0 %v2105_v1  ;;  %1736 = vmatprep.subr.bf16.mxu1 %v2105_v1  ;;  %v1835_v31 = vld [vmem:[%s2199_s11 + $0xd4] ss:$8 sps:$4 sm:$0xff]   ;;  %v1838_v33 = vld [vmem:[%s2199_s11 + $0xd0] ss:$8 sps:$4 sm:$0xff]   ;;  %v1841_v35 = vld [vmem:[%s2199_s11 + $0xe4] ss:$8 sps:$4 sm:$0xff]  }
  0x1f   : > { %v1843_v36 = vld [vmem:[%s2199_s11 + $0x60] ss:$8 sps:$4 sm:$0xff]   ;;  %v1845_v38 = vld [vmem:[%s2199_s11 + $0x74] ss:$8 sps:$4 sm:$0xff]   ;;  %v1849_v40 = vld [vmem:[%s2199_s11 + $0x70] ss:$8 sps:$4 sm:$0xff]  }
  0x20   : > { %v1844_v37 = vld [vmem:[%s2199_s11 + $0xe0] ss:$8 sps:$4 sm:$0xff]   ;;  %v1847_v39 = vld [vmem:[%s2199_s11 + $0xf4] ss:$8 sps:$4 sm:$0xff]   ;;  %v1850_v41 = vld [vmem:[%s2199_s11 + $0xf0] ss:$8 sps:$4 sm:$0xff]   ;;  %s2282_s11 = scalar_lea.vmem %s2721_s3, %s1507_s10 }
  0x21   : > { %528 = vmatpush1.bf16.msra.mxu0 %v1797_v4  ;;  %1745 = vmatpush1.bf16.msra.mxu1 %v1797_v4  ;;  %v2270_v42 = vld [vmem:[%s2720_s2] ss:$0 sm:$0xff]  ;;  %s2049_s9 = scalar_lea.vmem %s2048_s8, 4096 }
  0x22   : > { %529 = vmatprep.subr.bf16.mxu0 %v2105_v1  ;;  %1737 = vmatprep.subr.bf16.mxu1 %v2105_v1  ;;  %p2051_p1 = scmp.lt.s32.totalorder %s2049_s9, %s2043_s6 }
  0x24   : > { %p2052_p2 = por %p2051_p1, %p2050_p0 }
  0x25   : > { %530 = vmatpush1.bf16.msra.mxu0 %v1798_v7  ;;  %1746 = vmatpush1.bf16.msra.mxu1 %v1798_v7 }
  0x26   : > { %531 = vmatprep.subr.bf16.mxu0 %v2105_v1  ;;  %1738 = vmatprep.subr.bf16.mxu1 %v2105_v1  ;;  %p2053_p3 = pnand %p2052_p2, %p2046_p13 }
  0x29   : > { %532 = vmatpush1.bf16.msra.mxu0 %v1799_v8  ;;  %1747 = vmatpush1.bf16.msra.mxu1 %v1799_v8 }
  0x2a   : > { %533 = vmatprep.subr.bf16.mxu0 %v2105_v1  ;;  %1739 = vmatprep.subr.bf16.mxu1 %v2105_v1 }
  0x2d   : > { %534 = vmatpush1.bf16.msra.mxu0 %v1800_v9  ;;  %1748 = vmatpush1.bf16.msra.mxu1 %v1800_v9 }
  0x2e   : > { %535 = vmatprep.subr.bf16.mxu0 %v2105_v1  ;;  %1740 = vmatprep.subr.bf16.mxu1 %v2105_v1 }
  0x31   : > { %536 = vmatpush1.bf16.msra.mxu0 %v1801_v10  ;;  %1749 = vmatpush1.bf16.msra.mxu1 %v1801_v10 }
  0x32   : > { %551 = vmatprep.subr.bf16.mxu0 %v2105_v1  ;;  %1741 = vmatprep.subr.bf16.mxu1 %v2105_v1 }
  0x35   : > { %552 = vmatpush2.bf16.msra.mxu0 %v1802_v11  ;;  %1750 = vmatpush2.bf16.msra.mxu1 %v1802_v11 }
  0x38   : > { %554 = vmatmul.mubr.bf16.vlgmr.msra.gmra.mxu0 %v1803_v12  ;;  %618 = vmatmul.mubr.bf16.vlgmr.msra.gmra.mxu1 %v1806_v13 }
  0x39   : > { %1551 = vmatprep.mubr.msk.bf16.mxu0 %vm472_vm0, %v1809_v14  ;;  %1559 = vmatprep.mubr.msk.bf16.mxu1 %vm472_vm0, %v1811_v15 }
  0x40   : > { %562 = vmatmul.mubr.bf16.gmra.mxu0 %v1813_v16  ;;  %626 = vmatmul.mubr.bf16.gmra.mxu1 %v1814_v17 }
  0x41   : > { %1552 = vmatprep.mubr.msk.bf16.mxu0 %vm472_vm0, %v1815_v18  ;;  %1560 = vmatprep.mubr.msk.bf16.mxu1 %vm472_vm0, %v1817_v19 }
  0x48   : > { %570 = vmatmul.mubr.bf16.gmra.mxu0 %v1819_v20  ;;  %634 = vmatmul.mubr.bf16.gmra.mxu1 %v1820_v21 }
  0x49   : > { %1553 = vmatprep.mubr.msk.bf16.mxu0 %vm472_vm0, %v1821_v22  ;;  %1561 = vmatprep.mubr.msk.bf16.mxu1 %vm472_vm0, %v1823_v23 }
  0x50   : > { %578 = vmatmul.mubr.bf16.gmra.mxu0 %v1825_v24  ;;  %642 = vmatmul.mubr.bf16.gmra.mxu1 %v1826_v25 }
  0x51   : > { %1554 = vmatprep.mubr.msk.bf16.mxu0 %vm472_vm0, %v1827_v26  ;;  %1562 = vmatprep.mubr.msk.bf16.mxu1 %vm472_vm0, %v1829_v27 }
  0x58   : > { %586 = vmatmul.mubr.bf16.gmra.mxu0 %v1831_v28  ;;  %650 = vmatmul.mubr.bf16.gmra.mxu1 %v1832_v29 }
  0x59   : > { %1555 = vmatprep.mubr.msk.bf16.mxu0 %vm472_vm0, %v1833_v30  ;;  %1563 = vmatprep.mubr.msk.bf16.mxu1 %vm472_vm0, %v1835_v31 }
  0x60   : > { %594 = vmatmul.mubr.bf16.gmra.mxu0 %v1837_v32  ;;  %658 = vmatmul.mubr.bf16.gmra.mxu1 %v1838_v33 }
  0x61   : > { %1556 = vmatprep.mubr.msk.bf16.mxu0 %vm472_vm0, %v1839_v34  ;;  %1564 = vmatprep.mubr.msk.bf16.mxu1 %vm472_vm0, %v1841_v35 }
  0x68   : > { %602 = vmatmul.mubr.bf16.gmra.mxu0 %v1843_v36  ;;  %666 = vmatmul.mubr.bf16.gmra.mxu1 %v1844_v37 }
  0x69   : > { %1557 = vmatprep.mubr.msk.bf16.mxu0 %vm472_vm0, %v1845_v38  ;;  %1565 = vmatprep.mubr.msk.bf16.mxu1 %vm472_vm0, %v1847_v39 }
  0x70   : > { %610 = vmatmul.mubr.bf16.gmra.mxu0 %v1849_v40  ;;  %674 = vmatmul.mubr.bf16.gmra.mxu1 %v1850_v41 }
  0xf8   : > { %v555_v43 = vpop.f32.mrf.mxu0  ;;  %v619_v44 = vpop.f32.mrf.mxu1 }
  0xf9   : > { %v2274_v45 = vadd.f32 %v2270_v42, %v555_v43  ;;  %v2277_v46 = vadd.f32 %v2270_v42, %v619_v44 }
  0xfa   : > { %v557_v47 = vpop.f32.mrf.mxu0  ;;  %v621_v48 = vpop.f32.mrf.mxu1 }
  0xfb   : > { %v1668_v49 = vpack.c.bf16 %v2274_v45, %v2274_v45  ;;  %v1598_v50 = vmul.f32 -1.442695, %v2274_v45  ;;  %v1684_v51 = vpack.c.bf16 %v2277_v46, %v2277_v46  ;;  %v1614_v52 = vmul.f32 -1.442695, %v2277_v46 }
  0xfc   : > { %v558_v53 = vpop.f32.mrf.mxu0  ;;  %v622_v54 = vpop.f32.mrf.mxu1 }
  0xfd   : > { %811 = vst.msk [vmem:[%s2282_s11] sm:$0xf] %vm810_vm1, %v1668_v49  ;;  %1851 = vpow2.f32 %v1598_v50  ;;  %827 = vst.msk [vmem:[%s2282_s11 + $0x40] sm:$0xf] %vm810_vm1, %v1684_v51  ;;  %v2295_v55 = vadd.f32 %v2270_v42, %v558_v53  ;;  %v2298_v56 = vadd.f32 %v2270_v42, %v622_v54 }
  0xfe   : > { %1853 = vpow2.f32 %v1614_v52  ;;  %v560_v57 = vpop.f32.mrf.mxu0  ;;  %v624_v58 = vpop.f32.mrf.mxu1 }
  0xff   : > { %v1669_v59 = vpack.c.bf16 %v2295_v55, %v2295_v55  ;;  %v1599_v60 = vmul.f32 -1.442695, %v2295_v55  ;;  %v1685_v61 = vpack.c.bf16 %v2298_v56, %v2298_v56  ;;  %v1615_v62 = vmul.f32 -1.442695, %v2298_v56 }
 0x100   : > { %v563_v63 = vpop.f32.mrf.mxu0  ;;  %v627_v0 = vpop.f32.mrf.mxu1 }
 0x101   : > { %812 = vst.msk [vmem:[%s2282_s11 + $0x4] sm:$0xf] %vm810_vm1, %v1669_v59  ;;  %1855 = vpow2.f32 %v1599_v60  ;;  %828 = vst.msk [vmem:[%s2282_s11 + $0x44] sm:$0xf] %vm810_vm1, %v1685_v61  ;;  %v2311_v1 = vadd.f32 %v2270_v42, %v563_v63  ;;  %v2314_v2 = vadd.f32 %v2270_v42, %v627_v0 }
 0x102   : > { %1857 = vpow2.f32 %v1615_v62  ;;  %v565_v3 = vpop.f32.mrf.mxu0  ;;  %v629_v4 = vpop.f32.mrf.mxu1 }
 0x103   : > { %v1670_v5 = vpack.c.bf16 %v2311_v1, %v2311_v1  ;;  %v1600_v6 = vmul.f32 -1.442695, %v2311_v1  ;;  %v1686_v7 = vpack.c.bf16 %v2314_v2, %v2314_v2  ;;  %v1616_v8 = vmul.f32 -1.442695, %v2314_v2 }
 0x104   : > { %v566_v9 = vpop.f32.mrf.mxu0  ;;  %v630_v10 = vpop.f32.mrf.mxu1 }
 0x105   : > { %813 = vst.msk [vmem:[%s2282_s11 + $0x8] sm:$0xf] %vm810_vm1, %v1670_v5  ;;  %1859 = vpow2.f32 %v1600_v6  ;;  %829 = vst.msk [vmem:[%s2282_s11 + $0x48] sm:$0xf] %vm810_vm1, %v1686_v7  ;;  %v2327_v11 = vadd.f32 %v2270_v42, %v566_v9  ;;  %v2330_v12 = vadd.f32 %v2270_v42, %v630_v10 }
 0x106   : > { %1861 = vpow2.f32 %v1616_v8  ;;  %v568_v13 = vpop.f32.mrf.mxu0  ;;  %v632_v14 = vpop.f32.mrf.mxu1 }
 0x107   : > { %v1671_v15 = vpack.c.bf16 %v2327_v11, %v2327_v11  ;;  %v1601_v16 = vmul.f32 -1.442695, %v2327_v11  ;;  %v1687_v17 = vpack.c.bf16 %v2330_v12, %v2330_v12  ;;  %v1617_v18 = vmul.f32 -1.442695, %v2330_v12 }
 0x108   : > { %v571_v19 = vpop.f32.mrf.mxu0  ;;  %v635_v20 = vpop.f32.mrf.mxu1 }
 0x109   : > { %814 = vst.msk [vmem:[%s2282_s11 + $0xc] sm:$0xf] %vm810_vm1, %v1671_v15  ;;  %1863 = vpow2.f32 %v1601_v16  ;;  %830 = vst.msk [vmem:[%s2282_s11 + $0x4c] sm:$0xf] %vm810_vm1, %v1687_v17  ;;  %v2343_v21 = vadd.f32 %v2270_v42, %v571_v19  ;;  %v2346_v22 = vadd.f32 %v2270_v42, %v635_v20 }
 0x10a   : > { %v1852_v23 = vpop.eup %1851  ;;  %1865 = vpow2.f32 %v1617_v18  ;;  %v573_v24 = vpop.f32.mrf.mxu0 }
 0x10b   : > { %v637_v25 = vpop.f32.mrf.mxu1  ;;  %v1854_v26 = vpop.eup %1853  ;;  %v971_v27 = vadd.f32 1.0, %v1852_v23  ;;  %v1672_v28 = vpack.c.bf16 %v2343_v21, %v2343_v21  ;;  %v1602_v29 = vmul.f32 -1.442695, %v2343_v21  ;;  %v1688_v30 = vpack.c.bf16 %v2346_v22, %v2346_v22 }
 0x10c   : > { %v1618_v31 = vmul.f32 -1.442695, %v2346_v22  ;;  %v574_v32 = vpop.f32.mrf.mxu0  ;;  %v987_v34 = vadd.f32 1.0, %v1854_v26 }
 0x10d   : > { %v638_v33 = vpop.f32.mrf.mxu1  ;;  %1867 = vrcp.f32 %v971_v27  ;;  %815 = vst.msk [vmem:[%s2282_s11 + $0x10] sm:$0xf] %vm810_vm1, %v1672_v28  ;;  %v2357_v35 = vadd.f32 %v2270_v42, %v574_v32  ;;  %831 = vst.msk [vmem:[%s2282_s11 + $0x50] sm:$0xf] %vm810_vm1, %v1688_v30 }
 0x10e   : > { %v2360_v36 = vadd.f32 %v2270_v42, %v638_v33  ;;  %v1856_v37 = vpop.eup %1855  ;;  %v576_v38 = vpop.f32.mrf.mxu0  ;;  %1869 = vpow2.f32 %v1602_v29 }
 0x10f   : > { %v640_v39 = vpop.f32.mrf.mxu1  ;;  %v1858_v40 = vpop.eup %1857  ;;  %v972_v41 = vadd.f32 1.0, %v1856_v37  ;;  %v1673_v43 = vpack.c.bf16 %v2357_v35, %v2357_v35  ;;  %1871 = vpow2.f32 %v1618_v31  ;;  %v1603_v47 = vmul.f32 -1.442695, %v2357_v35 }
 0x110   : > { %v988_v44 = vadd.f32 1.0, %v1858_v40  ;;  %v1689_v48 = vpack.c.bf16 %v2360_v36, %v2360_v36  ;;  %v579_v49 = vpop.f32.mrf.mxu0  ;;  %1873 = vrcp.f32 %v987_v34  ;;  %v1619_v62 = vmul.f32 -1.442695, %v2360_v36 }
 0x111   : > { %v643_v50 = vpop.f32.mrf.mxu1  ;;  %816 = vst.msk [vmem:[%s2282_s11 + $0x14] sm:$0xf] %vm810_vm1, %v1673_v43  ;;  %v2372_v51 = vadd.f32 %v2270_v42, %v579_v49 }
 0x112   : > { %v2375_v52 = vadd.f32 %v2270_v42, %v643_v50  ;;  %v1860_v53 = vpop.eup %1859  ;;  %1875 = vrcp.f32 %v988_v44  ;;  %832 = vst.msk [vmem:[%s2282_s11 + $0x54] sm:$0xf] %vm810_vm1, %v1689_v48  ;;  %v581_v54 = vpop.f32.mrf.mxu0 }
 0x113   : > { %v645_v57 = vpop.f32.mrf.mxu1  ;;  %v1862_v58 = vpop.eup %1861  ;;  %1877 = vrcp.f32 %v972_v41  ;;  %v973_v59 = vadd.f32 1.0, %v1860_v53  ;;  %v1674_v60 = vpack.c.bf16 %v2372_v51, %v2372_v51  ;;  %v1604_v14 = vmul.f32 -1.442695, %v2372_v51 }
 0x114   : > { %v989_v61 = vadd.f32 1.0, %v1862_v58  ;;  %1879 = vpow2.f32 %v1603_v47  ;;  %v1690_v63 = vpack.c.bf16 %v2375_v52, %v2375_v52  ;;  %v582_v0 = vpop.f32.mrf.mxu0  ;;  %v1620_v24 = vmul.f32 -1.442695, %v2375_v52 }
 0x115   : > { %v646_v3 = vpop.f32.mrf.mxu1  ;;  %1881 = vrcp.f32 %v973_v59  ;;  %817 = vst.msk [vmem:[%s2282_s11 + $0x18] sm:$0xf] %vm810_vm1, %v1674_v60  ;;  %v2387_v4 = vadd.f32 %v2270_v42, %v582_v0 }
 0x116   : > { %v2390_v5 = vadd.f32 %v2270_v42, %v646_v3  ;;  %v1864_v6 = vpop.eup %1863  ;;  %833 = vst.msk [vmem:[%s2282_s11 + $0x58] sm:$0xf] %vm810_vm1, %v1690_v63  ;;  %v584_v7 = vpop.f32.mrf.mxu0  ;;  %1883 = vrcp.f32 %v989_v61 }
 0x117   : > { %v648_v8 = vpop.f32.mrf.mxu1  ;;  %v1866_v9 = vpop.eup %1865  ;;  %v974_v10 = vadd.f32 1.0, %v1864_v6  ;;  %v1675_v13 = vpack.c.bf16 %v2387_v4, %v2387_v4  ;;  %1885 = vpow2.f32 %v1619_v62  ;;  %v1605_v40 = vmul.f32 -1.442695, %v2387_v4 }
 0x118   : > { %v1691_v15 = vpack.c.bf16 %v2390_v5, %v2390_v5  ;;  %v587_v16 = vpop.f32.mrf.mxu0  ;;  %v990_v18 = vadd.f32 1.0, %v1866_v9  ;;  %v1621_v57 = vmul.f32 -1.442695, %v2390_v5 }
 0x119   : > { %v651_v17 = vpop.f32.mrf.mxu1  ;;  %1887 = vrcp.f32 %v974_v10  ;;  %818 = vst.msk [vmem:[%s2282_s11 + $0x1c] sm:$0xf] %vm810_vm1, %v1675_v13  ;;  %v2402_v19 = vadd.f32 %v2270_v42, %v587_v16 }
 0x11a   : > { %v2405_v20 = vadd.f32 %v2270_v42, %v651_v17  ;;  %v1868_v23 = vpop.eup %1867  ;;  %834 = vst.msk [vmem:[%s2282_s11 + $0x5c] sm:$0xf] %vm810_vm1, %v1691_v15  ;;  %v589_v25 = vpop.f32.mrf.mxu0  ;;  %1889 = vpow2.f32 %v1604_v14 }
 0x11b   : > { %v653_v26 = vpop.f32.mrf.mxu1  ;;  %v1676_v27 = vpack.c.bf16 %v2402_v19, %v2402_v19  ;;  %1099 = vrot.lane.b32.xlu0 %v1868_v23, %s2106_s29  ;;  %v1870_v29 = vpop.eup %1869  ;;  %1891 = vrcp.f32 %v990_v18  ;;  %v1606_v0 = vmul.f32 -1.442695, %v2402_v19 }
 0x11c   : > { %v1692_v28 = vpack.c.bf16 %v2405_v20, %v2405_v20  ;;  %v590_v30 = vpop.f32.mrf.mxu0  ;;  %v1872_v32 = vpop.eup %1871  ;;  %v975_v33 = vadd.f32 1.0, %v1870_v29  ;;  %1893 = vpow2.f32 %v1620_v24  ;;  %v1622_v17 = vmul.f32 -1.442695, %v2405_v20 }
 0x11d   : > { %v654_v31 = vpop.f32.mrf.mxu1  ;;  %819 = vst.msk [vmem:[%s2282_s11 + $0x20] sm:$0xf] %vm810_vm1, %v1676_v27  ;;  %v2420_v34 = vadd.f32 %v2270_v42, %v590_v30  ;;  %v1874_v38 = vpop.eup %1873  ;;  %v991_v39 = vadd.f32 1.0, %v1872_v32 }
 0x11e   : > { %835 = vst.msk [vmem:[%s2282_s11 + $0x60] sm:$0xf] %vm810_vm1, %v1692_v28  ;;  %v2423_v37 = vadd.f32 %v2270_v42, %v654_v31  ;;  %v592_v41 = vpop.f32.mrf.mxu0  ;;  %1895 = vrcp.f32 %v975_v33 }
 0x11f   : > { %v656_v43 = vpop.f32.mrf.mxu1  ;;  %v1876_v44 = vpop.eup %1875  ;;  %v1677_v47 = vpack.c.bf16 %v2420_v34, %v2420_v34  ;;  %1131 = vrot.lane.b32.xlu0 %v1874_v38, %s2106_s29  ;;  %1897 = vrcp.f32 %v991_v39  ;;  %v1607_v29 = vmul.f32 -1.442695, %v2420_v34 }
 0x120   : > { %v1693_v48 = vpack.c.bf16 %v2423_v37, %v2423_v37  ;;  %v1878_v49 = vpop.eup %1877  ;;  %1133 = vrot.lane.b32.xlu1 %v1876_v44, %s2106_s29  ;;  %v595_v50 = vpop.f32.mrf.mxu0  ;;  %1899 = vpow2.f32 %v1605_v40 }
 0x121   : > { %v659_v53 = vpop.f32.mrf.mxu1  ;;  %v1880_v54 = vpop.eup %1879  ;;  %820 = vst.msk [vmem:[%s2282_s11 + $0x24] sm:$0xf] %vm810_vm1, %v1677_v47  ;;  %v2438_v58 = vadd.f32 %v2270_v42, %v595_v50 }
 0x122   : > { %836 = vst.msk [vmem:[%s2282_s11 + $0x64] sm:$0xf] %vm810_vm1, %v1693_v48  ;;  %v2441_v59 = vadd.f32 %v2270_v42, %v659_v53  ;;  %v1882_v60 = vpop.eup %1881  ;;  %v976_v61 = vadd.f32 1.0, %v1880_v54  ;;  %v597_v62 = vpop.f32.mrf.mxu0  ;;  %v1623_v48 = vmul.f32 -1.442695, %v2423_v37 }
 0x123   : > { %v661_v63 = vpop.f32.mrf.mxu1  ;;  %v1678_v3 = vpack.c.bf16 %v2438_v58, %v2438_v58  ;;  %1101 = vrot.lane.b32.xlu0 %v1878_v49, %s2106_s29  ;;  %v1884_v7 = vpop.eup %1883 }
 0x124   : > { %v1694_v6 = vpack.c.bf16 %v2441_v59, %v2441_v59  ;;  %1901 = vrcp.f32 %v976_v61  ;;  %1103 = vrot.lane.b32.xlu1 %v1882_v60, %s2106_s29  ;;  %v598_v8 = vpop.f32.mrf.mxu0  ;;  %v1886_v10 = vpop.eup %1885  ;;  %v1608_v63 = vmul.f32 -1.442695, %v2438_v58 }
 0x125   : > { %v662_v9 = vpop.f32.mrf.mxu1  ;;  %1903 = vpow2.f32 %v1621_v57  ;;  %821 = vst.msk [vmem:[%s2282_s11 + $0x28] sm:$0xf] %vm810_vm1, %v1678_v3  ;;  %v2455_v13 = vadd.f32 %v2270_v42, %v598_v8  ;;  %v992_v16 = vadd.f32 1.0, %v1886_v10 }
 0x126   : > { %837 = vst.msk [vmem:[%s2282_s11 + $0x68] sm:$0xf] %vm810_vm1, %v1694_v6  ;;  %v2458_v14 = vadd.f32 %v2270_v42, %v662_v9  ;;  %v1888_v15 = vpop.eup %1887  ;;  %v600_v18 = vpop.f32.mrf.mxu0  ;;  %1905 = vpow2.f32 %v1606_v0 }
 0x127   : > { %v664_v23 = vpop.f32.mrf.mxu1  ;;  %v1679_v24 = vpack.c.bf16 %v2455_v13, %v2455_v13  ;;  %1135 = vrot.lane.b32.xlu0 %v1884_v7, %s2106_s29  ;;  %1907 = vrcp.f32 %v992_v16  ;;  %v1890_v28 = vpop.eup %1889 }
 0x128   : > { %v1695_v25 = vpack.c.bf16 %v2458_v14, %v2458_v14  ;;  %1105 = vrot.lane.b32.xlu1 %v1888_v15, %s2106_s29  ;;  %v603_v26 = vpop.f32.mrf.mxu0  ;;  %v1892_v32 = vpop.eup %1891  ;;  %v977_v33 = vadd.f32 1.0, %v1890_v28  ;;  %1909 = vpow2.f32 %v1622_v17  ;;  %v1624_v17 = vmul.f32 -1.442695, %v2441_v59 }
 0x129   : > { %v667_v27 = vpop.f32.mrf.mxu1  ;;  %822 = vst.msk [vmem:[%s2282_s11 + $0x2c] sm:$0xf] %vm810_vm1, %v1679_v24  ;;  %v2473_v30 = vadd.f32 %v2270_v42, %v603_v26  ;;  %v1894_v40 = vpop.eup %1893 }
 0x12a   : > { %838 = vst.msk [vmem:[%s2282_s11 + $0x6c] sm:$0xf] %vm810_vm1, %v1695_v25  ;;  %v2476_v31 = vadd.f32 %v2270_v42, %v667_v27  ;;  %v605_v38 = vpop.f32.mrf.mxu0  ;;  %1911 = vrcp.f32 %v977_v33  ;;  %v993_v47 = vadd.f32 1.0, %v1894_v40  ;;  %v1609_v27 = vmul.f32 -1.442695, %v2455_v13 }
 0x12b   : > { %v669_v39 = vpop.f32.mrf.mxu1  ;;  %v1680_v41 = vpack.c.bf16 %v2473_v30, %v2473_v30  ;;  %v1896_v44 = vpop.eup %1895  ;;  %1913 = vpow2.f32 %v1607_v29 }
 0x12c   : > { %v1696_v43 = vpack.c.bf16 %v2476_v31, %v2476_v31  ;;  %1137 = vrot.lane.b32.xlu1 %v1892_v32, %s2106_s29  ;;  %v606_v49 = vpop.f32.mrf.mxu0  ;;  %1107 = vrot.lane.b32.xlu0 %v1896_v44, %s2106_s29  ;;  %v1898_v57 = vpop.eup %1897  ;;  %1915 = vrcp.f32 %v993_v47 }
 0x12d   : > { %v670_v50 = vpop.f32.mrf.mxu1  ;;  %823 = vst.msk [vmem:[%s2282_s11 + $0x30] sm:$0xf] %vm810_vm1, %v1680_v41  ;;  %v2490_v53 = vadd.f32 %v2270_v42, %v606_v49  ;;  %v1900_v62 = vpop.eup %1899  ;;  %1917 = vpow2.f32 %v1623_v48 }
 0x12e   : > { %839 = vst.msk [vmem:[%s2282_s11 + $0x70] sm:$0xf] %vm810_vm1, %v1696_v43  ;;  %v2493_v54 = vadd.f32 %v2270_v42, %v670_v50  ;;  %v608_v60 = vpop.f32.mrf.mxu0  ;;  %v978_v6 = vadd.f32 1.0, %v1900_v62  ;;  %v1625_v50 = vmul.f32 -1.442695, %v2458_v14 }
 0x12f   : > { %v672_v61 = vpop.f32.mrf.mxu1  ;;  %v1681_v0 = vpack.c.bf16 %v2490_v53, %v2490_v53  ;;  %v1610_v62 = vmul.f32 -1.442695, %v2473_v30 }
 0x130   : > { %v1697_v3 = vpack.c.bf16 %v2493_v54, %v2493_v54  ;;  %v611_v7 = vpop.f32.mrf.mxu0  ;;  %1139 = vrot.lane.b32.xlu0 %v1898_v57, %s2106_s29  ;;  %1919 = vrcp.f32 %v978_v6 }
 0x131   : > { %v675_v8 = vpop.f32.mrf.mxu1  ;;  %v1902_v9 = vpop.eup %1901  ;;  %824 = vst.msk [vmem:[%s2282_s11 + $0x34] sm:$0xf] %vm810_vm1, %v1681_v0  ;;  %v2506_v10 = vadd.f32 %v2270_v42, %v611_v7  ;;  %1921 = vpow2.f32 %v1608_v63 }
 0x132   : > { %840 = vst.msk [vmem:[%s2282_s11 + $0x74] sm:$0xf] %vm810_vm1, %v1697_v3  ;;  %v2509_v15 = vadd.f32 %v2270_v42, %v675_v8  ;;  %v1904_v16 = vpop.eup %1903  ;;  %1109 = vrot.lane.b32.xlu1 %v1902_v9, %s2106_s29  ;;  %v613_v18 = vpop.f32.mrf.mxu0  ;;  %v1626_v3 = vmul.f32 -1.442695, %v2476_v31  ;;  %v1611_v9 = vmul.f32 -1.442695, %v2490_v53 }
 0x133   : > { %v677_v23 = vpop.f32.mrf.mxu1  ;;  %v994_v24 = vadd.f32 1.0, %v1904_v16  ;;  %v1682_v25 = vpack.c.bf16 %v2506_v10, %v2506_v10  ;;  %v1906_v26 = vpop.eup %1905 }
 0x134   : > { %v1698_v28 = vpack.c.bf16 %v2509_v15, %v2509_v15  ;;  %v614_v29 = vpop.f32.mrf.mxu0  ;;  %v1908_v33 = vpop.eup %1907  ;;  %v979_v38 = vadd.f32 1.0, %v1906_v26 }
 0x135   : > { %v678_v32 = vpop.f32.mrf.mxu1  ;;  %1923 = vrcp.f32 %v994_v24  ;;  %825 = vst.msk [vmem:[%s2282_s11 + $0x38] sm:$0xf] %vm810_vm1, %v1682_v25  ;;  %v2521_v39 = vadd.f32 %v2270_v42, %v614_v29  ;;  %v1910_v44 = vpop.eup %1909  ;;  %v1627_v24 = vmul.f32 -1.442695, %v2493_v54 }
 0x136   : > { %v2524_v40 = vadd.f32 %v2270_v42, %v678_v32  ;;  %1925 = vpow2.f32 %v1624_v17  ;;  %841 = vst.msk [vmem:[%s2282_s11 + $0x78] sm:$0xf] %vm810_vm1, %v1698_v28  ;;  %1141 = vrot.lane.b32.xlu1 %v1908_v33, %s2106_s29  ;;  %v616_v41 = vpop.f32.mrf.mxu0  ;;  %v995_v49 = vadd.f32 1.0, %v1910_v44  ;;  %v1612_v28 = vmul.f32 -1.442695, %v2506_v10 }
 0x137   : > { %v680_v43 = vpop.f32.mrf.mxu1  ;;  %1927 = vrcp.f32 %v979_v38  ;;  %v1683_v47 = vpack.c.bf16 %v2521_v39, %v2521_v39  ;;  %v1912_v42 = vpop.eup %1911  ;;  %v1628_v38 = vmul.f32 -1.442695, %v2509_v15  ;;  %v1613_v44 = vmul.f32 -1.442695, %v2521_v39 }
 0x138   : > { %v1699_v48 = vpack.c.bf16 %v2524_v40, %v2524_v40  ;;  %1929 = vpow2.f32 %v1609_v27  ;;  %v1914_v57 = vpop.eup %1913  ;;  %1111 = vrot.lane.b32.xlu0 %v1912_v42, %s2106_s29  ;;  %v1629_v42 = vmul.f32 -1.442695, %v2524_v40 }
 0x139   : > { %826 = vst.msk [vmem:[%s2282_s11 + $0x3c] sm:$0xf] %vm810_vm1, %v1683_v47  ;;  %1931 = vrcp.f32 %v995_v49  ;;  %v1916_v60 = vpop.eup %1915  ;;  %v980_v61 = vadd.f32 1.0, %v1914_v57 }
 0x13a   : > { %842 = vst.msk [vmem:[%s2282_s11 + $0x7c] sm:$0xf] %vm810_vm1, %v1699_v48  ;;  %1933 = vpow2.f32 %v1625_v50  ;;  %v1918_v63 = vpop.eup %1917 }
 0x13b   : > { %1935 = vrcp.f32 %v980_v61  ;;  %v996_v0 = vadd.f32 1.0, %v1918_v63 }
 0x13c   : > { %1143 = vrot.lane.b32.xlu0 %v1916_v60, %s2106_s29  ;;  %1937 = vpow2.f32 %v1610_v62 }
 0x13d   : > { %v1920_v6 = vpop.eup %1919  ;;  %1939 = vrcp.f32 %v996_v0 }
 0x13e   : > { %v1922_v7 = vpop.eup %1921  ;;  %1113 = vrot.lane.b32.xlu1 %v1920_v6, %s2106_s29  ;;  %1941 = vpow2.f32 %v1626_v3 }
 0x13f   : > { %v981_v8 = vadd.f32 1.0, %v1922_v7 }
 0x141   : > { %1943 = vrcp.f32 %v981_v8 }
 0x142   : > { %v1924_v16 = vpop.eup %1923  ;;  %1945 = vpow2.f32 %v1611_v9 }
 0x143   : > { %v1926_v17 = vpop.eup %1925  ;;  %1145 = vrot.lane.b32.xlu1 %v1924_v16, %s2106_s29 }
 0x144   : > { %v1928_v18 = vpop.eup %1927  ;;  %v997_v23 = vadd.f32 1.0, %v1926_v17 }
 0x145   : > { %1115 = vrot.lane.b32.xlu0 %v1928_v18, %s2106_s29  ;;  %v1930_v25 = vpop.eup %1929 }
 0x146   : > { %1947 = vrcp.f32 %v997_v23  ;;  %v1932_v26 = vpop.eup %1931  ;;  %v982_v27 = vadd.f32 1.0, %v1930_v25 }
 0x147   : > { %1949 = vpow2.f32 %v1627_v24  ;;  %v1934_v29 = vpop.eup %1933 }
 0x148   : > { %1951 = vrcp.f32 %v982_v27  ;;  %v1936_v32 = vpop.eup %1935  ;;  %v998_v33 = vadd.f32 1.0, %v1934_v29 }
 0x149   : > { %1147 = vrot.lane.b32.xlu0 %v1932_v26, %s2106_s29  ;;  %1953 = vpow2.f32 %v1612_v28  ;;  %1117 = vrot.lane.b32.xlu1 %v1936_v32, %s2106_s29  ;;  %v1938_v41 = vpop.eup %1937 }
 0x14a   : > { %1955 = vrcp.f32 %v998_v33  ;;  %v983_v43 = vadd.f32 1.0, %v1938_v41  ;;  %v1940_v47 = vpop.eup %1939 }
 0x14b   : > { %1957 = vpow2.f32 %v1628_v38  ;;  %v1942_v48 = vpop.eup %1941 }
 0x14c   : > { %1959 = vrcp.f32 %v983_v43  ;;  %v999_v50 = vadd.f32 1.0, %v1942_v48 }
 0x14d   : > { %1149 = vrot.lane.b32.xlu1 %v1940_v47, %s2106_s29  ;;  %1961 = vpow2.f32 %v1613_v44 }
 0x14e   : > { %v1944_v49 = vpop.eup %1943  ;;  %1963 = vrcp.f32 %v999_v50 }
 0x14f   : > { %1119 = vrot.lane.b32.xlu0 %v1944_v49, %s2106_s29  ;;  %v1946_v57 = vpop.eup %1945  ;;  %1965 = vpow2.f32 %v1629_v42 }
 0x150   : > { %v984_v61 = vadd.f32 1.0, %v1946_v57 }
 0x152   : > { %1967 = vrcp.f32 %v984_v61 }
 0x153   : > { %v1948_v60 = vpop.eup %1947 }
 0x154   : > { %v1950_v62 = vpop.eup %1949  ;;  %1151 = vrot.lane.b32.xlu0 %v1948_v60, %s2106_s29 }
 0x155   : > { %v1952_v63 = vpop.eup %1951  ;;  %v1000_v0 = vadd.f32 1.0, %v1950_v62 }
 0x156   : > { %1121 = vrot.lane.b32.xlu1 %v1952_v63, %s2106_s29  ;;  %v1954_v3 = vpop.eup %1953 }
 0x157   : > { %1969 = vrcp.f32 %v1000_v0  ;;  %v985_v6 = vadd.f32 1.0, %v1954_v3  ;;  %v1956_v7 = vpop.eup %1955 }
 0x158   : > { %v1958_v8 = vpop.eup %1957 }
 0x159   : > { %1971 = vrcp.f32 %v985_v6  ;;  %v1960_v9 = vpop.eup %1959  ;;  %v1001_v16 = vadd.f32 1.0, %v1958_v8 }
 0x15a   : > { %1153 = vrot.lane.b32.xlu1 %v1956_v7, %s2106_s29  ;;  %1123 = vrot.lane.b32.xlu0 %v1960_v9, %s2106_s29  ;;  %v1962_v17 = vpop.eup %1961 }
 0x15b   : > { %1973 = vrcp.f32 %v1001_v16  ;;  %v1964_v18 = vpop.eup %1963  ;;  %v986_v23 = vadd.f32 1.0, %v1962_v17 }
 0x15c   : > { %v1966_v24 = vpop.eup %1965 }
 0x15d   : > { %1975 = vrcp.f32 %v986_v23  ;;  %v1002_v26 = vadd.f32 1.0, %v1966_v24 }
 0x15e   : > { %1155 = vrot.lane.b32.xlu0 %v1964_v18, %s2106_s29 }
 0x15f   : > { %v1968_v25 = vpop.eup %1967  ;;  %1977 = vrcp.f32 %v1002_v26 }
 0x160   : > { %1125 = vrot.lane.b32.xlu1 %v1968_v25, %s2106_s29  ;;  %1979 = vtanh.f32 %v2274_v45 }
 0x161   : > { %1981 = vtanh.f32 %v2277_v46 }
 0x162   : > { %1983 = vtanh.f32 %v2298_v56 }
 0x163   : > { %1985 = vtanh.f32 %v2295_v55 }
 0x164   : > { %v1970_v27 = vpop.eup %1969  ;;  %1987 = vtanh.f32 %v2311_v1 }
 0x165   : > { %1157 = vrot.lane.b32.xlu1 %v1970_v27, %s2106_s29  ;;  %1989 = vtanh.f32 %v2314_v2 }
 0x166   : > { %v1972_v28 = vpop.eup %1971  ;;  %1991 = vtanh.f32 %v2327_v11 }
 0x167   : > { %1127 = vrot.lane.b32.xlu0 %v1972_v28, %s2106_s29  ;;  %1993 = vtanh.f32 %v2330_v12 }
 0x168   : > { %v1974_v29 = vpop.eup %1973  ;;  %1995 = vtanh.f32 %v2343_v21 }
 0x169   : > { %1997 = vtanh.f32 %v2346_v22 }
 0x16a   : > { %v1976_v32 = vpop.eup %1975  ;;  %1999 = vtanh.f32 %v2357_v35 }
 0x16b   : > { %1159 = vrot.lane.b32.xlu0 %v1974_v29, %s2106_s29  ;;  %1129 = vrot.lane.b32.xlu1 %v1976_v32, %s2106_s29  ;;  %2001 = vtanh.f32 %v2360_v36 }
 0x16c   : > { %v1978_v33 = vpop.eup %1977  ;;  %2003 = vtanh.f32 %v2372_v51 }
 0x16d   : > { %v1980_v38 = vpop.eup %1979  ;;  %2005 = vtanh.f32 %v2375_v52 }
 0x16e   : > { %v1982_v44 = vpop.eup %1981  ;;  %2007 = vtanh.f32 %v2387_v4 }
 0x16f   : > { %1161 = vrot.lane.b32.xlu1 %v1978_v33, %s2106_s29  ;;  %v1984_v56 = vpop.eup %1983  ;;  %2009 = vtanh.f32 %v2390_v5 }
 0x170   : > { %v1986_v47 = vpop.eup %1985  ;;  %2011 = vtanh.f32 %v2402_v19 }
 0x171   : > { %v1988_v12 = vpop.eup %1987  ;;  %2013 = vtanh.f32 %v2405_v20 }
 0x172   : > { %v1990_v60 = vpop.eup %1989  ;;  %2015 = vtanh.f32 %v2420_v34 }
 0x173   : > { %v1992_v63 = vpop.eup %1991  ;;  %2017 = vtanh.f32 %v2423_v37 }
 0x174   : > { %v1994_v7 = vpop.eup %1993  ;;  %2019 = vtanh.f32 %v2438_v58 }
 0x175   : > { %v1996_v9 = vpop.eup %1995  ;;  %2021 = vtanh.f32 %v2441_v59 }
 0x176   : > { %v1998_v24 = vpop.eup %1997  ;;  %2023 = vtanh.f32 %v2455_v13 }
 0x177   : > { %v2000_v26 = vpop.eup %1999  ;;  %2025 = vtanh.f32 %v2458_v14 }
 0x178   : > { %v2002_v33 = vpop.eup %2001  ;;  %2027 = vtanh.f32 %v2473_v30 }
 0x179   : > { %2029 = vtanh.f32 %v2476_v31 }
 0x17a   : > { %2031 = vtanh.f32 %v2490_v53 }
 0x17b   : > { %2033 = vtanh.f32 %v2493_v54 }
 0x18d   : > { %v1100_v41 = vpop.permute.xlu0 %1099 }
 0x18e   : > { %v1195_v43 = vmul.f32 %v1980_v38, %v1100_v41 }
 0x190   : > { %v1700_v45 = vpack.c.bf16 %v1195_v43, %v1195_v43  ;;  %v2004_v43 = vpop.eup %2003  ;;  %2035 = vtanh.f32 %v2506_v10 }
 0x191   : > { %v1132_v46 = vpop.permute.xlu0 %1131 }
 0x192   : > { %1356 = vst.msk [vmem:[%s2578_s22] sm:$0xf] %vm1355_vm2, %v1700_v45  ;;  %v1134_v55 = vpop.permute.xlu1 %1133  ;;  %v1211_v1 = vmul.f32 %v1982_v44, %v1132_v46  ;;  %v2006_v46 = vpop.eup %2005  ;;  %2037 = vtanh.f32 %v2509_v15 }
 0x193   : > { %v1212_v2 = vmul.f32 %v1984_v56, %v1134_v55  ;;  %v2008_v55 = vpop.eup %2007  ;;  %2039 = vtanh.f32 %v2521_v39 }
 0x194   : > { %v1716_v11 = vpack.c.bf16 %v1211_v1, %v1211_v1  ;;  %v2010_v20 = vpop.eup %2009  ;;  %2041 = vtanh.f32 %v2524_v40 }
 0x195   : > { %v1717_v48 = vpack.c.bf16 %v1212_v2, %v1212_v2  ;;  %v1102_v49 = vpop.permute.xlu0 %1101  ;;  %v2012_v34 = vpop.eup %2011 }
 0x196   : > { %1372 = vst.msk [vmem:[%s2578_s22 + $0x40] sm:$0xf] %vm1355_vm2, %v1716_v11  ;;  %v1104_v21 = vpop.permute.xlu1 %1103  ;;  %v1196_v50 = vmul.f32 %v1986_v47, %v1102_v49  ;;  %v2014_v37 = vpop.eup %2013 }
 0x197   : > { %1373 = vst.msk [vmem:[%s2578_s22 + $0x44] sm:$0xf] %vm1355_vm2, %v1717_v48  ;;  %v1197_v42 = vmul.f32 %v1988_v12, %v1104_v21 }
 0x198   : > { %v1701_v57 = vpack.c.bf16 %v1196_v50, %v1196_v50 }
 0x199   : > { %v1702_v61 = vpack.c.bf16 %v1197_v42, %v1197_v42  ;;  %v1136_v62 = vpop.permute.xlu0 %1135 }
 0x19a   : > { %1357 = vst.msk [vmem:[%s2578_s22 + $0x4] sm:$0xf] %vm1355_vm2, %v1701_v57  ;;  %v1106_v22 = vpop.permute.xlu1 %1105  ;;  %v1213_v0 = vmul.f32 %v1990_v60, %v1136_v62  ;;  %v2016_v57 = vpop.eup %2015 }
 0x19b   : > { %1358 = vst.msk [vmem:[%s2578_s22 + $0x8] sm:$0xf] %vm1355_vm2, %v1702_v61  ;;  %v1198_v3 = vmul.f32 %v1992_v63, %v1106_v22  ;;  %v2018_v59 = vpop.eup %2017 }
 0x19c   : > { %v1718_v35 = vpack.c.bf16 %v1213_v0, %v1213_v0  ;;  %v2020_v0 = vpop.eup %2019 }
 0x19d   : > { %v1703_v6 = vpack.c.bf16 %v1198_v3, %v1198_v3 }
 0x19e   : > { %1374 = vst.msk [vmem:[%s2578_s22 + $0x48] sm:$0xf] %vm1355_vm2, %v1718_v35  ;;  %v1138_v8 = vpop.permute.xlu1 %1137  ;;  %v1108_v17 = vpop.permute.xlu0 %1107 }
 0x19f   : > { %1359 = vst.msk [vmem:[%s2578_s22 + $0xc] sm:$0xf] %vm1355_vm2, %v1703_v6  ;;  %v1214_v16 = vmul.f32 %v1994_v7, %v1138_v8  ;;  %v1199_v18 = vmul.f32 %v1996_v9, %v1108_v17  ;;  %v2022_v7 = vpop.eup %2021 }
 0x1a0   : > { %v2024_v9 = vpop.eup %2023 }
 0x1a1   : > { %v1719_v36 = vpack.c.bf16 %v1214_v16, %v1214_v16  ;;  %v1704_v23 = vpack.c.bf16 %v1199_v18, %v1199_v18  ;;  %v2026_v31 = vpop.eup %2025 }
 0x1a2   : > { %v1140_v25 = vpop.permute.xlu0 %1139 }
 0x1a3   : > { %1375 = vst.msk [vmem:[%s2578_s22 + $0x4c] sm:$0xf] %vm1355_vm2, %v1719_v36  ;;  %1360 = vst.msk [vmem:[%s2578_s22 + $0x10] sm:$0xf] %vm1355_vm2, %v1704_v23  ;;  %v1215_v51 = vmul.f32 %v1998_v24, %v1140_v25  ;;  %v2028_v24 = vpop.eup %2027 }
 0x1a4   : > { %v1110_v27 = vpop.permute.xlu1 %1109 }
 0x1a5   : > { %v1200_v28 = vmul.f32 %v2000_v26, %v1110_v27  ;;  %v1720_v29 = vpack.c.bf16 %v1215_v51, %v1215_v51  ;;  %v2030_v51 = vpop.eup %2029 }
 0x1a7   : > { %v1705_v32 = vpack.c.bf16 %v1200_v28, %v1200_v28  ;;  %1376 = vst.msk [vmem:[%s2578_s22 + $0x50] sm:$0xf] %vm1355_vm2, %v1720_v29  ;;  %v2032_v29 = vpop.eup %2031 }
 0x1a8   : > { %v1142_v38 = vpop.permute.xlu1 %1141 }
 0x1a9   : > { %1361 = vst.msk [vmem:[%s2578_s22 + $0x14] sm:$0xf] %vm1355_vm2, %v1705_v32  ;;  %v1216_v52 = vmul.f32 %v2002_v33, %v1142_v38 }
 0x1aa   : > { %v1112_v45 = vpop.permute.xlu0 %1111 }
 0x1ab   : > { %v1721_v41 = vpack.c.bf16 %v1216_v52, %v1216_v52  ;;  %v1201_v4 = vmul.f32 %v2004_v43, %v1112_v45  ;;  %v2034_v52 = vpop.eup %2033 }
 0x1ac   : > { %v2036_v39 = vpop.eup %2035 }
 0x1ad   : > { %1377 = vst.msk [vmem:[%s2578_s22 + $0x54] sm:$0xf] %vm1355_vm2, %v1721_v41  ;;  %v1706_v44 = vpack.c.bf16 %v1201_v4, %v1201_v4  ;;  %v2038_v40 = vpop.eup %2037 }
 0x1ae   : > { %v1144_v5 = vpop.permute.xlu0 %1143 }
 0x1af   : > { %1362 = vst.msk [vmem:[%s2578_s22 + $0x18] sm:$0xf] %vm1355_vm2, %v1706_v44  ;;  %v1217_v56 = vmul.f32 %v2006_v46, %v1144_v5 }
 0x1b0   : > { %v1114_v19 = vpop.permute.xlu1 %1113 }
 0x1b1   : > { %v1202_v1 = vmul.f32 %v2008_v55, %v1114_v19  ;;  %v1722_v2 = vpack.c.bf16 %v1217_v56, %v1217_v56  ;;  %v2040_v55 = vpop.eup %2039 }
 0x1b3   : > { %v1707_v11 = vpack.c.bf16 %v1202_v1, %v1202_v1  ;;  %1378 = vst.msk [vmem:[%s2578_s22 + $0x58] sm:$0xf] %vm1355_vm2, %v1722_v2 }
 0x1b5   : > { %v1146_v47 = vpop.permute.xlu1 %1145  ;;  %1363 = vst.msk [vmem:[%s2578_s22 + $0x1c] sm:$0xf] %vm1355_vm2, %v1707_v11 }
 0x1b6   : > { %v1218_v48 = vmul.f32 %v2010_v20, %v1146_v47  ;;  %v2042_v20 = vpop.eup %2041 }
 0x1b7   : > { %v1116_v49 = vpop.permute.xlu0 %1115 }
 0x1b8   : > { %v1203_v12 = vmul.f32 %v2012_v34, %v1116_v49  ;;  %v1723_v21 = vpack.c.bf16 %v1218_v48, %v1218_v48 }
 0x1ba   : > { %v1708_v50 = vpack.c.bf16 %v1203_v12, %v1203_v12  ;;  %1379 = vst.msk [vmem:[%s2578_s22 + $0x5c] sm:$0xf] %vm1355_vm2, %v1723_v21 }
 0x1bb   : > { %v1148_v42 = vpop.permute.xlu0 %1147  ;;  %v1118_v60 = vpop.permute.xlu1 %1117 }
 0x1bc   : > { %1364 = vst.msk [vmem:[%s2578_s22 + $0x20] sm:$0xf] %vm1355_vm2, %v1708_v50  ;;  %v1219_v58 = vmul.f32 %v2014_v37, %v1148_v42  ;;  %v1204_v61 = vmul.f32 %v2016_v57, %v1118_v60 }
 0x1be   : > { %v1724_v62 = vpack.c.bf16 %v1219_v58, %v1219_v58  ;;  %v1709_v63 = vpack.c.bf16 %v1204_v61, %v1204_v61 }
 0x1bf   : > { %v1150_v22 = vpop.permute.xlu1 %1149 }
 0x1c0   : > { %1380 = vst.msk [vmem:[%s2578_s22 + $0x60] sm:$0xf] %vm1355_vm2, %v1724_v62  ;;  %1365 = vst.msk [vmem:[%s2578_s22 + $0x24] sm:$0xf] %vm1355_vm2, %v1709_v63  ;;  %v1220_v13 = vmul.f32 %v2018_v59, %v1150_v22 }
 0x1c1   : > { %v1120_v3 = vpop.permute.xlu0 %1119 }
 0x1c2   : > { %v1725_v35 = vpack.c.bf16 %v1220_v13, %v1220_v13  ;;  %v1205_v6 = vmul.f32 %v2020_v0, %v1120_v3 }
 0x1c4   : > { %1381 = vst.msk [vmem:[%s2578_s22 + $0x64] sm:$0xf] %vm1355_vm2, %v1725_v35  ;;  %v1710_v14 = vpack.c.bf16 %v1205_v6, %v1205_v6 }
 0x1c6   : > { %v1152_v8 = vpop.permute.xlu0 %1151  ;;  %1366 = vst.msk [vmem:[%s2578_s22 + $0x28] sm:$0xf] %vm1355_vm2, %v1710_v14 }
 0x1c7   : > { %v1221_v30 = vmul.f32 %v2022_v7, %v1152_v8 }
 0x1c8   : > { %v1122_v16 = vpop.permute.xlu1 %1121 }
 0x1c9   : > { %v1206_v17 = vmul.f32 %v2024_v9, %v1122_v16  ;;  %v1726_v18 = vpack.c.bf16 %v1221_v30, %v1221_v30 }
 0x1cb   : > { %v1711_v36 = vpack.c.bf16 %v1206_v17, %v1206_v17  ;;  %1382 = vst.msk [vmem:[%s2578_s22 + $0x68] sm:$0xf] %vm1355_vm2, %v1726_v18 }
 0x1cc   : > { %v1154_v23 = vpop.permute.xlu1 %1153  ;;  %v1124_v25 = vpop.permute.xlu0 %1123 }
 0x1cd   : > { %1367 = vst.msk [vmem:[%s2578_s22 + $0x2c] sm:$0xf] %vm1355_vm2, %v1711_v36  ;;  %v1222_v53 = vmul.f32 %v2026_v31, %v1154_v23  ;;  %v1207_v27 = vmul.f32 %v2028_v24, %v1124_v25 }
 0x1cf   : > { %v1727_v26 = vpack.c.bf16 %v1222_v53, %v1222_v53  ;;  %v1712_v54 = vpack.c.bf16 %v1207_v27, %v1207_v27 }
 0x1d0   : > { %v1156_v28 = vpop.permute.xlu0 %1155 }
 0x1d1   : > { %1383 = vst.msk [vmem:[%s2578_s22 + $0x6c] sm:$0xf] %vm1355_vm2, %v1727_v26  ;;  %1368 = vst.msk [vmem:[%s2578_s22 + $0x30] sm:$0xf] %vm1355_vm2, %v1712_v54  ;;  %v1223_v10 = vmul.f32 %v2030_v51, %v1156_v28 }
 0x1d2   : > { %v1126_v32 = vpop.permute.xlu1 %1125 }
 0x1d3   : > { %v1208_v33 = vmul.f32 %v2032_v29, %v1126_v32  ;;  %v1728_v38 = vpack.c.bf16 %v1223_v10, %v1223_v10 }
 0x1d5   : > { %v1713_v15 = vpack.c.bf16 %v1208_v33, %v1208_v33  ;;  %1384 = vst.msk [vmem:[%s2578_s22 + $0x70] sm:$0xf] %vm1355_vm2, %v1728_v38 }
 0x1d7   : > { %v1158_v41 = vpop.permute.xlu1 %1157  ;;  %1369 = vst.msk [vmem:[%s2578_s22 + $0x34] sm:$0xf] %vm1355_vm2, %v1713_v15 }
 0x1d8   : > { %v1224_v43 = vmul.f32 %v2034_v52, %v1158_v41 }
 0x1d9   : > { %v1128_v45 = vpop.permute.xlu0 %1127 }
 0x1da   : > { %v1729_v4 = vpack.c.bf16 %v1224_v43, %v1224_v43  ;;  %v1209_v44 = vmul.f32 %v2036_v39, %v1128_v45 }
 0x1dc   : > { %1385 = vst.msk [vmem:[%s2578_s22 + $0x74] sm:$0xf] %vm1355_vm2, %v1729_v4  ;;  %v1714_v46 = vpack.c.bf16 %v1209_v44, %v1209_v44 }
 0x1dd   : > { %v1160_v5 = vpop.permute.xlu0 %1159  ;;  %v1130_v19 = vpop.permute.xlu1 %1129 }
 0x1de   : > { %1370 = vst.msk [vmem:[%s2578_s22 + $0x38] sm:$0xf] %vm1355_vm2, %v1714_v46  ;;  %v1225_v56 = vmul.f32 %v2038_v40, %v1160_v5  ;;  %v1210_v1 = vmul.f32 %v2040_v55, %v1130_v19 }
 0x1e0   : > { %v1730_v2 = vpack.c.bf16 %v1225_v56, %v1225_v56  ;;  %v1715_v11 = vpack.c.bf16 %v1210_v1, %v1210_v1 }
 0x1e1   : > { %v1162_v47 = vpop.permute.xlu1 %1161 }
 0x1e2   : > { %1386 = vst.msk [vmem:[%s2578_s22 + $0x78] sm:$0xf] %vm1355_vm2, %v1730_v2  ;;  %1371 = vst.msk [vmem:[%s2578_s22 + $0x3c] sm:$0xf] %vm1355_vm2, %v1715_v11  ;;  %v1226_v34 = vmul.f32 %v2042_v20, %v1162_v47 }
 0x1e4   : > { %v1731_v48 = vpack.c.bf16 %v1226_v34, %v1226_v34 }
 0x1e6   : > { %1387 = vst.msk [vmem:[%s2578_s22 + $0x7c] sm:$0xf] %vm1355_vm2, %v1731_v48 }
 0x1e7   : > { %2056 = shalt.err (!%p2053_p3)
}
 0x1e8   : > { %s2057_s10 = scalar_lea.hbm %s2670_s5, 2048  ;;  %s2061_s11 = scalar_lea.hbm %s2722_s4, 4096 }
 0x1e9   : > { %p2058_p4 = scmp.ne.s32.totalorder %s2670_s5, %s2057_s10  ;;  %p2062_p9 = scmp.lt.s32.totalorder %s2670_s5, %s2722_s4 }
 0x1ea   : > { %p2063_p10 = scmp.lt.s32.totalorder %s2061_s11, %s2057_s10 }
 0x1eb   : > { %p2059_p7 = pnand %p2058_p4, %p2173_p5 }
 0x1ec   : > { %p2064_p11 = por %p2063_p10, %p2062_p9 }
 0x1ed   : > { %p2060_p8 = pneg %p2059_p7 }
 0x1ef   : > { %p2065_p12 = pnand %p2064_p11, %p2060_p8 }
 0x1f1   : > { %2068 = shalt.err (!%p2065_p12)
}
 0x1f2   : > { %s2108_s20 = smov 64   ;;  %s2109_s22 = smov 4  }
 0x1f3   : > { %1751 = dma.vmem_to_hbm [thread:$0]  (%p2173_p5), %s2672_s27, 2048, %s2670_s5, %s2678_s19, %s2108_s20, %s2108_s20, %s2109_s22  }
 0x1f4 PF: > { %p1757_p13 = scmp.ge.s32.totalorder %s2103_s18, 2  ;;  %s1434_s23 = sand.u32 1, %s2091_s15  }
 0x1f5   : > { %s1435_s28 = scalar_lea.sflag [#allocation3], %s1434_s23 }
 0x1f6   : > { %p1754_p0 = pnand %p1757_p13, %p2177_p6 }
 0x1f8   : > { %p1755_p1 = pneg %p1754_p0 }
 0x1fa   : > { %2086 = dma.done.wait (%p1755_p1), %s1435_s28, 2048  }
 0x1fb   : > { %2088 = vsyncadd (%p1755_p1), %s1435_s28, 4294965248  ;;  %p15_p2 = scmp.ge.s32.totalorder %s2160_s21, 4   ;;  %s2725_s15 = smov %s2095_s16 }
 0x1fc   : > { %s2726_s16 = smov %s2099_s17  ;;  %s2727_s17 = smov %s2171_s24 }
 0x1fd   : > { %s2728_s18 = smov %s2160_s21  ;;  %17 = sbr.rel (!%p15_p2) target bundleno = 3 (0x3), region = 79 }
 0x202   :  { %1440 = vsyncpa [#allocation3], 1 }
 0x203   :  { %1442 = vsyncpa [#allocation3 + $0x1], 1 }

// kernel: pixelcnn_forward.30
= control target key start
LH: loop header
LB: loop body
LE: loop exit
PB: predicated region body
PF: predicated region fallthrough
CT: control target
= control target key end

     0   :  { %s2477_s27 = smov 0   ;;  %s2988_s0 = inlined_call_operand.vmem [shape: bf16[512,35], index: 0, kind: input, shape index: {}]   ;;  %s2989_s1 = inlined_call_operand.vmem [shape: bf16[512,32], index: 1, kind: input, shape index: {}]   ;;  %s2990_s2 = inlined_call_operand.vmem [shape: bf16[35,32], index: 2, kind: input, shape index: {}]   ;;  %s2991_s3 = inlined_call_operand.vmem [shape: bf16[32,32], index: 3, kind: input, shape index: {}]   ;;  %s2992_s4 = inlined_call_operand.vmem [shape: f32[1,32], index: 4, kind: input, shape index: {}]   ;;  %s2993_s5 = inlined_call_operand.vmem [shape: bf16[16,16], index: 5, kind: input, shape index: {}]   ;;  %s2994_s6 = inlined_call_operand.vmem [shape: f32[1,16], index: 6, kind: input, shape index: {}]   ;;  %s2995_s7 = inlined_call_operand.vmem [shape: f32[512,16], index: 7, kind: input, shape index: {}]   ;;  %s2996_s8 = inlined_call_operand.vmem [shape: f32[512,16], index: 8, kind: output, shape index: {}]  }
   0x1 LB: > { %s1881_s28 = sadd.s32 4294967295, %s2428_s27   ;;  %p1885_p0 = scmp.ge.s32.totalorder %s2428_s27, 1  ;;  %s2428_s27 = sphi %s2477_s27, %s18_s27  }
   0x2   : > { %p285_p1 = scmp.lt.s32.totalorder %s2428_s27, 3 }
   0x4   : > { %p286_p2 = pnand %p1885_p0, %p285_p1 }
   0x5   : > { %s1886_s9 = sshll.u32 (!%p286_p2), %s1881_s28, 5  ;;  %s2431_s30 = smov (!%p286_p2), 112  }
   0x6   : > { %289 = sbr.rel (%p286_p2) target bundleno = 694 (0x2b6), region = 52  ;;  %p330_p3 = scmp.lt.s32.totalorder (!%p286_p2), %s1886_s9, 63 }
   0xb   : > { %v2192_v0 = vld [vmem:[%s2991_s3 + $0x8] sm:$0xff]   ;;  %v2193_v1 = vld [vmem:[%s2991_s3] sm:$0xff]   ;;  %v2196_v2 = vld [vmem:[%s2990_s2 + $0x10] ss:$0 sps:$4 sm:$0x33]   ;;  %s2998_s9 = smov (!%p330_p3, %s1886_s9), 63 }
   0xc   : > { %2178 = vmatprep.subr.bf16.mxu1 %v2192_v0  ;;  %2070 = vmatprep.subr.bf16.mxu0 %v2192_v0  ;;  %vm873_vm0 = vcmask 1040384   ;;  %vm874_vm1 = vcmask 1041408   ;;  %v2430_v3 = vmov 65535   ;;  %s1887_s14 = sshll.u32 %s2998_s9, 2  ;;  %vm519_vm2 = vcmask 261120   ;;  %v2199_v7 = vld [vmem:[%s2990_s2 + $0x8] sm:$0xff]  }
   0xd   : > { %2180 = vmatpush3.bf16.msra.mxu1 %v2192_v0  ;;  %2071 = vmatpush3.bf16.msra.mxu0 %v2192_v0  ;;  %v875_v4 = vsel %vm873_vm0, 4294967295, %v2430_v3  ;;  %s2500_s17 = scalar_lea.vmem %s2989_s1, %s1887_s14  ;;  %v2202_v11 = vld [vmem:[%s2990_s2] sm:$0xff]   ;;  %s2520_s24 = scalar_lea.vmem %s2988_s0, %s1887_s14  ;;  %vm824_vm3 = vcmask 285696   ;;  %vm1495_vm4 = vcmask 130048  }
   0xe   : > { %2179 = vmatprep.subr.bf16.mxu1 %v2193_v1  ;;  %2072 = vmatprep.subr.bf16.mxu0 %v2193_v1  ;;  %v876_v5 = vsel %vm874_vm1, %v875_v4, 0  ;;  %v2194_v8 = vld [vmem:[%s2500_s17 + $0x40] sm:$0xff]   ;;  %v2195_v9 = vld [vmem:[%s2500_s17 + $0x48] sm:$0xff]   ;;  %v2197_v10 = vld [vmem:[%s2500_s17 + $0x50] sm:$0xff]   ;;  %s1891_s10 = sshll.u32 %s2998_s9, 3 }
   0xf   : > { %v878_v6 = vand.u32 %v2196_v2, %v876_v5  ;;  %2090 = vmatprep.mubr.msk.bf16.mxu1 %vm519_vm2, %v2194_v8  ;;  %v2198_v12 = vld [vmem:[%s2500_s17 + $0x58] sm:$0xff]   ;;  %v2200_v13 = vld [vmem:[%s2500_s17 + $0x60] sm:$0xff]   ;;  %v2206_v15 = vld [vmem:[%s2500_s17 + $0x8] sm:$0xff]   ;;  %s2845_s13 = scalar_lea.vmem %s2995_s7, %s1891_s10 }
  0x10   : > { %v2205_v14 = vld [vmem:[%s2500_s17] sm:$0xff]   ;;  %v2209_v16 = vld [vmem:[%s2500_s17 + $0x10] sm:$0xff]   ;;  %v2201_v17 = vld [vmem:[%s2500_s17 + $0x68] sm:$0xff]  }
  0x11   : > { %2181 = vmatpush3.bf16.msra.mxu1 %v2193_v1  ;;  %2073 = vmatpush3.bf16.msra.mxu0 %v2193_v1  ;;  %v2203_v18 = vld [vmem:[%s2500_s17 + $0x70] sm:$0xff]   ;;  %v2210_v19 = vld [vmem:[%s2500_s17 + $0x18] sm:$0xff]   ;;  %v2213_v20 = vld [vmem:[%s2500_s17 + $0x20] sm:$0xff]  }
  0x12   : > { %2106 = vmatprep.subr.bf16.mxu1 %v878_v6  ;;  %2074 = vmatprep.mubr.msk.bf16.mxu0 %vm519_vm2, %v2205_v14  ;;  %v2204_v21 = vld [vmem:[%s2500_s17 + $0x78] sm:$0xff]   ;;  %v2207_v22 = vld [vmem:[%s2520_s24] sm:$0xff]   ;;  %v2214_v23 = vld [vmem:[%s2500_s17 + $0x28] sm:$0xff]  }
  0x13   : > { %v2217_v24 = vld [vmem:[%s2500_s17 + $0x30] sm:$0xff]   ;;  %v2208_v25 = vld [vmem:[%s2520_s24 + $0x8] sm:$0xff]   ;;  %v2218_v26 = vld [vmem:[%s2500_s17 + $0x38] sm:$0xff]   ;;  %s2857_s17 = scalar_lea.vmem %s2996_s8, %s1891_s10 }
  0x14   : > { %2091 = vmatmul.mubr.msk.bf16.vlgmr.msra.gmra.mxu1 %vm519_vm2, %v2195_v9  ;;  %2075 = vmatmul.mubr.msk.bf16.vlgmr.msra.gmra.mxu0 %vm519_vm2, %v2206_v15  ;;  %v2211_v27 = vld [vmem:[%s2520_s24 + $0x10] sm:$0xff]   ;;  %v2212_v28 = vld [vmem:[%s2520_s24 + $0x18] sm:$0xff]   ;;  %v2215_v29 = vld [vmem:[%s2520_s24 + $0x20] sm:$0xff]  }
  0x15   : > { %2107 = vmatpush3.bf16.msra.mxu1 %v878_v6  ;;  %2094 = vmatprep.mubr.msk.bf16.mxu1 %vm519_vm2, %v2197_v10  ;;  %v2216_v30 = vld [vmem:[%s2520_s24 + $0x28] sm:$0xff]   ;;  %v2219_v31 = vld [vmem:[%s2520_s24 + $0x30] sm:$0xff]   ;;  %v2220_v32 = vld [vmem:[%s2520_s24 + $0x38] sm:$0xff]  }
  0x16   : > { %2108 = vmatprep.subr.bf16.mxu1 %v2199_v7  ;;  %2078 = vmatprep.mubr.msk.bf16.mxu0 %vm519_vm2, %v2209_v16  ;;  %v2221_v33 = vld [vmem:[%s2520_s24 + $0x40] sm:$0xff]   ;;  %v2222_v34 = vld [vmem:[%s2520_s24 + $0x48] sm:$0xff]   ;;  %v2223_v35 = vld [vmem:[%s2520_s24 + $0x50] sm:$0xff]  }
  0x17   : > { %v2224_v36 = vld [vmem:[%s2520_s24 + $0x58] sm:$0xff]   ;;  %v2225_v37 = vld [vmem:[%s2520_s24 + $0x60] sm:$0xff]   ;;  %v2226_v38 = vld [vmem:[%s2520_s24 + $0x68] sm:$0xff]  }
  0x18   : > { %v2227_v39 = vld [vmem:[%s2520_s24 + $0x70] sm:$0xff]   ;;  %v2228_v40 = vld [vmem:[%s2520_s24 + $0x78] sm:$0xff]   ;;  %v2612_v1 = vld [vmem:[%s2992_s4] ss:$0 sm:$0xff] }
  0x19   : > { %2109 = vmatpush3.bf16.msra.mxu1 %v2199_v7  ;;  %v2229_v3 = vld [vmem:[%s2993_s5] sm:$0xff]  }
  0x1a   : > { %2110 = vmatprep.subr.bf16.mxu1 %v2202_v11  ;;  %2144 = vmatprep.subr.bf16.mxu0 %v2229_v3 }
  0x1b   : > { %2145 = vmatpush3.bf16.msra.mxu0 %v2229_v3 }
  0x1c   : > { %2095 = vmatmul.mubr.msk.bf16.gmra.mxu1 %vm519_vm2, %v2198_v12  ;;  %2079 = vmatmul.mubr.msk.bf16.gmra.mxu0 %vm519_vm2, %v2210_v19 }
  0x1d   : > { %2098 = vmatprep.mubr.msk.bf16.mxu1 %vm519_vm2, %v2200_v13  ;;  %2111 = vmatpush3.bf16.msra.mxu1 %v2202_v11 }
  0x1e   : > { %2082 = vmatprep.mubr.msk.bf16.mxu0 %vm519_vm2, %v2213_v20 }
  0x24   : > { %2099 = vmatmul.mubr.msk.bf16.gmra.mxu1 %vm519_vm2, %v2201_v17  ;;  %2083 = vmatmul.mubr.msk.bf16.gmra.mxu0 %vm519_vm2, %v2214_v23 }
  0x25   : > { %2102 = vmatprep.mubr.msk.bf16.mxu1 %vm519_vm2, %v2203_v18  ;;  %2086 = vmatprep.mubr.msk.bf16.mxu0 %vm519_vm2, %v2217_v24 }
  0x2c   : > { %2103 = vmatmul.mubr.msk.bf16.gmra.mxu1 %vm519_vm2, %v2204_v21  ;;  %2087 = vmatmul.mubr.msk.bf16.gmra.mxu0 %vm519_vm2, %v2218_v26 }
  0x2d   : > { %2112 = vmatprep.mubr.msk.bf16.mxu1 %vm824_vm3, %v2207_v22 }
  0x34   : > { %2113 = vmatmul.mubr.msk.bf16.vlgmr.msra.gmra.mxu1 %vm824_vm3, %v2208_v25 }
  0x35   : > { %2116 = vmatprep.mubr.msk.bf16.mxu1 %vm824_vm3, %v2211_v27 }
  0x3c   : > { %2117 = vmatmul.mubr.msk.bf16.gmra.mxu1 %vm824_vm3, %v2212_v28 }
  0x3d   : > { %2120 = vmatprep.mubr.msk.bf16.mxu1 %vm824_vm3, %v2215_v29 }
  0x44   : > { %2121 = vmatmul.mubr.msk.bf16.gmra.mxu1 %vm824_vm3, %v2216_v30 }
  0x45   : > { %2124 = vmatprep.mubr.msk.bf16.mxu1 %vm824_vm3, %v2219_v31 }
  0x4c   : > { %2125 = vmatmul.mubr.msk.bf16.gmra.mxu1 %vm824_vm3, %v2220_v32 }
  0x4d   : > { %2128 = vmatprep.mubr.msk.bf16.mxu1 %vm824_vm3, %v2221_v33 }
  0x54   : > { %2129 = vmatmul.mubr.msk.bf16.gmra.mxu1 %vm824_vm3, %v2222_v34 }
  0x55   : > { %2132 = vmatprep.mubr.msk.bf16.mxu1 %vm824_vm3, %v2223_v35 }
  0x5c   : > { %2133 = vmatmul.mubr.msk.bf16.gmra.mxu1 %vm824_vm3, %v2224_v36 }
  0x5d   : > { %2136 = vmatprep.mubr.msk.bf16.mxu1 %vm824_vm3, %v2225_v37 }
  0x64   : > { %2137 = vmatmul.mubr.msk.bf16.gmra.mxu1 %vm824_vm3, %v2226_v38 }
  0x65   : > { %2140 = vmatprep.mubr.msk.bf16.mxu1 %vm824_vm3, %v2227_v39 }
  0x6c   : > { %2141 = vmatmul.mubr.msk.bf16.gmra.mxu1 %vm824_vm3, %v2228_v40 }
  0xd4   : > { %v2577_v41 = vpop.f32.mrf.mxu1  ;;  %v2076_v46 = vpop.f32.mrf.mxu0 }
  0xd6   : > { %v2579_v42 = vpop.f32.mrf.mxu1  ;;  %v602_v48 = vpop.f32.mrf.mxu0 }
  0xd8   : > { %v2581_v43 = vpop.f32.mrf.mxu1  ;;  %v2077_v51 = vpop.f32.mrf.mxu0 }
  0xda   : > { %v2583_v44 = vpop.f32.mrf.mxu1  ;;  %v605_v54 = vpop.f32.mrf.mxu0 }
  0xdc   : > { %v2585_v45 = vpop.f32.mrf.mxu1  ;;  %v2080_v57 = vpop.f32.mrf.mxu0 }
  0xde   : > { %v2587_v47 = vpop.f32.mrf.mxu1  ;;  %v618_v60 = vpop.f32.mrf.mxu0 }
  0xe0   : > { %v2589_v49 = vpop.f32.mrf.mxu1  ;;  %v2081_v63 = vpop.f32.mrf.mxu0 }
  0xe2   : > { %v2591_v50 = vpop.f32.mrf.mxu1  ;;  %v621_v5 = vpop.f32.mrf.mxu0 }
  0xe4   : > { %v2593_v52 = vpop.f32.mrf.mxu1  ;;  %v2084_v13 = vpop.f32.mrf.mxu0 }
  0xe6   : > { %v2595_v53 = vpop.f32.mrf.mxu1  ;;  %v634_v22 = vpop.f32.mrf.mxu0 }
  0xe8   : > { %v2597_v55 = vpop.f32.mrf.mxu1  ;;  %v2085_v31 = vpop.f32.mrf.mxu0 }
  0xea   : > { %v2599_v56 = vpop.f32.mrf.mxu1  ;;  %v637_v39 = vpop.f32.mrf.mxu0 }
  0xec   : > { %v2601_v58 = vpop.f32.mrf.mxu1  ;;  %v2088_v3 = vpop.f32.mrf.mxu0 }
  0xee   : > { %v2603_v59 = vpop.f32.mrf.mxu1 }
  0xf0   : > { %v2605_v61 = vpop.f32.mrf.mxu1 }
  0xf2   : > { %v2607_v62 = vpop.f32.mrf.mxu1 }
  0xf4   : > { %v2114_v0 = vpop.f32.mrf.mxu1 }
  0xf5   : > { %v923_v2 = vadd.f32 %v2114_v0, %v2076_v46 }
  0xf6   : > { %v914_v4 = vpop.f32.mrf.mxu1 }
  0xf7   : > { %v2618_v6 = vadd.f32 %v2612_v1, %v923_v2  ;;  %v915_v7 = vadd.f32 %v914_v4, %v602_v48 }
  0xf8   : > { %v2115_v8 = vpop.f32.mrf.mxu1 }
  0xf9   : > { %v1966_v9 = vmul.f32 -1.442695, %v2618_v6  ;;  %v2622_v10 = vadd.f32 %v2612_v1, %v915_v7  ;;  %v926_v11 = vadd.f32 %v2115_v8, %v2077_v51 }
  0xfa   : > { %v917_v12 = vpop.f32.mrf.mxu1 }
  0xfb   : > { %2230 = vpow2.f32 %v1966_v9  ;;  %v1964_v14 = vmul.f32 -1.442695, %v2622_v10  ;;  %v2626_v15 = vadd.f32 %v2612_v1, %v926_v11  ;;  %v918_v16 = vadd.f32 %v917_v12, %v605_v54 }
  0xfc   : > { %v2118_v17 = vpop.f32.mrf.mxu1 }
  0xfd   : > { %2232 = vpow2.f32 %v1964_v14  ;;  %v1967_v18 = vmul.f32 -1.442695, %v2626_v15  ;;  %v2630_v19 = vadd.f32 %v2612_v1, %v918_v16  ;;  %v939_v20 = vadd.f32 %v2118_v17, %v2080_v57  ;;  %v650_v16 = vpop.f32.mrf.mxu0 }
  0xfe   : > { %v930_v21 = vpop.f32.mrf.mxu1 }
  0xff   : > { %2234 = vpow2.f32 %v1967_v18  ;;  %v1965_v23 = vmul.f32 -1.442695, %v2630_v19  ;;  %v2634_v24 = vadd.f32 %v2612_v1, %v939_v20  ;;  %v931_v25 = vadd.f32 %v930_v21, %v618_v60 }
 0x100   : > { %v2119_v26 = vpop.f32.mrf.mxu1 }
 0x101   : > { %2236 = vpow2.f32 %v1965_v23  ;;  %v1970_v27 = vmul.f32 -1.442695, %v2634_v24  ;;  %v2638_v28 = vadd.f32 %v2612_v1, %v931_v25  ;;  %v942_v29 = vadd.f32 %v2119_v26, %v2081_v63 }
 0x102   : > { %v933_v30 = vpop.f32.mrf.mxu1 }
 0x103   : > { %2238 = vpow2.f32 %v1970_v27  ;;  %v1968_v32 = vmul.f32 -1.442695, %v2638_v28  ;;  %v2642_v33 = vadd.f32 %v2612_v1, %v942_v29  ;;  %v934_v34 = vadd.f32 %v933_v30, %v621_v5  ;;  %v2089_v29 = vpop.f32.mrf.mxu0 }
 0x104   : > { %v2122_v35 = vpop.f32.mrf.mxu1 }
 0x105   : > { %2240 = vpow2.f32 %v1968_v32  ;;  %v1971_v36 = vmul.f32 -1.442695, %v2642_v33  ;;  %v2646_v37 = vadd.f32 %v2612_v1, %v934_v34  ;;  %v955_v38 = vadd.f32 %v2122_v35, %v2084_v13 }
 0x106   : > { %v946_v40 = vpop.f32.mrf.mxu1 }
 0x107   : > { %v1969_v46 = vmul.f32 -1.442695, %v2646_v37  ;;  %v2650_v48 = vadd.f32 %v2612_v1, %v955_v38  ;;  %v947_v51 = vadd.f32 %v946_v40, %v634_v22  ;;  %2242 = vpow2.f32 %v1971_v36 }
 0x108   : > { %v2231_v54 = vpop.eup %2230  ;;  %v2123_v57 = vpop.f32.mrf.mxu1 }
 0x109   : > { %v1210_v60 = vadd.f32 1.0, %v2231_v54  ;;  %2244 = vpow2.f32 %v1969_v46  ;;  %v2653_v63 = vadd.f32 %v2612_v1, %v947_v51  ;;  %v1974_v2 = vmul.f32 -1.442695, %v2650_v48  ;;  %v653_v46 = vpop.f32.mrf.mxu0 }
 0x10a   : > { %v2233_v0 = vpop.eup %2232  ;;  %v949_v4 = vpop.f32.mrf.mxu1  ;;  %v958_v7 = vadd.f32 %v2123_v57, %v2085_v31 }
 0x10b   : > { %2246 = vrcp.f32 %v1210_v60  ;;  %v1208_v5 = vadd.f32 1.0, %v2233_v0  ;;  %v1972_v9 = vmul.f32 -1.442695, %v2653_v63  ;;  %v950_v11 = vadd.f32 %v949_v4, %v637_v39 }
 0x10c   : > { %v2235_v8 = vpop.eup %2234  ;;  %v2126_v12 = vpop.f32.mrf.mxu1  ;;  %v2658_v20 = vadd.f32 %v2612_v1, %v958_v7 }
 0x10d   : > { %2248 = vrcp.f32 %v1208_v5  ;;  %v1211_v13 = vadd.f32 1.0, %v2235_v8  ;;  %v2661_v22 = vadd.f32 %v2612_v1, %v950_v11  ;;  %v971_v25 = vadd.f32 %v2126_v12, %v2088_v3 }
 0x10e   : > { %v2237_v14 = vpop.eup %2236  ;;  %2250 = vpow2.f32 %v1974_v2  ;;  %v962_v17 = vpop.f32.mrf.mxu1  ;;  %v1975_v34 = vmul.f32 -1.442695, %v2658_v20 }
 0x10f   : > { %2252 = vrcp.f32 %v1211_v13  ;;  %v1209_v18 = vadd.f32 1.0, %v2237_v14  ;;  %v963_v30 = vadd.f32 %v962_v17, %v650_v16  ;;  %v1973_v35 = vmul.f32 -1.442695, %v2661_v22 }
 0x110   : > { %v2239_v21 = vpop.eup %2238  ;;  %2254 = vpow2.f32 %v1972_v9  ;;  %v2127_v23 = vpop.f32.mrf.mxu1  ;;  %v2666_v39 = vadd.f32 %v2612_v1, %v971_v25 }
 0x111   : > { %2256 = vrcp.f32 %v1209_v18  ;;  %v1214_v27 = vadd.f32 1.0, %v2239_v21  ;;  %v2669_v51 = vadd.f32 %v2612_v1, %v963_v30  ;;  %v974_v54 = vadd.f32 %v2127_v23, %v2089_v29 }
 0x112   : > { %v2241_v26 = vpop.eup %2240  ;;  %v965_v31 = vpop.f32.mrf.mxu1  ;;  %v1978_v5 = vmul.f32 -1.442695, %v2666_v39 }
 0x113   : > { %v1212_v32 = vadd.f32 1.0, %v2241_v26  ;;  %v966_v0 = vadd.f32 %v965_v31, %v653_v46  ;;  %v1976_v8 = vmul.f32 -1.442695, %v2669_v51  ;;  %v2675_v9 = vadd.f32 %v2612_v1, %v974_v54 }
 0x114   : > { %v2130_v36 = vpop.f32.mrf.mxu1  ;;  %v2243_v38 = vpop.eup %2242 }
 0x115   : > { %2258 = vrcp.f32 %v1212_v32  ;;  %v1215_v3 = vadd.f32 1.0, %v2243_v38  ;;  %v987_v11 = vadd.f32 %v2130_v36, %v2577_v41  ;;  %v2679_v14 = vadd.f32 %v2612_v1, %v966_v0 }
 0x116   : > { %v2245_v40 = vpop.eup %2244  ;;  %2260 = vrcp.f32 %v1214_v27  ;;  %v978_v57 = vpop.f32.mrf.mxu1  ;;  %v1979_v41 = vmul.f32 -1.442695, %v2675_v9 }
 0x117   : > { %v1213_v60 = vadd.f32 1.0, %v2245_v40  ;;  %2262 = vpow2.f32 %v1975_v34  ;;  %v979_v21 = vadd.f32 %v978_v57, %v2579_v42  ;;  %v2686_v26 = vadd.f32 %v2612_v1, %v987_v11 }
 0x118   : > { %v2247_v2 = vpop.eup %2246  ;;  %2264 = vpow2.f32 %v1973_v35  ;;  %v2131_v4 = vpop.f32.mrf.mxu1  ;;  %v1977_v29 = vmul.f32 -1.442695, %v2679_v14 }
 0x119   : > { %2266 = vrcp.f32 %v1213_v60  ;;  %1340 = vrot.lane.b32.xlu1 %v2247_v2, %s2431_s30  ;;  %v2691_v42 = vadd.f32 %v2612_v1, %v979_v21  ;;  %v990_v32 = vadd.f32 %v2131_v4, %v2581_v43  ;;  %v1982_v36 = vmul.f32 -1.442695, %v2686_v26 }
 0x11a   : > { %v2249_v7 = vpop.eup %2248  ;;  %v981_v12 = vpop.f32.mrf.mxu1  ;;  %2268 = vrcp.f32 %v1215_v3 }
 0x11b   : > { %v2251_v13 = vpop.eup %2250  ;;  %1336 = vrot.lane.b32.xlu0 %v2249_v7, %s2431_s30  ;;  %2270 = vpow2.f32 %v1978_v5  ;;  %v982_v46 = vadd.f32 %v981_v12, %v2583_v44  ;;  %v1980_v0 = vmul.f32 -1.442695, %v2691_v42  ;;  %v2704_v2 = vadd.f32 %v2612_v1, %v990_v32 }
 0x11c   : > { %v2253_v16 = vpop.eup %2252  ;;  %v2134_v17 = vpop.f32.mrf.mxu1  ;;  %2272 = vpow2.f32 %v1976_v8  ;;  %v1218_v30 = vadd.f32 1.0, %v2251_v13 }
 0x11d   : > { %v2255_v18 = vpop.eup %2254  ;;  %1342 = vrot.lane.b32.xlu1 %v2253_v16, %s2431_s30 }
 0x11e   : > { %v2257_v23 = vpop.eup %2256  ;;  %v1216_v25 = vadd.f32 1.0, %v2255_v18  ;;  %v994_v27 = vpop.f32.mrf.mxu1  ;;  %v1983_v18 = vmul.f32 -1.442695, %v2704_v2 }
 0x11f   : > { %1338 = vrot.lane.b32.xlu0 %v2257_v23, %s2431_s30  ;;  %v995_v21 = vadd.f32 %v994_v27, %v2587_v47 }
 0x120   : > { %2274 = vrcp.f32 %v1216_v25  ;;  %v2135_v31 = vpop.f32.mrf.mxu1 }
 0x121   : > { %v1006_v34 = vadd.f32 %v2135_v31, %v2589_v49  ;;  %2276 = vpow2.f32 %v1979_v41 }
 0x122   : > { %v2259_v35 = vpop.eup %2258  ;;  %v997_v38 = vpop.f32.mrf.mxu1  ;;  %2278 = vpow2.f32 %v1977_v29 }
 0x123   : > { %v2261_v40 = vpop.eup %2260  ;;  %v2698_v54 = vadd.f32 %v2612_v1, %v1006_v34  ;;  %v998_v57 = vadd.f32 %v997_v38, %v2591_v50  ;;  %1344 = vrot.lane.b32.xlu0 %v2259_v35, %s2431_s30  ;;  %2280 = vrcp.f32 %v1218_v30  ;;  %v2711_v50 = vadd.f32 %v2612_v1, %v982_v46 }
 0x124   : > { %v2263_v60 = vpop.eup %2262  ;;  %v2138_v43 = vpop.f32.mrf.mxu1  ;;  %2282 = vpow2.f32 %v1982_v36 }
 0x125   : > { %v2265_v49 = vpop.eup %2264  ;;  %v2707_v3 = vadd.f32 %v2612_v1, %v998_v57  ;;  %v1019_v44 = vadd.f32 %v2138_v43, %v2593_v52  ;;  %v1219_v12 = vadd.f32 1.0, %v2263_v60  ;;  %v1003_v52 = vadd.f32 %v2134_v17, %v2585_v45 }
 0x126   : > { %v2267_v4 = vpop.eup %2266  ;;  %v1217_v5 = vadd.f32 1.0, %v2265_v49  ;;  %v1010_v7 = vpop.f32.mrf.mxu1  ;;  %v1981_v30 = vmul.f32 -1.442695, %v2711_v50 }
 0x127   : > { %v2714_v8 = vadd.f32 %v2612_v1, %v1019_v44  ;;  %v1011_v11 = vadd.f32 %v1010_v7, %v2595_v53  ;;  %1346 = vrot.lane.b32.xlu1 %v2267_v4, %s2431_s30  ;;  %1348 = vrot.lane.b32.xlu0 %v2261_v40, %s2431_s30  ;;  %v2269_v16 = vpop.eup %2268  ;;  %v2730_v17 = vadd.f32 %v2612_v1, %v1003_v52 }
 0x128   : > { %2284 = vrcp.f32 %v1217_v5  ;;  %v2139_v13 = vpop.f32.mrf.mxu1  ;;  %v2271_v25 = vpop.eup %2270 }
 0x129   : > { %2286 = vpow2.f32 %v1980_v0  ;;  %v2723_v23 = vadd.f32 %v2612_v1, %v1011_v11  ;;  %v1022_v53 = vadd.f32 %v2139_v13, %v2597_v55  ;;  %v2273_v29 = vpop.eup %2272  ;;  %v2736_v55 = vadd.f32 %v2612_v1, %v995_v21 }
 0x12a   : > { %v1013_v41 = vpop.f32.mrf.mxu1  ;;  %2288 = vrcp.f32 %v1219_v12  ;;  %v1220_v45 = vadd.f32 1.0, %v2273_v29  ;;  %v1222_v35 = vadd.f32 1.0, %v2271_v25  ;;  %v1986_v57 = vmul.f32 -1.442695, %v2730_v17 }
 0x12b   : > { %v1014_v31 = vadd.f32 %v1013_v41, %v2599_v56  ;;  %1350 = vrot.lane.b32.xlu1 %v2269_v16, %s2431_s30  ;;  %v2733_v47 = vadd.f32 %v2612_v1, %v1022_v53  ;;  %2290 = vpow2.f32 %v1983_v18  ;;  %v1987_v16 = vmul.f32 -1.442695, %v2698_v54 }
 0x12c   : > { %v2142_v27 = vpop.f32.mrf.mxu1  ;;  %2292 = vrcp.f32 %v1220_v45  ;;  %v1985_v21 = vmul.f32 -1.442695, %v2707_v3  ;;  %v1990_v29 = vmul.f32 -1.442695, %v2714_v8 }
 0x12d   : > { %v2275_v32 = vpop.eup %2274  ;;  %v2739_v34 = vadd.f32 %v2612_v1, %v1014_v31  ;;  %v1035_v56 = vadd.f32 %v2142_v27, %v2601_v58  ;;  %2294 = vpow2.f32 %v1981_v30  ;;  %v1984_v58 = vmul.f32 -1.442695, %v2736_v55 }
 0x12e   : > { %1352 = vrot.lane.b32.xlu0 %v2275_v32, %s2431_s30  ;;  %v1026_v36 = vpop.f32.mrf.mxu1  ;;  %v2277_v38 = vpop.eup %2276  ;;  %2296 = vrcp.f32 %v1222_v35  ;;  %v1988_v31 = vmul.f32 -1.442695, %v2723_v23 }
 0x12f   : > { %v2744_v40 = vadd.f32 %v2612_v1, %v1035_v56  ;;  %v2279_v46 = vpop.eup %2278  ;;  %v1027_v60 = vadd.f32 %v1026_v36, %v2603_v59  ;;  %v1223_v7 = vadd.f32 1.0, %v2277_v38  ;;  %v1991_v36 = vmul.f32 -1.442695, %v2733_v47 }
 0x130   : > { %v2143_v43 = vpop.f32.mrf.mxu1  ;;  %v2281_v49 = vpop.eup %2280  ;;  %v1221_v0 = vadd.f32 1.0, %v2279_v46  ;;  %v1989_v46 = vmul.f32 -1.442695, %v2739_v34 }
 0x131   : > { %v1038_v44 = vadd.f32 %v2143_v43, %v2605_v61  ;;  %v2751_v4 = vadd.f32 %v2612_v1, %v1027_v60  ;;  %v2283_v12 = vpop.eup %2282 }
 0x132   : > { %1356 = vrot.lane.b32.xlu0 %v2281_v49, %s2431_s30  ;;  %v1029_v5 = vpop.f32.mrf.mxu1  ;;  %2298 = vrcp.f32 %v1221_v0  ;;  %v1226_v53 = vadd.f32 1.0, %v2283_v12 }
 0x133   : > { %v2755_v11 = vadd.f32 %v2612_v1, %v1038_v44  ;;  %v1030_v59 = vadd.f32 %v1029_v5, %v2607_v62  ;;  %2300 = vpow2.f32 %v1986_v57  ;;  %v1992_v5 = vmul.f32 -1.442695, %v2751_v4 }
 0x134   : > { %2302 = vpow2.f32 %v1984_v58  ;;  %v1994_v58 = vmul.f32 -1.442695, %v2744_v40 }
 0x135   : > { %v2285_v52 = vpop.eup %2284  ;;  %v2759_v61 = vadd.f32 %v2612_v1, %v1030_v59  ;;  %2304 = vrcp.f32 %v1223_v7 }
 0x136   : > { %v2287_v13 = vpop.eup %2286  ;;  %1354 = vrot.lane.b32.xlu1 %v2285_v52, %s2431_s30 }
 0x137   : > { %v1224_v18 = vadd.f32 1.0, %v2287_v13  ;;  %v2289_v25 = vpop.eup %2288 }
 0x138   : > { %v2291_v62 = vpop.eup %2290 }
 0x139   : > { %2306 = vrcp.f32 %v1224_v18  ;;  %v2293_v41 = vpop.eup %2292  ;;  %v1227_v27 = vadd.f32 1.0, %v2291_v62 }
 0x13a   : > { %2308 = vpow2.f32 %v1987_v16  ;;  %1358 = vrot.lane.b32.xlu1 %v2289_v25, %s2431_s30  ;;  %v2295_v1 = vpop.eup %2294  ;;  %1360 = vrot.lane.b32.xlu0 %v2293_v41, %s2431_s30  ;;  %v1995_v16 = vmul.f32 -1.442695, %v2755_v11 }
 0x13b   : > { %2310 = vpow2.f32 %v1985_v21  ;;  %v1225_v30 = vadd.f32 1.0, %v2295_v1  ;;  %v2297_v45 = vpop.eup %2296  ;;  %v1993_v21 = vmul.f32 -1.442695, %v2759_v61 }
 0x13c   : > { %2312 = vrcp.f32 %v1226_v53 }
 0x13d   : > { %2314 = vrcp.f32 %v1225_v30 }
 0x13e   : > { %2316 = vpow2.f32 %v1990_v29  ;;  %1364 = vrot.lane.b32.xlu0 %v2297_v45, %s2431_s30 }
 0x13f   : > { %v2299_v32 = vpop.eup %2298  ;;  %2318 = vpow2.f32 %v1988_v31 }
 0x140   : > { %v2301_v56 = vpop.eup %2300  ;;  %1362 = vrot.lane.b32.xlu1 %v2299_v32, %s2431_s30  ;;  %2320 = vrcp.f32 %v1227_v27 }
 0x141   : > { %v2303_v35 = vpop.eup %2302  ;;  %v1230_v60 = vadd.f32 1.0, %v2301_v56 }
 0x142   : > { %v1228_v38 = vadd.f32 1.0, %v2303_v35  ;;  %v2305_v57 = vpop.eup %2304 }
 0x144   : > { %2322 = vrcp.f32 %v1228_v38  ;;  %1366 = vrot.lane.b32.xlu1 %v2305_v57, %s2431_s30 }
 0x145   : > { %2324 = vpow2.f32 %v1991_v36 }
 0x146   : > { %v2307_v43 = vpop.eup %2306  ;;  %2326 = vpow2.f32 %v1989_v46 }
 0x147   : > { %v2309_v49 = vpop.eup %2308  ;;  %1368 = vrot.lane.b32.xlu0 %v2307_v43, %s2431_s30  ;;  %2328 = vrcp.f32 %v1230_v60 }
 0x148   : > { %v2311_v0 = vpop.eup %2310  ;;  %v1231_v59 = vadd.f32 1.0, %v2309_v49 }
 0x149   : > { %v1229_v44 = vadd.f32 1.0, %v2311_v0  ;;  %v2313_v7 = vpop.eup %2312 }
 0x14a   : > { %v2315_v12 = vpop.eup %2314 }
 0x14b   : > { %2330 = vrcp.f32 %v1229_v44  ;;  %1372 = vrot.lane.b32.xlu0 %v2313_v7, %s2431_s30  ;;  %v2317_v52 = vpop.eup %2316  ;;  %1370 = vrot.lane.b32.xlu1 %v2315_v12, %s2431_s30 }
 0x14c   : > { %2332 = vpow2.f32 %v1994_v58  ;;  %v2319_v13 = vpop.eup %2318  ;;  %v1234_v53 = vadd.f32 1.0, %v2317_v52 }
 0x14d   : > { %2334 = vpow2.f32 %v1992_v5  ;;  %v1232_v18 = vadd.f32 1.0, %v2319_v13  ;;  %v2321_v25 = vpop.eup %2320 }
 0x14e   : > { %2336 = vrcp.f32 %v1231_v59 }
 0x14f   : > { %2338 = vrcp.f32 %v1232_v18  ;;  %1374 = vrot.lane.b32.xlu1 %v2321_v25, %s2431_s30 }
 0x150   : > { %2340 = vpow2.f32 %v1995_v16 }
 0x151   : > { %v2323_v62 = vpop.eup %2322  ;;  %2342 = vpow2.f32 %v1993_v21 }
 0x152   : > { %v2325_v41 = vpop.eup %2324  ;;  %1376 = vrot.lane.b32.xlu0 %v2323_v62, %s2431_s30  ;;  %2344 = vrcp.f32 %v1234_v53 }
 0x153   : > { %v2327_v1 = vpop.eup %2326  ;;  %v1235_v31 = vadd.f32 1.0, %v2325_v41 }
 0x154   : > { %v1233_v29 = vadd.f32 1.0, %v2327_v1  ;;  %v2329_v30 = vpop.eup %2328 }
 0x156   : > { %2346 = vrcp.f32 %v1233_v29  ;;  %1380 = vrot.lane.b32.xlu0 %v2329_v30, %s2431_s30 }
 0x157   : > { %2348 = vrcp.f32 %v1235_v31 }
 0x158   : > { %v2331_v45 = vpop.eup %2330 }
 0x159   : > { %v2333_v27 = vpop.eup %2332  ;;  %1378 = vrot.lane.b32.xlu1 %v2331_v45, %s2431_s30 }
 0x15a   : > { %v2335_v32 = vpop.eup %2334  ;;  %v1238_v36 = vadd.f32 1.0, %v2333_v27 }
 0x15b   : > { %v1236_v56 = vadd.f32 1.0, %v2335_v32  ;;  %v2337_v35 = vpop.eup %2336 }
 0x15c   : > { %v2339_v38 = vpop.eup %2338 }
 0x15d   : > { %2350 = vrcp.f32 %v1236_v56  ;;  %1382 = vrot.lane.b32.xlu1 %v2337_v35, %s2431_s30  ;;  %v2341_v46 = vpop.eup %2340  ;;  %1384 = vrot.lane.b32.xlu0 %v2339_v38, %s2431_s30 }
 0x15e   : > { %v2343_v57 = vpop.eup %2342  ;;  %2352 = vrcp.f32 %v1238_v36  ;;  %v1239_v49 = vadd.f32 1.0, %v2341_v46 }
 0x15f   : > { %v1237_v60 = vadd.f32 1.0, %v2343_v57  ;;  %v2345_v43 = vpop.eup %2344 }
 0x161   : > { %2354 = vrcp.f32 %v1237_v60  ;;  %1388 = vrot.lane.b32.xlu0 %v2345_v43, %s2431_s30 }
 0x162   : > { %2356 = vrcp.f32 %v1239_v49 }
 0x163   : > { %v2347_v0 = vpop.eup %2346  ;;  %2358 = vtanh.f32 %v2618_v6 }
 0x164   : > { %1386 = vrot.lane.b32.xlu1 %v2347_v0, %s2431_s30  ;;  %v2349_v58 = vpop.eup %2348  ;;  %2360 = vtanh.f32 %v2626_v15 }
 0x165   : > { %2362 = vtanh.f32 %v2622_v10 }
 0x166   : > { %2364 = vtanh.f32 %v2630_v19 }
 0x167   : > { %2366 = vtanh.f32 %v2638_v28 }
 0x168   : > { %1390 = vrot.lane.b32.xlu1 %v2349_v58, %s2431_s30  ;;  %2368 = vtanh.f32 %v2646_v37 }
 0x169   : > { %2370 = vtanh.f32 %v2634_v24 }
 0x16a   : > { %v2351_v44 = vpop.eup %2350  ;;  %2372 = vtanh.f32 %v2642_v33 }
 0x16b   : > { %1392 = vrot.lane.b32.xlu0 %v2351_v44, %s2431_s30  ;;  %v2353_v5 = vpop.eup %2352  ;;  %2374 = vtanh.f32 %v2653_v63 }
 0x16c   : > { %2376 = vtanh.f32 %v2661_v22 }
 0x16d   : > { %2378 = vtanh.f32 %v2650_v48 }
 0x16e   : > { %v2355_v7 = vpop.eup %2354  ;;  %2380 = vtanh.f32 %v2658_v20 }
 0x16f   : > { %1396 = vrot.lane.b32.xlu0 %v2353_v5, %s2431_s30  ;;  %1394 = vrot.lane.b32.xlu1 %v2355_v7, %s2431_s30  ;;  %v2357_v59 = vpop.eup %2356  ;;  %2382 = vtanh.f32 %v2669_v51 }
 0x170   : > { %v2359_v13 = vpop.eup %2358  ;;  %2384 = vtanh.f32 %v2679_v14 }
 0x171   : > { %v2361_v16 = vpop.eup %2360  ;;  %2386 = vtanh.f32 %v2666_v39 }
 0x172   : > { %v2363_v21 = vpop.eup %2362  ;;  %2388 = vtanh.f32 %v2675_v9 }
 0x173   : > { %1398 = vrot.lane.b32.xlu1 %v2357_v59, %s2431_s30  ;;  %v2365_v25 = vpop.eup %2364  ;;  %2390 = vtanh.f32 %v2691_v42 }
 0x174   : > { %v2367_v37 = vpop.eup %2366  ;;  %2392 = vtanh.f32 %v2711_v50 }
 0x175   : > { %v2369_v24 = vpop.eup %2368  ;;  %2394 = vtanh.f32 %v2686_v26 }
 0x176   : > { %v2371_v31 = vpop.eup %2370  ;;  %2396 = vtanh.f32 %v2704_v2 }
 0x177   : > { %v2373_v27 = vpop.eup %2372  ;;  %2398 = vtanh.f32 %v2736_v55 }
 0x178   : > { %v2375_v22 = vpop.eup %2374  ;;  %2400 = vtanh.f32 %v2707_v3 }
 0x179   : > { %v2377_v38 = vpop.eup %2376  ;;  %2402 = vtanh.f32 %v2730_v17 }
 0x17a   : > { %v2379_v43 = vpop.eup %2378  ;;  %2404 = vtanh.f32 %v2698_v54 }
 0x17b   : > { %v2381_v49 = vpop.eup %2380  ;;  %2406 = vtanh.f32 %v2723_v23 }
 0x17c   : > { %v2383_v39 = vpop.eup %2382  ;;  %2408 = vtanh.f32 %v2739_v34 }
 0x17d   : > { %v2385_v5 = vpop.eup %2384  ;;  %2410 = vtanh.f32 %v2714_v8 }
 0x17e   : > { %2412 = vtanh.f32 %v2733_v47 }
 0x17f   : > { %2414 = vtanh.f32 %v2751_v4 }
 0x180   : > { %2416 = vtanh.f32 %v2759_v61 }
 0x18b   : > { %v1341_v12 = vpop.permute.xlu1 %1340 }
 0x18c   : > { %v1434_v6 = vmul.f32 %v2359_v13, %v1341_v12 }
 0x18d   : > { %v1337_v52 = vpop.permute.xlu0 %1336 }
 0x18e   : > { %v1432_v53 = vmul.f32 %v2363_v21, %v1337_v52  ;;  %v2387_v52 = vpop.eup %2386  ;;  %2418 = vtanh.f32 %v2744_v40 }
 0x18f   : > { %v1343_v18 = vpop.permute.xlu1 %1342 }
 0x190   : > { %v1435_v15 = vmul.f32 %v2361_v16, %v1343_v18  ;;  %v2389_v16 = vpop.eup %2388  ;;  %2420 = vtanh.f32 %v2755_v11 }
 0x191   : > { %v1339_v10 = vpop.permute.xlu0 %1338  ;;  %v2391_v50 = vpop.eup %2390 }
 0x192   : > { %v1465_v19 = vpack.c.bf16 %v1435_v15, %v1434_v6  ;;  %v1433_v62 = vmul.f32 %v2365_v25, %v1339_v10  ;;  %v2393_v26 = vpop.eup %2392 }
 0x194   : > { %v1464_v28 = vpack.c.bf16 %v1433_v62, %v1432_v53 }
 0x195   : > { %v1345_v41 = vpop.permute.xlu0 %1344 }
 0x196   : > { %2146 = vmatprep.mubr.msk.bf16.mxu0 %vm1495_vm4, %v1464_v28  ;;  %v1436_v33 = vmul.f32 %v2367_v37, %v1345_v41 }
 0x197   : > { %2147 = vmatmul.mubr.msk.bf16.vlgmr.msra.gmra.mxu0 %vm1495_vm4, %v1465_v19  ;;  %v2395_v19 = vpop.eup %2394 }
 0x198   : > { %v2397_v28 = vpop.eup %2396 }
 0x199   : > { %v1347_v1 = vpop.permute.xlu1 %1346  ;;  %v1349_v30 = vpop.permute.xlu0 %1348 }
 0x19a   : > { %v1437_v29 = vmul.f32 %v2369_v24, %v1347_v1  ;;  %v1438_v56 = vmul.f32 %v2371_v31, %v1349_v30  ;;  %v2399_v3 = vpop.eup %2398 }
 0x19b   : > { %v2401_v17 = vpop.eup %2400 }
 0x19c   : > { %v1466_v45 = vpack.c.bf16 %v1437_v29, %v1436_v33  ;;  %v2403_v31 = vpop.eup %2402 }
 0x19d   : > { %v1351_v32 = vpop.permute.xlu1 %1350 }
 0x19e   : > { %v1439_v35 = vmul.f32 %v2373_v27, %v1351_v32  ;;  %2150 = vmatprep.mubr.msk.bf16.mxu0 %vm1495_vm4, %v1466_v45  ;;  %v2405_v27 = vpop.eup %2404 }
 0x19f   : > { %v2407_v34 = vpop.eup %2406 }
 0x1a0   : > { %v1467_v36 = vpack.c.bf16 %v1439_v35, %v1438_v56  ;;  %v1353_v63 = vpop.permute.xlu0 %1352  ;;  %v2409_v8 = vpop.eup %2408 }
 0x1a1   : > { %v1440_v48 = vmul.f32 %v2375_v22, %v1353_v63 }
 0x1a2   : > { %2151 = vmatmul.mubr.msk.bf16.gmra.mxu0 %vm1495_vm4, %v1467_v36 }
 0x1a4   : > { %v1357_v60 = vpop.permute.xlu0 %1356 }
 0x1a5   : > { %v1442_v58 = vmul.f32 %v2379_v43, %v1357_v60 }
 0x1a8   : > { %v1355_v46 = vpop.permute.xlu1 %1354 }
 0x1a9   : > { %v1441_v57 = vmul.f32 %v2377_v38, %v1355_v46  ;;  %v2411_v46 = vpop.eup %2410 }
 0x1ab   : > { %v1468_v20 = vpack.c.bf16 %v1441_v57, %v1440_v48  ;;  %v2413_v57 = vpop.eup %2412 }
 0x1ac   : > { %v1359_v0 = vpop.permute.xlu1 %1358  ;;  %v1361_v14 = vpop.permute.xlu0 %1360 }
 0x1ad   : > { %v1443_v44 = vmul.f32 %v2381_v49, %v1359_v0  ;;  %2154 = vmatprep.mubr.msk.bf16.mxu0 %vm1495_vm4, %v1468_v20  ;;  %v1444_v9 = vmul.f32 %v2383_v39, %v1361_v14  ;;  %v2415_v61 = vpop.eup %2414 }
 0x1ae   : > { %v2417_v0 = vpop.eup %2416 }
 0x1af   : > { %v1469_v51 = vpack.c.bf16 %v1443_v44, %v1442_v58  ;;  %v2419_v14 = vpop.eup %2418 }
 0x1b0   : > { %v1365_v12 = vpop.permute.xlu0 %1364  ;;  %v2421_v39 = vpop.eup %2420 }
 0x1b1   : > { %2155 = vmatmul.mubr.msk.bf16.gmra.mxu0 %vm1495_vm4, %v1469_v51  ;;  %v1446_v21 = vmul.f32 %v2387_v52, %v1365_v12  ;;  %v2850_v12 = vld [vmem:[%s2994_s6] ss:$0 sm:$0xff] }
 0x1b2   : > { %v1363_v7 = vpop.permute.xlu1 %1362 }
 0x1b3   : > { %v1445_v59 = vmul.f32 %v2385_v5, %v1363_v7 }
 0x1b5   : > { %v1470_v13 = vpack.c.bf16 %v1445_v59, %v1444_v9 }
 0x1b6   : > { %v1367_v18 = vpop.permute.xlu1 %1366 }
 0x1b7   : > { %v1447_v42 = vmul.f32 %v2389_v16, %v1367_v18  ;;  %2158 = vmatprep.mubr.msk.bf16.mxu0 %vm1495_vm4, %v1470_v13  ;;  %v1707_v13 = vld [vmem:[%s2845_s13 + $0x10] sm:$0xff] }
 0x1b9   : > { %v1471_v6 = vpack.c.bf16 %v1447_v42, %v1446_v21  ;;  %v1369_v15 = vpop.permute.xlu0 %1368  ;;  %v1705_v21 = vld [vmem:[%s2845_s13] sm:$0xff] }
 0x1ba   : > { %v1448_v10 = vmul.f32 %v2391_v50, %v1369_v15  ;;  %v1708_v50 = vld [vmem:[%s2845_s13 + $0x18] sm:$0xff] }
 0x1bb   : > { %2159 = vmatmul.mubr.msk.bf16.gmra.mxu0 %vm1495_vm4, %v1471_v6 }
 0x1bd   : > { %v1371_v25 = vpop.permute.xlu1 %1370  ;;  %v1373_v53 = vpop.permute.xlu0 %1372 }
 0x1be   : > { %v1449_v2 = vmul.f32 %v2393_v26, %v1371_v25  ;;  %v1450_v37 = vmul.f32 %v2395_v19, %v1373_v53 }
 0x1c0   : > { %v1472_v62 = vpack.c.bf16 %v1449_v2, %v1448_v10  ;;  %v1706_v2 = vld [vmem:[%s2845_s13 + $0x8] sm:$0xff] }
 0x1c1   : > { %v1375_v41 = vpop.permute.xlu1 %1374 }
 0x1c2   : > { %v1451_v24 = vmul.f32 %v2397_v28, %v1375_v41  ;;  %2162 = vmatprep.mubr.msk.bf16.mxu0 %vm1495_vm4, %v1472_v62  ;;  %v1711_v41 = vld [vmem:[%s2845_s13 + $0x30] sm:$0xff] }
 0x1c4   : > { %v1473_v55 = vpack.c.bf16 %v1451_v24, %v1450_v37  ;;  %v1377_v1 = vpop.permute.xlu0 %1376 }
 0x1c5   : > { %v1452_v29 = vmul.f32 %v2399_v3, %v1377_v1 }
 0x1c6   : > { %2163 = vmatmul.mubr.msk.bf16.gmra.mxu0 %vm1495_vm4, %v1473_v55  ;;  %v1709_v55 = vld [vmem:[%s2845_s13 + $0x20] sm:$0xff] }
 0x1c8   : > { %v1381_v30 = vpop.permute.xlu0 %1380 }
 0x1c9   : > { %v1454_v56 = vmul.f32 %v2403_v31, %v1381_v30  ;;  %v1710_v31 = vld [vmem:[%s2845_s13 + $0x28] sm:$0xff] }
 0x1cb   : > { %v1379_v33 = vpop.permute.xlu1 %1378 }
 0x1cc   : > { %v1453_v54 = vmul.f32 %v2401_v17, %v1379_v33  ;;  %v1712_v33 = vld [vmem:[%s2845_s13 + $0x38] sm:$0xff] }
 0x1ce   : > { %v1474_v45 = vpack.c.bf16 %v1453_v54, %v1452_v29 }
 0x1cf   : > { %v1383_v32 = vpop.permute.xlu1 %1382  ;;  %v1385_v36 = vpop.permute.xlu0 %1384 }
 0x1d0   : > { %v1455_v35 = vmul.f32 %v2405_v27, %v1383_v32  ;;  %2166 = vmatprep.mubr.msk.bf16.mxu0 %vm1495_vm4, %v1474_v45  ;;  %v1456_v22 = vmul.f32 %v2407_v34, %v1385_v36  ;;  %v1713_v34 = vld [vmem:[%s2845_s13 + $0x40] sm:$0xff] }
 0x1d2   : > { %v1475_v23 = vpack.c.bf16 %v1455_v35, %v1454_v56  ;;  %v1715_v35 = vld [vmem:[%s2845_s13 + $0x50] sm:$0xff] }
 0x1d3   : > { %v1389_v38 = vpop.permute.xlu0 %1388 }
 0x1d4   : > { %2167 = vmatmul.mubr.msk.bf16.gmra.mxu0 %vm1495_vm4, %v1475_v23  ;;  %v1458_v43 = vmul.f32 %v2411_v46, %v1389_v38 }
 0x1d6   : > { %v1387_v63 = vpop.permute.xlu1 %1386 }
 0x1d7   : > { %v1457_v47 = vmul.f32 %v2409_v8, %v1387_v63 }
 0x1d9   : > { %v1476_v48 = vpack.c.bf16 %v1457_v47, %v1456_v22  ;;  %v1716_v47 = vld [vmem:[%s2845_s13 + $0x58] sm:$0xff] }
 0x1da   : > { %v1391_v60 = vpop.permute.xlu1 %1390 }
 0x1db   : > { %v1459_v20 = vmul.f32 %v2413_v57, %v1391_v60  ;;  %2170 = vmatprep.mubr.msk.bf16.mxu0 %vm1495_vm4, %v1476_v48  ;;  %v1714_v57 = vld [vmem:[%s2845_s13 + $0x48] sm:$0xff] }
 0x1dd   : > { %v1477_v4 = vpack.c.bf16 %v1459_v20, %v1458_v43  ;;  %v1393_v49 = vpop.permute.xlu0 %1392 }
 0x1de   : > { %v1460_v40 = vmul.f32 %v2415_v61, %v1393_v49  ;;  %v1719_v49 = vld [vmem:[%s2845_s13 + $0x70] sm:$0xff] }
 0x1df   : > { %2171 = vmatmul.mubr.msk.bf16.gmra.mxu0 %vm1495_vm4, %v1477_v4 }
 0x1e1   : > { %v1395_v58 = vpop.permute.xlu1 %1394  ;;  %v1397_v51 = vpop.permute.xlu0 %1396 }
 0x1e2   : > { %v1461_v44 = vmul.f32 %v2417_v0, %v1395_v58  ;;  %v1462_v7 = vmul.f32 %v2419_v14, %v1397_v51  ;;  %v1717_v58 = vld [vmem:[%s2845_s13 + $0x60] sm:$0xff]  ;;  %v1720_v14 = vld [vmem:[%s2845_s13 + $0x78] sm:$0xff] }
 0x1e4   : > { %v1478_v11 = vpack.c.bf16 %v1461_v44, %v1460_v40 }
 0x1e5   : > { %v1399_v5 = vpop.permute.xlu1 %1398 }
 0x1e6   : > { %v1463_v9 = vmul.f32 %v2421_v39, %v1399_v5  ;;  %2174 = vmatprep.mubr.msk.bf16.mxu0 %vm1495_vm4, %v1478_v11 }
 0x1e8   : > { %v1479_v59 = vpack.c.bf16 %v1463_v9, %v1462_v7  ;;  %v1718_v7 = vld [vmem:[%s2845_s13 + $0x68] sm:$0xff] }
 0x1ea   : > { %2175 = vmatmul.mubr.msk.bf16.gmra.mxu0 %vm1495_vm4, %v1479_v59 }
 0x257   : > { %v2148_v52 = vpop.f32.mrf.mxu0 }
 0x258   : > { %v1587_v16 = vadd.f32 %v2148_v52, %v2850_v12 }
 0x259   : > { %v1578_v18 = vpop.f32.mrf.mxu0 }
 0x25a   : > { %v1739_v42 = vadd.f32 %v1707_v13, %v1587_v16  ;;  %v1579_v6 = vadd.f32 %v2850_v12, %v1578_v18  ;;  %v1723_v16 = vld [vmem:[%s2845_s13 + $0x90] sm:$0xff] }
 0x25b   : > { %v2149_v15 = vpop.f32.mrf.mxu0 }
 0x25c   : > { %1771 = vst.msk [vmem:[%s2857_s17 + $0x10] sm:$0xff] %vm1495_vm4, %v1739_v42  ;;  %v1737_v26 = vadd.f32 %v1705_v21, %v1579_v6  ;;  %v1590_v25 = vadd.f32 %v2149_v15, %v2850_v12  ;;  %v1721_v42 = vld [vmem:[%s2845_s13 + $0x80] sm:$0xff] }
 0x25d   : > { %v1581_v10 = vpop.f32.mrf.mxu0 }
 0x25e   : > { %1769 = vst.msk [vmem:[%s2857_s17] sm:$0xff] %vm1495_vm4, %v1737_v26  ;;  %v1740_v53 = vadd.f32 %v1708_v50, %v1590_v25  ;;  %v1582_v19 = vadd.f32 %v2850_v12, %v1581_v10  ;;  %v1724_v26 = vld [vmem:[%s2845_s13 + $0x98] sm:$0xff] }
 0x260   : > { %1772 = vst.msk [vmem:[%s2857_s17 + $0x18] sm:$0xff] %vm1495_vm4, %v1740_v53  ;;  %v1738_v62 = vadd.f32 %v1706_v2, %v1582_v19  ;;  %v1722_v53 = vld [vmem:[%s2845_s13 + $0x88] sm:$0xff] }
 0x262   : > { %1770 = vst.msk [vmem:[%s2857_s17 + $0x8] sm:$0xff] %vm1495_vm4, %v1738_v62  ;;  %v2152_v28 = vpop.f32.mrf.mxu0 }
 0x263   : > { %v1603_v37 = vadd.f32 %v2152_v28, %v2850_v12 }
 0x264   : > { %v1594_v24 = vpop.f32.mrf.mxu0 }
 0x265   : > { %v1743_v1 = vadd.f32 %v1711_v41, %v1603_v37  ;;  %v1595_v3 = vadd.f32 %v2850_v12, %v1594_v24  ;;  %v1727_v37 = vld [vmem:[%s2845_s13 + $0xb0] sm:$0xff] }
 0x266   : > { %v2153_v17 = vpop.f32.mrf.mxu0 }
 0x267   : > { %1775 = vst.msk [vmem:[%s2857_s17 + $0x30] sm:$0xff] %vm1495_vm4, %v1743_v1  ;;  %v1741_v29 = vadd.f32 %v1709_v55, %v1595_v3  ;;  %v1606_v54 = vadd.f32 %v2153_v17, %v2850_v12  ;;  %v1725_v1 = vld [vmem:[%s2845_s13 + $0xa0] sm:$0xff] }
 0x268   : > { %v1597_v30 = vpop.f32.mrf.mxu0 }
 0x269   : > { %1773 = vst.msk [vmem:[%s2857_s17 + $0x20] sm:$0xff] %vm1495_vm4, %v1741_v29  ;;  %v1744_v45 = vadd.f32 %v1712_v33, %v1606_v54  ;;  %v1598_v27 = vadd.f32 %v2850_v12, %v1597_v30  ;;  %v1728_v29 = vld [vmem:[%s2845_s13 + $0xb8] sm:$0xff] }
 0x26b   : > { %1776 = vst.msk [vmem:[%s2857_s17 + $0x38] sm:$0xff] %vm1495_vm4, %v1744_v45  ;;  %v1742_v32 = vadd.f32 %v1710_v31, %v1598_v27  ;;  %v1726_v45 = vld [vmem:[%s2845_s13 + $0xa8] sm:$0xff] }
 0x26d   : > { %1774 = vst.msk [vmem:[%s2857_s17 + $0x28] sm:$0xff] %vm1495_vm4, %v1742_v32 }
 0x271   : > { %v2156_v56 = vpop.f32.mrf.mxu0 }
 0x272   : > { %v1619_v23 = vadd.f32 %v2156_v56, %v2850_v12 }
 0x273   : > { %v1610_v36 = vpop.f32.mrf.mxu0 }
 0x274   : > { %v1747_v8 = vadd.f32 %v1715_v35, %v1619_v23  ;;  %v1611_v63 = vadd.f32 %v2850_v12, %v1610_v36  ;;  %v1731_v23 = vld [vmem:[%s2845_s13 + $0xd0] sm:$0xff] }
 0x275   : > { %v2157_v22 = vpop.f32.mrf.mxu0 }
 0x276   : > { %1779 = vst.msk [vmem:[%s2857_s17 + $0x50] sm:$0xff] %vm1495_vm4, %v1747_v8  ;;  %v1745_v38 = vadd.f32 %v1713_v34, %v1611_v63  ;;  %v1622_v46 = vadd.f32 %v2157_v22, %v2850_v12  ;;  %v1729_v8 = vld [vmem:[%s2845_s13 + $0xc0] sm:$0xff] }
 0x277   : > { %v1613_v48 = vpop.f32.mrf.mxu0 }
 0x278   : > { %1777 = vst.msk [vmem:[%s2857_s17 + $0x40] sm:$0xff] %vm1495_vm4, %v1745_v38  ;;  %v1748_v60 = vadd.f32 %v1716_v47, %v1622_v46  ;;  %v1614_v43 = vadd.f32 %v2850_v12, %v1613_v48  ;;  %v1732_v38 = vld [vmem:[%s2845_s13 + $0xd8] sm:$0xff] }
 0x27a   : > { %1780 = vst.msk [vmem:[%s2857_s17 + $0x58] sm:$0xff] %vm1495_vm4, %v1748_v60  ;;  %v1746_v20 = vadd.f32 %v1714_v57, %v1614_v43  ;;  %v1730_v60 = vld [vmem:[%s2845_s13 + $0xc8] sm:$0xff] }
 0x27b   : > { %v2160_v4 = vpop.f32.mrf.mxu0 }
 0x27c   : > { %1778 = vst.msk [vmem:[%s2857_s17 + $0x48] sm:$0xff] %vm1495_vm4, %v1746_v20  ;;  %v1635_v61 = vadd.f32 %v2160_v4, %v2850_v12 }
 0x27d   : > { %v1626_v0 = vpop.f32.mrf.mxu0 }
 0x27e   : > { %v1751_v40 = vadd.f32 %v1719_v49, %v1635_v61  ;;  %v1627_v44 = vadd.f32 %v2850_v12, %v1626_v0  ;;  %v1735_v61 = vld [vmem:[%s2845_s13 + $0xf0] sm:$0xff] }
 0x27f   : > { %v2161_v51 = vpop.f32.mrf.mxu0 }
 0x280   : > { %1783 = vst.msk [vmem:[%s2857_s17 + $0x70] sm:$0xff] %vm1495_vm4, %v1751_v40  ;;  %v1749_v11 = vadd.f32 %v1717_v58, %v1627_v44  ;;  %v1638_v39 = vadd.f32 %v2161_v51, %v2850_v12  ;;  %v1733_v40 = vld [vmem:[%s2845_s13 + $0xe0] sm:$0xff] }
 0x281   : > { %v1629_v5 = vpop.f32.mrf.mxu0 }
 0x282   : > { %1781 = vst.msk [vmem:[%s2857_s17 + $0x60] sm:$0xff] %vm1495_vm4, %v1749_v11  ;;  %v1752_v9 = vadd.f32 %v1720_v14, %v1638_v39  ;;  %v1630_v59 = vadd.f32 %v2850_v12, %v1629_v5  ;;  %v1736_v11 = vld [vmem:[%s2845_s13 + $0xf8] sm:$0xff] }
 0x284   : > { %1784 = vst.msk [vmem:[%s2857_s17 + $0x78] sm:$0xff] %vm1495_vm4, %v1752_v9  ;;  %v1750_v52 = vadd.f32 %v1718_v7, %v1630_v59  ;;  %v1734_v9 = vld [vmem:[%s2845_s13 + $0xe8] sm:$0xff] }
 0x286   : > { %1782 = vst.msk [vmem:[%s2857_s17 + $0x68] sm:$0xff] %vm1495_vm4, %v1750_v52  ;;  %v2164_v13 = vpop.f32.mrf.mxu0 }
 0x287   : > { %v1651_v18 = vadd.f32 %v2164_v13, %v2850_v12 }
 0x288   : > { %v1642_v21 = vpop.f32.mrf.mxu0 }
 0x289   : > { %v1755_v6 = vadd.f32 %v1723_v16, %v1651_v18  ;;  %v1643_v15 = vadd.f32 %v2850_v12, %v1642_v21 }
 0x28a   : > { %v2165_v50 = vpop.f32.mrf.mxu0 }
 0x28b   : > { %1787 = vst.msk [vmem:[%s2857_s17 + $0x90] sm:$0xff] %vm1495_vm4, %v1755_v6  ;;  %v1753_v25 = vadd.f32 %v1721_v42, %v1643_v15  ;;  %v1654_v10 = vadd.f32 %v2165_v50, %v2850_v12 }
 0x28c   : > { %v1645_v2 = vpop.f32.mrf.mxu0 }
 0x28d   : > { %1785 = vst.msk [vmem:[%s2857_s17 + $0x80] sm:$0xff] %vm1495_vm4, %v1753_v25  ;;  %v1756_v19 = vadd.f32 %v1724_v26, %v1654_v10  ;;  %v1646_v62 = vadd.f32 %v2850_v12, %v1645_v2 }
 0x28f   : > { %1788 = vst.msk [vmem:[%s2857_s17 + $0x98] sm:$0xff] %vm1495_vm4, %v1756_v19  ;;  %v1754_v28 = vadd.f32 %v1722_v53, %v1646_v62 }
 0x291   : > { %1786 = vst.msk [vmem:[%s2857_s17 + $0x88] sm:$0xff] %vm1495_vm4, %v1754_v28 }
 0x294   : > { %v2168_v41 = vpop.f32.mrf.mxu0 }
 0x295   : > { %v1667_v24 = vadd.f32 %v2168_v41, %v2850_v12 }
 0x296   : > { %v1658_v55 = vpop.f32.mrf.mxu0 }
 0x297   : > { %v1759_v3 = vadd.f32 %v1727_v37, %v1667_v24  ;;  %v1659_v17 = vadd.f32 %v2850_v12, %v1658_v55 }
 0x298   : > { %v2169_v33 = vpop.f32.mrf.mxu0 }
 0x299   : > { %1791 = vst.msk [vmem:[%s2857_s17 + $0xb0] sm:$0xff] %vm1495_vm4, %v1759_v3  ;;  %v1757_v54 = vadd.f32 %v1725_v1, %v1659_v17  ;;  %v1670_v30 = vadd.f32 %v2169_v33, %v2850_v12 }
 0x29a   : > { %v1661_v31 = vpop.f32.mrf.mxu0 }
 0x29b   : > { %1789 = vst.msk [vmem:[%s2857_s17 + $0xa0] sm:$0xff] %vm1495_vm4, %v1757_v54  ;;  %v1760_v27 = vadd.f32 %v1728_v29, %v1670_v30  ;;  %v1662_v32 = vadd.f32 %v2850_v12, %v1661_v31 }
 0x29d   : > { %1792 = vst.msk [vmem:[%s2857_s17 + $0xb8] sm:$0xff] %vm1495_vm4, %v1760_v27  ;;  %v1758_v56 = vadd.f32 %v1726_v45, %v1662_v32 }
 0x29f   : > { %1790 = vst.msk [vmem:[%s2857_s17 + $0xa8] sm:$0xff] %vm1495_vm4, %v1758_v56  ;;  %v2172_v35 = vpop.f32.mrf.mxu0 }
 0x2a0   : > { %v1683_v36 = vadd.f32 %v2172_v35, %v2850_v12 }
 0x2a1   : > { %v1674_v34 = vpop.f32.mrf.mxu0 }
 0x2a2   : > { %v1763_v63 = vadd.f32 %v1731_v23, %v1683_v36  ;;  %v1675_v22 = vadd.f32 %v2850_v12, %v1674_v34 }
 0x2a3   : > { %v2173_v47 = vpop.f32.mrf.mxu0 }
 0x2a4   : > { %1795 = vst.msk [vmem:[%s2857_s17 + $0xd0] sm:$0xff] %vm1495_vm4, %v1763_v63  ;;  %v1761_v46 = vadd.f32 %v1729_v8, %v1675_v22  ;;  %v1686_v48 = vadd.f32 %v2173_v47, %v2850_v12 }
 0x2a5   : > { %v1677_v57 = vpop.f32.mrf.mxu0 }
 0x2a6   : > { %1793 = vst.msk [vmem:[%s2857_s17 + $0xc0] sm:$0xff] %vm1495_vm4, %v1761_v46  ;;  %v1764_v43 = vadd.f32 %v1732_v38, %v1686_v48  ;;  %v1678_v20 = vadd.f32 %v2850_v12, %v1677_v57 }
 0x2a8   : > { %1796 = vst.msk [vmem:[%s2857_s17 + $0xd8] sm:$0xff] %vm1495_vm4, %v1764_v43  ;;  %v1762_v4 = vadd.f32 %v1730_v60, %v1678_v20 }
 0x2aa   : > { %1794 = vst.msk [vmem:[%s2857_s17 + $0xc8] sm:$0xff] %vm1495_vm4, %v1762_v4  ;;  %v2176_v49 = vpop.f32.mrf.mxu0 }
 0x2ab   : > { %v1699_v0 = vadd.f32 %v2176_v49, %v2850_v12 }
 0x2ac   : > { %v1690_v58 = vpop.f32.mrf.mxu0 }
 0x2ad   : > { %v1767_v44 = vadd.f32 %v1735_v61, %v1699_v0  ;;  %v1691_v51 = vadd.f32 %v2850_v12, %v1690_v58 }
 0x2ae   : > { %v2177_v14 = vpop.f32.mrf.mxu0 }
 0x2af   : > { %1799 = vst.msk [vmem:[%s2857_s17 + $0xf0] sm:$0xff] %vm1495_vm4, %v1767_v44  ;;  %v1765_v39 = vadd.f32 %v1733_v40, %v1691_v51  ;;  %v1702_v5 = vadd.f32 %v2177_v14, %v2850_v12 }
 0x2b0   : > { %v1693_v7 = vpop.f32.mrf.mxu0 }
 0x2b1   : > { %1797 = vst.msk [vmem:[%s2857_s17 + $0xe0] sm:$0xff] %vm1495_vm4, %v1765_v39  ;;  %v1768_v59 = vadd.f32 %v1736_v11, %v1702_v5  ;;  %v1694_v52 = vadd.f32 %v2850_v12, %v1693_v7 }
 0x2b3   : > { %1800 = vst.msk [vmem:[%s2857_s17 + $0xf8] sm:$0xff] %vm1495_vm4, %v1768_v59  ;;  %v1766_v13 = vadd.f32 %v1734_v9, %v1694_v52 }
 0x2b5   : > { %1798 = vst.msk [vmem:[%s2857_s17 + $0xe8] sm:$0xff] %vm1495_vm4, %v1766_v13 }
 0x2b6 PF: > { %s18_s27 = sadd.s32 1, %s2428_s27  }
 0x2b7   : > { %p15_p4 = scmp.ge.s32.totalorder %s18_s27, 4  }
 0x2b9   :  { %17 = sbr.rel (!%p15_p4) target bundleno = 1 (0x1), region = 88 }

// kernel: pixelcnn_forward.32
= control target key start
LH: loop header
LB: loop body
LE: loop exit
PB: predicated region body
PF: predicated region fallthrough
CT: control target
= control target key end

     0   :  { %s2472_s27 = smov 0   ;;  %s2983_s0 = inlined_call_operand.vmem [shape: bf16[512,48], index: 0, kind: input, shape index: {}]   ;;  %s2984_s1 = inlined_call_operand.vmem [shape: bf16[512,32], index: 1, kind: input, shape index: {}]   ;;  %s2985_s2 = inlined_call_operand.vmem [shape: bf16[48,32], index: 2, kind: input, shape index: {}]   ;;  %s2986_s3 = inlined_call_operand.vmem [shape: bf16[32,32], index: 3, kind: input, shape index: {}]   ;;  %s2987_s4 = inlined_call_operand.vmem [shape: f32[1,32], index: 4, kind: input, shape index: {}]   ;;  %s2988_s5 = inlined_call_operand.vmem [shape: bf16[16,16], index: 5, kind: input, shape index: {}]   ;;  %s2989_s6 = inlined_call_operand.vmem [shape: f32[1,16], index: 6, kind: input, shape index: {}]   ;;  %s2990_s7 = inlined_call_operand.vmem [shape: f32[512,16], index: 7, kind: input, shape index: {}]   ;;  %s2991_s8 = inlined_call_operand.vmem [shape: f32[512,16], index: 8, kind: output, shape index: {}]  }
   0x1 LB: > { %s1878_s28 = sadd.s32 4294967295, %s2424_s27   ;;  %p1882_p0 = scmp.ge.s32.totalorder %s2424_s27, 1  ;;  %s2424_s27 = sphi %s2472_s27, %s18_s27  }
   0x2   : > { %p285_p1 = scmp.lt.s32.totalorder %s2424_s27, 3 }
   0x4   : > { %p286_p2 = pnand %p1882_p0, %p285_p1 }
   0x5   : > { %s1883_s9 = sshll.u32 (!%p286_p2), %s1878_s28, 5  ;;  %s2426_s30 = smov (!%p286_p2), 112  }
   0x6   : > { %289 = sbr.rel (%p286_p2) target bundleno = 694 (0x2b6), region = 52  ;;  %p330_p3 = scmp.lt.s32.totalorder (!%p286_p2), %s1883_s9, 63 }
   0xb   : > { %v2188_v0 = vld [vmem:[%s2986_s3 + $0x8] sm:$0xff]   ;;  %v2189_v1 = vld [vmem:[%s2986_s3] sm:$0xff]   ;;  %s2993_s9 = smov (!%p330_p3, %s1883_s9), 63  ;;  %v2192_v2 = vld [vmem:[%s2985_s2 + $0x10] sm:$0xff]   ;;  %vm520_vm0 = vcmask 261120   ;;  %vm828_vm1 = vcmask 392192  }
   0xc   : > { %2175 = vmatprep.subr.bf16.mxu1 %v2188_v0  ;;  %2067 = vmatprep.subr.bf16.mxu0 %v2188_v0  ;;  %s1884_s14 = sshll.u32 %s2993_s9, 2  ;;  %v2195_v3 = vld [vmem:[%s2985_s2 + $0x8] sm:$0xff]   ;;  %v2198_v7 = vld [vmem:[%s2985_s2] sm:$0xff]   ;;  %vm1492_vm2 = vcmask 130048   ;;  %s1888_s10 = sshll.u32 %s2993_s9, 3 }
   0xd   : > { %2177 = vmatpush3.bf16.msra.mxu1 %v2188_v0  ;;  %2068 = vmatpush3.bf16.msra.mxu0 %v2188_v0  ;;  %s2495_s17 = scalar_lea.vmem %s2984_s1, %s1884_s14  ;;  %s2515_s24 = scalar_lea.vmem %s2983_s0, %s1884_s14  ;;  %v2607_v61 = vld [vmem:[%s2987_s4] ss:$0 sm:$0xff] }
   0xe   : > { %2176 = vmatprep.subr.bf16.mxu1 %v2189_v1  ;;  %2069 = vmatprep.subr.bf16.mxu0 %v2189_v1  ;;  %v2190_v4 = vld [vmem:[%s2495_s17 + $0x40] sm:$0xff]   ;;  %v2191_v5 = vld [vmem:[%s2495_s17 + $0x48] sm:$0xff]   ;;  %v2193_v6 = vld [vmem:[%s2495_s17 + $0x50] sm:$0xff]   ;;  %s2840_s13 = scalar_lea.vmem %s2990_s7, %s1888_s10 }
   0xf   : > { %2087 = vmatprep.mubr.msk.bf16.mxu1 %vm520_vm0, %v2190_v4  ;;  %v2194_v8 = vld [vmem:[%s2495_s17 + $0x58] sm:$0xff]   ;;  %v2196_v9 = vld [vmem:[%s2495_s17 + $0x60] sm:$0xff]   ;;  %v2202_v11 = vld [vmem:[%s2495_s17 + $0x8] sm:$0xff]  }
  0x10   : > { %v2201_v10 = vld [vmem:[%s2495_s17] sm:$0xff]   ;;  %v2205_v12 = vld [vmem:[%s2495_s17 + $0x10] sm:$0xff]   ;;  %v2197_v13 = vld [vmem:[%s2495_s17 + $0x68] sm:$0xff]  }
  0x11   : > { %2178 = vmatpush3.bf16.msra.mxu1 %v2189_v1  ;;  %2070 = vmatpush3.bf16.msra.mxu0 %v2189_v1  ;;  %v2199_v14 = vld [vmem:[%s2495_s17 + $0x70] sm:$0xff]   ;;  %v2206_v15 = vld [vmem:[%s2495_s17 + $0x18] sm:$0xff]   ;;  %v2209_v16 = vld [vmem:[%s2495_s17 + $0x20] sm:$0xff]  }
  0x12   : > { %2103 = vmatprep.subr.bf16.mxu1 %v2192_v2  ;;  %2071 = vmatprep.mubr.msk.bf16.mxu0 %vm520_vm0, %v2201_v10  ;;  %v2200_v17 = vld [vmem:[%s2495_s17 + $0x78] sm:$0xff]   ;;  %v2203_v18 = vld [vmem:[%s2515_s24] sm:$0xff]   ;;  %v2210_v19 = vld [vmem:[%s2495_s17 + $0x28] sm:$0xff]  }
  0x13   : > { %v2213_v20 = vld [vmem:[%s2495_s17 + $0x30] sm:$0xff]   ;;  %v2204_v21 = vld [vmem:[%s2515_s24 + $0x8] sm:$0xff]   ;;  %v2214_v22 = vld [vmem:[%s2495_s17 + $0x38] sm:$0xff]   ;;  %s2852_s17 = scalar_lea.vmem %s2991_s8, %s1888_s10 }
  0x14   : > { %2088 = vmatmul.mubr.msk.bf16.vlgmr.msra.gmra.mxu1 %vm520_vm0, %v2191_v5  ;;  %2072 = vmatmul.mubr.msk.bf16.vlgmr.msra.gmra.mxu0 %vm520_vm0, %v2202_v11  ;;  %v2207_v23 = vld [vmem:[%s2515_s24 + $0x10] sm:$0xff]   ;;  %v2208_v24 = vld [vmem:[%s2515_s24 + $0x18] sm:$0xff]   ;;  %v2211_v25 = vld [vmem:[%s2515_s24 + $0x20] sm:$0xff]  }
  0x15   : > { %2104 = vmatpush3.bf16.msra.mxu1 %v2192_v2  ;;  %2091 = vmatprep.mubr.msk.bf16.mxu1 %vm520_vm0, %v2193_v6  ;;  %v2212_v26 = vld [vmem:[%s2515_s24 + $0x28] sm:$0xff]   ;;  %v2215_v27 = vld [vmem:[%s2515_s24 + $0x30] sm:$0xff]   ;;  %v2216_v28 = vld [vmem:[%s2515_s24 + $0x38] sm:$0xff]  }
  0x16   : > { %2105 = vmatprep.subr.bf16.mxu1 %v2195_v3  ;;  %2075 = vmatprep.mubr.msk.bf16.mxu0 %vm520_vm0, %v2205_v12  ;;  %v2217_v29 = vld [vmem:[%s2515_s24 + $0x40] sm:$0xff]   ;;  %v2218_v30 = vld [vmem:[%s2515_s24 + $0x48] sm:$0xff]   ;;  %v2219_v31 = vld [vmem:[%s2515_s24 + $0x50] sm:$0xff]  }
  0x17   : > { %v2220_v32 = vld [vmem:[%s2515_s24 + $0x58] sm:$0xff]   ;;  %v2221_v33 = vld [vmem:[%s2515_s24 + $0x60] sm:$0xff]   ;;  %v2222_v34 = vld [vmem:[%s2515_s24 + $0x68] sm:$0xff]  }
  0x18   : > { %v2223_v35 = vld [vmem:[%s2515_s24 + $0x70] sm:$0xff]   ;;  %v2224_v36 = vld [vmem:[%s2515_s24 + $0x78] sm:$0xff]   ;;  %v2225_v63 = vld [vmem:[%s2988_s5] sm:$0xff]  }
  0x19   : > { %2106 = vmatpush3.bf16.msra.mxu1 %v2195_v3  ;;  %2141 = vmatprep.subr.bf16.mxu0 %v2225_v63 }
  0x1a   : > { %2107 = vmatprep.subr.bf16.mxu1 %v2198_v7  ;;  %2142 = vmatpush3.bf16.msra.mxu0 %v2225_v63 }
  0x1c   : > { %2092 = vmatmul.mubr.msk.bf16.gmra.mxu1 %vm520_vm0, %v2194_v8  ;;  %2076 = vmatmul.mubr.msk.bf16.gmra.mxu0 %vm520_vm0, %v2206_v15 }
  0x1d   : > { %2095 = vmatprep.mubr.msk.bf16.mxu1 %vm520_vm0, %v2196_v9  ;;  %2108 = vmatpush3.bf16.msra.mxu1 %v2198_v7 }
  0x1e   : > { %2079 = vmatprep.mubr.msk.bf16.mxu0 %vm520_vm0, %v2209_v16 }
  0x24   : > { %2096 = vmatmul.mubr.msk.bf16.gmra.mxu1 %vm520_vm0, %v2197_v13  ;;  %2080 = vmatmul.mubr.msk.bf16.gmra.mxu0 %vm520_vm0, %v2210_v19 }
  0x25   : > { %2099 = vmatprep.mubr.msk.bf16.mxu1 %vm520_vm0, %v2199_v14  ;;  %2083 = vmatprep.mubr.msk.bf16.mxu0 %vm520_vm0, %v2213_v20 }
  0x2c   : > { %2100 = vmatmul.mubr.msk.bf16.gmra.mxu1 %vm520_vm0, %v2200_v17  ;;  %2084 = vmatmul.mubr.msk.bf16.gmra.mxu0 %vm520_vm0, %v2214_v22 }
  0x2d   : > { %2109 = vmatprep.mubr.msk.bf16.mxu1 %vm828_vm1, %v2203_v18 }
  0x34   : > { %2110 = vmatmul.mubr.msk.bf16.vlgmr.msra.gmra.mxu1 %vm828_vm1, %v2204_v21 }
  0x35   : > { %2113 = vmatprep.mubr.msk.bf16.mxu1 %vm828_vm1, %v2207_v23 }
  0x3c   : > { %2114 = vmatmul.mubr.msk.bf16.gmra.mxu1 %vm828_vm1, %v2208_v24 }
  0x3d   : > { %2117 = vmatprep.mubr.msk.bf16.mxu1 %vm828_vm1, %v2211_v25 }
  0x44   : > { %2118 = vmatmul.mubr.msk.bf16.gmra.mxu1 %vm828_vm1, %v2212_v26 }
  0x45   : > { %2121 = vmatprep.mubr.msk.bf16.mxu1 %vm828_vm1, %v2215_v27 }
  0x4c   : > { %2122 = vmatmul.mubr.msk.bf16.gmra.mxu1 %vm828_vm1, %v2216_v28 }
  0x4d   : > { %2125 = vmatprep.mubr.msk.bf16.mxu1 %vm828_vm1, %v2217_v29 }
  0x54   : > { %2126 = vmatmul.mubr.msk.bf16.gmra.mxu1 %vm828_vm1, %v2218_v30 }
  0x55   : > { %2129 = vmatprep.mubr.msk.bf16.mxu1 %vm828_vm1, %v2219_v31 }
  0x5c   : > { %2130 = vmatmul.mubr.msk.bf16.gmra.mxu1 %vm828_vm1, %v2220_v32 }
  0x5d   : > { %2133 = vmatprep.mubr.msk.bf16.mxu1 %vm828_vm1, %v2221_v33 }
  0x64   : > { %2134 = vmatmul.mubr.msk.bf16.gmra.mxu1 %vm828_vm1, %v2222_v34 }
  0x65   : > { %2137 = vmatprep.mubr.msk.bf16.mxu1 %vm828_vm1, %v2223_v35 }
  0x6c   : > { %2138 = vmatmul.mubr.msk.bf16.gmra.mxu1 %vm828_vm1, %v2224_v36 }
  0xd4   : > { %v2572_v37 = vpop.f32.mrf.mxu1  ;;  %v2073_v42 = vpop.f32.mrf.mxu0 }
  0xd6   : > { %v2574_v38 = vpop.f32.mrf.mxu1  ;;  %v603_v44 = vpop.f32.mrf.mxu0 }
  0xd8   : > { %v2576_v39 = vpop.f32.mrf.mxu1  ;;  %v2074_v47 = vpop.f32.mrf.mxu0 }
  0xda   : > { %v2578_v40 = vpop.f32.mrf.mxu1  ;;  %v606_v50 = vpop.f32.mrf.mxu0 }
  0xdc   : > { %v2580_v41 = vpop.f32.mrf.mxu1  ;;  %v2077_v53 = vpop.f32.mrf.mxu0 }
  0xde   : > { %v2582_v43 = vpop.f32.mrf.mxu1  ;;  %v619_v56 = vpop.f32.mrf.mxu0 }
  0xe0   : > { %v2584_v45 = vpop.f32.mrf.mxu1  ;;  %v2078_v59 = vpop.f32.mrf.mxu0 }
  0xe2   : > { %v2586_v46 = vpop.f32.mrf.mxu1  ;;  %v622_v1 = vpop.f32.mrf.mxu0 }
  0xe4   : > { %v2588_v48 = vpop.f32.mrf.mxu1  ;;  %v2081_v9 = vpop.f32.mrf.mxu0 }
  0xe6   : > { %v2590_v49 = vpop.f32.mrf.mxu1  ;;  %v635_v18 = vpop.f32.mrf.mxu0 }
  0xe8   : > { %v2592_v51 = vpop.f32.mrf.mxu1  ;;  %v2082_v27 = vpop.f32.mrf.mxu0 }
  0xea   : > { %v2594_v52 = vpop.f32.mrf.mxu1  ;;  %v638_v35 = vpop.f32.mrf.mxu0 }
  0xec   : > { %v2596_v54 = vpop.f32.mrf.mxu1  ;;  %v2085_v63 = vpop.f32.mrf.mxu0 }
  0xee   : > { %v2598_v55 = vpop.f32.mrf.mxu1 }
  0xf0   : > { %v2600_v57 = vpop.f32.mrf.mxu1 }
  0xf2   : > { %v2602_v58 = vpop.f32.mrf.mxu1 }
  0xf4   : > { %v2111_v60 = vpop.f32.mrf.mxu1 }
  0xf5   : > { %v920_v62 = vadd.f32 %v2111_v60, %v2073_v42 }
  0xf6   : > { %v911_v0 = vpop.f32.mrf.mxu1 }
  0xf7   : > { %v2613_v2 = vadd.f32 %v2607_v61, %v920_v62  ;;  %v912_v3 = vadd.f32 %v911_v0, %v603_v44 }
  0xf8   : > { %v2112_v4 = vpop.f32.mrf.mxu1 }
  0xf9   : > { %v1963_v5 = vmul.f32 -1.442695, %v2613_v2  ;;  %v2617_v6 = vadd.f32 %v2607_v61, %v912_v3  ;;  %v923_v7 = vadd.f32 %v2112_v4, %v2074_v47 }
  0xfa   : > { %v914_v8 = vpop.f32.mrf.mxu1 }
  0xfb   : > { %2226 = vpow2.f32 %v1963_v5  ;;  %v1961_v10 = vmul.f32 -1.442695, %v2617_v6  ;;  %v2621_v11 = vadd.f32 %v2607_v61, %v923_v7  ;;  %v915_v12 = vadd.f32 %v914_v8, %v606_v50 }
  0xfc   : > { %v2115_v13 = vpop.f32.mrf.mxu1 }
  0xfd   : > { %2228 = vpow2.f32 %v1961_v10  ;;  %v1964_v14 = vmul.f32 -1.442695, %v2621_v11  ;;  %v2625_v15 = vadd.f32 %v2607_v61, %v915_v12  ;;  %v936_v16 = vadd.f32 %v2115_v13, %v2077_v53  ;;  %v651_v12 = vpop.f32.mrf.mxu0 }
  0xfe   : > { %v927_v17 = vpop.f32.mrf.mxu1 }
  0xff   : > { %2230 = vpow2.f32 %v1964_v14  ;;  %v1962_v19 = vmul.f32 -1.442695, %v2625_v15  ;;  %v2629_v20 = vadd.f32 %v2607_v61, %v936_v16  ;;  %v928_v21 = vadd.f32 %v927_v17, %v619_v56 }
 0x100   : > { %v2116_v22 = vpop.f32.mrf.mxu1 }
 0x101   : > { %2232 = vpow2.f32 %v1962_v19  ;;  %v1967_v23 = vmul.f32 -1.442695, %v2629_v20  ;;  %v2633_v24 = vadd.f32 %v2607_v61, %v928_v21  ;;  %v939_v25 = vadd.f32 %v2116_v22, %v2078_v59 }
 0x102   : > { %v930_v26 = vpop.f32.mrf.mxu1 }
 0x103   : > { %2234 = vpow2.f32 %v1967_v23  ;;  %v1965_v28 = vmul.f32 -1.442695, %v2633_v24  ;;  %v2637_v29 = vadd.f32 %v2607_v61, %v939_v25  ;;  %v931_v30 = vadd.f32 %v930_v26, %v622_v1  ;;  %v2086_v25 = vpop.f32.mrf.mxu0 }
 0x104   : > { %v2119_v31 = vpop.f32.mrf.mxu1 }
 0x105   : > { %2236 = vpow2.f32 %v1965_v28  ;;  %v1968_v32 = vmul.f32 -1.442695, %v2637_v29  ;;  %v2641_v33 = vadd.f32 %v2607_v61, %v931_v30  ;;  %v952_v34 = vadd.f32 %v2119_v31, %v2081_v9 }
 0x106   : > { %v943_v36 = vpop.f32.mrf.mxu1 }
 0x107   : > { %v1966_v42 = vmul.f32 -1.442695, %v2641_v33  ;;  %v2645_v44 = vadd.f32 %v2607_v61, %v952_v34  ;;  %v944_v47 = vadd.f32 %v943_v36, %v635_v18  ;;  %2238 = vpow2.f32 %v1968_v32 }
 0x108   : > { %v2227_v50 = vpop.eup %2226  ;;  %v2120_v53 = vpop.f32.mrf.mxu1 }
 0x109   : > { %v1207_v56 = vadd.f32 1.0, %v2227_v50  ;;  %2240 = vpow2.f32 %v1966_v42  ;;  %v2648_v59 = vadd.f32 %v2607_v61, %v944_v47  ;;  %v1971_v62 = vmul.f32 -1.442695, %v2645_v44  ;;  %v654_v42 = vpop.f32.mrf.mxu0 }
 0x10a   : > { %v2229_v60 = vpop.eup %2228  ;;  %v946_v0 = vpop.f32.mrf.mxu1  ;;  %v955_v3 = vadd.f32 %v2120_v53, %v2082_v27 }
 0x10b   : > { %2242 = vrcp.f32 %v1207_v56  ;;  %v1205_v1 = vadd.f32 1.0, %v2229_v60  ;;  %v1969_v5 = vmul.f32 -1.442695, %v2648_v59  ;;  %v947_v7 = vadd.f32 %v946_v0, %v638_v35 }
 0x10c   : > { %v2231_v4 = vpop.eup %2230  ;;  %v2123_v8 = vpop.f32.mrf.mxu1  ;;  %v2653_v16 = vadd.f32 %v2607_v61, %v955_v3 }
 0x10d   : > { %2244 = vrcp.f32 %v1205_v1  ;;  %v1208_v9 = vadd.f32 1.0, %v2231_v4  ;;  %v2656_v18 = vadd.f32 %v2607_v61, %v947_v7  ;;  %v968_v21 = vadd.f32 %v2123_v8, %v2085_v63 }
 0x10e   : > { %v2233_v10 = vpop.eup %2232  ;;  %2246 = vpow2.f32 %v1971_v62  ;;  %v959_v13 = vpop.f32.mrf.mxu1  ;;  %v1972_v30 = vmul.f32 -1.442695, %v2653_v16 }
 0x10f   : > { %2248 = vrcp.f32 %v1208_v9  ;;  %v1206_v14 = vadd.f32 1.0, %v2233_v10  ;;  %v960_v26 = vadd.f32 %v959_v13, %v651_v12  ;;  %v1970_v31 = vmul.f32 -1.442695, %v2656_v18 }
 0x110   : > { %v2235_v17 = vpop.eup %2234  ;;  %2250 = vpow2.f32 %v1969_v5  ;;  %v2124_v19 = vpop.f32.mrf.mxu1  ;;  %v2661_v35 = vadd.f32 %v2607_v61, %v968_v21 }
 0x111   : > { %2252 = vrcp.f32 %v1206_v14  ;;  %v1211_v23 = vadd.f32 1.0, %v2235_v17  ;;  %v2664_v47 = vadd.f32 %v2607_v61, %v960_v26  ;;  %v971_v50 = vadd.f32 %v2124_v19, %v2086_v25 }
 0x112   : > { %v2237_v22 = vpop.eup %2236  ;;  %v962_v27 = vpop.f32.mrf.mxu1  ;;  %v1975_v1 = vmul.f32 -1.442695, %v2661_v35 }
 0x113   : > { %v1209_v28 = vadd.f32 1.0, %v2237_v22  ;;  %v963_v60 = vadd.f32 %v962_v27, %v654_v42  ;;  %v1973_v4 = vmul.f32 -1.442695, %v2664_v47  ;;  %v2670_v5 = vadd.f32 %v2607_v61, %v971_v50 }
 0x114   : > { %v2127_v32 = vpop.f32.mrf.mxu1  ;;  %v2239_v34 = vpop.eup %2238 }
 0x115   : > { %2254 = vrcp.f32 %v1209_v28  ;;  %v1212_v63 = vadd.f32 1.0, %v2239_v34  ;;  %v984_v7 = vadd.f32 %v2127_v32, %v2572_v37  ;;  %v2674_v10 = vadd.f32 %v2607_v61, %v963_v60 }
 0x116   : > { %v2241_v36 = vpop.eup %2240  ;;  %2256 = vrcp.f32 %v1211_v23  ;;  %v975_v53 = vpop.f32.mrf.mxu1  ;;  %v1976_v37 = vmul.f32 -1.442695, %v2670_v5 }
 0x117   : > { %v1210_v56 = vadd.f32 1.0, %v2241_v36  ;;  %2258 = vpow2.f32 %v1972_v30  ;;  %v976_v17 = vadd.f32 %v975_v53, %v2574_v38  ;;  %v2681_v22 = vadd.f32 %v2607_v61, %v984_v7 }
 0x118   : > { %v2243_v62 = vpop.eup %2242  ;;  %2260 = vpow2.f32 %v1970_v31  ;;  %v2128_v0 = vpop.f32.mrf.mxu1  ;;  %v1974_v25 = vmul.f32 -1.442695, %v2674_v10 }
 0x119   : > { %2262 = vrcp.f32 %v1210_v56  ;;  %1337 = vrot.lane.b32.xlu1 %v2243_v62, %s2426_s30  ;;  %v2686_v38 = vadd.f32 %v2607_v61, %v976_v17  ;;  %v987_v28 = vadd.f32 %v2128_v0, %v2576_v39  ;;  %v1979_v32 = vmul.f32 -1.442695, %v2681_v22 }
 0x11a   : > { %v2245_v3 = vpop.eup %2244  ;;  %v978_v8 = vpop.f32.mrf.mxu1  ;;  %2264 = vrcp.f32 %v1212_v63 }
 0x11b   : > { %v2247_v9 = vpop.eup %2246  ;;  %1333 = vrot.lane.b32.xlu0 %v2245_v3, %s2426_s30  ;;  %2266 = vpow2.f32 %v1975_v1  ;;  %v979_v42 = vadd.f32 %v978_v8, %v2578_v40  ;;  %v1977_v60 = vmul.f32 -1.442695, %v2686_v38  ;;  %v2699_v62 = vadd.f32 %v2607_v61, %v987_v28 }
 0x11c   : > { %v2249_v12 = vpop.eup %2248  ;;  %v2131_v13 = vpop.f32.mrf.mxu1  ;;  %2268 = vpow2.f32 %v1973_v4  ;;  %v1215_v26 = vadd.f32 1.0, %v2247_v9 }
 0x11d   : > { %v2251_v14 = vpop.eup %2250  ;;  %1339 = vrot.lane.b32.xlu1 %v2249_v12, %s2426_s30 }
 0x11e   : > { %v2253_v19 = vpop.eup %2252  ;;  %v1213_v21 = vadd.f32 1.0, %v2251_v14  ;;  %v991_v23 = vpop.f32.mrf.mxu1  ;;  %v1980_v14 = vmul.f32 -1.442695, %v2699_v62 }
 0x11f   : > { %1335 = vrot.lane.b32.xlu0 %v2253_v19, %s2426_s30  ;;  %v992_v17 = vadd.f32 %v991_v23, %v2582_v43 }
 0x120   : > { %2270 = vrcp.f32 %v1213_v21  ;;  %v2132_v27 = vpop.f32.mrf.mxu1 }
 0x121   : > { %v1003_v30 = vadd.f32 %v2132_v27, %v2584_v45  ;;  %2272 = vpow2.f32 %v1976_v37 }
 0x122   : > { %v2255_v31 = vpop.eup %2254  ;;  %v994_v34 = vpop.f32.mrf.mxu1  ;;  %2274 = vpow2.f32 %v1974_v25 }
 0x123   : > { %v2257_v36 = vpop.eup %2256  ;;  %v2693_v50 = vadd.f32 %v2607_v61, %v1003_v30  ;;  %v995_v53 = vadd.f32 %v994_v34, %v2586_v46  ;;  %1341 = vrot.lane.b32.xlu0 %v2255_v31, %s2426_s30  ;;  %2276 = vrcp.f32 %v1215_v26  ;;  %v2706_v46 = vadd.f32 %v2607_v61, %v979_v42 }
 0x124   : > { %v2259_v56 = vpop.eup %2258  ;;  %v2135_v39 = vpop.f32.mrf.mxu1  ;;  %2278 = vpow2.f32 %v1979_v32 }
 0x125   : > { %v2261_v45 = vpop.eup %2260  ;;  %v2702_v63 = vadd.f32 %v2607_v61, %v995_v53  ;;  %v1016_v40 = vadd.f32 %v2135_v39, %v2588_v48  ;;  %v1216_v8 = vadd.f32 1.0, %v2259_v56  ;;  %v1000_v48 = vadd.f32 %v2131_v13, %v2580_v41 }
 0x126   : > { %v2263_v0 = vpop.eup %2262  ;;  %v1214_v1 = vadd.f32 1.0, %v2261_v45  ;;  %v1007_v3 = vpop.f32.mrf.mxu1  ;;  %v1978_v26 = vmul.f32 -1.442695, %v2706_v46 }
 0x127   : > { %v2709_v4 = vadd.f32 %v2607_v61, %v1016_v40  ;;  %v1008_v7 = vadd.f32 %v1007_v3, %v2590_v49  ;;  %1343 = vrot.lane.b32.xlu1 %v2263_v0, %s2426_s30  ;;  %1345 = vrot.lane.b32.xlu0 %v2257_v36, %s2426_s30  ;;  %v2265_v12 = vpop.eup %2264  ;;  %v2725_v13 = vadd.f32 %v2607_v61, %v1000_v48 }
 0x128   : > { %2280 = vrcp.f32 %v1214_v1  ;;  %v2136_v9 = vpop.f32.mrf.mxu1  ;;  %v2267_v21 = vpop.eup %2266 }
 0x129   : > { %2282 = vpow2.f32 %v1977_v60  ;;  %v2718_v19 = vadd.f32 %v2607_v61, %v1008_v7  ;;  %v1019_v49 = vadd.f32 %v2136_v9, %v2592_v51  ;;  %v2269_v25 = vpop.eup %2268  ;;  %v2731_v51 = vadd.f32 %v2607_v61, %v992_v17 }
 0x12a   : > { %v1010_v37 = vpop.f32.mrf.mxu1  ;;  %2284 = vrcp.f32 %v1216_v8  ;;  %v1217_v41 = vadd.f32 1.0, %v2269_v25  ;;  %v1219_v31 = vadd.f32 1.0, %v2267_v21  ;;  %v1983_v53 = vmul.f32 -1.442695, %v2725_v13 }
 0x12b   : > { %v1011_v27 = vadd.f32 %v1010_v37, %v2594_v52  ;;  %1347 = vrot.lane.b32.xlu1 %v2265_v12, %s2426_s30  ;;  %v2728_v43 = vadd.f32 %v2607_v61, %v1019_v49  ;;  %2286 = vpow2.f32 %v1980_v14  ;;  %v1984_v12 = vmul.f32 -1.442695, %v2693_v50 }
 0x12c   : > { %v2139_v23 = vpop.f32.mrf.mxu1  ;;  %2288 = vrcp.f32 %v1217_v41  ;;  %v1982_v17 = vmul.f32 -1.442695, %v2702_v63  ;;  %v1987_v25 = vmul.f32 -1.442695, %v2709_v4 }
 0x12d   : > { %v2271_v28 = vpop.eup %2270  ;;  %v2734_v30 = vadd.f32 %v2607_v61, %v1011_v27  ;;  %v1032_v52 = vadd.f32 %v2139_v23, %v2596_v54  ;;  %2290 = vpow2.f32 %v1978_v26  ;;  %v1981_v54 = vmul.f32 -1.442695, %v2731_v51 }
 0x12e   : > { %1349 = vrot.lane.b32.xlu0 %v2271_v28, %s2426_s30  ;;  %v1023_v32 = vpop.f32.mrf.mxu1  ;;  %v2273_v34 = vpop.eup %2272  ;;  %2292 = vrcp.f32 %v1219_v31  ;;  %v1985_v27 = vmul.f32 -1.442695, %v2718_v19 }
 0x12f   : > { %v2739_v36 = vadd.f32 %v2607_v61, %v1032_v52  ;;  %v2275_v42 = vpop.eup %2274  ;;  %v1024_v56 = vadd.f32 %v1023_v32, %v2598_v55  ;;  %v1220_v3 = vadd.f32 1.0, %v2273_v34  ;;  %v1988_v32 = vmul.f32 -1.442695, %v2728_v43 }
 0x130   : > { %v2140_v39 = vpop.f32.mrf.mxu1  ;;  %v2277_v45 = vpop.eup %2276  ;;  %v1218_v60 = vadd.f32 1.0, %v2275_v42  ;;  %v1986_v42 = vmul.f32 -1.442695, %v2734_v30 }
 0x131   : > { %v1035_v40 = vadd.f32 %v2140_v39, %v2600_v57  ;;  %v2746_v0 = vadd.f32 %v2607_v61, %v1024_v56  ;;  %v2279_v8 = vpop.eup %2278 }
 0x132   : > { %1353 = vrot.lane.b32.xlu0 %v2277_v45, %s2426_s30  ;;  %v1026_v1 = vpop.f32.mrf.mxu1  ;;  %2294 = vrcp.f32 %v1218_v60  ;;  %v1223_v49 = vadd.f32 1.0, %v2279_v8 }
 0x133   : > { %v2750_v7 = vadd.f32 %v2607_v61, %v1035_v40  ;;  %v1027_v55 = vadd.f32 %v1026_v1, %v2602_v58  ;;  %2296 = vpow2.f32 %v1983_v53  ;;  %v1989_v1 = vmul.f32 -1.442695, %v2746_v0 }
 0x134   : > { %2298 = vpow2.f32 %v1981_v54  ;;  %v1991_v54 = vmul.f32 -1.442695, %v2739_v36 }
 0x135   : > { %v2281_v48 = vpop.eup %2280  ;;  %v2754_v57 = vadd.f32 %v2607_v61, %v1027_v55  ;;  %2300 = vrcp.f32 %v1220_v3 }
 0x136   : > { %v2283_v9 = vpop.eup %2282  ;;  %1351 = vrot.lane.b32.xlu1 %v2281_v48, %s2426_s30 }
 0x137   : > { %v1221_v14 = vadd.f32 1.0, %v2283_v9  ;;  %v2285_v21 = vpop.eup %2284 }
 0x138   : > { %v2287_v58 = vpop.eup %2286 }
 0x139   : > { %2302 = vrcp.f32 %v1221_v14  ;;  %v2289_v37 = vpop.eup %2288  ;;  %v1224_v23 = vadd.f32 1.0, %v2287_v58 }
 0x13a   : > { %2304 = vpow2.f32 %v1984_v12  ;;  %1355 = vrot.lane.b32.xlu1 %v2285_v21, %s2426_s30  ;;  %v2291_v61 = vpop.eup %2290  ;;  %1357 = vrot.lane.b32.xlu0 %v2289_v37, %s2426_s30  ;;  %v1992_v12 = vmul.f32 -1.442695, %v2750_v7 }
 0x13b   : > { %2306 = vpow2.f32 %v1982_v17  ;;  %v1222_v26 = vadd.f32 1.0, %v2291_v61  ;;  %v2293_v41 = vpop.eup %2292  ;;  %v1990_v17 = vmul.f32 -1.442695, %v2754_v57 }
 0x13c   : > { %2308 = vrcp.f32 %v1223_v49 }
 0x13d   : > { %2310 = vrcp.f32 %v1222_v26 }
 0x13e   : > { %2312 = vpow2.f32 %v1987_v25  ;;  %1361 = vrot.lane.b32.xlu0 %v2293_v41, %s2426_s30 }
 0x13f   : > { %v2295_v28 = vpop.eup %2294  ;;  %2314 = vpow2.f32 %v1985_v27 }
 0x140   : > { %v2297_v52 = vpop.eup %2296  ;;  %1359 = vrot.lane.b32.xlu1 %v2295_v28, %s2426_s30  ;;  %2316 = vrcp.f32 %v1224_v23 }
 0x141   : > { %v2299_v31 = vpop.eup %2298  ;;  %v1227_v56 = vadd.f32 1.0, %v2297_v52 }
 0x142   : > { %v1225_v34 = vadd.f32 1.0, %v2299_v31  ;;  %v2301_v53 = vpop.eup %2300 }
 0x144   : > { %2318 = vrcp.f32 %v1225_v34  ;;  %1363 = vrot.lane.b32.xlu1 %v2301_v53, %s2426_s30 }
 0x145   : > { %2320 = vpow2.f32 %v1988_v32 }
 0x146   : > { %v2303_v39 = vpop.eup %2302  ;;  %2322 = vpow2.f32 %v1986_v42 }
 0x147   : > { %v2305_v45 = vpop.eup %2304  ;;  %1365 = vrot.lane.b32.xlu0 %v2303_v39, %s2426_s30  ;;  %2324 = vrcp.f32 %v1227_v56 }
 0x148   : > { %v2307_v60 = vpop.eup %2306  ;;  %v1228_v55 = vadd.f32 1.0, %v2305_v45 }
 0x149   : > { %v1226_v40 = vadd.f32 1.0, %v2307_v60  ;;  %v2309_v3 = vpop.eup %2308 }
 0x14a   : > { %v2311_v8 = vpop.eup %2310 }
 0x14b   : > { %2326 = vrcp.f32 %v1226_v40  ;;  %1369 = vrot.lane.b32.xlu0 %v2309_v3, %s2426_s30  ;;  %v2313_v48 = vpop.eup %2312  ;;  %1367 = vrot.lane.b32.xlu1 %v2311_v8, %s2426_s30 }
 0x14c   : > { %2328 = vpow2.f32 %v1991_v54  ;;  %v2315_v9 = vpop.eup %2314  ;;  %v1231_v49 = vadd.f32 1.0, %v2313_v48 }
 0x14d   : > { %2330 = vpow2.f32 %v1989_v1  ;;  %v1229_v14 = vadd.f32 1.0, %v2315_v9  ;;  %v2317_v21 = vpop.eup %2316 }
 0x14e   : > { %2332 = vrcp.f32 %v1228_v55 }
 0x14f   : > { %2334 = vrcp.f32 %v1229_v14  ;;  %1371 = vrot.lane.b32.xlu1 %v2317_v21, %s2426_s30 }
 0x150   : > { %2336 = vpow2.f32 %v1992_v12 }
 0x151   : > { %v2319_v58 = vpop.eup %2318  ;;  %2338 = vpow2.f32 %v1990_v17 }
 0x152   : > { %v2321_v37 = vpop.eup %2320  ;;  %1373 = vrot.lane.b32.xlu0 %v2319_v58, %s2426_s30  ;;  %2340 = vrcp.f32 %v1231_v49 }
 0x153   : > { %v2323_v61 = vpop.eup %2322  ;;  %v1232_v27 = vadd.f32 1.0, %v2321_v37 }
 0x154   : > { %v1230_v25 = vadd.f32 1.0, %v2323_v61  ;;  %v2325_v26 = vpop.eup %2324 }
 0x156   : > { %2342 = vrcp.f32 %v1230_v25  ;;  %1377 = vrot.lane.b32.xlu0 %v2325_v26, %s2426_s30 }
 0x157   : > { %2344 = vrcp.f32 %v1232_v27 }
 0x158   : > { %v2327_v41 = vpop.eup %2326 }
 0x159   : > { %v2329_v23 = vpop.eup %2328  ;;  %1375 = vrot.lane.b32.xlu1 %v2327_v41, %s2426_s30 }
 0x15a   : > { %v2331_v28 = vpop.eup %2330  ;;  %v1235_v32 = vadd.f32 1.0, %v2329_v23 }
 0x15b   : > { %v1233_v52 = vadd.f32 1.0, %v2331_v28  ;;  %v2333_v31 = vpop.eup %2332 }
 0x15c   : > { %v2335_v34 = vpop.eup %2334 }
 0x15d   : > { %2346 = vrcp.f32 %v1233_v52  ;;  %1379 = vrot.lane.b32.xlu1 %v2333_v31, %s2426_s30  ;;  %v2337_v42 = vpop.eup %2336  ;;  %1381 = vrot.lane.b32.xlu0 %v2335_v34, %s2426_s30 }
 0x15e   : > { %v2339_v53 = vpop.eup %2338  ;;  %2348 = vrcp.f32 %v1235_v32  ;;  %v1236_v45 = vadd.f32 1.0, %v2337_v42 }
 0x15f   : > { %v1234_v56 = vadd.f32 1.0, %v2339_v53  ;;  %v2341_v39 = vpop.eup %2340 }
 0x161   : > { %2350 = vrcp.f32 %v1234_v56  ;;  %1385 = vrot.lane.b32.xlu0 %v2341_v39, %s2426_s30 }
 0x162   : > { %2352 = vrcp.f32 %v1236_v45 }
 0x163   : > { %v2343_v60 = vpop.eup %2342  ;;  %2354 = vtanh.f32 %v2613_v2 }
 0x164   : > { %1383 = vrot.lane.b32.xlu1 %v2343_v60, %s2426_s30  ;;  %v2345_v54 = vpop.eup %2344  ;;  %2356 = vtanh.f32 %v2621_v11 }
 0x165   : > { %2358 = vtanh.f32 %v2617_v6 }
 0x166   : > { %2360 = vtanh.f32 %v2625_v15 }
 0x167   : > { %2362 = vtanh.f32 %v2633_v24 }
 0x168   : > { %1387 = vrot.lane.b32.xlu1 %v2345_v54, %s2426_s30  ;;  %2364 = vtanh.f32 %v2641_v33 }
 0x169   : > { %2366 = vtanh.f32 %v2629_v20 }
 0x16a   : > { %v2347_v40 = vpop.eup %2346  ;;  %2368 = vtanh.f32 %v2637_v29 }
 0x16b   : > { %1389 = vrot.lane.b32.xlu0 %v2347_v40, %s2426_s30  ;;  %v2349_v1 = vpop.eup %2348  ;;  %2370 = vtanh.f32 %v2648_v59 }
 0x16c   : > { %2372 = vtanh.f32 %v2656_v18 }
 0x16d   : > { %2374 = vtanh.f32 %v2645_v44 }
 0x16e   : > { %v2351_v3 = vpop.eup %2350  ;;  %2376 = vtanh.f32 %v2653_v16 }
 0x16f   : > { %1393 = vrot.lane.b32.xlu0 %v2349_v1, %s2426_s30  ;;  %1391 = vrot.lane.b32.xlu1 %v2351_v3, %s2426_s30  ;;  %v2353_v55 = vpop.eup %2352  ;;  %2378 = vtanh.f32 %v2664_v47 }
 0x170   : > { %v2355_v9 = vpop.eup %2354  ;;  %2380 = vtanh.f32 %v2674_v10 }
 0x171   : > { %v2357_v12 = vpop.eup %2356  ;;  %2382 = vtanh.f32 %v2661_v35 }
 0x172   : > { %v2359_v17 = vpop.eup %2358  ;;  %2384 = vtanh.f32 %v2670_v5 }
 0x173   : > { %1395 = vrot.lane.b32.xlu1 %v2353_v55, %s2426_s30  ;;  %v2361_v21 = vpop.eup %2360  ;;  %2386 = vtanh.f32 %v2686_v38 }
 0x174   : > { %v2363_v33 = vpop.eup %2362  ;;  %2388 = vtanh.f32 %v2706_v46 }
 0x175   : > { %v2365_v20 = vpop.eup %2364  ;;  %2390 = vtanh.f32 %v2681_v22 }
 0x176   : > { %v2367_v27 = vpop.eup %2366  ;;  %2392 = vtanh.f32 %v2699_v62 }
 0x177   : > { %v2369_v23 = vpop.eup %2368  ;;  %2394 = vtanh.f32 %v2731_v51 }
 0x178   : > { %v2371_v18 = vpop.eup %2370  ;;  %2396 = vtanh.f32 %v2702_v63 }
 0x179   : > { %v2373_v34 = vpop.eup %2372  ;;  %2398 = vtanh.f32 %v2725_v13 }
 0x17a   : > { %v2375_v39 = vpop.eup %2374  ;;  %2400 = vtanh.f32 %v2693_v50 }
 0x17b   : > { %v2377_v45 = vpop.eup %2376  ;;  %2402 = vtanh.f32 %v2718_v19 }
 0x17c   : > { %v2379_v35 = vpop.eup %2378  ;;  %2404 = vtanh.f32 %v2734_v30 }
 0x17d   : > { %v2381_v1 = vpop.eup %2380  ;;  %2406 = vtanh.f32 %v2709_v4 }
 0x17e   : > { %2408 = vtanh.f32 %v2728_v43 }
 0x17f   : > { %2410 = vtanh.f32 %v2746_v0 }
 0x180   : > { %2412 = vtanh.f32 %v2754_v57 }
 0x18b   : > { %v1338_v8 = vpop.permute.xlu1 %1337 }
 0x18c   : > { %v1431_v2 = vmul.f32 %v2355_v9, %v1338_v8 }
 0x18d   : > { %v1334_v48 = vpop.permute.xlu0 %1333 }
 0x18e   : > { %v1429_v49 = vmul.f32 %v2359_v17, %v1334_v48  ;;  %v2383_v48 = vpop.eup %2382  ;;  %2414 = vtanh.f32 %v2739_v36 }
 0x18f   : > { %v1340_v14 = vpop.permute.xlu1 %1339 }
 0x190   : > { %v1432_v11 = vmul.f32 %v2357_v12, %v1340_v14  ;;  %v2385_v12 = vpop.eup %2384  ;;  %2416 = vtanh.f32 %v2750_v7 }
 0x191   : > { %v1336_v6 = vpop.permute.xlu0 %1335  ;;  %v2387_v46 = vpop.eup %2386 }
 0x192   : > { %v1462_v15 = vpack.c.bf16 %v1432_v11, %v1431_v2  ;;  %v1430_v58 = vmul.f32 %v2361_v21, %v1336_v6  ;;  %v2389_v22 = vpop.eup %2388 }
 0x194   : > { %v1461_v24 = vpack.c.bf16 %v1430_v58, %v1429_v49 }
 0x195   : > { %v1342_v37 = vpop.permute.xlu0 %1341 }
 0x196   : > { %2143 = vmatprep.mubr.msk.bf16.mxu0 %vm1492_vm2, %v1461_v24  ;;  %v1433_v29 = vmul.f32 %v2363_v33, %v1342_v37 }
 0x197   : > { %2144 = vmatmul.mubr.msk.bf16.vlgmr.msra.gmra.mxu0 %vm1492_vm2, %v1462_v15  ;;  %v2391_v15 = vpop.eup %2390 }
 0x198   : > { %v2393_v24 = vpop.eup %2392 }
 0x199   : > { %v1344_v61 = vpop.permute.xlu1 %1343  ;;  %v1346_v26 = vpop.permute.xlu0 %1345 }
 0x19a   : > { %v1434_v25 = vmul.f32 %v2365_v20, %v1344_v61  ;;  %v1435_v52 = vmul.f32 %v2367_v27, %v1346_v26  ;;  %v2395_v63 = vpop.eup %2394 }
 0x19b   : > { %v2397_v13 = vpop.eup %2396 }
 0x19c   : > { %v1463_v41 = vpack.c.bf16 %v1434_v25, %v1433_v29  ;;  %v2399_v27 = vpop.eup %2398 }
 0x19d   : > { %v1348_v28 = vpop.permute.xlu1 %1347 }
 0x19e   : > { %v1436_v31 = vmul.f32 %v2369_v23, %v1348_v28  ;;  %2147 = vmatprep.mubr.msk.bf16.mxu0 %vm1492_vm2, %v1463_v41  ;;  %v2401_v23 = vpop.eup %2400 }
 0x19f   : > { %v2403_v30 = vpop.eup %2402 }
 0x1a0   : > { %v1464_v32 = vpack.c.bf16 %v1436_v31, %v1435_v52  ;;  %v1350_v59 = vpop.permute.xlu0 %1349  ;;  %v2405_v4 = vpop.eup %2404 }
 0x1a1   : > { %v1437_v44 = vmul.f32 %v2371_v18, %v1350_v59 }
 0x1a2   : > { %2148 = vmatmul.mubr.msk.bf16.gmra.mxu0 %vm1492_vm2, %v1464_v32 }
 0x1a4   : > { %v1354_v56 = vpop.permute.xlu0 %1353 }
 0x1a5   : > { %v1439_v54 = vmul.f32 %v2375_v39, %v1354_v56 }
 0x1a8   : > { %v1352_v42 = vpop.permute.xlu1 %1351 }
 0x1a9   : > { %v1438_v53 = vmul.f32 %v2373_v34, %v1352_v42  ;;  %v2407_v42 = vpop.eup %2406 }
 0x1ab   : > { %v1465_v16 = vpack.c.bf16 %v1438_v53, %v1437_v44  ;;  %v2409_v53 = vpop.eup %2408 }
 0x1ac   : > { %v1356_v60 = vpop.permute.xlu1 %1355  ;;  %v1358_v10 = vpop.permute.xlu0 %1357 }
 0x1ad   : > { %v1440_v40 = vmul.f32 %v2377_v45, %v1356_v60  ;;  %2151 = vmatprep.mubr.msk.bf16.mxu0 %vm1492_vm2, %v1465_v16  ;;  %v1441_v5 = vmul.f32 %v2379_v35, %v1358_v10  ;;  %v2411_v57 = vpop.eup %2410 }
 0x1ae   : > { %v2413_v60 = vpop.eup %2412 }
 0x1af   : > { %v1466_v47 = vpack.c.bf16 %v1440_v40, %v1439_v54  ;;  %v2415_v10 = vpop.eup %2414 }
 0x1b0   : > { %v1362_v8 = vpop.permute.xlu0 %1361  ;;  %v2417_v35 = vpop.eup %2416 }
 0x1b1   : > { %2152 = vmatmul.mubr.msk.bf16.gmra.mxu0 %vm1492_vm2, %v1466_v47  ;;  %v1443_v17 = vmul.f32 %v2383_v48, %v1362_v8  ;;  %v2845_v8 = vld [vmem:[%s2989_s6] ss:$0 sm:$0xff] }
 0x1b2   : > { %v1360_v3 = vpop.permute.xlu1 %1359 }
 0x1b3   : > { %v1442_v55 = vmul.f32 %v2381_v1, %v1360_v3 }
 0x1b5   : > { %v1467_v9 = vpack.c.bf16 %v1442_v55, %v1441_v5 }
 0x1b6   : > { %v1364_v14 = vpop.permute.xlu1 %1363 }
 0x1b7   : > { %v1444_v38 = vmul.f32 %v2385_v12, %v1364_v14  ;;  %2155 = vmatprep.mubr.msk.bf16.mxu0 %vm1492_vm2, %v1467_v9  ;;  %v1704_v9 = vld [vmem:[%s2840_s13 + $0x10] sm:$0xff] }
 0x1b9   : > { %v1468_v2 = vpack.c.bf16 %v1444_v38, %v1443_v17  ;;  %v1366_v11 = vpop.permute.xlu0 %1365  ;;  %v1702_v17 = vld [vmem:[%s2840_s13] sm:$0xff] }
 0x1ba   : > { %v1445_v6 = vmul.f32 %v2387_v46, %v1366_v11  ;;  %v1705_v46 = vld [vmem:[%s2840_s13 + $0x18] sm:$0xff] }
 0x1bb   : > { %2156 = vmatmul.mubr.msk.bf16.gmra.mxu0 %vm1492_vm2, %v1468_v2 }
 0x1bd   : > { %v1368_v21 = vpop.permute.xlu1 %1367  ;;  %v1370_v49 = vpop.permute.xlu0 %1369 }
 0x1be   : > { %v1446_v62 = vmul.f32 %v2389_v22, %v1368_v21  ;;  %v1447_v33 = vmul.f32 %v2391_v15, %v1370_v49 }
 0x1c0   : > { %v1469_v58 = vpack.c.bf16 %v1446_v62, %v1445_v6  ;;  %v1703_v62 = vld [vmem:[%s2840_s13 + $0x8] sm:$0xff] }
 0x1c1   : > { %v1372_v37 = vpop.permute.xlu1 %1371 }
 0x1c2   : > { %v1448_v20 = vmul.f32 %v2393_v24, %v1372_v37  ;;  %2159 = vmatprep.mubr.msk.bf16.mxu0 %vm1492_vm2, %v1469_v58  ;;  %v1708_v37 = vld [vmem:[%s2840_s13 + $0x30] sm:$0xff] }
 0x1c4   : > { %v1470_v51 = vpack.c.bf16 %v1448_v20, %v1447_v33  ;;  %v1374_v61 = vpop.permute.xlu0 %1373 }
 0x1c5   : > { %v1449_v25 = vmul.f32 %v2395_v63, %v1374_v61 }
 0x1c6   : > { %2160 = vmatmul.mubr.msk.bf16.gmra.mxu0 %vm1492_vm2, %v1470_v51  ;;  %v1706_v51 = vld [vmem:[%s2840_s13 + $0x20] sm:$0xff] }
 0x1c8   : > { %v1378_v26 = vpop.permute.xlu0 %1377 }
 0x1c9   : > { %v1451_v52 = vmul.f32 %v2399_v27, %v1378_v26  ;;  %v1707_v27 = vld [vmem:[%s2840_s13 + $0x28] sm:$0xff] }
 0x1cb   : > { %v1376_v29 = vpop.permute.xlu1 %1375 }
 0x1cc   : > { %v1450_v50 = vmul.f32 %v2397_v13, %v1376_v29  ;;  %v1709_v29 = vld [vmem:[%s2840_s13 + $0x38] sm:$0xff] }
 0x1ce   : > { %v1471_v41 = vpack.c.bf16 %v1450_v50, %v1449_v25 }
 0x1cf   : > { %v1380_v28 = vpop.permute.xlu1 %1379  ;;  %v1382_v32 = vpop.permute.xlu0 %1381 }
 0x1d0   : > { %v1452_v31 = vmul.f32 %v2401_v23, %v1380_v28  ;;  %2163 = vmatprep.mubr.msk.bf16.mxu0 %vm1492_vm2, %v1471_v41  ;;  %v1453_v18 = vmul.f32 %v2403_v30, %v1382_v32  ;;  %v1710_v30 = vld [vmem:[%s2840_s13 + $0x40] sm:$0xff] }
 0x1d2   : > { %v1472_v19 = vpack.c.bf16 %v1452_v31, %v1451_v52  ;;  %v1712_v31 = vld [vmem:[%s2840_s13 + $0x50] sm:$0xff] }
 0x1d3   : > { %v1386_v34 = vpop.permute.xlu0 %1385 }
 0x1d4   : > { %2164 = vmatmul.mubr.msk.bf16.gmra.mxu0 %vm1492_vm2, %v1472_v19  ;;  %v1455_v39 = vmul.f32 %v2407_v42, %v1386_v34 }
 0x1d6   : > { %v1384_v59 = vpop.permute.xlu1 %1383 }
 0x1d7   : > { %v1454_v43 = vmul.f32 %v2405_v4, %v1384_v59 }
 0x1d9   : > { %v1473_v44 = vpack.c.bf16 %v1454_v43, %v1453_v18  ;;  %v1713_v43 = vld [vmem:[%s2840_s13 + $0x58] sm:$0xff] }
 0x1da   : > { %v1388_v56 = vpop.permute.xlu1 %1387 }
 0x1db   : > { %v1456_v16 = vmul.f32 %v2409_v53, %v1388_v56  ;;  %2167 = vmatprep.mubr.msk.bf16.mxu0 %vm1492_vm2, %v1473_v44  ;;  %v1711_v53 = vld [vmem:[%s2840_s13 + $0x48] sm:$0xff] }
 0x1dd   : > { %v1474_v0 = vpack.c.bf16 %v1456_v16, %v1455_v39  ;;  %v1390_v45 = vpop.permute.xlu0 %1389 }
 0x1de   : > { %v1457_v36 = vmul.f32 %v2411_v57, %v1390_v45  ;;  %v1716_v45 = vld [vmem:[%s2840_s13 + $0x70] sm:$0xff] }
 0x1df   : > { %2168 = vmatmul.mubr.msk.bf16.gmra.mxu0 %vm1492_vm2, %v1474_v0 }
 0x1e1   : > { %v1392_v54 = vpop.permute.xlu1 %1391  ;;  %v1394_v47 = vpop.permute.xlu0 %1393 }
 0x1e2   : > { %v1458_v40 = vmul.f32 %v2413_v60, %v1392_v54  ;;  %v1459_v3 = vmul.f32 %v2415_v10, %v1394_v47  ;;  %v1714_v54 = vld [vmem:[%s2840_s13 + $0x60] sm:$0xff]  ;;  %v1717_v10 = vld [vmem:[%s2840_s13 + $0x78] sm:$0xff] }
 0x1e4   : > { %v1475_v7 = vpack.c.bf16 %v1458_v40, %v1457_v36 }
 0x1e5   : > { %v1396_v1 = vpop.permute.xlu1 %1395 }
 0x1e6   : > { %v1460_v5 = vmul.f32 %v2417_v35, %v1396_v1  ;;  %2171 = vmatprep.mubr.msk.bf16.mxu0 %vm1492_vm2, %v1475_v7 }
 0x1e8   : > { %v1476_v55 = vpack.c.bf16 %v1460_v5, %v1459_v3  ;;  %v1715_v3 = vld [vmem:[%s2840_s13 + $0x68] sm:$0xff] }
 0x1ea   : > { %2172 = vmatmul.mubr.msk.bf16.gmra.mxu0 %vm1492_vm2, %v1476_v55 }
 0x257   : > { %v2145_v48 = vpop.f32.mrf.mxu0 }
 0x258   : > { %v1584_v12 = vadd.f32 %v2145_v48, %v2845_v8 }
 0x259   : > { %v1575_v14 = vpop.f32.mrf.mxu0 }
 0x25a   : > { %v1736_v38 = vadd.f32 %v1704_v9, %v1584_v12  ;;  %v1576_v2 = vadd.f32 %v2845_v8, %v1575_v14  ;;  %v1720_v12 = vld [vmem:[%s2840_s13 + $0x90] sm:$0xff] }
 0x25b   : > { %v2146_v11 = vpop.f32.mrf.mxu0 }
 0x25c   : > { %1768 = vst.msk [vmem:[%s2852_s17 + $0x10] sm:$0xff] %vm1492_vm2, %v1736_v38  ;;  %v1734_v22 = vadd.f32 %v1702_v17, %v1576_v2  ;;  %v1587_v21 = vadd.f32 %v2146_v11, %v2845_v8  ;;  %v1718_v38 = vld [vmem:[%s2840_s13 + $0x80] sm:$0xff] }
 0x25d   : > { %v1578_v6 = vpop.f32.mrf.mxu0 }
 0x25e   : > { %1766 = vst.msk [vmem:[%s2852_s17] sm:$0xff] %vm1492_vm2, %v1734_v22  ;;  %v1737_v49 = vadd.f32 %v1705_v46, %v1587_v21  ;;  %v1579_v15 = vadd.f32 %v2845_v8, %v1578_v6  ;;  %v1721_v22 = vld [vmem:[%s2840_s13 + $0x98] sm:$0xff] }
 0x260   : > { %1769 = vst.msk [vmem:[%s2852_s17 + $0x18] sm:$0xff] %vm1492_vm2, %v1737_v49  ;;  %v1735_v58 = vadd.f32 %v1703_v62, %v1579_v15  ;;  %v1719_v49 = vld [vmem:[%s2840_s13 + $0x88] sm:$0xff] }
 0x262   : > { %1767 = vst.msk [vmem:[%s2852_s17 + $0x8] sm:$0xff] %vm1492_vm2, %v1735_v58  ;;  %v2149_v24 = vpop.f32.mrf.mxu0 }
 0x263   : > { %v1600_v33 = vadd.f32 %v2149_v24, %v2845_v8 }
 0x264   : > { %v1591_v20 = vpop.f32.mrf.mxu0 }
 0x265   : > { %v1740_v61 = vadd.f32 %v1708_v37, %v1600_v33  ;;  %v1592_v63 = vadd.f32 %v2845_v8, %v1591_v20  ;;  %v1724_v33 = vld [vmem:[%s2840_s13 + $0xb0] sm:$0xff] }
 0x266   : > { %v2150_v13 = vpop.f32.mrf.mxu0 }
 0x267   : > { %1772 = vst.msk [vmem:[%s2852_s17 + $0x30] sm:$0xff] %vm1492_vm2, %v1740_v61  ;;  %v1738_v25 = vadd.f32 %v1706_v51, %v1592_v63  ;;  %v1603_v50 = vadd.f32 %v2150_v13, %v2845_v8  ;;  %v1722_v61 = vld [vmem:[%s2840_s13 + $0xa0] sm:$0xff] }
 0x268   : > { %v1594_v26 = vpop.f32.mrf.mxu0 }
 0x269   : > { %1770 = vst.msk [vmem:[%s2852_s17 + $0x20] sm:$0xff] %vm1492_vm2, %v1738_v25  ;;  %v1741_v41 = vadd.f32 %v1709_v29, %v1603_v50  ;;  %v1595_v23 = vadd.f32 %v2845_v8, %v1594_v26  ;;  %v1725_v25 = vld [vmem:[%s2840_s13 + $0xb8] sm:$0xff] }
 0x26b   : > { %1773 = vst.msk [vmem:[%s2852_s17 + $0x38] sm:$0xff] %vm1492_vm2, %v1741_v41  ;;  %v1739_v28 = vadd.f32 %v1707_v27, %v1595_v23  ;;  %v1723_v41 = vld [vmem:[%s2840_s13 + $0xa8] sm:$0xff] }
 0x26d   : > { %1771 = vst.msk [vmem:[%s2852_s17 + $0x28] sm:$0xff] %vm1492_vm2, %v1739_v28 }
 0x271   : > { %v2153_v52 = vpop.f32.mrf.mxu0 }
 0x272   : > { %v1616_v19 = vadd.f32 %v2153_v52, %v2845_v8 }
 0x273   : > { %v1607_v32 = vpop.f32.mrf.mxu0 }
 0x274   : > { %v1744_v4 = vadd.f32 %v1712_v31, %v1616_v19  ;;  %v1608_v59 = vadd.f32 %v2845_v8, %v1607_v32  ;;  %v1728_v19 = vld [vmem:[%s2840_s13 + $0xd0] sm:$0xff] }
 0x275   : > { %v2154_v18 = vpop.f32.mrf.mxu0 }
 0x276   : > { %1776 = vst.msk [vmem:[%s2852_s17 + $0x50] sm:$0xff] %vm1492_vm2, %v1744_v4  ;;  %v1742_v34 = vadd.f32 %v1710_v30, %v1608_v59  ;;  %v1619_v42 = vadd.f32 %v2154_v18, %v2845_v8  ;;  %v1726_v4 = vld [vmem:[%s2840_s13 + $0xc0] sm:$0xff] }
 0x277   : > { %v1610_v44 = vpop.f32.mrf.mxu0 }
 0x278   : > { %1774 = vst.msk [vmem:[%s2852_s17 + $0x40] sm:$0xff] %vm1492_vm2, %v1742_v34  ;;  %v1745_v56 = vadd.f32 %v1713_v43, %v1619_v42  ;;  %v1611_v39 = vadd.f32 %v2845_v8, %v1610_v44  ;;  %v1729_v34 = vld [vmem:[%s2840_s13 + $0xd8] sm:$0xff] }
 0x27a   : > { %1777 = vst.msk [vmem:[%s2852_s17 + $0x58] sm:$0xff] %vm1492_vm2, %v1745_v56  ;;  %v1743_v16 = vadd.f32 %v1711_v53, %v1611_v39  ;;  %v1727_v56 = vld [vmem:[%s2840_s13 + $0xc8] sm:$0xff] }
 0x27b   : > { %v2157_v0 = vpop.f32.mrf.mxu0 }
 0x27c   : > { %1775 = vst.msk [vmem:[%s2852_s17 + $0x48] sm:$0xff] %vm1492_vm2, %v1743_v16  ;;  %v1632_v57 = vadd.f32 %v2157_v0, %v2845_v8 }
 0x27d   : > { %v1623_v60 = vpop.f32.mrf.mxu0 }
 0x27e   : > { %v1748_v36 = vadd.f32 %v1716_v45, %v1632_v57  ;;  %v1624_v40 = vadd.f32 %v2845_v8, %v1623_v60  ;;  %v1732_v57 = vld [vmem:[%s2840_s13 + $0xf0] sm:$0xff] }
 0x27f   : > { %v2158_v47 = vpop.f32.mrf.mxu0 }
 0x280   : > { %1780 = vst.msk [vmem:[%s2852_s17 + $0x70] sm:$0xff] %vm1492_vm2, %v1748_v36  ;;  %v1746_v7 = vadd.f32 %v1714_v54, %v1624_v40  ;;  %v1635_v35 = vadd.f32 %v2158_v47, %v2845_v8  ;;  %v1730_v36 = vld [vmem:[%s2840_s13 + $0xe0] sm:$0xff] }
 0x281   : > { %v1626_v1 = vpop.f32.mrf.mxu0 }
 0x282   : > { %1778 = vst.msk [vmem:[%s2852_s17 + $0x60] sm:$0xff] %vm1492_vm2, %v1746_v7  ;;  %v1749_v5 = vadd.f32 %v1717_v10, %v1635_v35  ;;  %v1627_v55 = vadd.f32 %v2845_v8, %v1626_v1  ;;  %v1733_v7 = vld [vmem:[%s2840_s13 + $0xf8] sm:$0xff] }
 0x284   : > { %1781 = vst.msk [vmem:[%s2852_s17 + $0x78] sm:$0xff] %vm1492_vm2, %v1749_v5  ;;  %v1747_v48 = vadd.f32 %v1715_v3, %v1627_v55  ;;  %v1731_v5 = vld [vmem:[%s2840_s13 + $0xe8] sm:$0xff] }
 0x286   : > { %1779 = vst.msk [vmem:[%s2852_s17 + $0x68] sm:$0xff] %vm1492_vm2, %v1747_v48  ;;  %v2161_v9 = vpop.f32.mrf.mxu0 }
 0x287   : > { %v1648_v14 = vadd.f32 %v2161_v9, %v2845_v8 }
 0x288   : > { %v1639_v17 = vpop.f32.mrf.mxu0 }
 0x289   : > { %v1752_v2 = vadd.f32 %v1720_v12, %v1648_v14  ;;  %v1640_v11 = vadd.f32 %v2845_v8, %v1639_v17 }
 0x28a   : > { %v2162_v46 = vpop.f32.mrf.mxu0 }
 0x28b   : > { %1784 = vst.msk [vmem:[%s2852_s17 + $0x90] sm:$0xff] %vm1492_vm2, %v1752_v2  ;;  %v1750_v21 = vadd.f32 %v1718_v38, %v1640_v11  ;;  %v1651_v6 = vadd.f32 %v2162_v46, %v2845_v8 }
 0x28c   : > { %v1642_v62 = vpop.f32.mrf.mxu0 }
 0x28d   : > { %1782 = vst.msk [vmem:[%s2852_s17 + $0x80] sm:$0xff] %vm1492_vm2, %v1750_v21  ;;  %v1753_v15 = vadd.f32 %v1721_v22, %v1651_v6  ;;  %v1643_v58 = vadd.f32 %v2845_v8, %v1642_v62 }
 0x28f   : > { %1785 = vst.msk [vmem:[%s2852_s17 + $0x98] sm:$0xff] %vm1492_vm2, %v1753_v15  ;;  %v1751_v24 = vadd.f32 %v1719_v49, %v1643_v58 }
 0x291   : > { %1783 = vst.msk [vmem:[%s2852_s17 + $0x88] sm:$0xff] %vm1492_vm2, %v1751_v24 }
 0x294   : > { %v2165_v37 = vpop.f32.mrf.mxu0 }
 0x295   : > { %v1664_v20 = vadd.f32 %v2165_v37, %v2845_v8 }
 0x296   : > { %v1655_v51 = vpop.f32.mrf.mxu0 }
 0x297   : > { %v1756_v63 = vadd.f32 %v1724_v33, %v1664_v20  ;;  %v1656_v13 = vadd.f32 %v2845_v8, %v1655_v51 }
 0x298   : > { %v2166_v29 = vpop.f32.mrf.mxu0 }
 0x299   : > { %1788 = vst.msk [vmem:[%s2852_s17 + $0xb0] sm:$0xff] %vm1492_vm2, %v1756_v63  ;;  %v1754_v50 = vadd.f32 %v1722_v61, %v1656_v13  ;;  %v1667_v26 = vadd.f32 %v2166_v29, %v2845_v8 }
 0x29a   : > { %v1658_v27 = vpop.f32.mrf.mxu0 }
 0x29b   : > { %1786 = vst.msk [vmem:[%s2852_s17 + $0xa0] sm:$0xff] %vm1492_vm2, %v1754_v50  ;;  %v1757_v23 = vadd.f32 %v1725_v25, %v1667_v26  ;;  %v1659_v28 = vadd.f32 %v2845_v8, %v1658_v27 }
 0x29d   : > { %1789 = vst.msk [vmem:[%s2852_s17 + $0xb8] sm:$0xff] %vm1492_vm2, %v1757_v23  ;;  %v1755_v52 = vadd.f32 %v1723_v41, %v1659_v28 }
 0x29f   : > { %1787 = vst.msk [vmem:[%s2852_s17 + $0xa8] sm:$0xff] %vm1492_vm2, %v1755_v52  ;;  %v2169_v31 = vpop.f32.mrf.mxu0 }
 0x2a0   : > { %v1680_v32 = vadd.f32 %v2169_v31, %v2845_v8 }
 0x2a1   : > { %v1671_v30 = vpop.f32.mrf.mxu0 }
 0x2a2   : > { %v1760_v59 = vadd.f32 %v1728_v19, %v1680_v32  ;;  %v1672_v18 = vadd.f32 %v2845_v8, %v1671_v30 }
 0x2a3   : > { %v2170_v43 = vpop.f32.mrf.mxu0 }
 0x2a4   : > { %1792 = vst.msk [vmem:[%s2852_s17 + $0xd0] sm:$0xff] %vm1492_vm2, %v1760_v59  ;;  %v1758_v42 = vadd.f32 %v1726_v4, %v1672_v18  ;;  %v1683_v44 = vadd.f32 %v2170_v43, %v2845_v8 }
 0x2a5   : > { %v1674_v53 = vpop.f32.mrf.mxu0 }
 0x2a6   : > { %1790 = vst.msk [vmem:[%s2852_s17 + $0xc0] sm:$0xff] %vm1492_vm2, %v1758_v42  ;;  %v1761_v39 = vadd.f32 %v1729_v34, %v1683_v44  ;;  %v1675_v16 = vadd.f32 %v2845_v8, %v1674_v53 }
 0x2a8   : > { %1793 = vst.msk [vmem:[%s2852_s17 + $0xd8] sm:$0xff] %vm1492_vm2, %v1761_v39  ;;  %v1759_v0 = vadd.f32 %v1727_v56, %v1675_v16 }
 0x2aa   : > { %1791 = vst.msk [vmem:[%s2852_s17 + $0xc8] sm:$0xff] %vm1492_vm2, %v1759_v0  ;;  %v2173_v45 = vpop.f32.mrf.mxu0 }
 0x2ab   : > { %v1696_v60 = vadd.f32 %v2173_v45, %v2845_v8 }
 0x2ac   : > { %v1687_v54 = vpop.f32.mrf.mxu0 }
 0x2ad   : > { %v1764_v40 = vadd.f32 %v1732_v57, %v1696_v60  ;;  %v1688_v47 = vadd.f32 %v2845_v8, %v1687_v54 }
 0x2ae   : > { %v2174_v10 = vpop.f32.mrf.mxu0 }
 0x2af   : > { %1796 = vst.msk [vmem:[%s2852_s17 + $0xf0] sm:$0xff] %vm1492_vm2, %v1764_v40  ;;  %v1762_v35 = vadd.f32 %v1730_v36, %v1688_v47  ;;  %v1699_v1 = vadd.f32 %v2174_v10, %v2845_v8 }
 0x2b0   : > { %v1690_v3 = vpop.f32.mrf.mxu0 }
 0x2b1   : > { %1794 = vst.msk [vmem:[%s2852_s17 + $0xe0] sm:$0xff] %vm1492_vm2, %v1762_v35  ;;  %v1765_v55 = vadd.f32 %v1733_v7, %v1699_v1  ;;  %v1691_v48 = vadd.f32 %v2845_v8, %v1690_v3 }
 0x2b3   : > { %1797 = vst.msk [vmem:[%s2852_s17 + $0xf8] sm:$0xff] %vm1492_vm2, %v1765_v55  ;;  %v1763_v9 = vadd.f32 %v1731_v5, %v1691_v48 }
 0x2b5   : > { %1795 = vst.msk [vmem:[%s2852_s17 + $0xe8] sm:$0xff] %vm1492_vm2, %v1763_v9 }
 0x2b6 PF: > { %s18_s27 = sadd.s32 1, %s2424_s27  }
 0x2b7   : > { %p15_p4 = scmp.ge.s32.totalorder %s18_s27, 4  }
 0x2b9   :  { %17 = sbr.rel (!%p15_p4) target bundleno = 1 (0x1), region = 88 }

// kernel: pixelcnn_forward.57
= control target key start
LH: loop header
LB: loop body
LE: loop exit
PB: predicated region body
PF: predicated region fallthrough
CT: control target
= control target key end

     0   :  { %s3750_s24 = smov 0   ;;  %s5876_s0 = inlined_call_operand.vmem [shape: f32[512,16], index: 0, kind: input, shape index: {}]   ;;  %s5877_s1 = inlined_call_operand.vmem [shape: bf16[16,16], index: 1, kind: input, shape index: {}]   ;;  %s5878_s2 = inlined_call_operand.vmem [shape: bf16[16,16], index: 2, kind: input, shape index: {}]   ;;  %s5879_s3 = inlined_call_operand.vmem [shape: f32[1,16], index: 3, kind: input, shape index: {}]   ;;  %s5880_s4 = inlined_call_operand.vmem [shape: bf16[16,1024], index: 4, kind: input, shape index: {}]   ;;  %s5881_s5 = inlined_call_operand.vmem [shape: bf16[16,1024], index: 5, kind: input, shape index: {}]   ;;  %s5882_s6 = inlined_call_operand.vmem [shape: f32[1,1024], index: 6, kind: input, shape index: {}]   ;;  %s5883_s7 = inlined_call_operand.vmem [shape: f32[512,1024], index: 7, kind: output, shape index: {}]  }
   0x1 LB: > { %s3395_s25 = sadd.s32 4294967295, %s3707_s24   ;;  %p3399_p0 = scmp.ge.s32.totalorder %s3707_s24, 1  ;;  %s3707_s24 = sphi %s3750_s24, %s17_s24  }
   0x2   : > { %p238_p1 = scmp.lt.s32.totalorder %s3707_s24, 3 }
   0x4   : > { %p239_p2 = pnand %p3399_p0, %p238_p1 }
   0x6   : > { %242 = sbr.rel (%p239_p2) target bundleno = 943 (0x3af), region = 48 }
   0xb   : > { %v3698_v0 = vld [vmem:[%s5877_s1] sm:$0xff]   ;;  %s3400_s28 = sshll.u32 %s3395_s25, 5  ;;  %v1056_v4 = vld [vmem:[%s5881_s5 + $0x8] sm:$0xff]  ;;  %vm455_vm0 = vcmask 130048  }
   0xc   : > { %v3699_v1 = vld [vmem:[%s5878_s2] sm:$0xff]   ;;  %p272_p3 = scmp.lt.s32.totalorder %s3400_s28, 63  ;;  %3655 = vmatprep.subr.bf16.mxu1 %v3698_v0  ;;  %v1060_v6 = vld [vmem:[%s5881_s5 + $0x28] sm:$0xff] }
   0xd   : > { %v3767_v2 = vld [vmem:[%s5881_s5] sm:$0xff]  ;;  %3656 = vmatpush3.bf16.msra.mxu1 %v3698_v0  ;;  %3621 = vmatprep.subr.bf16.mxu0 %v3699_v1  ;;  %v3443_v7 = vcombine.high %v1056_v4, %v1060_v6  ;;  %v3442_v12 = vcombine.low %v1056_v4, %v1060_v6 }
   0xe   : > { %v3772_v3 = vld [vmem:[%s5881_s5 + $0x20] sm:$0xff]  ;;  %s6324_s28 = smov (!%p272_p3, %s3400_s28), 63  ;;  %3622 = vmatpush3.bf16.msra.mxu0 %v3699_v1 }
   0xf   : > { %v3441_v5 = vcombine.high %v3767_v2, %v3772_v3  ;;  %s3401_s16 = sshll.u32 %s6324_s28, 3  ;;  %1358 = vmatprep.subr.bf16.mxu1 %v3443_v7  ;;  %v3440_v11 = vcombine.low %v3767_v2, %v3772_v3  ;;  %s3586_s29 = sshll.u32 %s6324_s28, 6 }
  0x10   : > { %s3788_s19 = scalar_lea.vmem %s5876_s0, %s3401_s16  ;;  %s5050_s8 = scalar_lea.vmem %s5883_s7, %s3586_s29 }
  0x11   : > { %1165 = vmatprep.subr.bf16.mxu0 %v3441_v5  ;;  %v285_v8 = vld [vmem:[%s3788_s19] sm:$0xff]  ;;  %v286_v9 = vld [vmem:[%s3788_s19 + $0x8] sm:$0xff]  ;;  %v287_v10 = vld [vmem:[%s3788_s19 + $0x10] sm:$0xff] }
  0x12   : > { %v317_v13 = vmax.f32 %v285_v8, 0.0  ;;  %v318_v14 = vmax.f32 %v286_v9, 0.0  ;;  %v288_v15 = vld [vmem:[%s3788_s19 + $0x18] sm:$0xff]  ;;  %v319_v16 = vmax.f32 %v287_v10, 0.0  ;;  %v365_v17 = vsub.f32 0.0, %v285_v8  ;;  %v289_v18 = vld [vmem:[%s3788_s19 + $0x20] sm:$0xff] }
  0x13   : > { %v320_v19 = vmax.f32 %v288_v15, 0.0  ;;  %v366_v20 = vsub.f32 0.0, %v286_v9  ;;  %v367_v21 = vsub.f32 0.0, %v287_v10  ;;  %v368_v22 = vsub.f32 0.0, %v288_v15  ;;  %v290_v23 = vld [vmem:[%s3788_s19 + $0x28] sm:$0xff]  ;;  %v291_v28 = vld [vmem:[%s3788_s19 + $0x30] sm:$0xff] }
  0x14   : > { %v349_v24 = vpack.c.bf16 %v318_v14, %v317_v13  ;;  %v397_v25 = vmax.f32 %v365_v17, 0.0  ;;  %v369_v26 = vsub.f32 0.0, %v289_v18  ;;  %v370_v27 = vsub.f32 0.0, %v290_v23  ;;  %v292_v29 = vld [vmem:[%s3788_s19 + $0x38] sm:$0xff]  ;;  %v293_v38 = vld [vmem:[%s3788_s19 + $0x40] sm:$0xff]  ;;  %v294_v39 = vld [vmem:[%s3788_s19 + $0x48] sm:$0xff] }
  0x15   : > { %v350_v30 = vpack.c.bf16 %v320_v19, %v319_v16  ;;  %v398_v31 = vmax.f32 %v366_v20, 0.0  ;;  %v399_v32 = vmax.f32 %v367_v21, 0.0  ;;  %v400_v33 = vmax.f32 %v368_v22, 0.0  ;;  %v295_v57 = vld [vmem:[%s3788_s19 + $0x50] sm:$0xff]  ;;  %v296_v58 = vld [vmem:[%s3788_s19 + $0x58] sm:$0xff]  ;;  %v297_v60 = vld [vmem:[%s3788_s19 + $0x60] sm:$0xff] }
  0x16   : > { %3657 = vmatprep.mubr.msk.bf16.mxu1 %vm455_vm0, %v349_v24  ;;  %v401_v34 = vmax.f32 %v369_v26, 0.0  ;;  %v402_v35 = vmax.f32 %v370_v27, 0.0  ;;  %v321_v36 = vmax.f32 %v289_v18, 0.0  ;;  %v322_v37 = vmax.f32 %v290_v23, 0.0  ;;  %v298_v61 = vld [vmem:[%s3788_s19 + $0x68] sm:$0xff]  ;;  %v299_v13 = vld [vmem:[%s3788_s19 + $0x70] sm:$0xff] }
  0x17   : > { %3658 = vmatmul.mubr.msk.bf16.vlgmr.msra.gmra.mxu1 %vm455_vm0, %v350_v30  ;;  %v429_v40 = vpack.c.bf16 %v398_v31, %v397_v25  ;;  %v430_v41 = vpack.c.bf16 %v400_v33, %v399_v32  ;;  %v371_v42 = vsub.f32 0.0, %v291_v28  ;;  %v372_v43 = vsub.f32 0.0, %v292_v29  ;;  %v300_v14 = vld [vmem:[%s3788_s19 + $0x78] sm:$0xff]  ;;  %v301_v16 = vld [vmem:[%s3788_s19 + $0x80] sm:$0xff]  ;;  %v302_v17 = vld [vmem:[%s3788_s19 + $0x88] sm:$0xff] }
  0x18   : > { %v431_v44 = vpack.c.bf16 %v402_v35, %v401_v34  ;;  %v351_v45 = vpack.c.bf16 %v322_v37, %v321_v36  ;;  %v323_v46 = vmax.f32 %v291_v28, 0.0  ;;  %v324_v47 = vmax.f32 %v292_v29, 0.0  ;;  %1359 = vmatpush1.bf16.msra.mxu1 %v3442_v12  ;;  %v303_v33 = vld [vmem:[%s3788_s19 + $0x90] sm:$0xff]  ;;  %v304_v34 = vld [vmem:[%s3788_s19 + $0x98] sm:$0xff]  ;;  %v305_v36 = vld [vmem:[%s3788_s19 + $0xa0] sm:$0xff] }
  0x19   : > { %3623 = vmatprep.mubr.msk.bf16.mxu0 %vm455_vm0, %v429_v40  ;;  %v373_v48 = vsub.f32 0.0, %v293_v38  ;;  %v374_v49 = vsub.f32 0.0, %v294_v39  ;;  %v403_v50 = vmax.f32 %v371_v42, 0.0  ;;  %v404_v51 = vmax.f32 %v372_v43, 0.0  ;;  %v306_v37 = vld [vmem:[%s3788_s19 + $0xa8] sm:$0xff] }
  0x1a   : > { %3624 = vmatmul.mubr.msk.bf16.vlgmr.msra.gmra.mxu0 %vm455_vm0, %v430_v41  ;;  %3661 = vmatprep.mubr.msk.bf16.mxu1 %vm455_vm0, %v351_v45  ;;  %v325_v52 = vmax.f32 %v293_v38, 0.0  ;;  %v326_v53 = vmax.f32 %v294_v39, 0.0  ;;  %v352_v54 = vpack.c.bf16 %v324_v47, %v323_v46  ;;  %v375_v63 = vsub.f32 0.0, %v295_v57 }
  0x1b   : > { %3627 = vmatprep.mubr.msk.bf16.mxu0 %vm455_vm0, %v431_v44  ;;  %v405_v55 = vmax.f32 %v373_v48, 0.0  ;;  %v406_v56 = vmax.f32 %v374_v49, 0.0  ;;  %1166 = vmatpush1.bf16.msra.mxu0 %v3440_v11  ;;  %v432_v62 = vpack.c.bf16 %v404_v51, %v403_v50  ;;  %v376_v0 = vsub.f32 0.0, %v296_v58 }
  0x1c   : > { %v353_v59 = vpack.c.bf16 %v326_v53, %v325_v52  ;;  %v327_v1 = vmax.f32 %v295_v57, 0.0  ;;  %v328_v3 = vmax.f32 %v296_v58, 0.0  ;;  %v377_v4 = vsub.f32 0.0, %v297_v60  ;;  %v307_v53 = vld [vmem:[%s3788_s19 + $0xb0] sm:$0xff]  ;;  %v310_v57 = vld [vmem:[%s3788_s19 + $0xc8] sm:$0xff] }
  0x1d   : > { %v433_v2 = vpack.c.bf16 %v406_v56, %v405_v55  ;;  %v378_v5 = vsub.f32 0.0, %v298_v61  ;;  %v329_v6 = vmax.f32 %v297_v60, 0.0  ;;  %v330_v7 = vmax.f32 %v298_v61, 0.0  ;;  %v309_v56 = vld [vmem:[%s3788_s19 + $0xc0] sm:$0xff] }
  0x1e   : > { %v407_v8 = vmax.f32 %v375_v63, 0.0  ;;  %v408_v9 = vmax.f32 %v376_v0, 0.0  ;;  %v354_v10 = vpack.c.bf16 %v328_v3, %v327_v1  ;;  %v409_v11 = vmax.f32 %v377_v4, 0.0 }
  0x1f   : > { %3662 = vmatmul.mubr.msk.bf16.gmra.mxu1 %vm455_vm0, %v352_v54  ;;  %v410_v12 = vmax.f32 %v378_v5, 0.0  ;;  %v355_v15 = vpack.c.bf16 %v330_v7, %v329_v6  ;;  %v379_v19 = vsub.f32 0.0, %v299_v13  ;;  %v380_v20 = vsub.f32 0.0, %v300_v14  ;;  %v308_v54 = vld [vmem:[%s3788_s19 + $0xb8] sm:$0xff] }
  0x20   : > { %3665 = vmatprep.mubr.msk.bf16.mxu1 %vm455_vm0, %v353_v59  ;;  %v434_v18 = vpack.c.bf16 %v408_v9, %v407_v8  ;;  %v331_v21 = vmax.f32 %v299_v13, 0.0  ;;  %v332_v23 = vmax.f32 %v300_v14, 0.0  ;;  %v381_v24 = vsub.f32 0.0, %v301_v16  ;;  %v311_v9 = vld [vmem:[%s3788_s19 + $0xd0] sm:$0xff]  ;;  %v314_v13 = vld [vmem:[%s3788_s19 + $0xe8] sm:$0xff] }
  0x21   : > { %v435_v22 = vpack.c.bf16 %v410_v12, %v409_v11  ;;  %v382_v25 = vsub.f32 0.0, %v302_v17  ;;  %v333_v26 = vmax.f32 %v301_v16, 0.0  ;;  %v334_v27 = vmax.f32 %v302_v17, 0.0  ;;  %v313_v12 = vld [vmem:[%s3788_s19 + $0xe0] sm:$0xff] }
  0x22   : > { %3628 = vmatmul.mubr.msk.bf16.gmra.mxu0 %vm455_vm0, %v432_v62  ;;  %v411_v28 = vmax.f32 %v379_v19, 0.0  ;;  %v412_v29 = vmax.f32 %v380_v20, 0.0  ;;  %v356_v30 = vpack.c.bf16 %v332_v23, %v331_v21  ;;  %v413_v31 = vmax.f32 %v381_v24, 0.0 }
  0x23   : > { %3631 = vmatprep.mubr.msk.bf16.mxu0 %vm455_vm0, %v433_v2  ;;  %v414_v32 = vmax.f32 %v382_v25, 0.0  ;;  %v357_v35 = vpack.c.bf16 %v334_v27, %v333_v26  ;;  %v383_v39 = vsub.f32 0.0, %v303_v33  ;;  %v384_v40 = vsub.f32 0.0, %v304_v34 }
  0x24   : > { %v436_v38 = vpack.c.bf16 %v412_v29, %v411_v28  ;;  %v335_v41 = vmax.f32 %v303_v33, 0.0  ;;  %v336_v43 = vmax.f32 %v304_v34, 0.0  ;;  %v385_v44 = vsub.f32 0.0, %v305_v36  ;;  %v315_v29 = vld [vmem:[%s3788_s19 + $0xf0] sm:$0xff] }
  0x25   : > { %v437_v42 = vpack.c.bf16 %v414_v32, %v413_v31  ;;  %v386_v45 = vsub.f32 0.0, %v306_v37  ;;  %v337_v46 = vmax.f32 %v305_v36, 0.0  ;;  %v338_v47 = vmax.f32 %v306_v37, 0.0 }
  0x26   : > { %v415_v48 = vmax.f32 %v383_v39, 0.0  ;;  %v416_v49 = vmax.f32 %v384_v40, 0.0  ;;  %v358_v50 = vpack.c.bf16 %v336_v43, %v335_v41  ;;  %v417_v51 = vmax.f32 %v385_v44, 0.0  ;;  %v3861_v43 = vld [vmem:[%s5881_s5 + $0x10] sm:$0xff] }
  0x27   : > { %3666 = vmatmul.mubr.msk.bf16.gmra.mxu1 %vm455_vm0, %v354_v10  ;;  %v418_v52 = vmax.f32 %v386_v45, 0.0  ;;  %v359_v55 = vpack.c.bf16 %v338_v47, %v337_v46  ;;  %v387_v59 = vsub.f32 0.0, %v307_v53  ;;  %v388_v60 = vsub.f32 0.0, %v308_v54  ;;  %v312_v10 = vld [vmem:[%s3788_s19 + $0xd8] sm:$0xff]  ;;  %v3866_v44 = vld [vmem:[%s5881_s5 + $0x30] sm:$0xff] }
  0x28   : > { %3669 = vmatprep.mubr.msk.bf16.mxu1 %vm455_vm0, %v355_v15  ;;  %v438_v58 = vpack.c.bf16 %v416_v49, %v415_v48  ;;  %v339_v61 = vmax.f32 %v307_v53, 0.0  ;;  %v340_v63 = vmax.f32 %v308_v54, 0.0  ;;  %v389_v0 = vsub.f32 0.0, %v309_v56  ;;  %v3871_v45 = vld [vmem:[%s5881_s5 + $0x18] sm:$0xff] }
  0x29   : > { %v439_v62 = vpack.c.bf16 %v418_v52, %v417_v51  ;;  %v390_v1 = vsub.f32 0.0, %v310_v57  ;;  %v341_v2 = vmax.f32 %v309_v56, 0.0  ;;  %v342_v3 = vmax.f32 %v310_v57, 0.0  ;;  %v3880_v48 = vld [vmem:[%s5881_s5 + $0x38] sm:$0xff]  ;;  %v3889_v56 = vld [vmem:[%s5879_s3] ss:$0 sm:$0xff] }
  0x2a   : > { %3632 = vmatmul.mubr.msk.bf16.gmra.mxu0 %vm455_vm0, %v434_v18  ;;  %v419_v4 = vmax.f32 %v387_v59, 0.0  ;;  %v420_v5 = vmax.f32 %v388_v60, 0.0  ;;  %v360_v6 = vpack.c.bf16 %v340_v63, %v339_v61  ;;  %v421_v7 = vmax.f32 %v389_v0, 0.0 }
  0x2b   : > { %3635 = vmatprep.mubr.msk.bf16.mxu0 %vm455_vm0, %v435_v22  ;;  %v422_v8 = vmax.f32 %v390_v1, 0.0  ;;  %v361_v11 = vpack.c.bf16 %v342_v3, %v341_v2  ;;  %v391_v15 = vsub.f32 0.0, %v311_v9  ;;  %v392_v16 = vsub.f32 0.0, %v312_v10 }
  0x2c   : > { %v440_v14 = vpack.c.bf16 %v420_v5, %v419_v4  ;;  %v343_v17 = vmax.f32 %v311_v9, 0.0  ;;  %v344_v19 = vmax.f32 %v312_v10, 0.0  ;;  %v393_v20 = vsub.f32 0.0, %v313_v12 }
  0x2d   : > { %v441_v18 = vpack.c.bf16 %v422_v8, %v421_v7  ;;  %v394_v21 = vsub.f32 0.0, %v314_v13  ;;  %v345_v22 = vmax.f32 %v313_v12, 0.0  ;;  %v346_v23 = vmax.f32 %v314_v13, 0.0 }
  0x2e   : > { %v423_v24 = vmax.f32 %v391_v15, 0.0  ;;  %v424_v25 = vmax.f32 %v392_v16, 0.0  ;;  %v362_v26 = vpack.c.bf16 %v344_v19, %v343_v17  ;;  %v425_v27 = vmax.f32 %v393_v20, 0.0  ;;  %v3903_v17 = vld [vmem:[%s5880_s4] sm:$0xff]  ;;  %v3913_v19 = vld [vmem:[%s5880_s4 + $0x8] sm:$0xff] }
  0x2f   : > { %3670 = vmatmul.mubr.msk.bf16.gmra.mxu1 %vm455_vm0, %v356_v30  ;;  %v426_v28 = vmax.f32 %v394_v21, 0.0  ;;  %v316_v30 = vld [vmem:[%s3788_s19 + $0xf8] sm:$0xff]  ;;  %v363_v31 = vpack.c.bf16 %v346_v23, %v345_v22  ;;  %v395_v33 = vsub.f32 0.0, %v315_v29  ;;  %v347_v36 = vmax.f32 %v315_v29, 0.0 }
  0x30   : > { %3673 = vmatprep.mubr.msk.bf16.mxu1 %vm455_vm0, %v357_v35  ;;  %v442_v32 = vpack.c.bf16 %v424_v25, %v423_v24  ;;  %v396_v34 = vsub.f32 0.0, %v316_v30  ;;  %v348_v37 = vmax.f32 %v316_v30, 0.0  ;;  %v3444_v46 = vcombine.low %v3861_v43, %v3866_v44  ;;  %v3923_v25 = vld [vmem:[%s5880_s4 + $0x28] sm:$0xff] }
  0x31   : > { %v443_v35 = vpack.c.bf16 %v426_v28, %v425_v27  ;;  %v3445_v47 = vcombine.high %v3861_v43, %v3866_v44  ;;  %v3446_v49 = vcombine.low %v3871_v45, %v3880_v48 }
  0x32   : > { %3636 = vmatmul.mubr.msk.bf16.gmra.mxu0 %vm455_vm0, %v436_v38  ;;  %v427_v38 = vmax.f32 %v395_v33, 0.0  ;;  %v428_v39 = vmax.f32 %v396_v34, 0.0  ;;  %v364_v40 = vpack.c.bf16 %v348_v37, %v347_v36  ;;  %v3514_v33 = vcombine.low %v3913_v19, %v3923_v25 }
  0x33   : > { %3639 = vmatprep.mubr.msk.bf16.mxu0 %vm455_vm0, %v437_v42  ;;  %v5884_v42 = vmov 0   ;;  %1551 = vmatprep.subr.bf16.mxu0 %v3445_v47 }
  0x34   : > { %v444_v41 = vpack.c.bf16 %v428_v39, %v427_v38 }
  0x37   : > { %3674 = vmatmul.mubr.msk.bf16.gmra.mxu1 %vm455_vm0, %v358_v50  ;;  %v3447_v50 = vcombine.high %v3871_v45, %v3880_v48 }
  0x38   : > { %3677 = vmatprep.mubr.msk.bf16.mxu1 %vm455_vm0, %v359_v55 }
  0x39   : > { %1744 = vmatprep.subr.bf16.mxu1 %v3447_v50 }
  0x3a   : > { %3640 = vmatmul.mubr.msk.bf16.gmra.mxu0 %vm455_vm0, %v438_v58 }
  0x3b   : > { %3643 = vmatprep.mubr.msk.bf16.mxu0 %vm455_vm0, %v439_v62 }
  0x3f   : > { %3678 = vmatmul.mubr.msk.bf16.gmra.mxu1 %vm455_vm0, %v360_v6 }
  0x40   : > { %3681 = vmatprep.mubr.msk.bf16.mxu1 %vm455_vm0, %v361_v11 }
  0x42   : > { %3644 = vmatmul.mubr.msk.bf16.gmra.mxu0 %vm455_vm0, %v440_v14 }
  0x43   : > { %3647 = vmatprep.mubr.msk.bf16.mxu0 %vm455_vm0, %v441_v18  ;;  %v3908_v18 = vld [vmem:[%s5880_s4 + $0x20] sm:$0xff] }
  0x44   : > { %v3512_v24 = vcombine.low %v3903_v17, %v3908_v18  ;;  %v3513_v47 = vcombine.high %v3903_v17, %v3908_v18 }
  0x47   : > { %3682 = vmatmul.mubr.msk.bf16.gmra.mxu1 %vm455_vm0, %v362_v26 }
  0x48   : > { %3685 = vmatprep.mubr.msk.bf16.mxu1 %vm455_vm0, %v363_v31 }
  0x4a   : > { %3648 = vmatmul.mubr.msk.bf16.gmra.mxu0 %vm455_vm0, %v442_v32 }
  0x4b   : > { %3651 = vmatprep.mubr.msk.bf16.mxu0 %vm455_vm0, %v443_v35 }
  0x4f   : > { %3686 = vmatmul.mubr.msk.bf16.gmra.mxu1 %vm455_vm0, %v364_v40 }
  0x50   : > { %1376 = vmatprep.mubr.bf16.mxu1 %v5884_v42 }
  0x52   : > { %3652 = vmatmul.mubr.msk.bf16.gmra.mxu0 %vm455_vm0, %v444_v41 }
  0x53   : > { %1183 = vmatprep.mubr.bf16.mxu0 %v5884_v42 }
  0xd7   : > { %v3659_v51 = vpop.f32.mrf.mxu1 }
  0xd9   : > { %v753_v52 = vpop.f32.mrf.mxu1 }
  0xda   : > { %v3625_v53 = vpop.f32.mrf.mxu0 }
  0xdb   : > { %v762_v54 = vadd.f32 %v3659_v51, %v3625_v53  ;;  %v3660_v55 = vpop.f32.mrf.mxu1 }
  0xdc   : > { %v538_v57 = vpop.f32.mrf.mxu0 }
  0xdd   : > { %v754_v58 = vadd.f32 %v753_v52, %v538_v57  ;;  %v756_v59 = vpop.f32.mrf.mxu1  ;;  %v3892_v61 = vadd.f32 %v3889_v56, %v762_v54  ;;  %v3515_v54 = vcombine.high %v3913_v19, %v3923_v25 }
  0xde   : > { %v3626_v60 = vpop.f32.mrf.mxu0 }
  0xdf   : > { %v887_v62 = vadd.f32 %v3889_v56, %v754_v58  ;;  %v765_v63 = vadd.f32 %v3660_v55, %v3626_v60  ;;  %v3663_v0 = vpop.f32.mrf.mxu1  ;;  %v921_v6 = vmax.f32 %v3892_v61, 0.0  ;;  %v969_v34 = vsub.f32 0.0, %v3892_v61 }
  0xe0   : > { %v541_v1 = vpop.f32.mrf.mxu0 }
  0xe1   : > { %v890_v2 = vadd.f32 %v3889_v56, %v765_v63  ;;  %v769_v3 = vpop.f32.mrf.mxu1  ;;  %v757_v4 = vadd.f32 %v756_v59, %v541_v1  ;;  %v967_v7 = vsub.f32 0.0, %v887_v62  ;;  %v919_v13 = vmax.f32 %v887_v62, 0.0 }
  0xe2   : > { %v3629_v5 = vpop.f32.mrf.mxu0  ;;  %v1001_v1 = vmax.f32 %v969_v34, 0.0 }
  0xe3   : > { %v922_v8 = vmax.f32 %v890_v2, 0.0  ;;  %v778_v9 = vadd.f32 %v3663_v0, %v3629_v5  ;;  %v3664_v10 = vpop.f32.mrf.mxu1  ;;  %v888_v11 = vadd.f32 %v3889_v56, %v757_v4  ;;  %v999_v26 = vmax.f32 %v967_v7, 0.0 }
  0xe4   : > { %v554_v12 = vpop.f32.mrf.mxu0  ;;  %v970_v35 = vsub.f32 0.0, %v890_v2 }
  0xe5   : > { %v3898_v14 = vpack.c.bf16 %v922_v8, %v921_v6  ;;  %v770_v15 = vadd.f32 %v769_v3, %v554_v12  ;;  %v772_v16 = vpop.f32.mrf.mxu1  ;;  %v920_v20 = vmax.f32 %v888_v11, 0.0  ;;  %v968_v21 = vsub.f32 0.0, %v888_v11 }
  0xe6   : > { %v3916_v22 = vadd.f32 %v3889_v56, %v778_v9  ;;  %v3630_v23 = vpop.f32.mrf.mxu0  ;;  %v1002_v58 = vmax.f32 %v970_v35, 0.0 }
  0xe7   : > { %v3926_v27 = vadd.f32 %v3889_v56, %v770_v15  ;;  %v3667_v28 = vpop.f32.mrf.mxu1  ;;  %v3928_v29 = vpack.c.bf16 %v920_v20, %v919_v13  ;;  %v1000_v30 = vmax.f32 %v968_v21, 0.0  ;;  %v781_v31 = vadd.f32 %v3664_v10, %v3630_v23 }
  0xe8   : > { %v557_v32 = vpop.f32.mrf.mxu0  ;;  %v925_v39 = vmax.f32 %v3916_v22, 0.0  ;;  %v3968_v48 = vpack.c.bf16 %v1002_v58, %v1001_v1 }
  0xe9   : > { %v773_v36 = vadd.f32 %v772_v16, %v557_v32  ;;  %v785_v37 = vpop.f32.mrf.mxu1  ;;  %v3933_v38 = vpack.c.bf16 %v1000_v30, %v999_v26  ;;  %v3937_v40 = vadd.f32 %v3889_v56, %v781_v31  ;;  %v923_v50 = vmax.f32 %v3926_v27, 0.0 }
  0xea   : > { %v3633_v41 = vpop.f32.mrf.mxu0  ;;  %v971_v4 = vsub.f32 0.0, %v3926_v27 }
  0xeb   : > { %v892_v51 = vadd.f32 %v3889_v56, %v773_v36  ;;  %v794_v52 = vadd.f32 %v3667_v28, %v3633_v41  ;;  %v3668_v53 = vpop.f32.mrf.mxu1  ;;  %v926_v55 = vmax.f32 %v3937_v40, 0.0  ;;  %3448 = vmatmul.mubr.msk.bf16.vlgmr.msra.gmra.mxu0 %vm455_vm0, %v3933_v38  ;;  %3464 = vmatmul.mubr.msk.bf16.vlgmr.msra.gmra.mxu1 %vm455_vm0, %v3933_v38 }
  0xec   : > { %v570_v57 = vpop.f32.mrf.mxu0  ;;  %1552 = vmatpush1.bf16.msra.mxu0 %v3444_v46  ;;  %1745 = vmatpush1.bf16.msra.mxu1 %v3446_v49  ;;  %v1003_v23 = vmax.f32 %v971_v4, 0.0 }
  0xed   : > { %v924_v59 = vmax.f32 %v892_v51, 0.0  ;;  %v786_v60 = vadd.f32 %v785_v37, %v570_v57  ;;  %v788_v61 = vpop.f32.mrf.mxu1  ;;  %v3956_v62 = vpack.c.bf16 %v926_v55, %v925_v39  ;;  %1193 = vmatprep.mubr.bf16.mxu0 %v5884_v42  ;;  %1386 = vmatprep.mubr.bf16.mxu1 %v5884_v42  ;;  %v3961_v63 = vadd.f32 %v3889_v56, %v794_v52 }
  0xee   : > { %v3634_v0 = vpop.f32.mrf.mxu0  ;;  %2025 = vmatprep.subr.bf16.mxu0 %v3513_v47  ;;  %2218 = vmatprep.subr.bf16.mxu1 %v3515_v54  ;;  %v972_v5 = vsub.f32 0.0, %v892_v51  ;;  %v973_v37 = vsub.f32 0.0, %v3916_v22  ;;  %v974_v39 = vsub.f32 0.0, %v3937_v40 }
  0xef   : > { %v3963_v2 = vpack.c.bf16 %v924_v59, %v923_v50  ;;  %v3671_v43 = vpop.f32.mrf.mxu1  ;;  %v3966_v44 = vadd.f32 %v3889_v56, %v786_v60  ;;  %v797_v45 = vadd.f32 %v3668_v53, %v3634_v0  ;;  %v929_v6 = vmax.f32 %v3961_v63, 0.0 }
  0xf0   : > { %v573_v46 = vpop.f32.mrf.mxu0  ;;  %v1004_v26 = vmax.f32 %v972_v5, 0.0  ;;  %v1005_v59 = vmax.f32 %v973_v37, 0.0  ;;  %v1006_v60 = vmax.f32 %v974_v39, 0.0 }
  0xf1   : > { %v789_v49 = vadd.f32 %v788_v61, %v573_v46  ;;  %v801_v3 = vpop.f32.mrf.mxu1  ;;  %v3973_v7 = vadd.f32 %v3889_v56, %v797_v45  ;;  %v927_v9 = vmax.f32 %v3966_v44, 0.0 }
  0xf2   : > { %v3637_v8 = vpop.f32.mrf.mxu0  ;;  %v3999_v50 = vpack.c.bf16 %v1004_v26, %v1003_v23 }
  0xf3   : > { %v3977_v10 = vadd.f32 %v3889_v56, %v789_v49  ;;  %v810_v11 = vadd.f32 %v3671_v43, %v3637_v8  ;;  %v3672_v12 = vpop.f32.mrf.mxu1  ;;  %3449 = vmatmul.mubr.msk.bf16.gmra.mxu0 %vm455_vm0, %v3968_v48  ;;  %3465 = vmatmul.mubr.msk.bf16.gmra.mxu1 %vm455_vm0, %v3968_v48  ;;  %v930_v13 = vmax.f32 %v3973_v7, 0.0  ;;  %v4027_v8 = vpack.c.bf16 %v1006_v60, %v1005_v59 }
  0xf4   : > { %v586_v15 = vpop.f32.mrf.mxu0  ;;  %1203 = vmatprep.mubr.bf16.mxu0 %v5884_v42  ;;  %1396 = vmatprep.mubr.bf16.mxu1 %v5884_v42  ;;  %v978_v59 = vsub.f32 0.0, %v3973_v7 }
  0xf5   : > { %v928_v16 = vmax.f32 %v3977_v10, 0.0  ;;  %v802_v20 = vadd.f32 %v801_v3, %v586_v15  ;;  %v804_v21 = vpop.f32.mrf.mxu1  ;;  %v3987_v27 = vpack.c.bf16 %v930_v13, %v929_v6  ;;  %v3990_v28 = vadd.f32 %v3889_v56, %v810_v11 }
  0xf6   : > { %v3638_v30 = vpop.f32.mrf.mxu0  ;;  %v976_v13 = vsub.f32 0.0, %v3977_v10 }
  0xf7   : > { %v3992_v31 = vpack.c.bf16 %v928_v16, %v927_v9  ;;  %v3675_v32 = vpop.f32.mrf.mxu1  ;;  %v3995_v34 = vadd.f32 %v3889_v56, %v802_v20  ;;  %v813_v35 = vadd.f32 %v3672_v12, %v3638_v30  ;;  %v933_v51 = vmax.f32 %v3990_v28, 0.0 }
  0xf8   : > { %v589_v36 = vpop.f32.mrf.mxu0  ;;  %v975_v12 = vsub.f32 0.0, %v3966_v44  ;;  %v1008_v39 = vmax.f32 %v976_v13, 0.0  ;;  %v1010_v13 = vmax.f32 %v978_v59, 0.0 }
  0xf9   : > { %v805_v41 = vadd.f32 %v804_v21, %v589_v36  ;;  %v817_v47 = vpop.f32.mrf.mxu1  ;;  %v4003_v52 = vadd.f32 %v3889_v56, %v813_v35  ;;  %v931_v54 = vmax.f32 %v3995_v34, 0.0 }
  0xfa   : > { %v3641_v53 = vpop.f32.mrf.mxu0  ;;  %v1007_v37 = vmax.f32 %v975_v12, 0.0 }
  0xfb   : > { %v4007_v55 = vadd.f32 %v3889_v56, %v805_v41  ;;  %v826_v57 = vadd.f32 %v3675_v32, %v3641_v53  ;;  %v3676_v58 = vpop.f32.mrf.mxu1  ;;  %3450 = vmatmul.mubr.msk.bf16.gmra.mxu0 %vm455_vm0, %v3999_v50  ;;  %3466 = vmatmul.mubr.msk.bf16.gmra.mxu1 %vm455_vm0, %v3999_v50  ;;  %v934_v22 = vmax.f32 %v4003_v52, 0.0 }
  0xfc   : > { %v602_v40 = vpop.f32.mrf.mxu0  ;;  %1213 = vmatprep.mubr.bf16.mxu0 %v5884_v42  ;;  %1406 = vmatprep.mubr.bf16.mxu1 %v5884_v42 }
  0xfd   : > { %v932_v61 = vmax.f32 %v4007_v55, 0.0  ;;  %v818_v0 = vadd.f32 %v817_v47, %v602_v40  ;;  %v820_v1 = vpop.f32.mrf.mxu1  ;;  %v4017_v43 = vpack.c.bf16 %v934_v22, %v933_v51  ;;  %v4020_v45 = vadd.f32 %v3889_v56, %v826_v57 }
  0xfe   : > { %v3642_v46 = vpop.f32.mrf.mxu0  ;;  %v977_v40 = vsub.f32 0.0, %v3961_v63 }
  0xff   : > { %v4022_v49 = vpack.c.bf16 %v932_v61, %v931_v54  ;;  %v3679_v3 = vpop.f32.mrf.mxu1  ;;  %v4025_v4 = vadd.f32 %v3889_v56, %v818_v0  ;;  %v829_v5 = vadd.f32 %v3676_v58, %v3642_v46  ;;  %v937_v15 = vmax.f32 %v4020_v45, 0.0 }
 0x100   : > { %v605_v6 = vpop.f32.mrf.mxu0  ;;  %v4059_v0 = vpack.c.bf16 %v1008_v39, %v1007_v37  ;;  %v1009_v12 = vmax.f32 %v977_v40, 0.0 }
 0x101   : > { %v821_v9 = vadd.f32 %v820_v1, %v605_v6  ;;  %v833_v11 = vpop.f32.mrf.mxu1  ;;  %v4033_v16 = vadd.f32 %v3889_v56, %v829_v5  ;;  %v935_v21 = vmax.f32 %v4025_v4, 0.0 }
 0x102   : > { %v3645_v20 = vpop.f32.mrf.mxu0  ;;  %v4087_v39 = vpack.c.bf16 %v1010_v13, %v1009_v12 }
 0x103   : > { %v4037_v23 = vadd.f32 %v3889_v56, %v821_v9  ;;  %v842_v26 = vadd.f32 %v3679_v3, %v3645_v20  ;;  %v3680_v30 = vpop.f32.mrf.mxu1  ;;  %3451 = vmatmul.mubr.msk.bf16.gmra.mxu0 %vm455_vm0, %v4027_v8  ;;  %3467 = vmatmul.mubr.msk.bf16.gmra.mxu1 %vm455_vm0, %v4027_v8  ;;  %v938_v44 = vmax.f32 %v4033_v16, 0.0 }
 0x104   : > { %v618_v10 = vpop.f32.mrf.mxu0  ;;  %1223 = vmatprep.mubr.bf16.mxu0 %v5884_v42  ;;  %1416 = vmatprep.mubr.bf16.mxu1 %v5884_v42 }
 0x105   : > { %v936_v32 = vmax.f32 %v4037_v23, 0.0  ;;  %v834_v35 = vadd.f32 %v833_v11, %v618_v10  ;;  %v836_v36 = vpop.f32.mrf.mxu1  ;;  %v4047_v41 = vpack.c.bf16 %v938_v44, %v937_v15  ;;  %v4050_v47 = vadd.f32 %v3889_v56, %v842_v26 }
 0x106   : > { %v3646_v51 = vpop.f32.mrf.mxu0 }
 0x107   : > { %v4052_v53 = vpack.c.bf16 %v936_v32, %v935_v21  ;;  %v3683_v54 = vpop.f32.mrf.mxu1  ;;  %v4055_v57 = vadd.f32 %v3889_v56, %v834_v35  ;;  %v845_v58 = vadd.f32 %v3680_v30, %v3646_v51  ;;  %v941_v1 = vmax.f32 %v4050_v47, 0.0 }
 0x108   : > { %v621_v22 = vpop.f32.mrf.mxu0 }
 0x109   : > { %v837_v60 = vadd.f32 %v836_v36, %v621_v22  ;;  %v849_v61 = vpop.f32.mrf.mxu1  ;;  %v4063_v46 = vadd.f32 %v3889_v56, %v845_v58  ;;  %v939_v5 = vmax.f32 %v4055_v57, 0.0  ;;  %v979_v58 = vsub.f32 0.0, %v3995_v34 }
 0x10a   : > { %v3649_v3 = vpop.f32.mrf.mxu0  ;;  %v980_v22 = vsub.f32 0.0, %v4007_v55 }
 0x10b   : > { %v4067_v6 = vadd.f32 %v3889_v56, %v837_v60  ;;  %v858_v9 = vadd.f32 %v3683_v54, %v3649_v3  ;;  %v3684_v11 = vpop.f32.mrf.mxu1  ;;  %3452 = vmatmul.mubr.msk.bf16.gmra.mxu0 %vm455_vm0, %v4059_v0  ;;  %3468 = vmatmul.mubr.msk.bf16.gmra.mxu1 %vm455_vm0, %v4059_v0  ;;  %v942_v63 = vmax.f32 %v4063_v46, 0.0 }
 0x10c   : > { %v634_v7 = vpop.f32.mrf.mxu0  ;;  %1233 = vmatprep.mubr.bf16.mxu0 %v5884_v42  ;;  %1426 = vmatprep.mubr.bf16.mxu1 %v5884_v42 }
 0x10d   : > { %v940_v15 = vmax.f32 %v4067_v6, 0.0  ;;  %v850_v20 = vadd.f32 %v849_v61, %v634_v7  ;;  %v852_v21 = vpop.f32.mrf.mxu1  ;;  %v4077_v26 = vpack.c.bf16 %v942_v63, %v941_v1  ;;  %v4080_v30 = vadd.f32 %v3889_v56, %v858_v9 }
 0x10e   : > { %v3650_v44 = vpop.f32.mrf.mxu0  ;;  %v1011_v63 = vmax.f32 %v979_v58, 0.0  ;;  %v1012_v7 = vmax.f32 %v980_v22, 0.0 }
 0x10f   : > { %v4082_v10 = vpack.c.bf16 %v940_v15, %v939_v5  ;;  %v3687_v32 = vpop.f32.mrf.mxu1  ;;  %v4085_v35 = vadd.f32 %v3889_v56, %v850_v20  ;;  %v861_v36 = vadd.f32 %v3684_v11, %v3650_v44  ;;  %v945_v40 = vmax.f32 %v4080_v30, 0.0 }
 0x110   : > { %v637_v37 = vpop.f32.mrf.mxu0  ;;  %v4119_v58 = vpack.c.bf16 %v1012_v7, %v1011_v63 }
 0x111   : > { %v853_v51 = vadd.f32 %v852_v21, %v637_v37  ;;  %v865_v54 = vpop.f32.mrf.mxu1  ;;  %v4093_v59 = vadd.f32 %v3889_v56, %v861_v36  ;;  %v943_v61 = vmax.f32 %v4085_v35, 0.0  ;;  %v981_v37 = vsub.f32 0.0, %v3990_v28 }
 0x112   : > { %v3653_v60 = vpop.f32.mrf.mxu0 }
 0x113   : > { %v4097_v1 = vadd.f32 %v3889_v56, %v853_v51  ;;  %v874_v3 = vadd.f32 %v3687_v32, %v3653_v60  ;;  %v3688_v5 = vpop.f32.mrf.mxu1  ;;  %3453 = vmatmul.mubr.msk.bf16.gmra.mxu0 %vm455_vm0, %v4087_v39  ;;  %3469 = vmatmul.mubr.msk.bf16.gmra.mxu1 %vm455_vm0, %v4087_v39  ;;  %v946_v34 = vmax.f32 %v4093_v59, 0.0 }
 0x114   : > { %v650_v55 = vpop.f32.mrf.mxu0  ;;  %1243 = vmatprep.mubr.bf16.mxu0 %v5884_v42  ;;  %1436 = vmatprep.mubr.bf16.mxu1 %v5884_v42 }
 0x115   : > { %v944_v9 = vmax.f32 %v4097_v1, 0.0  ;;  %v866_v11 = vadd.f32 %v865_v54, %v650_v55  ;;  %v4107_v12 = vpack.c.bf16 %v946_v34, %v945_v40  ;;  %v4110_v13 = vadd.f32 %v3889_v56, %v874_v3  ;;  %v868_v20 = vpop.f32.mrf.mxu1 }
 0x116   : > { %v3654_v15 = vpop.f32.mrf.mxu0  ;;  %v982_v54 = vsub.f32 0.0, %v4003_v52  ;;  %v1013_v3 = vmax.f32 %v981_v37, 0.0 }
 0x117   : > { %v4112_v21 = vpack.c.bf16 %v944_v9, %v943_v61  ;;  %v4115_v44 = vadd.f32 %v3889_v56, %v866_v11  ;;  %v877_v32 = vadd.f32 %v3688_v5, %v3654_v15  ;;  %v949_v22 = vmax.f32 %v4110_v13, 0.0 }
 0x118   : > { %v653_v36 = vpop.f32.mrf.mxu0  ;;  %v1014_v5 = vmax.f32 %v982_v54, 0.0  ;;  %v983_v9 = vsub.f32 0.0, %v4025_v4  ;;  %v984_v11 = vsub.f32 0.0, %v4037_v23  ;;  %v985_v15 = vsub.f32 0.0, %v4020_v45 }
 0x119   : > { %v869_v51 = vadd.f32 %v868_v20, %v653_v36  ;;  %v4123_v40 = vadd.f32 %v3889_v56, %v877_v32  ;;  %v947_v60 = vmax.f32 %v4115_v44, 0.0  ;;  %v986_v20 = vsub.f32 0.0, %v4033_v16 }
 0x11a   : > { %v4141_v55 = vpack.c.bf16 %v1014_v5, %v1013_v3  ;;  %v1015_v63 = vmax.f32 %v983_v9, 0.0  ;;  %v1016_v7 = vmax.f32 %v984_v11, 0.0  ;;  %v1017_v4 = vmax.f32 %v985_v15, 0.0 }
 0x11b   : > { %v4127_v61 = vadd.f32 %v3889_v56, %v869_v51  ;;  %3454 = vmatmul.mubr.msk.bf16.gmra.mxu0 %vm455_vm0, %v4119_v58  ;;  %3470 = vmatmul.mubr.msk.bf16.gmra.mxu1 %vm455_vm0, %v4119_v58  ;;  %v950_v28 = vmax.f32 %v4123_v40, 0.0  ;;  %v1018_v23 = vmax.f32 %v986_v20, 0.0  ;;  %v987_v45 = vsub.f32 0.0, %v4055_v57 }
 0x11c   : > { %1253 = vmatprep.mubr.bf16.mxu0 %v5884_v42  ;;  %1446 = vmatprep.mubr.bf16.mxu1 %v5884_v42  ;;  %v4153_v32 = vpack.c.bf16 %v1016_v7, %v1015_v63  ;;  %v988_v16 = vsub.f32 0.0, %v4067_v6  ;;  %v989_v54 = vsub.f32 0.0, %v4050_v47  ;;  %v991_v47 = vsub.f32 0.0, %v4085_v35 }
 0x11d   : > { %v948_v52 = vmax.f32 %v4127_v61, 0.0  ;;  %v4137_v34 = vpack.c.bf16 %v950_v28, %v949_v22  ;;  %v4161_v36 = vpack.c.bf16 %v1018_v23, %v1017_v4  ;;  %v1019_v37 = vmax.f32 %v987_v45, 0.0 }
 0x11e   : > { %v1020_v51 = vmax.f32 %v988_v16, 0.0  ;;  %v990_v22 = vsub.f32 0.0, %v4063_v46  ;;  %v1021_v57 = vmax.f32 %v989_v54, 0.0  ;;  %v992_v46 = vsub.f32 0.0, %v4097_v1  ;;  %v4242_v16 = vld [vmem:[%s5880_s4 + $0x18] sm:$0xff] }
 0x11f   : > { %v4139_v56 = vpack.c.bf16 %v948_v52, %v947_v60  ;;  %v1023_v52 = vmax.f32 %v991_v47, 0.0  ;;  %v993_v5 = vsub.f32 0.0, %v4080_v30  ;;  %v994_v9 = vsub.f32 0.0, %v4093_v59  ;;  %v4251_v54 = vld [vmem:[%s5880_s4 + $0x38] sm:$0xff] }
 0x120   : > { %v4173_v60 = vpack.c.bf16 %v1020_v51, %v1019_v37  ;;  %v1022_v6 = vmax.f32 %v990_v22, 0.0  ;;  %v1024_v3 = vmax.f32 %v992_v46, 0.0  ;;  %v995_v30 = vsub.f32 0.0, %v4115_v44 }
 0x121   : > { %v1025_v35 = vmax.f32 %v993_v5, 0.0  ;;  %v1026_v1 = vmax.f32 %v994_v9, 0.0  ;;  %v996_v59 = vsub.f32 0.0, %v4127_v61  ;;  %v997_v20 = vsub.f32 0.0, %v4110_v13  ;;  %v4232_v13 = vld [vmem:[%s5880_s4 + $0x10] sm:$0xff] }
 0x122   : > { %v4181_v28 = vpack.c.bf16 %v1022_v6, %v1021_v57  ;;  %v4193_v11 = vpack.c.bf16 %v1024_v3, %v1023_v52  ;;  %v1027_v7 = vmax.f32 %v995_v30, 0.0  ;;  %v998_v4 = vsub.f32 0.0, %v4123_v40  ;;  %v4237_v40 = vld [vmem:[%s5880_s4 + $0x30] sm:$0xff] }
 0x123   : > { %3455 = vmatmul.mubr.msk.bf16.gmra.mxu0 %vm455_vm0, %v4141_v55  ;;  %3471 = vmatmul.mubr.msk.bf16.gmra.mxu1 %vm455_vm0, %v4141_v55  ;;  %v4201_v63 = vpack.c.bf16 %v1026_v1, %v1025_v35  ;;  %v1028_v15 = vmax.f32 %v996_v59, 0.0  ;;  %v1029_v44 = vmax.f32 %v997_v20, 0.0  ;;  %v3517_v51 = vcombine.high %v4232_v13, %v4237_v40 }
 0x124   : > { %1263 = vmatprep.mubr.bf16.mxu0 %v5884_v42  ;;  %1456 = vmatprep.mubr.bf16.mxu1 %v5884_v42  ;;  %v1030_v61 = vmax.f32 %v998_v4, 0.0  ;;  %v3519_v57 = vcombine.high %v4242_v16, %v4251_v54 }
 0x125   : > { %v4213_v23 = vpack.c.bf16 %v1028_v15, %v1027_v7 }
 0x126   : > { %v4221_v45 = vpack.c.bf16 %v1030_v61, %v1029_v44 }
 0x12b   : > { %3456 = vmatmul.mubr.msk.bf16.gmra.mxu0 %vm455_vm0, %v4153_v32  ;;  %3472 = vmatmul.mubr.msk.bf16.gmra.mxu1 %vm455_vm0, %v4153_v32 }
 0x12c   : > { %1273 = vmatprep.mubr.bf16.mxu0 %v5884_v42  ;;  %1466 = vmatprep.mubr.bf16.mxu1 %v5884_v42 }
 0x133   : > { %3457 = vmatmul.mubr.msk.bf16.gmra.mxu0 %vm455_vm0, %v4161_v36  ;;  %3473 = vmatmul.mubr.msk.bf16.gmra.mxu1 %vm455_vm0, %v4161_v36 }
 0x134   : > { %1283 = vmatprep.mubr.bf16.mxu0 %v5884_v42  ;;  %1476 = vmatprep.mubr.bf16.mxu1 %v5884_v42 }
 0x13b   : > { %3458 = vmatmul.mubr.msk.bf16.gmra.mxu0 %vm455_vm0, %v4173_v60  ;;  %3474 = vmatmul.mubr.msk.bf16.gmra.mxu1 %vm455_vm0, %v4173_v60 }
 0x13c   : > { %1293 = vmatprep.mubr.bf16.mxu0 %v5884_v42  ;;  %1486 = vmatprep.mubr.bf16.mxu1 %v5884_v42 }
 0x143   : > { %3459 = vmatmul.mubr.msk.bf16.gmra.mxu0 %vm455_vm0, %v4181_v28  ;;  %3475 = vmatmul.mubr.msk.bf16.gmra.mxu1 %vm455_vm0, %v4181_v28 }
 0x144   : > { %1303 = vmatprep.mubr.bf16.mxu0 %v5884_v42  ;;  %1496 = vmatprep.mubr.bf16.mxu1 %v5884_v42 }
 0x14b   : > { %3460 = vmatmul.mubr.msk.bf16.gmra.mxu0 %vm455_vm0, %v4193_v11  ;;  %3476 = vmatmul.mubr.msk.bf16.gmra.mxu1 %vm455_vm0, %v4193_v11 }
 0x14c   : > { %1313 = vmatprep.mubr.bf16.mxu0 %v5884_v42  ;;  %1506 = vmatprep.mubr.bf16.mxu1 %v5884_v42 }
 0x153   : > { %3461 = vmatmul.mubr.msk.bf16.gmra.mxu0 %vm455_vm0, %v4201_v63  ;;  %3477 = vmatmul.mubr.msk.bf16.gmra.mxu1 %vm455_vm0, %v4201_v63 }
 0x154   : > { %1323 = vmatprep.mubr.bf16.mxu0 %v5884_v42  ;;  %1516 = vmatprep.mubr.bf16.mxu1 %v5884_v42 }
 0x15b   : > { %3462 = vmatmul.mubr.msk.bf16.gmra.mxu0 %vm455_vm0, %v4213_v23  ;;  %3478 = vmatmul.mubr.msk.bf16.gmra.mxu1 %vm455_vm0, %v4213_v23 }
 0x15c   : > { %1333 = vmatprep.mubr.bf16.mxu0 %v5884_v42  ;;  %1526 = vmatprep.mubr.bf16.mxu1 %v5884_v42 }
 0x163   : > { %3463 = vmatmul.mubr.msk.bf16.gmra.mxu0 %vm455_vm0, %v4221_v45  ;;  %3479 = vmatmul.mubr.msk.bf16.gmra.mxu1 %vm455_vm0, %v4221_v45 }
 0x164   : > { %1569 = vmatprep.mubr.bf16.mxu0 %v5884_v42  ;;  %1762 = vmatprep.mubr.bf16.mxu1 %v5884_v42 }
 0x16b   : > { %3480 = vmatmul.mubr.msk.bf16.vlgmr.msra.gmra.mxu0 %vm455_vm0, %v3933_v38  ;;  %3496 = vmatmul.mubr.msk.bf16.vlgmr.msra.gmra.mxu1 %vm455_vm0, %v3933_v38 }
 0x16c   : > { %2026 = vmatpush1.bf16.msra.mxu0 %v3512_v24  ;;  %2219 = vmatpush1.bf16.msra.mxu1 %v3514_v33 }
 0x16d   : > { %1579 = vmatprep.mubr.bf16.mxu0 %v5884_v42  ;;  %1772 = vmatprep.mubr.bf16.mxu1 %v5884_v42 }
 0x16e   : > { %2411 = vmatprep.subr.bf16.mxu0 %v3517_v51  ;;  %2604 = vmatprep.subr.bf16.mxu1 %v3519_v57 }
 0x173   : > { %3481 = vmatmul.mubr.msk.bf16.gmra.mxu0 %vm455_vm0, %v3968_v48  ;;  %3497 = vmatmul.mubr.msk.bf16.gmra.mxu1 %vm455_vm0, %v3968_v48 }
 0x174   : > { %1589 = vmatprep.mubr.bf16.mxu0 %v5884_v42  ;;  %1782 = vmatprep.mubr.bf16.mxu1 %v5884_v42 }
 0x17b   : > { %3482 = vmatmul.mubr.msk.bf16.gmra.mxu0 %vm455_vm0, %v3999_v50  ;;  %3498 = vmatmul.mubr.msk.bf16.gmra.mxu1 %vm455_vm0, %v3999_v50 }
 0x17c   : > { %1599 = vmatprep.mubr.bf16.mxu0 %v5884_v42  ;;  %1792 = vmatprep.mubr.bf16.mxu1 %v5884_v42 }
 0x183   : > { %3483 = vmatmul.mubr.msk.bf16.gmra.mxu0 %vm455_vm0, %v4027_v8  ;;  %3499 = vmatmul.mubr.msk.bf16.gmra.mxu1 %vm455_vm0, %v4027_v8 }
 0x184   : > { %1609 = vmatprep.mubr.bf16.mxu0 %v5884_v42  ;;  %1802 = vmatprep.mubr.bf16.mxu1 %v5884_v42 }
 0x18b   : > { %3484 = vmatmul.mubr.msk.bf16.gmra.mxu0 %vm455_vm0, %v4059_v0  ;;  %3500 = vmatmul.mubr.msk.bf16.gmra.mxu1 %vm455_vm0, %v4059_v0 }
 0x18c   : > { %1619 = vmatprep.mubr.bf16.mxu0 %v5884_v42  ;;  %1812 = vmatprep.mubr.bf16.mxu1 %v5884_v42 }
 0x193   : > { %3485 = vmatmul.mubr.msk.bf16.gmra.mxu0 %vm455_vm0, %v4087_v39  ;;  %3501 = vmatmul.mubr.msk.bf16.gmra.mxu1 %vm455_vm0, %v4087_v39 }
 0x194   : > { %1629 = vmatprep.mubr.bf16.mxu0 %v5884_v42  ;;  %1822 = vmatprep.mubr.bf16.mxu1 %v5884_v42 }
 0x19b   : > { %3486 = vmatmul.mubr.msk.bf16.gmra.mxu0 %vm455_vm0, %v4119_v58  ;;  %3502 = vmatmul.mubr.msk.bf16.gmra.mxu1 %vm455_vm0, %v4119_v58 }
 0x19c   : > { %1639 = vmatprep.mubr.bf16.mxu0 %v5884_v42  ;;  %1832 = vmatprep.mubr.bf16.mxu1 %v5884_v42 }
 0x1a3   : > { %3487 = vmatmul.mubr.msk.bf16.gmra.mxu0 %vm455_vm0, %v4141_v55  ;;  %3503 = vmatmul.mubr.msk.bf16.gmra.mxu1 %vm455_vm0, %v4141_v55 }
 0x1a4   : > { %1649 = vmatprep.mubr.bf16.mxu0 %v5884_v42  ;;  %1842 = vmatprep.mubr.bf16.mxu1 %v5884_v42 }
 0x1ab   : > { %v4311_v17 = vpop.f32.mrf.mxu0  ;;  %v4313_v18 = vpop.f32.mrf.mxu1  ;;  %3488 = vmatmul.mubr.msk.bf16.gmra.mxu0 %vm455_vm0, %v4153_v32  ;;  %3504 = vmatmul.mubr.msk.bf16.gmra.mxu1 %vm455_vm0, %v4153_v32 }
 0x1ac   : > { %1659 = vmatprep.mubr.bf16.mxu0 %v5884_v42  ;;  %1852 = vmatprep.mubr.bf16.mxu1 %v5884_v42 }
 0x1ad   : > { %v4321_v19 = vpop.f32.mrf.mxu0  ;;  %v4323_v24 = vpop.f32.mrf.mxu1 }
 0x1af   : > { %v4325_v25 = vpop.f32.mrf.mxu0  ;;  %v4327_v33 = vpop.f32.mrf.mxu1 }
 0x1b1   : > { %v4329_v38 = vpop.f32.mrf.mxu0  ;;  %v4331_v48 = vpop.f32.mrf.mxu1 }
 0x1b3   : > { %v4333_v50 = vpop.f32.mrf.mxu0  ;;  %v4335_v8 = vpop.f32.mrf.mxu1  ;;  %3489 = vmatmul.mubr.msk.bf16.gmra.mxu0 %vm455_vm0, %v4161_v36  ;;  %3505 = vmatmul.mubr.msk.bf16.gmra.mxu1 %vm455_vm0, %v4161_v36 }
 0x1b4   : > { %1669 = vmatprep.mubr.bf16.mxu0 %v5884_v42  ;;  %1862 = vmatprep.mubr.bf16.mxu1 %v5884_v42 }
 0x1b5   : > { %v4343_v0 = vpop.f32.mrf.mxu0  ;;  %v4345_v39 = vpop.f32.mrf.mxu1 }
 0x1b7   : > { %v4347_v58 = vpop.f32.mrf.mxu0  ;;  %v4349_v55 = vpop.f32.mrf.mxu1 }
 0x1b9   : > { %v4351_v32 = vpop.f32.mrf.mxu0  ;;  %v4353_v6 = vpop.f32.mrf.mxu1 }
 0x1bb   : > { %v4355_v47 = vpop.f32.mrf.mxu0  ;;  %v4357_v46 = vpop.f32.mrf.mxu1  ;;  %3490 = vmatmul.mubr.msk.bf16.gmra.mxu0 %vm455_vm0, %v4173_v60  ;;  %3506 = vmatmul.mubr.msk.bf16.gmra.mxu1 %vm455_vm0, %v4173_v60 }
 0x1bc   : > { %1679 = vmatprep.mubr.bf16.mxu0 %v5884_v42  ;;  %1872 = vmatprep.mubr.bf16.mxu1 %v5884_v42 }
 0x1bd   : > { %v4365_v36 = vpop.f32.mrf.mxu0  ;;  %v4367_v52 = vpop.f32.mrf.mxu1 }
 0x1bf   : > { %v4369_v3 = vpop.f32.mrf.mxu0  ;;  %v4371_v5 = vpop.f32.mrf.mxu1 }
 0x1c1   : > { %v4373_v9 = vpop.f32.mrf.mxu0  ;;  %v4375_v35 = vpop.f32.mrf.mxu1 }
 0x1c3   : > { %v4377_v1 = vpop.f32.mrf.mxu0  ;;  %v4379_v30 = vpop.f32.mrf.mxu1  ;;  %3491 = vmatmul.mubr.msk.bf16.gmra.mxu0 %vm455_vm0, %v4181_v28  ;;  %3507 = vmatmul.mubr.msk.bf16.gmra.mxu1 %vm455_vm0, %v4181_v28 }
 0x1c4   : > { %1689 = vmatprep.mubr.bf16.mxu0 %v5884_v42  ;;  %1882 = vmatprep.mubr.bf16.mxu1 %v5884_v42 }
 0x1c5   : > { %v4387_v60 = vpop.f32.mrf.mxu0  ;;  %v4389_v59 = vpop.f32.mrf.mxu1 }
 0x1c7   : > { %v4391_v7 = vpop.f32.mrf.mxu0  ;;  %v4393_v15 = vpop.f32.mrf.mxu1 }
 0x1c9   : > { %v4395_v20 = vpop.f32.mrf.mxu0  ;;  %v4397_v4 = vpop.f32.mrf.mxu1 }
 0x1ca   : > { %5886 = vst [vmem:[#allocation2_spill] sm:$0xff] %v4397_v4 }
 0x1cb   : > { %v4399_v44 = vpop.f32.mrf.mxu0  ;;  %v4401_v61 = vpop.f32.mrf.mxu1  ;;  %3492 = vmatmul.mubr.msk.bf16.gmra.mxu0 %vm455_vm0, %v4193_v11  ;;  %3508 = vmatmul.mubr.msk.bf16.gmra.mxu1 %vm455_vm0, %v4193_v11 }
 0x1cc   : > { %5887 = vst [vmem:[#allocation3_spill] sm:$0xff] %v4399_v44  ;;  %5888 = vst [vmem:[#allocation4_spill] sm:$0xff] %v4401_v61  ;;  %1699 = vmatprep.mubr.bf16.mxu0 %v5884_v42  ;;  %1892 = vmatprep.mubr.bf16.mxu1 %v5884_v42 }
 0x1cd   : > { %v4409_v28 = vpop.f32.mrf.mxu0  ;;  %v4411_v51 = vpop.f32.mrf.mxu1 }
 0x1ce   : > { %5889 = vst [vmem:[#allocation5_spill] sm:$0xff] %v4411_v51 }
 0x1cf   : > { %v4413_v57 = vpop.f32.mrf.mxu0  ;;  %v4415_v22 = vpop.f32.mrf.mxu1 }
 0x1d0   : > { %5890 = vst [vmem:[#allocation6_spill] sm:$0xff] %v4413_v57  ;;  %5891 = vst [vmem:[#allocation7_spill] sm:$0xff] %v4415_v22 }
 0x1d1   : > { %v4417_v37 = vpop.f32.mrf.mxu0  ;;  %v4419_v61 = vpop.f32.mrf.mxu1 }
 0x1d2   : > { %5892 = vst [vmem:[#allocation8_spill] sm:$0xff] %v4417_v37  ;;  %5893 = vst [vmem:[#allocation9_spill] sm:$0xff] %v4419_v61 }
 0x1d3   : > { %v4421_v44 = vpop.f32.mrf.mxu0  ;;  %v4423_v4 = vpop.f32.mrf.mxu1  ;;  %3493 = vmatmul.mubr.msk.bf16.gmra.mxu0 %vm455_vm0, %v4201_v63  ;;  %3509 = vmatmul.mubr.msk.bf16.gmra.mxu1 %vm455_vm0, %v4201_v63 }
 0x1d4   : > { %5894 = vst [vmem:[#allocation10_spill] sm:$0xff] %v4421_v44  ;;  %5895 = vst [vmem:[#allocation11_spill] sm:$0xff] %v4423_v4  ;;  %1709 = vmatprep.mubr.bf16.mxu0 %v5884_v42  ;;  %1902 = vmatprep.mubr.bf16.mxu1 %v5884_v42 }
 0x1d5   : > { %v4431_v11 = vpop.f32.mrf.mxu0  ;;  %v4433_v22 = vpop.f32.mrf.mxu1 }
 0x1d6   : > { %5896 = vst [vmem:[#allocation12_spill] sm:$0xff] %v4433_v22 }
 0x1d7   : > { %v4435_v37 = vpop.f32.mrf.mxu0  ;;  %v4437_v61 = vpop.f32.mrf.mxu1 }
 0x1d8   : > { %5897 = vst [vmem:[#allocation13_spill] sm:$0xff] %v4435_v37  ;;  %5898 = vst [vmem:[#allocation14_spill] sm:$0xff] %v4437_v61 }
 0x1d9   : > { %v4439_v44 = vpop.f32.mrf.mxu0  ;;  %v4441_v4 = vpop.f32.mrf.mxu1 }
 0x1da   : > { %5899 = vst [vmem:[#allocation15_spill] sm:$0xff] %v4439_v44  ;;  %5900 = vst [vmem:[#allocation16_spill] sm:$0xff] %v4441_v4 }
 0x1db   : > { %v4443_v57 = vpop.f32.mrf.mxu0  ;;  %v4445_v51 = vpop.f32.mrf.mxu1  ;;  %3494 = vmatmul.mubr.msk.bf16.gmra.mxu0 %vm455_vm0, %v4213_v23  ;;  %3510 = vmatmul.mubr.msk.bf16.gmra.mxu1 %vm455_vm0, %v4213_v23 }
 0x1dc   : > { %5901 = vst [vmem:[#allocation17_spill] sm:$0xff] %v4443_v57  ;;  %5902 = vst [vmem:[#allocation18_spill] sm:$0xff] %v4445_v51  ;;  %1719 = vmatprep.mubr.bf16.mxu0 %v5884_v42  ;;  %1912 = vmatprep.mubr.bf16.mxu1 %v5884_v42 }
 0x1dd   : > { %v4453_v63 = vpop.f32.mrf.mxu0  ;;  %v4455_v61 = vpop.f32.mrf.mxu1 }
 0x1de   : > { %5903 = vst [vmem:[#allocation19_spill] sm:$0xff] %v4455_v61 }
 0x1df   : > { %v4457_v44 = vpop.f32.mrf.mxu0  ;;  %v4459_v4 = vpop.f32.mrf.mxu1 }
 0x1e0   : > { %5904 = vst [vmem:[#allocation20_spill] sm:$0xff] %v4457_v44  ;;  %5905 = vst [vmem:[#allocation21_spill] sm:$0xff] %v4459_v4 }
 0x1e1   : > { %v4461_v57 = vpop.f32.mrf.mxu0  ;;  %v4463_v51 = vpop.f32.mrf.mxu1 }
 0x1e2   : > { %5906 = vst [vmem:[#allocation22_spill] sm:$0xff] %v4461_v57  ;;  %5907 = vst [vmem:[#allocation23_spill] sm:$0xff] %v4463_v51 }
 0x1e3   : > { %v4465_v37 = vpop.f32.mrf.mxu0  ;;  %v4467_v22 = vpop.f32.mrf.mxu1  ;;  %3495 = vmatmul.mubr.msk.bf16.gmra.mxu0 %vm455_vm0, %v4221_v45  ;;  %3511 = vmatmul.mubr.msk.bf16.gmra.mxu1 %vm455_vm0, %v4221_v45  ;;  %v5916_v45 = vcombine.low %v4232_v13, %v4237_v40 }
 0x1e4   : > { %5908 = vst [vmem:[#allocation24_spill] sm:$0xff] %v4465_v37  ;;  %5909 = vst [vmem:[#allocation25_spill] sm:$0xff] %v4467_v22  ;;  %2043 = vmatprep.mubr.bf16.mxu0 %v5884_v42  ;;  %2236 = vmatprep.mubr.bf16.mxu1 %v5884_v42  ;;  %v5917_v42 = vcombine.low %v4242_v16, %v4251_v54 }
 0x1e5   : > { %v4475_v23 = vpop.f32.mrf.mxu0  ;;  %v4477_v4 = vpop.f32.mrf.mxu1 }
 0x1e7   : > { %v4479_v57 = vpop.f32.mrf.mxu0  ;;  %v4481_v51 = vpop.f32.mrf.mxu1 }
 0x1e8   : > { %5910 = vst [vmem:[#allocation26_spill] sm:$0xff] %v4479_v57  ;;  %5911 = vst [vmem:[#allocation27_spill] sm:$0xff] %v4481_v51 }
 0x1e9   : > { %v4483_v37 = vpop.f32.mrf.mxu0  ;;  %v4485_v22 = vpop.f32.mrf.mxu1 }
 0x1ea   : > { %5912 = vst [vmem:[#allocation28_spill] sm:$0xff] %v4483_v37  ;;  %5913 = vst [vmem:[#allocation29_spill] sm:$0xff] %v4485_v22 }
 0x1eb   : > { %v4487_v44 = vpop.f32.mrf.mxu0  ;;  %v4489_v61 = vpop.f32.mrf.mxu1  ;;  %3520 = vmatmul.mubr.msk.bf16.vlgmr.msra.gmra.mxu0 %vm455_vm0, %v3928_v29  ;;  %3536 = vmatmul.mubr.msk.bf16.vlgmr.msra.gmra.mxu1 %vm455_vm0, %v3928_v29 }
 0x1ec   : > { %5914 = vst [vmem:[#allocation30_spill] sm:$0xff] %v4487_v44  ;;  %5915 = vst [vmem:[#allocation31_spill] sm:$0xff] %v4489_v61  ;;  %2412 = vmatpush1.bf16.msra.mxu0 %v5916_v45  ;;  %2605 = vmatpush1.bf16.msra.mxu1 %v5917_v42  ;;  %v5918_v44 = vmov 0  }
 0x1ed   : > { %v4501_v37 = vpop.f32.mrf.mxu0  ;;  %v4503_v22 = vpop.f32.mrf.mxu1  ;;  %2053 = vmatprep.mubr.bf16.mxu0 %v5918_v44  ;;  %2246 = vmatprep.mubr.bf16.mxu1 %v5918_v44 }
 0x1ef   : > { %v4507_v61 = vpop.f32.mrf.mxu0  ;;  %v4509_v51 = vpop.f32.mrf.mxu1 }
 0x1f0   : > { %5919 = vst [vmem:[#allocation32_spill] sm:$0xff] %v4509_v51 }
 0x1f1   : > { %v4511_v57 = vpop.f32.mrf.mxu0  ;;  %v4513_v13 = vpop.f32.mrf.mxu1 }
 0x1f2   : > { %5920 = vst [vmem:[#allocation33_spill] sm:$0xff] %v4511_v57  ;;  %5921 = vst [vmem:[#allocation34_spill] sm:$0xff] %v4513_v13 }
 0x1f3   : > { %v4515_v40 = vpop.f32.mrf.mxu0  ;;  %v4517_v16 = vpop.f32.mrf.mxu1  ;;  %3521 = vmatmul.mubr.msk.bf16.gmra.mxu0 %vm455_vm0, %v3898_v14  ;;  %3537 = vmatmul.mubr.msk.bf16.gmra.mxu1 %vm455_vm0, %v3898_v14 }
 0x1f4   : > { %5922 = vst [vmem:[#allocation35_spill] sm:$0xff] %v4515_v40  ;;  %5923 = vst [vmem:[#allocation36_spill] sm:$0xff] %v4517_v16  ;;  %2063 = vmatprep.mubr.bf16.mxu0 %v5918_v44  ;;  %2256 = vmatprep.mubr.bf16.mxu1 %v5918_v44 }
 0x1f5   : > { %v4525_v42 = vpop.f32.mrf.mxu0  ;;  %v4527_v54 = vpop.f32.mrf.mxu1 }
 0x1f6   : > { %5924 = vst [vmem:[#allocation37_spill] sm:$0xff] %v4525_v42  ;;  %5925 = vst [vmem:[#allocation38_spill] sm:$0xff] %v4527_v54 }
 0x1f7   : > { %v4529_v45 = vpop.f32.mrf.mxu0  ;;  %v4531_v13 = vpop.f32.mrf.mxu1 }
 0x1f8   : > { %5926 = vst [vmem:[#allocation39_spill] sm:$0xff] %v4529_v45  ;;  %5927 = vst [vmem:[#allocation40_spill] sm:$0xff] %v4531_v13 }
 0x1f9   : > { %v4533_v40 = vpop.f32.mrf.mxu0  ;;  %v4535_v16 = vpop.f32.mrf.mxu1 }
 0x1fa   : > { %5928 = vst [vmem:[#allocation41_spill] sm:$0xff] %v4533_v40  ;;  %5929 = vst [vmem:[#allocation42_spill] sm:$0xff] %v4535_v16 }
 0x1fb   : > { %v4537_v57 = vpop.f32.mrf.mxu0  ;;  %v4539_v51 = vpop.f32.mrf.mxu1  ;;  %3522 = vmatmul.mubr.msk.bf16.gmra.mxu0 %vm455_vm0, %v3963_v2  ;;  %3538 = vmatmul.mubr.msk.bf16.gmra.mxu1 %vm455_vm0, %v3963_v2 }
 0x1fc   : > { %5930 = vst [vmem:[#allocation43_spill] sm:$0xff] %v4537_v57  ;;  %5931 = vst [vmem:[#allocation44_spill] sm:$0xff] %v4539_v51  ;;  %2073 = vmatprep.mubr.bf16.mxu0 %v5918_v44  ;;  %2266 = vmatprep.mubr.bf16.mxu1 %v5918_v44 }
 0x1fd   : > { %v4547_v45 = vpop.f32.mrf.mxu0  ;;  %v4549_v13 = vpop.f32.mrf.mxu1 }
 0x1fe   : > { %5932 = vst [vmem:[#allocation45_spill] sm:$0xff] %v4547_v45  ;;  %5933 = vst [vmem:[#allocation46_spill] sm:$0xff] %v4549_v13 }
 0x1ff   : > { %v4551_v40 = vpop.f32.mrf.mxu0  ;;  %v4553_v16 = vpop.f32.mrf.mxu1 }
 0x200   : > { %5934 = vst [vmem:[#allocation47_spill] sm:$0xff] %v4551_v40  ;;  %5935 = vst [vmem:[#allocation48_spill] sm:$0xff] %v4553_v16 }
 0x201   : > { %v4555_v57 = vpop.f32.mrf.mxu0  ;;  %v4557_v51 = vpop.f32.mrf.mxu1 }
 0x202   : > { %5936 = vst [vmem:[#allocation49_spill] sm:$0xff] %v4555_v57  ;;  %5937 = vst [vmem:[#allocation50_spill] sm:$0xff] %v4557_v51 }
 0x203   : > { %v4559_v54 = vpop.f32.mrf.mxu0  ;;  %v4561_v42 = vpop.f32.mrf.mxu1  ;;  %3523 = vmatmul.mubr.msk.bf16.gmra.mxu0 %vm455_vm0, %v3956_v62  ;;  %3539 = vmatmul.mubr.msk.bf16.gmra.mxu1 %vm455_vm0, %v3956_v62 }
 0x204   : > { %5938 = vst [vmem:[#allocation51_spill] sm:$0xff] %v4559_v54  ;;  %5939 = vst [vmem:[#allocation52_spill] sm:$0xff] %v4561_v42  ;;  %2083 = vmatprep.mubr.bf16.mxu0 %v5918_v44  ;;  %2276 = vmatprep.mubr.bf16.mxu1 %v5918_v44 }
 0x205   : > { %v4569_v40 = vpop.f32.mrf.mxu0  ;;  %v4571_v16 = vpop.f32.mrf.mxu1 }
 0x206   : > { %5940 = vst [vmem:[#allocation53_spill] sm:$0xff] %v4569_v40  ;;  %5941 = vst [vmem:[#allocation54_spill] sm:$0xff] %v4571_v16 }
 0x207   : > { %v4573_v57 = vpop.f32.mrf.mxu0  ;;  %v4575_v51 = vpop.f32.mrf.mxu1 }
 0x208   : > { %5942 = vst [vmem:[#allocation55_spill] sm:$0xff] %v4573_v57  ;;  %5943 = vst [vmem:[#allocation56_spill] sm:$0xff] %v4575_v51 }
 0x209   : > { %v4577_v54 = vpop.f32.mrf.mxu0  ;;  %v4579_v42 = vpop.f32.mrf.mxu1 }
 0x20a   : > { %5944 = vst [vmem:[#allocation57_spill] sm:$0xff] %v4577_v54  ;;  %5945 = vst [vmem:[#allocation58_spill] sm:$0xff] %v4579_v42 }
 0x20b   : > { %v4581_v13 = vpop.f32.mrf.mxu0  ;;  %v4583_v45 = vpop.f32.mrf.mxu1  ;;  %3524 = vmatmul.mubr.msk.bf16.gmra.mxu0 %vm455_vm0, %v3992_v31  ;;  %3540 = vmatmul.mubr.msk.bf16.gmra.mxu1 %vm455_vm0, %v3992_v31 }
 0x20c   : > { %5946 = vst [vmem:[#allocation59_spill] sm:$0xff] %v4581_v13  ;;  %5947 = vst [vmem:[#allocation60_spill] sm:$0xff] %v4583_v45  ;;  %2093 = vmatprep.mubr.bf16.mxu0 %v5918_v44  ;;  %2286 = vmatprep.mubr.bf16.mxu1 %v5918_v44 }
 0x20d   : > { %v4591_v57 = vpop.f32.mrf.mxu0  ;;  %v4593_v51 = vpop.f32.mrf.mxu1 }
 0x20e   : > { %5948 = vst [vmem:[#allocation61_spill] sm:$0xff] %v4591_v57  ;;  %5949 = vst [vmem:[#allocation62_spill] sm:$0xff] %v4593_v51 }
 0x20f   : > { %v4595_v54 = vpop.f32.mrf.mxu0  ;;  %v4597_v42 = vpop.f32.mrf.mxu1 }
 0x210   : > { %5950 = vst [vmem:[#allocation63_spill] sm:$0xff] %v4595_v54  ;;  %5951 = vst [vmem:[#allocation64_spill] sm:$0xff] %v4597_v42 }
 0x211   : > { %v4599_v13 = vpop.f32.mrf.mxu0  ;;  %v4601_v45 = vpop.f32.mrf.mxu1 }
 0x212   : > { %5952 = vst [vmem:[#allocation65_spill] sm:$0xff] %v4599_v13  ;;  %5953 = vst [vmem:[#allocation66_spill] sm:$0xff] %v4601_v45 }
 0x213   : > { %v4603_v16 = vpop.f32.mrf.mxu0  ;;  %v4605_v40 = vpop.f32.mrf.mxu1  ;;  %3525 = vmatmul.mubr.msk.bf16.gmra.mxu0 %vm455_vm0, %v3987_v27  ;;  %3541 = vmatmul.mubr.msk.bf16.gmra.mxu1 %vm455_vm0, %v3987_v27 }
 0x214   : > { %5954 = vst [vmem:[#allocation67_spill] sm:$0xff] %v4603_v16  ;;  %5955 = vst [vmem:[#allocation68_spill] sm:$0xff] %v4605_v40  ;;  %2103 = vmatprep.mubr.bf16.mxu0 %v5918_v44  ;;  %2296 = vmatprep.mubr.bf16.mxu1 %v5918_v44 }
 0x215   : > { %v4613_v54 = vpop.f32.mrf.mxu0  ;;  %v4615_v42 = vpop.f32.mrf.mxu1 }
 0x216   : > { %5956 = vst [vmem:[#allocation69_spill] sm:$0xff] %v4613_v54  ;;  %5957 = vst [vmem:[#allocation70_spill] sm:$0xff] %v4615_v42 }
 0x217   : > { %v4617_v13 = vpop.f32.mrf.mxu0  ;;  %v4619_v45 = vpop.f32.mrf.mxu1 }
 0x218   : > { %5958 = vst [vmem:[#allocation71_spill] sm:$0xff] %v4617_v13  ;;  %5959 = vst [vmem:[#allocation72_spill] sm:$0xff] %v4619_v45 }
 0x219   : > { %v4621_v16 = vpop.f32.mrf.mxu0  ;;  %v4623_v40 = vpop.f32.mrf.mxu1 }
 0x21a   : > { %5960 = vst [vmem:[#allocation73_spill] sm:$0xff] %v4621_v16  ;;  %5961 = vst [vmem:[#allocation74_spill] sm:$0xff] %v4623_v40 }
 0x21b   : > { %v4625_v51 = vpop.f32.mrf.mxu0  ;;  %v4627_v57 = vpop.f32.mrf.mxu1  ;;  %3526 = vmatmul.mubr.msk.bf16.gmra.mxu0 %vm455_vm0, %v4022_v49  ;;  %3542 = vmatmul.mubr.msk.bf16.gmra.mxu1 %vm455_vm0, %v4022_v49 }
 0x21c   : > { %5962 = vst [vmem:[#allocation75_spill] sm:$0xff] %v4625_v51  ;;  %5963 = vst [vmem:[#allocation76_spill] sm:$0xff] %v4627_v57  ;;  %2113 = vmatprep.mubr.bf16.mxu0 %v5918_v44  ;;  %2306 = vmatprep.mubr.bf16.mxu1 %v5918_v44 }
 0x21d   : > { %v4635_v13 = vpop.f32.mrf.mxu0  ;;  %v4637_v45 = vpop.f32.mrf.mxu1 }
 0x21e   : > { %5964 = vst [vmem:[#allocation77_spill] sm:$0xff] %v4635_v13  ;;  %5965 = vst [vmem:[#allocation78_spill] sm:$0xff] %v4637_v45 }
 0x21f   : > { %v4639_v16 = vpop.f32.mrf.mxu0  ;;  %v4641_v40 = vpop.f32.mrf.mxu1 }
 0x220   : > { %5966 = vst [vmem:[#allocation79_spill] sm:$0xff] %v4639_v16  ;;  %5967 = vst [vmem:[#allocation80_spill] sm:$0xff] %v4641_v40 }
 0x221   : > { %v4643_v51 = vpop.f32.mrf.mxu0  ;;  %v4645_v57 = vpop.f32.mrf.mxu1 }
 0x222   : > { %5968 = vst [vmem:[#allocation81_spill] sm:$0xff] %v4643_v51  ;;  %5969 = vst [vmem:[#allocation82_spill] sm:$0xff] %v4645_v57 }
 0x223   : > { %v4647_v42 = vpop.f32.mrf.mxu0  ;;  %v4649_v54 = vpop.f32.mrf.mxu1  ;;  %3527 = vmatmul.mubr.msk.bf16.gmra.mxu0 %vm455_vm0, %v4017_v43  ;;  %3543 = vmatmul.mubr.msk.bf16.gmra.mxu1 %vm455_vm0, %v4017_v43 }
 0x224   : > { %5970 = vst [vmem:[#allocation83_spill] sm:$0xff] %v4647_v42  ;;  %5971 = vst [vmem:[#allocation84_spill] sm:$0xff] %v4649_v54  ;;  %2123 = vmatprep.mubr.bf16.mxu0 %v5918_v44  ;;  %2316 = vmatprep.mubr.bf16.mxu1 %v5918_v44 }
 0x225   : > { %v4657_v16 = vpop.f32.mrf.mxu0  ;;  %v4659_v40 = vpop.f32.mrf.mxu1 }
 0x226   : > { %5972 = vst [vmem:[#allocation85_spill] sm:$0xff] %v4657_v16  ;;  %5973 = vst [vmem:[#allocation86_spill] sm:$0xff] %v4659_v40 }
 0x227   : > { %v4661_v51 = vpop.f32.mrf.mxu0  ;;  %v4663_v57 = vpop.f32.mrf.mxu1 }
 0x228   : > { %5974 = vst [vmem:[#allocation87_spill] sm:$0xff] %v4661_v51  ;;  %5975 = vst [vmem:[#allocation88_spill] sm:$0xff] %v4663_v57 }
 0x229   : > { %v4665_v42 = vpop.f32.mrf.mxu0  ;;  %v4667_v54 = vpop.f32.mrf.mxu1 }
 0x22a   : > { %5976 = vst [vmem:[#allocation89_spill] sm:$0xff] %v4665_v42  ;;  %5977 = vst [vmem:[#allocation90_spill] sm:$0xff] %v4667_v54 }
 0x22b   : > { %v4669_v45 = vpop.f32.mrf.mxu0  ;;  %v4671_v13 = vpop.f32.mrf.mxu1  ;;  %3528 = vmatmul.mubr.msk.bf16.gmra.mxu0 %vm455_vm0, %v4052_v53  ;;  %3544 = vmatmul.mubr.msk.bf16.gmra.mxu1 %vm455_vm0, %v4052_v53 }
 0x22c   : > { %5978 = vst [vmem:[#allocation91_spill] sm:$0xff] %v4669_v45  ;;  %5979 = vst [vmem:[#allocation92_spill] sm:$0xff] %v4671_v13  ;;  %2133 = vmatprep.mubr.bf16.mxu0 %v5918_v44  ;;  %2326 = vmatprep.mubr.bf16.mxu1 %v5918_v44 }
 0x22d   : > { %v4679_v51 = vpop.f32.mrf.mxu0  ;;  %v4681_v57 = vpop.f32.mrf.mxu1 }
 0x22e   : > { %5980 = vst [vmem:[#allocation93_spill] sm:$0xff] %v4679_v51  ;;  %5981 = vst [vmem:[#allocation94_spill] sm:$0xff] %v4681_v57 }
 0x22f   : > { %v4683_v42 = vpop.f32.mrf.mxu0  ;;  %v4685_v54 = vpop.f32.mrf.mxu1 }
 0x230   : > { %5982 = vst [vmem:[#allocation95_spill] sm:$0xff] %v4683_v42  ;;  %5983 = vst [vmem:[#allocation96_spill] sm:$0xff] %v4685_v54 }
 0x231   : > { %v4687_v45 = vpop.f32.mrf.mxu0  ;;  %v4689_v13 = vpop.f32.mrf.mxu1 }
 0x232   : > { %5984 = vst [vmem:[#allocation97_spill] sm:$0xff] %v4687_v45  ;;  %5985 = vst [vmem:[#allocation98_spill] sm:$0xff] %v4689_v13 }
 0x233   : > { %v4691_v40 = vpop.f32.mrf.mxu0  ;;  %v4693_v16 = vpop.f32.mrf.mxu1  ;;  %3529 = vmatmul.mubr.msk.bf16.gmra.mxu0 %vm455_vm0, %v4047_v41  ;;  %3545 = vmatmul.mubr.msk.bf16.gmra.mxu1 %vm455_vm0, %v4047_v41 }
 0x234   : > { %5986 = vst [vmem:[#allocation99_spill] sm:$0xff] %v4691_v40  ;;  %5987 = vst [vmem:[#allocation100_spill] sm:$0xff] %v4693_v16  ;;  %2143 = vmatprep.mubr.bf16.mxu0 %v5918_v44  ;;  %2336 = vmatprep.mubr.bf16.mxu1 %v5918_v44 }
 0x235   : > { %v4701_v42 = vpop.f32.mrf.mxu0  ;;  %v4703_v54 = vpop.f32.mrf.mxu1 }
 0x236   : > { %5988 = vst [vmem:[#allocation101_spill] sm:$0xff] %v4701_v42  ;;  %5989 = vst [vmem:[#allocation102_spill] sm:$0xff] %v4703_v54 }
 0x237   : > { %v4705_v45 = vpop.f32.mrf.mxu0  ;;  %v4707_v13 = vpop.f32.mrf.mxu1 }
 0x238   : > { %5990 = vst [vmem:[#allocation103_spill] sm:$0xff] %v4705_v45  ;;  %5991 = vst [vmem:[#allocation104_spill] sm:$0xff] %v4707_v13 }
 0x239   : > { %v4709_v40 = vpop.f32.mrf.mxu0  ;;  %v4711_v16 = vpop.f32.mrf.mxu1 }
 0x23a   : > { %5992 = vst [vmem:[#allocation105_spill] sm:$0xff] %v4709_v40  ;;  %5993 = vst [vmem:[#allocation106_spill] sm:$0xff] %v4711_v16 }
 0x23b   : > { %v4713_v57 = vpop.f32.mrf.mxu0  ;;  %v4715_v51 = vpop.f32.mrf.mxu1  ;;  %3530 = vmatmul.mubr.msk.bf16.gmra.mxu0 %vm455_vm0, %v4082_v10  ;;  %3546 = vmatmul.mubr.msk.bf16.gmra.mxu1 %vm455_vm0, %v4082_v10 }
 0x23c   : > { %5994 = vst [vmem:[#allocation107_spill] sm:$0xff] %v4713_v57  ;;  %5995 = vst [vmem:[#allocation108_spill] sm:$0xff] %v4715_v51  ;;  %2153 = vmatprep.mubr.bf16.mxu0 %v5918_v44  ;;  %2346 = vmatprep.mubr.bf16.mxu1 %v5918_v44 }
 0x23d   : > { %v4723_v45 = vpop.f32.mrf.mxu0  ;;  %v4725_v13 = vpop.f32.mrf.mxu1 }
 0x23e   : > { %5996 = vst [vmem:[#allocation109_spill] sm:$0xff] %v4723_v45  ;;  %5997 = vst [vmem:[#allocation110_spill] sm:$0xff] %v4725_v13 }
 0x23f   : > { %v4727_v40 = vpop.f32.mrf.mxu0  ;;  %v4729_v16 = vpop.f32.mrf.mxu1 }
 0x240   : > { %5998 = vst [vmem:[#allocation111_spill] sm:$0xff] %v4727_v40  ;;  %5999 = vst [vmem:[#allocation112_spill] sm:$0xff] %v4729_v16 }
 0x241   : > { %v4731_v57 = vpop.f32.mrf.mxu0  ;;  %v4733_v51 = vpop.f32.mrf.mxu1 }
 0x242   : > { %6000 = vst [vmem:[#allocation113_spill] sm:$0xff] %v4731_v57  ;;  %6001 = vst [vmem:[#allocation114_spill] sm:$0xff] %v4733_v51 }
 0x243   : > { %v4735_v54 = vpop.f32.mrf.mxu0  ;;  %v4737_v42 = vpop.f32.mrf.mxu1  ;;  %3531 = vmatmul.mubr.msk.bf16.gmra.mxu0 %vm455_vm0, %v4077_v26  ;;  %3547 = vmatmul.mubr.msk.bf16.gmra.mxu1 %vm455_vm0, %v4077_v26 }
 0x244   : > { %6002 = vst [vmem:[#allocation115_spill] sm:$0xff] %v4735_v54  ;;  %6003 = vst [vmem:[#allocation116_spill] sm:$0xff] %v4737_v42  ;;  %2163 = vmatprep.mubr.bf16.mxu0 %v5918_v44  ;;  %2356 = vmatprep.mubr.bf16.mxu1 %v5918_v44 }
 0x245   : > { %v4745_v40 = vpop.f32.mrf.mxu0  ;;  %v4747_v16 = vpop.f32.mrf.mxu1 }
 0x246   : > { %6004 = vst [vmem:[#allocation117_spill] sm:$0xff] %v4745_v40  ;;  %6005 = vst [vmem:[#allocation118_spill] sm:$0xff] %v4747_v16 }
 0x247   : > { %v4749_v57 = vpop.f32.mrf.mxu0  ;;  %v4751_v51 = vpop.f32.mrf.mxu1 }
 0x248   : > { %6006 = vst [vmem:[#allocation119_spill] sm:$0xff] %v4749_v57  ;;  %6007 = vst [vmem:[#allocation120_spill] sm:$0xff] %v4751_v51 }
 0x249   : > { %v4753_v54 = vpop.f32.mrf.mxu0  ;;  %v4755_v42 = vpop.f32.mrf.mxu1 }
 0x24a   : > { %6008 = vst [vmem:[#allocation121_spill] sm:$0xff] %v4753_v54  ;;  %6009 = vst [vmem:[#allocation122_spill] sm:$0xff] %v4755_v42 }
 0x24b   : > { %v4757_v13 = vpop.f32.mrf.mxu0  ;;  %v4759_v45 = vpop.f32.mrf.mxu1  ;;  %3532 = vmatmul.mubr.msk.bf16.gmra.mxu0 %vm455_vm0, %v4112_v21  ;;  %3548 = vmatmul.mubr.msk.bf16.gmra.mxu1 %vm455_vm0, %v4112_v21 }
 0x24c   : > { %6010 = vst [vmem:[#allocation123_spill] sm:$0xff] %v4757_v13  ;;  %6011 = vst [vmem:[#allocation124_spill] sm:$0xff] %v4759_v45  ;;  %2173 = vmatprep.mubr.bf16.mxu0 %v5918_v44  ;;  %2366 = vmatprep.mubr.bf16.mxu1 %v5918_v44 }
 0x24d   : > { %v4767_v57 = vpop.f32.mrf.mxu0  ;;  %v4769_v51 = vpop.f32.mrf.mxu1 }
 0x24e   : > { %6012 = vst [vmem:[#allocation125_spill] sm:$0xff] %v4767_v57  ;;  %6013 = vst [vmem:[#allocation126_spill] sm:$0xff] %v4769_v51 }
 0x24f   : > { %v4771_v54 = vpop.f32.mrf.mxu0  ;;  %v4773_v42 = vpop.f32.mrf.mxu1 }
 0x250   : > { %6014 = vst [vmem:[#allocation127_spill] sm:$0xff] %v4771_v54  ;;  %6015 = vst [vmem:[#allocation128_spill] sm:$0xff] %v4773_v42 }
 0x251   : > { %v4775_v13 = vpop.f32.mrf.mxu0  ;;  %v4777_v45 = vpop.f32.mrf.mxu1 }
 0x252   : > { %6016 = vst [vmem:[#allocation129_spill] sm:$0xff] %v4775_v13  ;;  %6017 = vst [vmem:[#allocation130_spill] sm:$0xff] %v4777_v45 }
 0x253   : > { %v4779_v16 = vpop.f32.mrf.mxu0  ;;  %v4781_v40 = vpop.f32.mrf.mxu1  ;;  %3533 = vmatmul.mubr.msk.bf16.gmra.mxu0 %vm455_vm0, %v4107_v12  ;;  %3549 = vmatmul.mubr.msk.bf16.gmra.mxu1 %vm455_vm0, %v4107_v12 }
 0x254   : > { %6018 = vst [vmem:[#allocation131_spill] sm:$0xff] %v4779_v16  ;;  %6019 = vst [vmem:[#allocation132_spill] sm:$0xff] %v4781_v40  ;;  %2183 = vmatprep.mubr.bf16.mxu0 %v5918_v44  ;;  %2376 = vmatprep.mubr.bf16.mxu1 %v5918_v44 }
 0x255   : > { %v4789_v54 = vpop.f32.mrf.mxu0  ;;  %v4791_v42 = vpop.f32.mrf.mxu1 }
 0x256   : > { %6020 = vst [vmem:[#allocation133_spill] sm:$0xff] %v4789_v54  ;;  %6021 = vst [vmem:[#allocation134_spill] sm:$0xff] %v4791_v42 }
 0x257   : > { %v4793_v13 = vpop.f32.mrf.mxu0  ;;  %v4795_v45 = vpop.f32.mrf.mxu1 }
 0x258   : > { %6022 = vst [vmem:[#allocation135_spill] sm:$0xff] %v4793_v13  ;;  %6023 = vst [vmem:[#allocation136_spill] sm:$0xff] %v4795_v45 }
 0x259   : > { %v4797_v16 = vpop.f32.mrf.mxu0  ;;  %v4799_v40 = vpop.f32.mrf.mxu1 }
 0x25a   : > { %6024 = vst [vmem:[#allocation137_spill] sm:$0xff] %v4797_v16  ;;  %6025 = vst [vmem:[#allocation138_spill] sm:$0xff] %v4799_v40 }
 0x25b   : > { %v4801_v51 = vpop.f32.mrf.mxu0  ;;  %v4803_v57 = vpop.f32.mrf.mxu1  ;;  %3534 = vmatmul.mubr.msk.bf16.gmra.mxu0 %vm455_vm0, %v4139_v56  ;;  %3550 = vmatmul.mubr.msk.bf16.gmra.mxu1 %vm455_vm0, %v4139_v56 }
 0x25c   : > { %6026 = vst [vmem:[#allocation139_spill] sm:$0xff] %v4801_v51  ;;  %6027 = vst [vmem:[#allocation140_spill] sm:$0xff] %v4803_v57  ;;  %2193 = vmatprep.mubr.bf16.mxu0 %v5918_v44  ;;  %2386 = vmatprep.mubr.bf16.mxu1 %v5918_v44 }
 0x25d   : > { %v4811_v13 = vpop.f32.mrf.mxu0  ;;  %v4813_v45 = vpop.f32.mrf.mxu1 }
 0x25e   : > { %6028 = vst [vmem:[#allocation141_spill] sm:$0xff] %v4811_v13  ;;  %6029 = vst [vmem:[#allocation142_spill] sm:$0xff] %v4813_v45 }
 0x25f   : > { %v4815_v16 = vpop.f32.mrf.mxu0  ;;  %v4817_v40 = vpop.f32.mrf.mxu1 }
 0x260   : > { %6030 = vst [vmem:[#allocation143_spill] sm:$0xff] %v4815_v16  ;;  %6031 = vst [vmem:[#allocation144_spill] sm:$0xff] %v4817_v40 }
 0x261   : > { %v4819_v51 = vpop.f32.mrf.mxu0  ;;  %v4821_v57 = vpop.f32.mrf.mxu1 }
 0x262   : > { %6032 = vst [vmem:[#allocation145_spill] sm:$0xff] %v4819_v51  ;;  %6033 = vst [vmem:[#allocation146_spill] sm:$0xff] %v4821_v57 }
 0x263   : > { %v4823_v42 = vpop.f32.mrf.mxu0  ;;  %v4825_v54 = vpop.f32.mrf.mxu1  ;;  %3535 = vmatmul.mubr.msk.bf16.gmra.mxu0 %vm455_vm0, %v4137_v34  ;;  %3551 = vmatmul.mubr.msk.bf16.gmra.mxu1 %vm455_vm0, %v4137_v34 }
 0x264   : > { %6034 = vst [vmem:[#allocation147_spill] sm:$0xff] %v4823_v42  ;;  %6035 = vst [vmem:[#allocation148_spill] sm:$0xff] %v4825_v54  ;;  %2429 = vmatprep.mubr.bf16.mxu0 %v5918_v44  ;;  %2622 = vmatprep.mubr.bf16.mxu1 %v5918_v44 }
 0x265   : > { %v4833_v16 = vpop.f32.mrf.mxu0  ;;  %v4835_v40 = vpop.f32.mrf.mxu1 }
 0x266   : > { %6036 = vst [vmem:[#allocation149_spill] sm:$0xff] %v4833_v16  ;;  %6037 = vst [vmem:[#allocation150_spill] sm:$0xff] %v4835_v40 }
 0x267   : > { %v4837_v51 = vpop.f32.mrf.mxu0  ;;  %v4839_v57 = vpop.f32.mrf.mxu1 }
 0x268   : > { %6038 = vst [vmem:[#allocation151_spill] sm:$0xff] %v4837_v51  ;;  %6039 = vst [vmem:[#allocation152_spill] sm:$0xff] %v4839_v57 }
 0x269   : > { %v4841_v42 = vpop.f32.mrf.mxu0  ;;  %v4843_v54 = vpop.f32.mrf.mxu1 }
 0x26a   : > { %6040 = vst [vmem:[#allocation153_spill] sm:$0xff] %v4841_v42  ;;  %6041 = vst [vmem:[#allocation154_spill] sm:$0xff] %v4843_v54 }
 0x26b   : > { %v4845_v45 = vpop.f32.mrf.mxu0  ;;  %v4847_v13 = vpop.f32.mrf.mxu1  ;;  %3552 = vmatmul.mubr.msk.bf16.vlgmr.msra.gmra.mxu0 %vm455_vm0, %v3928_v29  ;;  %3568 = vmatmul.mubr.msk.bf16.vlgmr.msra.gmra.mxu1 %vm455_vm0, %v3928_v29 }
 0x26c   : > { %6042 = vst [vmem:[#allocation155_spill] sm:$0xff] %v4845_v45  ;;  %6043 = vst [vmem:[#allocation156_spill] sm:$0xff] %v4847_v13  ;;  %2439 = vmatprep.mubr.bf16.mxu0 %v5918_v44  ;;  %2632 = vmatprep.mubr.bf16.mxu1 %v5918_v44 }
 0x26d   : > { %v4855_v51 = vpop.f32.mrf.mxu0  ;;  %v4857_v57 = vpop.f32.mrf.mxu1 }
 0x26e   : > { %6044 = vst [vmem:[#allocation157_spill] sm:$0xff] %v4855_v51  ;;  %6045 = vst [vmem:[#allocation158_spill] sm:$0xff] %v4857_v57 }
 0x26f   : > { %v4859_v42 = vpop.f32.mrf.mxu0  ;;  %v4861_v54 = vpop.f32.mrf.mxu1 }
 0x270   : > { %6046 = vst [vmem:[#allocation159_spill] sm:$0xff] %v4859_v42  ;;  %6047 = vst [vmem:[#allocation160_spill] sm:$0xff] %v4861_v54 }
 0x271   : > { %v4863_v45 = vpop.f32.mrf.mxu0  ;;  %v4865_v13 = vpop.f32.mrf.mxu1 }
 0x272   : > { %6048 = vst [vmem:[#allocation161_spill] sm:$0xff] %v4863_v45  ;;  %6049 = vst [vmem:[#allocation162_spill] sm:$0xff] %v4865_v13 }
 0x273   : > { %v4867_v40 = vpop.f32.mrf.mxu0  ;;  %v4869_v16 = vpop.f32.mrf.mxu1  ;;  %3553 = vmatmul.mubr.msk.bf16.gmra.mxu0 %vm455_vm0, %v3898_v14  ;;  %3569 = vmatmul.mubr.msk.bf16.gmra.mxu1 %vm455_vm0, %v3898_v14 }
 0x274   : > { %6050 = vst [vmem:[#allocation163_spill] sm:$0xff] %v4867_v40  ;;  %6051 = vst [vmem:[#allocation164_spill] sm:$0xff] %v4869_v16  ;;  %2449 = vmatprep.mubr.bf16.mxu0 %v5918_v44  ;;  %2642 = vmatprep.mubr.bf16.mxu1 %v5918_v44 }
 0x275   : > { %v4877_v29 = vpop.f32.mrf.mxu0  ;;  %v4879_v54 = vpop.f32.mrf.mxu1 }
 0x276   : > { %6052 = vst [vmem:[#allocation165_spill] sm:$0xff] %v4877_v29  ;;  %6053 = vst [vmem:[#allocation166_spill] sm:$0xff] %v4879_v54 }
 0x277   : > { %v4881_v45 = vpop.f32.mrf.mxu0  ;;  %v4883_v13 = vpop.f32.mrf.mxu1 }
 0x278   : > { %6054 = vst [vmem:[#allocation167_spill] sm:$0xff] %v4881_v45  ;;  %6055 = vst [vmem:[#allocation168_spill] sm:$0xff] %v4883_v13 }
 0x279   : > { %v4885_v40 = vpop.f32.mrf.mxu0  ;;  %v4887_v16 = vpop.f32.mrf.mxu1 }
 0x27a   : > { %6056 = vst [vmem:[#allocation169_spill] sm:$0xff] %v4885_v40  ;;  %6057 = vst [vmem:[#allocation170_spill] sm:$0xff] %v4887_v16 }
 0x27b   : > { %v4889_v42 = vpop.f32.mrf.mxu0  ;;  %v4891_v57 = vpop.f32.mrf.mxu1  ;;  %3554 = vmatmul.mubr.msk.bf16.gmra.mxu0 %vm455_vm0, %v3963_v2  ;;  %3570 = vmatmul.mubr.msk.bf16.gmra.mxu1 %vm455_vm0, %v3963_v2 }
 0x27c   : > { %6058 = vst [vmem:[#allocation171_spill] sm:$0xff] %v4889_v42  ;;  %6059 = vst [vmem:[#allocation172_spill] sm:$0xff] %v4891_v57  ;;  %2459 = vmatprep.mubr.bf16.mxu0 %v5918_v44  ;;  %2652 = vmatprep.mubr.bf16.mxu1 %v5918_v44 }
 0x27d   : > { %v4899_v14 = vpop.f32.mrf.mxu0  ;;  %v4901_v13 = vpop.f32.mrf.mxu1 }
 0x27e   : > { %6060 = vst [vmem:[#allocation173_spill] sm:$0xff] %v4899_v14  ;;  %6061 = vst [vmem:[#allocation174_spill] sm:$0xff] %v4901_v13 }
 0x27f   : > { %v4903_v40 = vpop.f32.mrf.mxu0  ;;  %v4905_v16 = vpop.f32.mrf.mxu1 }
 0x280   : > { %6062 = vst [vmem:[#allocation175_spill] sm:$0xff] %v4903_v40  ;;  %6063 = vst [vmem:[#allocation176_spill] sm:$0xff] %v4905_v16 }
 0x281   : > { %v4907_v42 = vpop.f32.mrf.mxu0  ;;  %v4909_v57 = vpop.f32.mrf.mxu1 }
 0x282   : > { %6064 = vst [vmem:[#allocation177_spill] sm:$0xff] %v4907_v42  ;;  %6065 = vst [vmem:[#allocation178_spill] sm:$0xff] %v4909_v57 }
 0x283   : > { %v4911_v45 = vpop.f32.mrf.mxu0  ;;  %v4913_v54 = vpop.f32.mrf.mxu1  ;;  %3555 = vmatmul.mubr.msk.bf16.gmra.mxu0 %vm455_vm0, %v3956_v62  ;;  %3571 = vmatmul.mubr.msk.bf16.gmra.mxu1 %vm455_vm0, %v3956_v62 }
 0x284   : > { %6066 = vst [vmem:[#allocation179_spill] sm:$0xff] %v4911_v45  ;;  %6067 = vst [vmem:[#allocation180_spill] sm:$0xff] %v4913_v54  ;;  %2469 = vmatprep.mubr.bf16.mxu0 %v5918_v44  ;;  %2662 = vmatprep.mubr.bf16.mxu1 %v5918_v44 }
 0x285   : > { %v4921_v2 = vpop.f32.mrf.mxu0  ;;  %v4923_v16 = vpop.f32.mrf.mxu1 }
 0x286   : > { %6068 = vst [vmem:[#allocation181_spill] sm:$0xff] %v4921_v2  ;;  %6069 = vst [vmem:[#allocation182_spill] sm:$0xff] %v4923_v16 }
 0x287   : > { %v4925_v42 = vpop.f32.mrf.mxu0  ;;  %v4927_v57 = vpop.f32.mrf.mxu1 }
 0x288   : > { %6070 = vst [vmem:[#allocation183_spill] sm:$0xff] %v4925_v42  ;;  %6071 = vst [vmem:[#allocation184_spill] sm:$0xff] %v4927_v57 }
 0x289   : > { %v4929_v45 = vpop.f32.mrf.mxu0  ;;  %v4931_v54 = vpop.f32.mrf.mxu1 }
 0x28a   : > { %6072 = vst [vmem:[#allocation185_spill] sm:$0xff] %v4929_v45  ;;  %6073 = vst [vmem:[#allocation186_spill] sm:$0xff] %v4931_v54 }
 0x28b   : > { %v4933_v40 = vpop.f32.mrf.mxu0  ;;  %v4935_v13 = vpop.f32.mrf.mxu1  ;;  %3556 = vmatmul.mubr.msk.bf16.gmra.mxu0 %vm455_vm0, %v3992_v31  ;;  %3572 = vmatmul.mubr.msk.bf16.gmra.mxu1 %vm455_vm0, %v3992_v31 }
 0x28c   : > { %6074 = vst [vmem:[#allocation187_spill] sm:$0xff] %v4933_v40  ;;  %6075 = vst [vmem:[#allocation188_spill] sm:$0xff] %v4935_v13  ;;  %2479 = vmatprep.mubr.bf16.mxu0 %v5918_v44  ;;  %2672 = vmatprep.mubr.bf16.mxu1 %v5918_v44 }
 0x28d   : > { %v4943_v62 = vpop.f32.mrf.mxu0  ;;  %v4945_v57 = vpop.f32.mrf.mxu1 }
 0x28e   : > { %6076 = vst [vmem:[#allocation189_spill] sm:$0xff] %v4943_v62  ;;  %6077 = vst [vmem:[#allocation190_spill] sm:$0xff] %v4945_v57 }
 0x28f   : > { %v4947_v45 = vpop.f32.mrf.mxu0  ;;  %v4949_v54 = vpop.f32.mrf.mxu1 }
 0x290   : > { %6078 = vst [vmem:[#allocation191_spill] sm:$0xff] %v4947_v45  ;;  %6079 = vst [vmem:[#allocation192_spill] sm:$0xff] %v4949_v54 }
 0x291   : > { %v4951_v40 = vpop.f32.mrf.mxu0  ;;  %v4953_v13 = vpop.f32.mrf.mxu1 }
 0x292   : > { %6080 = vst [vmem:[#allocation193_spill] sm:$0xff] %v4951_v40  ;;  %6081 = vst [vmem:[#allocation194_spill] sm:$0xff] %v4953_v13 }
 0x293   : > { %v4955_v42 = vpop.f32.mrf.mxu0  ;;  %v4957_v16 = vpop.f32.mrf.mxu1  ;;  %3557 = vmatmul.mubr.msk.bf16.gmra.mxu0 %vm455_vm0, %v3987_v27  ;;  %3573 = vmatmul.mubr.msk.bf16.gmra.mxu1 %vm455_vm0, %v3987_v27 }
 0x294   : > { %6082 = vst [vmem:[#allocation195_spill] sm:$0xff] %v4955_v42  ;;  %6083 = vst [vmem:[#allocation196_spill] sm:$0xff] %v4957_v16  ;;  %2489 = vmatprep.mubr.bf16.mxu0 %v5918_v44  ;;  %2682 = vmatprep.mubr.bf16.mxu1 %v5918_v44 }
 0x295   : > { %v4965_v31 = vpop.f32.mrf.mxu0  ;;  %v4967_v54 = vpop.f32.mrf.mxu1 }
 0x296   : > { %6084 = vst [vmem:[#allocation197_spill] sm:$0xff] %v4965_v31  ;;  %6085 = vst [vmem:[#allocation198_spill] sm:$0xff] %v4967_v54 }
 0x297   : > { %v4969_v40 = vpop.f32.mrf.mxu0  ;;  %v4971_v13 = vpop.f32.mrf.mxu1 }
 0x298   : > { %6086 = vst [vmem:[#allocation199_spill] sm:$0xff] %v4969_v40  ;;  %6087 = vst [vmem:[#allocation200_spill] sm:$0xff] %v4971_v13 }
 0x299   : > { %v4973_v42 = vpop.f32.mrf.mxu0  ;;  %v4975_v16 = vpop.f32.mrf.mxu1 }
 0x29a   : > { %6088 = vst [vmem:[#allocation201_spill] sm:$0xff] %v4973_v42  ;;  %6089 = vst [vmem:[#allocation202_spill] sm:$0xff] %v4975_v16  ;;  %v2785_v42 = vlaneseq }
 0x29b   : > { %v4977_v45 = vpop.f32.mrf.mxu0  ;;  %v4979_v57 = vpop.f32.mrf.mxu1  ;;  %3558 = vmatmul.mubr.msk.bf16.gmra.mxu0 %vm455_vm0, %v4022_v49  ;;  %3574 = vmatmul.mubr.msk.bf16.gmra.mxu1 %vm455_vm0, %v4022_v49 }
 0x29c   : > { %6090 = vst [vmem:[#allocation203_spill] sm:$0xff] %v4977_v45  ;;  %6091 = vst [vmem:[#allocation204_spill] sm:$0xff] %v4979_v57  ;;  %2499 = vmatprep.mubr.bf16.mxu0 %v5918_v44  ;;  %2692 = vmatprep.mubr.bf16.mxu1 %v5918_v44  ;;  %v4999_v54 = vshrl.u32 %v2785_v42, 7 }
 0x29d   : > { %v4987_v27 = vpop.f32.mrf.mxu0  ;;  %v4989_v13 = vpop.f32.mrf.mxu1 }
 0x29e   : > { %6092 = vst [vmem:[#allocation205_spill] sm:$0xff] %v4987_v27  ;;  %6093 = vst [vmem:[#allocation206_spill] sm:$0xff] %v4989_v13  ;;  %v2787_v42 = vsub.s32 0, %v4999_v54  ;;  %v2799_v13 = vsub.s32 3, %v4999_v54 }
 0x29f   : > { %v4991_v16 = vpop.f32.mrf.mxu0  ;;  %v4993_v45 = vpop.f32.mrf.mxu1 }
 0x2a0   : > { %6094 = vst [vmem:[#allocation207_spill] sm:$0xff] %v4991_v16  ;;  %6095 = vst [vmem:[#allocation208_spill] sm:$0xff] %v4993_v45  ;;  %v2791_v16 = vsub.s32 1, %v4999_v54 }
 0x2a1   : > { %v4995_v57 = vpop.f32.mrf.mxu0  ;;  %v4997_v40 = vpop.f32.mrf.mxu1 }
 0x2a2   : > { %6096 = vst [vmem:[#allocation209_spill] sm:$0xff] %v4995_v57  ;;  %6097 = vst [vmem:[#allocation210_spill] sm:$0xff] %v4997_v40 }
 0x2a3   : > { %v5001_v49 = vpop.f32.mrf.mxu0  ;;  %v5003_v31 = vpop.f32.mrf.mxu1  ;;  %3559 = vmatmul.mubr.msk.bf16.gmra.mxu0 %vm455_vm0, %v4017_v43  ;;  %3575 = vmatmul.mubr.msk.bf16.gmra.mxu1 %vm455_vm0, %v4017_v43  ;;  %v2783_v43 = vld [vmem:[%s5882_s6] sm:$0xff] }
 0x2a4   : > { %6098 = vst [vmem:[#allocation211_spill] sm:$0xff] %v5001_v49  ;;  %6099 = vst [vmem:[#allocation212_spill] sm:$0xff] %v5003_v31  ;;  %2509 = vmatprep.mubr.bf16.mxu0 %v5918_v44  ;;  %2702 = vmatprep.mubr.bf16.mxu1 %v5918_v44  ;;  %v2795_v49 = vsub.s32 2, %v4999_v54 }
 0x2a5   : > { %v5011_v57 = vpop.f32.mrf.mxu0  ;;  %v5013_v40 = vpop.f32.mrf.mxu1 }
 0x2a6   : > { %6100 = vst [vmem:[#allocation213_spill] sm:$0xff] %v5011_v57  ;;  %6101 = vst [vmem:[#allocation214_spill] sm:$0xff] %v5013_v40  ;;  %v5031_v40 = vrot.slane %v2783_v43, %v2787_v42  ;;  %v5033_v62 = vrot.slane %v2783_v43, %v2795_v49 }
 0x2a7   : > { %v5017_v31 = vpop.f32.mrf.mxu0  ;;  %v5019_v45 = vpop.f32.mrf.mxu1 }
 0x2a8   : > { %6102 = vst [vmem:[#allocation215_spill] sm:$0xff] %v5017_v31  ;;  %6103 = vst [vmem:[#allocation216_spill] sm:$0xff] %v5019_v45  ;;  %v5039_v45 = vrot.slane %v2783_v43, %v2791_v16 }
 0x2a9   : > { %v5026_v27 = vpop.f32.mrf.mxu0  ;;  %v5028_v57 = vpop.f32.mrf.mxu1 }
 0x2aa   : > { %6104 = vst [vmem:[#allocation217_spill] sm:$0xff] %v5026_v27  ;;  %6105 = vst [vmem:[#allocation218_spill] sm:$0xff] %v5028_v57  ;;  %v5043_v57 = vrot.slane %v2783_v43, %v2799_v13 }
 0x2ab   : > { %v2045_v31 = vpop.f32.mrf.mxu0  ;;  %v2238_v2 = vpop.f32.mrf.mxu1  ;;  %3560 = vmatmul.mubr.msk.bf16.gmra.mxu0 %vm455_vm0, %v4052_v53  ;;  %3576 = vmatmul.mubr.msk.bf16.gmra.mxu1 %vm455_vm0, %v4052_v53 }
 0x2ac   : > { %v2046_v14 = vadd.f32 %v2045_v31, %v4311_v17  ;;  %v2239_v27 = vadd.f32 %v2238_v2, %v4313_v18  ;;  %2519 = vmatprep.mubr.bf16.mxu0 %v5918_v44  ;;  %2712 = vmatprep.mubr.bf16.mxu1 %v5918_v44 }
 0x2ad   : > { %v2047_v53 = vpop.f32.mrf.mxu0  ;;  %v2240_v16 = vpop.f32.mrf.mxu1 }
 0x2ae   : > { %v2825_v17 = vadd.f32 %v5031_v40, %v2046_v14  ;;  %v2827_v18 = vadd.f32 %v5033_v62, %v2239_v27  ;;  %v2048_v13 = vadd.f32 %v2047_v53, %v4321_v19  ;;  %v2241_v2 = vadd.f32 %v2240_v16, %v4323_v24 }
 0x2af   : > { %v2049_v31 = vpop.f32.mrf.mxu0  ;;  %v2242_v49 = vpop.f32.mrf.mxu1 }
 0x2b0   : > { %3081 = vst [vmem:[%s5050_s8] sm:$0xff] %v2825_v17  ;;  %3083 = vst [vmem:[%s5050_s8 + $0x10] sm:$0xff] %v2827_v18  ;;  %v2826_v42 = vadd.f32 %v5039_v45, %v2048_v13  ;;  %v2828_v43 = vadd.f32 %v5043_v57, %v2241_v2  ;;  %v2050_v29 = vadd.f32 %v2049_v31, %v4325_v25 }
 0x2b1   : > { %v2243_v14 = vadd.f32 %v2242_v49, %v4327_v33  ;;  %v2051_v51 = vpop.f32.mrf.mxu0  ;;  %v2244_v27 = vpop.f32.mrf.mxu1 }
 0x2b2   : > { %3082 = vst [vmem:[%s5050_s8 + $0x8] sm:$0xff] %v2826_v42  ;;  %3084 = vst [vmem:[%s5050_s8 + $0x18] sm:$0xff] %v2828_v43  ;;  %v2833_v19 = vadd.f32 %v5031_v40, %v2050_v29  ;;  %v2052_v53 = vadd.f32 %v2051_v51, %v4329_v38  ;;  %v2245_v16 = vadd.f32 %v2244_v27, %v4331_v48 }
 0x2b3   : > { %v2835_v24 = vadd.f32 %v5033_v62, %v2243_v14  ;;  %v2055_v17 = vpop.f32.mrf.mxu0  ;;  %v2248_v18 = vpop.f32.mrf.mxu1  ;;  %3561 = vmatmul.mubr.msk.bf16.gmra.mxu0 %vm455_vm0, %v4047_v41  ;;  %3577 = vmatmul.mubr.msk.bf16.gmra.mxu1 %vm455_vm0, %v4047_v41 }
 0x2b4   : > { %3089 = vst [vmem:[%s5050_s8 + $0x40] sm:$0xff] %v2833_v19  ;;  %v2834_v25 = vadd.f32 %v5039_v45, %v2052_v53  ;;  %v2836_v33 = vadd.f32 %v5043_v57, %v2245_v16  ;;  %v2056_v38 = vadd.f32 %v2055_v17, %v4333_v50  ;;  %v2249_v48 = vadd.f32 %v2248_v18, %v4335_v8 }
 0x2b5   : > { %3091 = vst [vmem:[%s5050_s8 + $0x50] sm:$0xff] %v2835_v24  ;;  %2529 = vmatprep.mubr.bf16.mxu0 %v5918_v44  ;;  %v2057_v51 = vpop.f32.mrf.mxu0  ;;  %v2250_v29 = vpop.f32.mrf.mxu1  ;;  %2722 = vmatprep.mubr.bf16.mxu1 %v5918_v44 }
 0x2b6   : > { %3090 = vst [vmem:[%s5050_s8 + $0x48] sm:$0xff] %v2834_v25  ;;  %3092 = vst [vmem:[%s5050_s8 + $0x58] sm:$0xff] %v2836_v33  ;;  %v2841_v41 = vadd.f32 %v5031_v40, %v2056_v38  ;;  %v2843_v13 = vadd.f32 %v5033_v62, %v2249_v48  ;;  %v2058_v2 = vadd.f32 %v2057_v51, %v4343_v0 }
 0x2b7   : > { %v2251_v50 = vadd.f32 %v2250_v29, %v4345_v39  ;;  %v2059_v31 = vpop.f32.mrf.mxu0  ;;  %v2252_v8 = vpop.f32.mrf.mxu1 }
 0x2b8   : > { %3097 = vst [vmem:[%s5050_s8 + $0x80] sm:$0xff] %v2841_v41  ;;  %3099 = vst [vmem:[%s5050_s8 + $0x90] sm:$0xff] %v2843_v13  ;;  %v2842_v49 = vadd.f32 %v5039_v45, %v2058_v2  ;;  %v2060_v43 = vadd.f32 %v2059_v31, %v4347_v58  ;;  %v2253_v14 = vadd.f32 %v2252_v8, %v4349_v55 }
 0x2b9   : > { %v2844_v42 = vadd.f32 %v5043_v57, %v2251_v50  ;;  %v2061_v27 = vpop.f32.mrf.mxu0  ;;  %v2254_v19 = vpop.f32.mrf.mxu1 }
 0x2ba   : > { %3098 = vst [vmem:[%s5050_s8 + $0x88] sm:$0xff] %v2842_v49  ;;  %v2849_v0 = vadd.f32 %v5031_v40, %v2060_v43  ;;  %v2851_v39 = vadd.f32 %v5033_v62, %v2253_v14  ;;  %v2062_v24 = vadd.f32 %v2061_v27, %v4351_v32  ;;  %v2255_v53 = vadd.f32 %v2254_v19, %v4353_v6 }
 0x2bb   : > { %3100 = vst [vmem:[%s5050_s8 + $0x98] sm:$0xff] %v2844_v42  ;;  %v2065_v16 = vpop.f32.mrf.mxu0  ;;  %v2258_v17 = vpop.f32.mrf.mxu1  ;;  %3562 = vmatmul.mubr.msk.bf16.gmra.mxu0 %vm455_vm0, %v4082_v10  ;;  %3578 = vmatmul.mubr.msk.bf16.gmra.mxu1 %vm455_vm0, %v4082_v10 }
 0x2bc   : > { %3105 = vst [vmem:[%s5050_s8 + $0xc0] sm:$0xff] %v2849_v0  ;;  %3107 = vst [vmem:[%s5050_s8 + $0xd0] sm:$0xff] %v2851_v39  ;;  %v2850_v58 = vadd.f32 %v5039_v45, %v2062_v24  ;;  %v2852_v55 = vadd.f32 %v5043_v57, %v2255_v53  ;;  %v2066_v32 = vadd.f32 %v2065_v16, %v4355_v47  ;;  %2539 = vmatprep.mubr.bf16.mxu0 %v5918_v44 }
 0x2bd   : > { %v2259_v6 = vadd.f32 %v2258_v17, %v4357_v46  ;;  %v2067_v18 = vpop.f32.mrf.mxu0  ;;  %v2260_v25 = vpop.f32.mrf.mxu1  ;;  %2732 = vmatprep.mubr.bf16.mxu1 %v5918_v44 }
 0x2be   : > { %3106 = vst [vmem:[%s5050_s8 + $0xc8] sm:$0xff] %v2850_v58  ;;  %3108 = vst [vmem:[%s5050_s8 + $0xd8] sm:$0xff] %v2852_v55  ;;  %v2857_v10 = vadd.f32 %v5031_v40, %v2066_v32  ;;  %v2068_v38 = vadd.f32 %v2067_v18, %v4365_v36  ;;  %v2261_v47 = vadd.f32 %v2260_v25, %v4367_v52  ;;  %v6106_v32 = vld [vmem:[#allocation2_spill] sm:$0xff] }
 0x2bf   : > { %v2859_v33 = vadd.f32 %v5033_v62, %v2259_v6  ;;  %v2069_v48 = vpop.f32.mrf.mxu0  ;;  %v2262_v46 = vpop.f32.mrf.mxu1 }
 0x2c0   : > { %3113 = vst [vmem:[%s5050_s8 + $0x100] sm:$0xff] %v2857_v10  ;;  %v2858_v51 = vadd.f32 %v5039_v45, %v2068_v38  ;;  %v2860_v29 = vadd.f32 %v5043_v57, %v2261_v47  ;;  %v2070_v41 = vadd.f32 %v2069_v48, %v4369_v3  ;;  %v2263_v13 = vadd.f32 %v2262_v46, %v4371_v5 }
 0x2c1   : > { %3115 = vst [vmem:[%s5050_s8 + $0x110] sm:$0xff] %v2859_v33  ;;  %v2071_v2 = vpop.f32.mrf.mxu0  ;;  %v2264_v50 = vpop.f32.mrf.mxu1  ;;  %v6108_v33 = vld [vmem:[#allocation4_spill] sm:$0xff] }
 0x2c2   : > { %3114 = vst [vmem:[%s5050_s8 + $0x108] sm:$0xff] %v2858_v51  ;;  %3116 = vst [vmem:[%s5050_s8 + $0x118] sm:$0xff] %v2860_v29  ;;  %v2865_v36 = vadd.f32 %v5031_v40, %v2070_v41  ;;  %v2867_v52 = vadd.f32 %v5033_v62, %v2263_v13  ;;  %v2072_v31 = vadd.f32 %v2071_v2, %v4373_v9  ;;  %v6109_v29 = vld [vmem:[#allocation5_spill] sm:$0xff] }
 0x2c3   : > { %v2265_v8 = vadd.f32 %v2264_v50, %v4375_v35  ;;  %v2075_v49 = vpop.f32.mrf.mxu0  ;;  %v2268_v42 = vpop.f32.mrf.mxu1  ;;  %3563 = vmatmul.mubr.msk.bf16.gmra.mxu0 %vm455_vm0, %v4077_v26  ;;  %3579 = vmatmul.mubr.msk.bf16.gmra.mxu1 %vm455_vm0, %v4077_v26 }
 0x2c4   : > { %3121 = vst [vmem:[%s5050_s8 + $0x140] sm:$0xff] %v2865_v36  ;;  %3123 = vst [vmem:[%s5050_s8 + $0x150] sm:$0xff] %v2867_v52  ;;  %v2866_v3 = vadd.f32 %v5039_v45, %v2072_v31  ;;  %v2076_v9 = vadd.f32 %v2075_v49, %v4377_v1  ;;  %v2269_v35 = vadd.f32 %v2268_v42, %v4379_v30  ;;  %2549 = vmatprep.mubr.bf16.mxu0 %v5918_v44  ;;  %v6110_v52 = vld [vmem:[#allocation6_spill] sm:$0xff] }
 0x2c5   : > { %v2868_v5 = vadd.f32 %v5043_v57, %v2265_v8  ;;  %v2077_v43 = vpop.f32.mrf.mxu0  ;;  %v2270_v14 = vpop.f32.mrf.mxu1  ;;  %2742 = vmatprep.mubr.bf16.mxu1 %v5918_v44  ;;  %v6111_v8 = vld [vmem:[#allocation7_spill] sm:$0xff] }
 0x2c6   : > { %3122 = vst [vmem:[%s5050_s8 + $0x148] sm:$0xff] %v2866_v3  ;;  %v2873_v26 = vadd.f32 %v5031_v40, %v2076_v9  ;;  %v2875_v27 = vadd.f32 %v5033_v62, %v2269_v35  ;;  %v2078_v19 = vadd.f32 %v2077_v43, %v4387_v60  ;;  %v2271_v1 = vadd.f32 %v2270_v14, %v4389_v59  ;;  %v6112_v9 = vld [vmem:[#allocation8_spill] sm:$0xff]  ;;  %v6113_v43 = vld [vmem:[#allocation9_spill] sm:$0xff] }
 0x2c7   : > { %3124 = vst [vmem:[%s5050_s8 + $0x158] sm:$0xff] %v2868_v5  ;;  %v2079_v0 = vpop.f32.mrf.mxu0  ;;  %v2272_v30 = vpop.f32.mrf.mxu1 }
 0x2c8   : > { %3129 = vst [vmem:[%s5050_s8 + $0x180] sm:$0xff] %v2873_v26  ;;  %3131 = vst [vmem:[%s5050_s8 + $0x190] sm:$0xff] %v2875_v27  ;;  %v2874_v39 = vadd.f32 %v5039_v45, %v2078_v19  ;;  %v2876_v24 = vadd.f32 %v5043_v57, %v2271_v1  ;;  %v2080_v53 = vadd.f32 %v2079_v0, %v4391_v7  ;;  %v6114_v0 = vld [vmem:[#allocation10_spill] sm:$0xff] }
 0x2c9   : > { %v2273_v16 = vadd.f32 %v2272_v30, %v4393_v15  ;;  %v2081_v17 = vpop.f32.mrf.mxu0  ;;  %v2274_v58 = vpop.f32.mrf.mxu1 }
 0x2ca   : > { %3130 = vst [vmem:[%s5050_s8 + $0x188] sm:$0xff] %v2874_v39  ;;  %3132 = vst [vmem:[%s5050_s8 + $0x198] sm:$0xff] %v2876_v24  ;;  %v2881_v60 = vadd.f32 %v5031_v40, %v2080_v53  ;;  %v2082_v55 = vadd.f32 %v2081_v17, %v4395_v20  ;;  %v2275_v6 = vadd.f32 %v2274_v58, %v6106_v32  ;;  %v6107_v20 = vld [vmem:[#allocation3_spill] sm:$0xff] }
 0x2cb   : > { %v2883_v59 = vadd.f32 %v5033_v62, %v2273_v16  ;;  %v2085_v18 = vpop.f32.mrf.mxu0  ;;  %v2278_v25 = vpop.f32.mrf.mxu1  ;;  %3564 = vmatmul.mubr.msk.bf16.gmra.mxu0 %vm455_vm0, %v4112_v21  ;;  %3580 = vmatmul.mubr.msk.bf16.gmra.mxu1 %vm455_vm0, %v4112_v21  ;;  %v6115_v39 = vld [vmem:[#allocation11_spill] sm:$0xff] }
 0x2cc   : > { %3137 = vst [vmem:[%s5050_s8 + $0x1c0] sm:$0xff] %v2881_v60  ;;  %v2882_v7 = vadd.f32 %v5039_v45, %v2082_v55  ;;  %v2884_v15 = vadd.f32 %v5043_v57, %v2275_v6  ;;  %v2086_v10 = vadd.f32 %v2085_v18, %v6107_v20  ;;  %v2279_v38 = vadd.f32 %v2278_v25, %v6108_v33  ;;  %v6116_v60 = vld [vmem:[#allocation12_spill] sm:$0xff]  ;;  %v6117_v25 = vld [vmem:[#allocation13_spill] sm:$0xff] }
 0x2cd   : > { %3139 = vst [vmem:[%s5050_s8 + $0x1d0] sm:$0xff] %v2883_v59  ;;  %2559 = vmatprep.mubr.bf16.mxu0 %v5918_v44  ;;  %v2087_v47 = vpop.f32.mrf.mxu0  ;;  %v2280_v48 = vpop.f32.mrf.mxu1  ;;  %2752 = vmatprep.mubr.bf16.mxu1 %v5918_v44 }
 0x2ce   : > { %3138 = vst [vmem:[%s5050_s8 + $0x1c8] sm:$0xff] %v2882_v7  ;;  %3140 = vst [vmem:[%s5050_s8 + $0x1d8] sm:$0xff] %v2884_v15  ;;  %v2889_v21 = vadd.f32 %v5031_v40, %v2086_v10  ;;  %v2891_v46 = vadd.f32 %v5033_v62, %v2279_v38  ;;  %v2088_v51 = vadd.f32 %v2087_v47, %v4409_v28  ;;  %v6118_v15 = vld [vmem:[#allocation14_spill] sm:$0xff]  ;;  %v6119_v47 = vld [vmem:[#allocation15_spill] sm:$0xff] }
 0x2cf   : > { %v2281_v41 = vadd.f32 %v2280_v48, %v6109_v29  ;;  %v2089_v13 = vpop.f32.mrf.mxu0  ;;  %v2282_v2 = vpop.f32.mrf.mxu1 }
 0x2d0   : > { %3145 = vst [vmem:[%s5050_s8 + $0x200] sm:$0xff] %v2889_v21  ;;  %3147 = vst [vmem:[%s5050_s8 + $0x210] sm:$0xff] %v2891_v46  ;;  %v2890_v50 = vadd.f32 %v5039_v45, %v2088_v51  ;;  %v2090_v31 = vadd.f32 %v2089_v13, %v6110_v52  ;;  %v2283_v49 = vadd.f32 %v2282_v2, %v6111_v8  ;;  %v6120_v21 = vld [vmem:[#allocation16_spill] sm:$0xff]  ;;  %v6121_v2 = vld [vmem:[#allocation17_spill] sm:$0xff] }
 0x2d1   : > { %v2892_v36 = vadd.f32 %v5043_v57, %v2281_v41  ;;  %v2091_v42 = vpop.f32.mrf.mxu0  ;;  %v2284_v3 = vpop.f32.mrf.mxu1 }
 0x2d2   : > { %3146 = vst [vmem:[%s5050_s8 + $0x208] sm:$0xff] %v2890_v50  ;;  %v2897_v28 = vadd.f32 %v5031_v40, %v2090_v31  ;;  %v2899_v5 = vadd.f32 %v5033_v62, %v2283_v49  ;;  %v2092_v35 = vadd.f32 %v2091_v42, %v6112_v9  ;;  %v2285_v14 = vadd.f32 %v2284_v3, %v6113_v43  ;;  %v6123_v3 = vld [vmem:[#allocation19_spill] sm:$0xff]  ;;  %v6124_v43 = vld [vmem:[#allocation20_spill] sm:$0xff] }
 0x2d3   : > { %3148 = vst [vmem:[%s5050_s8 + $0x218] sm:$0xff] %v2892_v36  ;;  %v2095_v26 = vpop.f32.mrf.mxu0  ;;  %v2288_v27 = vpop.f32.mrf.mxu1  ;;  %3565 = vmatmul.mubr.msk.bf16.gmra.mxu0 %vm455_vm0, %v4107_v12  ;;  %3581 = vmatmul.mubr.msk.bf16.gmra.mxu1 %vm455_vm0, %v4107_v12  ;;  %v6122_v36 = vld [vmem:[#allocation18_spill] sm:$0xff] }
 0x2d4   : > { %3153 = vst [vmem:[%s5050_s8 + $0x240] sm:$0xff] %v2897_v28  ;;  %3155 = vst [vmem:[%s5050_s8 + $0x250] sm:$0xff] %v2899_v5  ;;  %v2898_v19 = vadd.f32 %v5039_v45, %v2092_v35  ;;  %v2900_v1 = vadd.f32 %v5043_v57, %v2285_v14  ;;  %v2096_v30 = vadd.f32 %v2095_v26, %v6114_v0  ;;  %2569 = vmatprep.mubr.bf16.mxu0 %v5918_v44  ;;  %v6125_v26 = vld [vmem:[#allocation21_spill] sm:$0xff] }
 0x2d5   : > { %v2289_v24 = vadd.f32 %v2288_v27, %v6115_v39  ;;  %v2097_v53 = vpop.f32.mrf.mxu0  ;;  %v2290_v16 = vpop.f32.mrf.mxu1  ;;  %2762 = vmatprep.mubr.bf16.mxu1 %v5918_v44 }
 0x2d6   : > { %3154 = vst [vmem:[%s5050_s8 + $0x248] sm:$0xff] %v2898_v19  ;;  %3156 = vst [vmem:[%s5050_s8 + $0x258] sm:$0xff] %v2900_v1  ;;  %v2905_v12 = vadd.f32 %v5031_v40, %v2096_v30  ;;  %v2098_v58 = vadd.f32 %v2097_v53, %v4431_v11  ;;  %v2291_v59 = vadd.f32 %v2290_v16, %v6116_v60  ;;  %v6126_v30 = vld [vmem:[#allocation22_spill] sm:$0xff]  ;;  %v6128_v60 = vld [vmem:[#allocation24_spill] sm:$0xff] }
 0x2d7   : > { %v2907_v17 = vadd.f32 %v5033_v62, %v2289_v24  ;;  %v2099_v55 = vpop.f32.mrf.mxu0  ;;  %v2292_v32 = vpop.f32.mrf.mxu1  ;;  %v6127_v24 = vld [vmem:[#allocation23_spill] sm:$0xff] }
 0x2d8   : > { %3161 = vst [vmem:[%s5050_s8 + $0x280] sm:$0xff] %v2905_v12  ;;  %v2906_v6 = vadd.f32 %v5039_v45, %v2098_v58  ;;  %v2908_v18 = vadd.f32 %v5043_v57, %v2291_v59  ;;  %v2100_v7 = vadd.f32 %v2099_v55, %v6117_v25  ;;  %v2293_v20 = vadd.f32 %v2292_v32, %v6118_v15  ;;  %v6129_v55 = vld [vmem:[#allocation25_spill] sm:$0xff] }
 0x2d9   : > { %3163 = vst [vmem:[%s5050_s8 + $0x290] sm:$0xff] %v2907_v17  ;;  %v2101_v10 = vpop.f32.mrf.mxu0  ;;  %v2294_v33 = vpop.f32.mrf.mxu1 }
 0x2da   : > { %3162 = vst [vmem:[%s5050_s8 + $0x288] sm:$0xff] %v2906_v6  ;;  %3164 = vst [vmem:[%s5050_s8 + $0x298] sm:$0xff] %v2908_v18  ;;  %v2913_v11 = vadd.f32 %v5031_v40, %v2100_v7  ;;  %v2915_v38 = vadd.f32 %v5033_v62, %v2293_v20  ;;  %v2102_v48 = vadd.f32 %v2101_v10, %v6119_v47 }
 0x2db   : > { %v2295_v46 = vadd.f32 %v2294_v33, %v6120_v21  ;;  %v2105_v51 = vpop.f32.mrf.mxu0  ;;  %v2298_v29 = vpop.f32.mrf.mxu1  ;;  %3566 = vmatmul.mubr.msk.bf16.gmra.mxu0 %vm455_vm0, %v4139_v56  ;;  %3582 = vmatmul.mubr.msk.bf16.gmra.mxu1 %vm455_vm0, %v4139_v56 }
 0x2dc   : > { %3169 = vst [vmem:[%s5050_s8 + $0x2c0] sm:$0xff] %v2913_v11  ;;  %3171 = vst [vmem:[%s5050_s8 + $0x2d0] sm:$0xff] %v2915_v38  ;;  %v2914_v41 = vadd.f32 %v5039_v45, %v2102_v48  ;;  %v2106_v50 = vadd.f32 %v2105_v51, %v6121_v2  ;;  %v2299_v52 = vadd.f32 %v2298_v29, %v6122_v36  ;;  %2579 = vmatprep.mubr.bf16.mxu0 %v5918_v44  ;;  %v6130_v38 = vld [vmem:[#allocation26_spill] sm:$0xff]  ;;  %v6131_v48 = vld [vmem:[#allocation27_spill] sm:$0xff] }
 0x2dd   : > { %v2916_v13 = vadd.f32 %v5043_v57, %v2295_v46  ;;  %v2107_v31 = vpop.f32.mrf.mxu0  ;;  %v2300_v8 = vpop.f32.mrf.mxu1  ;;  %2772 = vmatprep.mubr.bf16.mxu1 %v5918_v44  ;;  %v6132_v29 = vld [vmem:[#allocation28_spill] sm:$0xff] }
 0x2de   : > { %3170 = vst [vmem:[%s5050_s8 + $0x2c8] sm:$0xff] %v2914_v41  ;;  %v2921_v56 = vadd.f32 %v5031_v40, %v2106_v50  ;;  %v2923_v49 = vadd.f32 %v5033_v62, %v2299_v52  ;;  %v2108_v42 = vadd.f32 %v2107_v31, %v4453_v63  ;;  %v2301_v28 = vadd.f32 %v2300_v8, %v6123_v3  ;;  %v6134_v8 = vld [vmem:[#allocation30_spill] sm:$0xff] }
 0x2df   : > { %3172 = vst [vmem:[%s5050_s8 + $0x2d8] sm:$0xff] %v2916_v13  ;;  %v2109_v5 = vpop.f32.mrf.mxu0  ;;  %v2302_v9 = vpop.f32.mrf.mxu1  ;;  %v6133_v13 = vld [vmem:[#allocation29_spill] sm:$0xff] }
 0x2e0   : > { %3177 = vst [vmem:[%s5050_s8 + $0x300] sm:$0xff] %v2921_v56  ;;  %3179 = vst [vmem:[%s5050_s8 + $0x310] sm:$0xff] %v2923_v49  ;;  %v2922_v35 = vadd.f32 %v5039_v45, %v2108_v42  ;;  %v2924_v44 = vadd.f32 %v5043_v57, %v2301_v28  ;;  %v2110_v14 = vadd.f32 %v2109_v5, %v6124_v43  ;;  %v6135_v49 = vld [vmem:[#allocation31_spill] sm:$0xff] }
 0x2e1   : > { %v2303_v27 = vadd.f32 %v2302_v9, %v6125_v26  ;;  %v2111_v19 = vpop.f32.mrf.mxu0  ;;  %v2304_v1 = vpop.f32.mrf.mxu1 }
 0x2e2   : > { %3178 = vst [vmem:[%s5050_s8 + $0x308] sm:$0xff] %v2922_v35  ;;  %3180 = vst [vmem:[%s5050_s8 + $0x318] sm:$0xff] %v2924_v44  ;;  %v2929_v63 = vadd.f32 %v5031_v40, %v2110_v14  ;;  %v2112_v39 = vadd.f32 %v2111_v19, %v6126_v30  ;;  %v2305_v53 = vadd.f32 %v2304_v1, %v6127_v24  ;;  %v6136_v1 = vld [vmem:[#allocation32_spill] sm:$0xff] }
 0x2e3   : > { %v2931_v0 = vadd.f32 %v5033_v62, %v2303_v27  ;;  %v2115_v16 = vpop.f32.mrf.mxu0  ;;  %v2308_v12 = vpop.f32.mrf.mxu1  ;;  %3567 = vmatmul.mubr.msk.bf16.gmra.mxu0 %vm455_vm0, %v4137_v34  ;;  %3583 = vmatmul.mubr.msk.bf16.gmra.mxu1 %vm455_vm0, %v4137_v34 }
 0x2e4   : > { %3185 = vst [vmem:[%s5050_s8 + $0x340] sm:$0xff] %v2929_v63  ;;  %v2930_v17 = vadd.f32 %v5039_v45, %v2112_v39  ;;  %v2932_v58 = vadd.f32 %v5043_v57, %v2305_v53  ;;  %v2116_v59 = vadd.f32 %v2115_v16, %v6128_v60  ;;  %v2309_v32 = vadd.f32 %v2308_v12, %v6129_v55  ;;  %v6137_v39 = vld [vmem:[#allocation33_spill] sm:$0xff]  ;;  %v6138_v53 = vld [vmem:[#allocation34_spill] sm:$0xff]  ;;  %v6139_v60 = vld [vmem:[#allocation35_spill] sm:$0xff] }
 0x2e5   : > { %3187 = vst [vmem:[%s5050_s8 + $0x350] sm:$0xff] %v2931_v0  ;;  %v2117_v6 = vpop.f32.mrf.mxu0  ;;  %v2310_v18 = vpop.f32.mrf.mxu1  ;;  %v6140_v55 = vld [vmem:[#allocation36_spill] sm:$0xff] }
 0x2e6   : > { %3186 = vst [vmem:[%s5050_s8 + $0x348] sm:$0xff] %v2930_v17  ;;  %3188 = vst [vmem:[%s5050_s8 + $0x358] sm:$0xff] %v2932_v58  ;;  %v2937_v34 = vadd.f32 %v5031_v40, %v2116_v59  ;;  %v2939_v25 = vadd.f32 %v5033_v62, %v2309_v32  ;;  %v2118_v7 = vadd.f32 %v2117_v6, %v4475_v23 }
 0x2e7   : > { %v2311_v15 = vadd.f32 %v2310_v18, %v4477_v4  ;;  %v2119_v20 = vpop.f32.mrf.mxu0  ;;  %v2312_v10 = vpop.f32.mrf.mxu1 }
 0x2e8   : > { %3193 = vst [vmem:[%s5050_s8 + $0x380] sm:$0xff] %v2937_v34  ;;  %3195 = vst [vmem:[%s5050_s8 + $0x390] sm:$0xff] %v2939_v25  ;;  %v2938_v33 = vadd.f32 %v5039_v45, %v2118_v7  ;;  %v2120_v47 = vadd.f32 %v2119_v20, %v6130_v38  ;;  %v2313_v21 = vadd.f32 %v2312_v10, %v6131_v48  ;;  %v6141_v7 = vld [vmem:[#allocation37_spill] sm:$0xff]  ;;  %v6142_v20 = vld [vmem:[#allocation38_spill] sm:$0xff] }
 0x2e9   : > { %v2940_v11 = vadd.f32 %v5043_v57, %v2311_v15  ;;  %v2121_v46 = vpop.f32.mrf.mxu0  ;;  %v2314_v51 = vpop.f32.mrf.mxu1  ;;  %v6143_v48 = vld [vmem:[#allocation39_spill] sm:$0xff] }
 0x2ea   : > { %3194 = vst [vmem:[%s5050_s8 + $0x388] sm:$0xff] %v2938_v33  ;;  %v2945_v4 = vadd.f32 %v5031_v40, %v2120_v47  ;;  %v2947_v23 = vadd.f32 %v5033_v62, %v2313_v21  ;;  %v2122_v41 = vadd.f32 %v2121_v46, %v6132_v29  ;;  %v2315_v2 = vadd.f32 %v2314_v51, %v6133_v13  ;;  %v6144_v46 = vld [vmem:[#allocation40_spill] sm:$0xff]  ;;  %v6145_v13 = vld [vmem:[#allocation41_spill] sm:$0xff] }
 0x2eb   : > { %3196 = vst [vmem:[%s5050_s8 + $0x398] sm:$0xff] %v2940_v11  ;;  %v2125_v50 = vpop.f32.mrf.mxu0  ;;  %v2318_v36 = vpop.f32.mrf.mxu1 }
 0x2ec   : > { %3201 = vst [vmem:[%s5050_s8 + $0x3c0] sm:$0xff] %v2945_v4  ;;  %3203 = vst [vmem:[%s5050_s8 + $0x3d0] sm:$0xff] %v2947_v23  ;;  %v2946_v52 = vadd.f32 %v5039_v45, %v2122_v41  ;;  %v2948_v31 = vadd.f32 %v5043_v57, %v2315_v2  ;;  %v2126_v56 = vadd.f32 %v2125_v50, %v6134_v8  ;;  %v6146_v50 = vld [vmem:[#allocation42_spill] sm:$0xff] }
 0x2ed   : > { %v2319_v42 = vadd.f32 %v2318_v36, %v6135_v49  ;;  %v2127_v3 = vpop.f32.mrf.mxu0  ;;  %v2320_v28 = vpop.f32.mrf.mxu1  ;;  %v6147_v49 = vld [vmem:[#allocation43_spill] sm:$0xff] }
 0x2ee   : > { %3202 = vst [vmem:[%s5050_s8 + $0x3c8] sm:$0xff] %v2946_v52  ;;  %3204 = vst [vmem:[%s5050_s8 + $0x3d8] sm:$0xff] %v2948_v31  ;;  %v2953_v5 = vadd.f32 %v5031_v40, %v2126_v56  ;;  %v2128_v35 = vadd.f32 %v2127_v3, %v4501_v37  ;;  %v2321_v44 = vadd.f32 %v2320_v28, %v4503_v22  ;;  %v6148_v3 = vld [vmem:[#allocation44_spill] sm:$0xff] }
 0x2ef   : > { %v2955_v9 = vadd.f32 %v5033_v62, %v2319_v42  ;;  %v2129_v43 = vpop.f32.mrf.mxu0  ;;  %v2322_v14 = vpop.f32.mrf.mxu1 }
 0x2f0   : > { %3209 = vst [vmem:[%s5050_s8 + $0x400] sm:$0xff] %v2953_v5  ;;  %v2954_v26 = vadd.f32 %v5039_v45, %v2128_v35  ;;  %v2956_v27 = vadd.f32 %v5043_v57, %v2321_v44  ;;  %v2130_v19 = vadd.f32 %v2129_v43, %v4507_v61  ;;  %v2323_v63 = vadd.f32 %v2322_v14, %v6136_v1  ;;  %v6149_v43 = vld [vmem:[#allocation45_spill] sm:$0xff] }
 0x2f1   : > { %3211 = vst [vmem:[%s5050_s8 + $0x410] sm:$0xff] %v2955_v9  ;;  %v2131_v0 = vpop.f32.mrf.mxu0  ;;  %v2324_v30 = vpop.f32.mrf.mxu1 }
 0x2f2   : > { %3210 = vst [vmem:[%s5050_s8 + $0x408] sm:$0xff] %v2954_v26  ;;  %3212 = vst [vmem:[%s5050_s8 + $0x418] sm:$0xff] %v2956_v27  ;;  %v2961_v37 = vadd.f32 %v5031_v40, %v2130_v19  ;;  %v2963_v22 = vadd.f32 %v5033_v62, %v2323_v63  ;;  %v2132_v24 = vadd.f32 %v2131_v0, %v6137_v39  ;;  %v6150_v26 = vld [vmem:[#allocation46_spill] sm:$0xff] }
 0x2f3   : > { %v2325_v16 = vadd.f32 %v2324_v30, %v6138_v53  ;;  %v2135_v12 = vpop.f32.mrf.mxu0  ;;  %v2328_v17 = vpop.f32.mrf.mxu1  ;;  %v6151_v30 = vld [vmem:[#allocation47_spill] sm:$0xff] }
 0x2f4   : > { %3217 = vst [vmem:[%s5050_s8 + $0x440] sm:$0xff] %v2961_v37  ;;  %3219 = vst [vmem:[%s5050_s8 + $0x450] sm:$0xff] %v2963_v22  ;;  %v2962_v61 = vadd.f32 %v5039_v45, %v2132_v24  ;;  %v2136_v59 = vadd.f32 %v2135_v12, %v6139_v60  ;;  %v2329_v32 = vadd.f32 %v2328_v17, %v6140_v55  ;;  %v6152_v22 = vld [vmem:[#allocation48_spill] sm:$0xff]  ;;  %v6153_v17 = vld [vmem:[#allocation49_spill] sm:$0xff] }
 0x2f5   : > { %v2964_v58 = vadd.f32 %v5043_v57, %v2325_v16  ;;  %v2137_v6 = vpop.f32.mrf.mxu0  ;;  %v2330_v18 = vpop.f32.mrf.mxu1 }
 0x2f6   : > { %3218 = vst [vmem:[%s5050_s8 + $0x448] sm:$0xff] %v2962_v61  ;;  %v2969_v34 = vadd.f32 %v5031_v40, %v2136_v59  ;;  %v2971_v25 = vadd.f32 %v5033_v62, %v2329_v32  ;;  %v2138_v15 = vadd.f32 %v2137_v6, %v6141_v7  ;;  %v2331_v10 = vadd.f32 %v2330_v18, %v6142_v20  ;;  %v6155_v18 = vld [vmem:[#allocation51_spill] sm:$0xff] }
 0x2f7   : > { %3220 = vst [vmem:[%s5050_s8 + $0x458] sm:$0xff] %v2964_v58  ;;  %v2139_v33 = vpop.f32.mrf.mxu0  ;;  %v2332_v11 = vpop.f32.mrf.mxu1  ;;  %v6154_v58 = vld [vmem:[#allocation50_spill] sm:$0xff] }
 0x2f8   : > { %3225 = vst [vmem:[%s5050_s8 + $0x480] sm:$0xff] %v2969_v34  ;;  %3227 = vst [vmem:[%s5050_s8 + $0x490] sm:$0xff] %v2971_v25  ;;  %v2970_v38 = vadd.f32 %v5039_v45, %v2138_v15  ;;  %v2972_v47 = vadd.f32 %v5043_v57, %v2331_v10  ;;  %v2140_v21 = vadd.f32 %v2139_v33, %v6143_v48  ;;  %v6156_v25 = vld [vmem:[#allocation52_spill] sm:$0xff] }
 0x2f9   : > { %v2333_v51 = vadd.f32 %v2332_v11, %v6144_v46  ;;  %v2141_v4 = vpop.f32.mrf.mxu0  ;;  %v2334_v23 = vpop.f32.mrf.mxu1  ;;  %v6157_v11 = vld [vmem:[#allocation53_spill] sm:$0xff] }
 0x2fa   : > { %3226 = vst [vmem:[%s5050_s8 + $0x488] sm:$0xff] %v2970_v38  ;;  %3228 = vst [vmem:[%s5050_s8 + $0x498] sm:$0xff] %v2972_v47  ;;  %v2977_v29 = vadd.f32 %v5031_v40, %v2140_v21  ;;  %v2142_v2 = vadd.f32 %v2141_v4, %v6145_v13  ;;  %v2335_v36 = vadd.f32 %v2334_v23, %v6146_v50  ;;  %v6158_v47 = vld [vmem:[#allocation54_spill] sm:$0xff]  ;;  %v6159_v23 = vld [vmem:[#allocation55_spill] sm:$0xff] }
 0x2fb   : > { %v2979_v41 = vadd.f32 %v5033_v62, %v2333_v51  ;;  %v2145_v52 = vpop.f32.mrf.mxu0  ;;  %v2338_v31 = vpop.f32.mrf.mxu1 }
 0x2fc   : > { %3233 = vst [vmem:[%s5050_s8 + $0x4c0] sm:$0xff] %v2977_v29  ;;  %v2978_v8 = vadd.f32 %v5039_v45, %v2142_v2  ;;  %v2980_v56 = vadd.f32 %v5043_v57, %v2335_v36  ;;  %v2146_v42 = vadd.f32 %v2145_v52, %v6147_v49  ;;  %v2339_v28 = vadd.f32 %v2338_v31, %v6148_v3  ;;  %v6161_v31 = vld [vmem:[#allocation57_spill] sm:$0xff] }
 0x2fd   : > { %3235 = vst [vmem:[%s5050_s8 + $0x4d0] sm:$0xff] %v2979_v41  ;;  %v2147_v5 = vpop.f32.mrf.mxu0  ;;  %v2340_v9 = vpop.f32.mrf.mxu1  ;;  %v6160_v41 = vld [vmem:[#allocation56_spill] sm:$0xff] }
 0x2fe   : > { %3234 = vst [vmem:[%s5050_s8 + $0x4c8] sm:$0xff] %v2978_v8  ;;  %3236 = vst [vmem:[%s5050_s8 + $0x4d8] sm:$0xff] %v2980_v56  ;;  %v2985_v35 = vadd.f32 %v5031_v40, %v2146_v42  ;;  %v2987_v44 = vadd.f32 %v5033_v62, %v2339_v28  ;;  %v2148_v14 = vadd.f32 %v2147_v5, %v6149_v43  ;;  %v6162_v56 = vld [vmem:[#allocation58_spill] sm:$0xff] }
 0x2ff   : > { %v2341_v27 = vadd.f32 %v2340_v9, %v6150_v26  ;;  %v2149_v19 = vpop.f32.mrf.mxu0  ;;  %v2342_v1 = vpop.f32.mrf.mxu1  ;;  %v6163_v9 = vld [vmem:[#allocation59_spill] sm:$0xff] }
 0x300   : > { %3241 = vst [vmem:[%s5050_s8 + $0x500] sm:$0xff] %v2985_v35  ;;  %3243 = vst [vmem:[%s5050_s8 + $0x510] sm:$0xff] %v2987_v44  ;;  %v2986_v63 = vadd.f32 %v5039_v45, %v2148_v14  ;;  %v2150_v37 = vadd.f32 %v2149_v19, %v6151_v30  ;;  %v2343_v39 = vadd.f32 %v2342_v1, %v6152_v22  ;;  %v6164_v44 = vld [vmem:[#allocation60_spill] sm:$0xff]  ;;  %v6165_v1 = vld [vmem:[#allocation61_spill] sm:$0xff] }
 0x301   : > { %v2988_v0 = vadd.f32 %v5043_v57, %v2341_v27  ;;  %v2151_v24 = vpop.f32.mrf.mxu0  ;;  %v2344_v53 = vpop.f32.mrf.mxu1 }
 0x302   : > { %3242 = vst [vmem:[%s5050_s8 + $0x508] sm:$0xff] %v2986_v63  ;;  %v2993_v16 = vadd.f32 %v5031_v40, %v2150_v37  ;;  %v2995_v12 = vadd.f32 %v5033_v62, %v2343_v39  ;;  %v2152_v61 = vadd.f32 %v2151_v24, %v6153_v17  ;;  %v2345_v60 = vadd.f32 %v2344_v53, %v6154_v58  ;;  %v6167_v53 = vld [vmem:[#allocation63_spill] sm:$0xff] }
 0x303   : > { %3244 = vst [vmem:[%s5050_s8 + $0x518] sm:$0xff] %v2988_v0  ;;  %v2155_v59 = vpop.f32.mrf.mxu0  ;;  %v2348_v55 = vpop.f32.mrf.mxu1  ;;  %v6166_v0 = vld [vmem:[#allocation62_spill] sm:$0xff] }
 0x304   : > { %3249 = vst [vmem:[%s5050_s8 + $0x540] sm:$0xff] %v2993_v16  ;;  %3251 = vst [vmem:[%s5050_s8 + $0x550] sm:$0xff] %v2995_v12  ;;  %v2994_v32 = vadd.f32 %v5039_v45, %v2152_v61  ;;  %v2996_v6 = vadd.f32 %v5043_v57, %v2345_v60  ;;  %v2156_v34 = vadd.f32 %v2155_v59, %v6155_v18  ;;  %v6168_v12 = vld [vmem:[#allocation64_spill] sm:$0xff] }
 0x305   : > { %v2349_v7 = vadd.f32 %v2348_v55, %v6156_v25  ;;  %v2157_v15 = vpop.f32.mrf.mxu0  ;;  %v2350_v20 = vpop.f32.mrf.mxu1  ;;  %v6169_v55 = vld [vmem:[#allocation65_spill] sm:$0xff] }
 0x306   : > { %3250 = vst [vmem:[%s5050_s8 + $0x548] sm:$0xff] %v2994_v32  ;;  %3252 = vst [vmem:[%s5050_s8 + $0x558] sm:$0xff] %v2996_v6  ;;  %v3001_v10 = vadd.f32 %v5031_v40, %v2156_v34  ;;  %v2158_v38 = vadd.f32 %v2157_v15, %v6157_v11  ;;  %v2351_v48 = vadd.f32 %v2350_v20, %v6158_v47  ;;  %v6170_v6 = vld [vmem:[#allocation66_spill] sm:$0xff]  ;;  %v6171_v20 = vld [vmem:[#allocation67_spill] sm:$0xff] }
 0x307   : > { %v3003_v33 = vadd.f32 %v5033_v62, %v2349_v7  ;;  %v2159_v21 = vpop.f32.mrf.mxu0  ;;  %v2352_v46 = vpop.f32.mrf.mxu1 }
 0x308   : > { %3257 = vst [vmem:[%s5050_s8 + $0x580] sm:$0xff] %v3001_v10  ;;  %v3002_v51 = vadd.f32 %v5039_v45, %v2158_v38  ;;  %v3004_v4 = vadd.f32 %v5043_v57, %v2351_v48  ;;  %v2160_v29 = vadd.f32 %v2159_v21, %v6159_v23  ;;  %v2353_v13 = vadd.f32 %v2352_v46, %v6160_v41  ;;  %v6173_v46 = vld [vmem:[#allocation69_spill] sm:$0xff] }
 0x309   : > { %3259 = vst [vmem:[%s5050_s8 + $0x590] sm:$0xff] %v3003_v33  ;;  %v2161_v2 = vpop.f32.mrf.mxu0  ;;  %v2354_v50 = vpop.f32.mrf.mxu1  ;;  %v6172_v33 = vld [vmem:[#allocation68_spill] sm:$0xff] }
 0x30a   : > { %3258 = vst [vmem:[%s5050_s8 + $0x588] sm:$0xff] %v3002_v51  ;;  %3260 = vst [vmem:[%s5050_s8 + $0x598] sm:$0xff] %v3004_v4  ;;  %v3009_v36 = vadd.f32 %v5031_v40, %v2160_v29  ;;  %v3011_v52 = vadd.f32 %v5033_v62, %v2353_v13  ;;  %v2162_v8 = vadd.f32 %v2161_v2, %v6161_v31  ;;  %v6174_v4 = vld [vmem:[#allocation70_spill] sm:$0xff] }
 0x30b   : > { %v2355_v49 = vadd.f32 %v2354_v50, %v6162_v56  ;;  %v2165_v42 = vpop.f32.mrf.mxu0  ;;  %v2358_v3 = vpop.f32.mrf.mxu1  ;;  %v6175_v50 = vld [vmem:[#allocation71_spill] sm:$0xff] }
 0x30c   : > { %3265 = vst [vmem:[%s5050_s8 + $0x5c0] sm:$0xff] %v3009_v36  ;;  %3267 = vst [vmem:[%s5050_s8 + $0x5d0] sm:$0xff] %v3011_v52  ;;  %v3010_v28 = vadd.f32 %v5039_v45, %v2162_v8  ;;  %v2166_v35 = vadd.f32 %v2165_v42, %v6163_v9  ;;  %v2359_v43 = vadd.f32 %v2358_v3, %v6164_v44  ;;  %v6176_v52 = vld [vmem:[#allocation72_spill] sm:$0xff]  ;;  %v6177_v3 = vld [vmem:[#allocation73_spill] sm:$0xff] }
 0x30d   : > { %v3012_v5 = vadd.f32 %v5043_v57, %v2355_v49  ;;  %v2167_v14 = vpop.f32.mrf.mxu0  ;;  %v2360_v26 = vpop.f32.mrf.mxu1 }
 0x30e   : > { %3266 = vst [vmem:[%s5050_s8 + $0x5c8] sm:$0xff] %v3010_v28  ;;  %v3017_v27 = vadd.f32 %v5031_v40, %v2166_v35  ;;  %v3019_v19 = vadd.f32 %v5033_v62, %v2359_v43  ;;  %v2168_v63 = vadd.f32 %v2167_v14, %v6165_v1  ;;  %v2361_v30 = vadd.f32 %v2360_v26, %v6166_v0  ;;  %v6179_v26 = vld [vmem:[#allocation75_spill] sm:$0xff] }
 0x30f   : > { %3268 = vst [vmem:[%s5050_s8 + $0x5d8] sm:$0xff] %v3012_v5  ;;  %v2169_v37 = vpop.f32.mrf.mxu0  ;;  %v2362_v22 = vpop.f32.mrf.mxu1  ;;  %v6178_v5 = vld [vmem:[#allocation74_spill] sm:$0xff] }
 0x310   : > { %3273 = vst [vmem:[%s5050_s8 + $0x600] sm:$0xff] %v3017_v27  ;;  %3275 = vst [vmem:[%s5050_s8 + $0x610] sm:$0xff] %v3019_v19  ;;  %v3018_v39 = vadd.f32 %v5039_v45, %v2168_v63  ;;  %v3020_v24 = vadd.f32 %v5043_v57, %v2361_v30  ;;  %v2170_v16 = vadd.f32 %v2169_v37, %v6167_v53  ;;  %v6180_v19 = vld [vmem:[#allocation76_spill] sm:$0xff] }
 0x311   : > { %v2363_v17 = vadd.f32 %v2362_v22, %v6168_v12  ;;  %v2171_v61 = vpop.f32.mrf.mxu0  ;;  %v2364_v58 = vpop.f32.mrf.mxu1  ;;  %v6181_v22 = vld [vmem:[#allocation77_spill] sm:$0xff] }
 0x312   : > { %3274 = vst [vmem:[%s5050_s8 + $0x608] sm:$0xff] %v3018_v39  ;;  %3276 = vst [vmem:[%s5050_s8 + $0x618] sm:$0xff] %v3020_v24  ;;  %v3025_v60 = vadd.f32 %v5031_v40, %v2170_v16  ;;  %v2172_v32 = vadd.f32 %v2171_v61, %v6169_v55  ;;  %v2365_v18 = vadd.f32 %v2364_v58, %v6170_v6  ;;  %v6182_v24 = vld [vmem:[#allocation78_spill] sm:$0xff]  ;;  %v6183_v58 = vld [vmem:[#allocation79_spill] sm:$0xff] }
 0x313   : > { %v3027_v59 = vadd.f32 %v5033_v62, %v2363_v17  ;;  %v2175_v34 = vpop.f32.mrf.mxu0  ;;  %v2368_v25 = vpop.f32.mrf.mxu1 }
 0x314   : > { %3281 = vst [vmem:[%s5050_s8 + $0x640] sm:$0xff] %v3025_v60  ;;  %v3026_v7 = vadd.f32 %v5039_v45, %v2172_v32  ;;  %v3028_v15 = vadd.f32 %v5043_v57, %v2365_v18  ;;  %v2176_v10 = vadd.f32 %v2175_v34, %v6171_v20  ;;  %v2369_v11 = vadd.f32 %v2368_v25, %v6172_v33  ;;  %v6185_v25 = vld [vmem:[#allocation81_spill] sm:$0xff] }
 0x315   : > { %3283 = vst [vmem:[%s5050_s8 + $0x650] sm:$0xff] %v3027_v59  ;;  %v2177_v38 = vpop.f32.mrf.mxu0  ;;  %v2370_v47 = vpop.f32.mrf.mxu1  ;;  %v6184_v59 = vld [vmem:[#allocation80_spill] sm:$0xff] }
 0x316   : > { %3282 = vst [vmem:[%s5050_s8 + $0x648] sm:$0xff] %v3026_v7  ;;  %3284 = vst [vmem:[%s5050_s8 + $0x658] sm:$0xff] %v3028_v15  ;;  %v3033_v48 = vadd.f32 %v5031_v40, %v2176_v10  ;;  %v3035_v21 = vadd.f32 %v5033_v62, %v2369_v11  ;;  %v2178_v51 = vadd.f32 %v2177_v38, %v6173_v46  ;;  %v6186_v15 = vld [vmem:[#allocation82_spill] sm:$0xff] }
 0x317   : > { %v2371_v23 = vadd.f32 %v2370_v47, %v6174_v4  ;;  %v2179_v29 = vpop.f32.mrf.mxu0  ;;  %v2372_v41 = vpop.f32.mrf.mxu1  ;;  %v6187_v47 = vld [vmem:[#allocation83_spill] sm:$0xff] }
 0x318   : > { %3289 = vst [vmem:[%s5050_s8 + $0x680] sm:$0xff] %v3033_v48  ;;  %3291 = vst [vmem:[%s5050_s8 + $0x690] sm:$0xff] %v3035_v21  ;;  %v3034_v13 = vadd.f32 %v5039_v45, %v2178_v51  ;;  %v2180_v36 = vadd.f32 %v2179_v29, %v6175_v50  ;;  %v2373_v31 = vadd.f32 %v2372_v41, %v6176_v52  ;;  %v6188_v21 = vld [vmem:[#allocation84_spill] sm:$0xff]  ;;  %v2811_v29 = vsub.s32 6, %v4999_v54 }
 0x319   : > { %v3036_v2 = vadd.f32 %v5043_v57, %v2371_v23  ;;  %v2181_v8 = vpop.f32.mrf.mxu0  ;;  %v2374_v56 = vpop.f32.mrf.mxu1  ;;  %v2803_v23 = vsub.s32 4, %v4999_v54 }
 0x31a   : > { %3290 = vst [vmem:[%s5050_s8 + $0x688] sm:$0xff] %v3034_v13  ;;  %v3041_v49 = vadd.f32 %v5031_v40, %v2180_v36  ;;  %v3043_v42 = vadd.f32 %v5033_v62, %v2373_v31  ;;  %v2182_v28 = vadd.f32 %v2181_v8, %v6177_v3  ;;  %v2375_v9 = vadd.f32 %v2374_v56, %v6178_v5  ;;  %v6190_v36 = vld [vmem:[#allocation86_spill] sm:$0xff] }
 0x31b   : > { %3292 = vst [vmem:[%s5050_s8 + $0x698] sm:$0xff] %v3036_v2  ;;  %v2185_v35 = vpop.f32.mrf.mxu0  ;;  %v2378_v44 = vpop.f32.mrf.mxu1  ;;  %v6189_v2 = vld [vmem:[#allocation85_spill] sm:$0xff]  ;;  %v2807_v56 = vsub.s32 5, %v4999_v54 }
 0x31c   : > { %3297 = vst [vmem:[%s5050_s8 + $0x6c0] sm:$0xff] %v3041_v49  ;;  %3299 = vst [vmem:[%s5050_s8 + $0x6d0] sm:$0xff] %v3043_v42  ;;  %v3042_v43 = vadd.f32 %v5039_v45, %v2182_v28  ;;  %v3044_v14 = vadd.f32 %v5043_v57, %v2375_v9  ;;  %v2186_v27 = vadd.f32 %v2185_v35, %v6179_v26  ;;  %v2815_v49 = vsub.s32 7, %v4999_v54  ;;  %v6191_v28 = vld [vmem:[#allocation87_spill] sm:$0xff]  ;;  %v6192_v9 = vld [vmem:[#allocation88_spill] sm:$0xff] }
 0x31d   : > { %v2379_v1 = vadd.f32 %v2378_v44, %v6180_v19  ;;  %v2187_v63 = vpop.f32.mrf.mxu0  ;;  %v2380_v0 = vpop.f32.mrf.mxu1 }
 0x31e   : > { %3298 = vst [vmem:[%s5050_s8 + $0x6c8] sm:$0xff] %v3042_v43  ;;  %3300 = vst [vmem:[%s5050_s8 + $0x6d8] sm:$0xff] %v3044_v14  ;;  %v3049_v30 = vadd.f32 %v5031_v40, %v2186_v27  ;;  %v2188_v39 = vadd.f32 %v2187_v63, %v6181_v22  ;;  %v2381_v53 = vadd.f32 %v2380_v0, %v6182_v24  ;;  %v3700_v14 = vld [vmem:[%s5882_s6] sm:$0xff] }
 0x31f   : > { %v3051_v37 = vadd.f32 %v5033_v62, %v2379_v1  ;;  %v2189_v16 = vpop.f32.mrf.mxu0  ;;  %v2382_v12 = vpop.f32.mrf.mxu1  ;;  %v5469_v26 = vrot.slane %v3700_v14, %v2803_v23  ;;  %v5471_v54 = vrot.slane %v3700_v14, %v2811_v29  ;;  %v6193_v1 = vld [vmem:[#allocation89_spill] sm:$0xff]  ;;  %v6194_v0 = vld [vmem:[#allocation90_spill] sm:$0xff]  ;;  %v5481_v24 = vrot.slane %v3700_v14, %v2815_v49 }
 0x320   : > { %3305 = vst [vmem:[%s5050_s8 + $0x700] sm:$0xff] %v3049_v30  ;;  %v3050_v17 = vadd.f32 %v5039_v45, %v2188_v39  ;;  %v3052_v61 = vadd.f32 %v5043_v57, %v2381_v53  ;;  %v2190_v60 = vadd.f32 %v2189_v16, %v6183_v58  ;;  %v2383_v55 = vadd.f32 %v2382_v12, %v6184_v59  ;;  %v6196_v12 = vld [vmem:[#allocation92_spill] sm:$0xff]  ;;  %v6205_v49 = vld [vmem:[#allocation101_spill] sm:$0xff] }
 0x321   : > { %3307 = vst [vmem:[%s5050_s8 + $0x710] sm:$0xff] %v3051_v37  ;;  %v2191_v32 = vpop.f32.mrf.mxu0  ;;  %v2384_v6 = vpop.f32.mrf.mxu1  ;;  %v5479_v39 = vrot.slane %v3700_v14, %v2807_v56 }
 0x322   : > { %3306 = vst [vmem:[%s5050_s8 + $0x708] sm:$0xff] %v3050_v17  ;;  %3308 = vst [vmem:[%s5050_s8 + $0x718] sm:$0xff] %v3052_v61  ;;  %v3057_v18 = vadd.f32 %v5031_v40, %v2190_v60  ;;  %v3059_v34 = vadd.f32 %v5033_v62, %v2383_v55  ;;  %v2192_v7 = vadd.f32 %v2191_v32, %v6185_v25  ;;  %v6197_v55 = vld [vmem:[#allocation93_spill] sm:$0xff] }
 0x323   : > { %v2385_v20 = vadd.f32 %v2384_v6, %v6186_v15  ;;  %v2195_v10 = vpop.f32.mrf.mxu0  ;;  %v2388_v33 = vpop.f32.mrf.mxu1  ;;  %v6198_v6 = vld [vmem:[#allocation94_spill] sm:$0xff] }
 0x324   : > { %3313 = vst [vmem:[%s5050_s8 + $0x740] sm:$0xff] %v3057_v18  ;;  %3315 = vst [vmem:[%s5050_s8 + $0x750] sm:$0xff] %v3059_v34  ;;  %v3058_v11 = vadd.f32 %v5039_v45, %v2192_v7  ;;  %v2196_v48 = vadd.f32 %v2195_v10, %v6187_v47  ;;  %v2389_v46 = vadd.f32 %v2388_v33, %v6188_v21  ;;  %v6199_v7 = vld [vmem:[#allocation95_spill] sm:$0xff] }
 0x325   : > { %v3060_v38 = vadd.f32 %v5043_v57, %v2385_v20  ;;  %v2197_v51 = vpop.f32.mrf.mxu0  ;;  %v2390_v4 = vpop.f32.mrf.mxu1  ;;  %v6200_v20 = vld [vmem:[#allocation96_spill] sm:$0xff] }
 0x326   : > { %3314 = vst [vmem:[%s5050_s8 + $0x748] sm:$0xff] %v3058_v11  ;;  %v3065_v41 = vadd.f32 %v5031_v40, %v2196_v48  ;;  %v3067_v13 = vadd.f32 %v5033_v62, %v2389_v46  ;;  %v2198_v50 = vadd.f32 %v2197_v51, %v6189_v2  ;;  %v2391_v52 = vadd.f32 %v2390_v4, %v6190_v36  ;;  %v6201_v48 = vld [vmem:[#allocation97_spill] sm:$0xff]  ;;  %v6202_v46 = vld [vmem:[#allocation98_spill] sm:$0xff] }
 0x327   : > { %3316 = vst [vmem:[%s5050_s8 + $0x758] sm:$0xff] %v3060_v38  ;;  %v2199_v31 = vpop.f32.mrf.mxu0  ;;  %v2392_v8 = vpop.f32.mrf.mxu1 }
 0x328   : > { %3321 = vst [vmem:[%s5050_s8 + $0x780] sm:$0xff] %v3065_v41  ;;  %3323 = vst [vmem:[%s5050_s8 + $0x790] sm:$0xff] %v3067_v13  ;;  %v3066_v42 = vadd.f32 %v5039_v45, %v2198_v50  ;;  %v3068_v3 = vadd.f32 %v5043_v57, %v2391_v52  ;;  %v2200_v5 = vadd.f32 %v2199_v31, %v6191_v28  ;;  %v6203_v13 = vld [vmem:[#allocation99_spill] sm:$0xff]  ;;  %v6204_v50 = vld [vmem:[#allocation100_spill] sm:$0xff] }
 0x329   : > { %v2393_v35 = vadd.f32 %v2392_v8, %v6192_v9  ;;  %v2201_v44 = vpop.f32.mrf.mxu0  ;;  %v2394_v43 = vpop.f32.mrf.mxu1 }
 0x32a   : > { %3322 = vst [vmem:[%s5050_s8 + $0x788] sm:$0xff] %v3066_v42  ;;  %3324 = vst [vmem:[%s5050_s8 + $0x798] sm:$0xff] %v3068_v3  ;;  %v3073_v27 = vadd.f32 %v5031_v40, %v2200_v5  ;;  %v2202_v63 = vadd.f32 %v2201_v44, %v6193_v1  ;;  %v2395_v30 = vadd.f32 %v2394_v43, %v6194_v0  ;;  %v6206_v3 = vld [vmem:[#allocation102_spill] sm:$0xff]  ;;  %v6207_v43 = vld [vmem:[#allocation103_spill] sm:$0xff] }
 0x32b   : > { %v3075_v19 = vadd.f32 %v5033_v62, %v2393_v35  ;;  %v2431_v37 = vpop.f32.mrf.mxu0  ;;  %v2624_v22 = vpop.f32.mrf.mxu1  ;;  %v6195_v62 = vld [vmem:[#allocation91_spill] sm:$0xff] }
 0x32c   : > { %3329 = vst [vmem:[%s5050_s8 + $0x7c0] sm:$0xff] %v3073_v27  ;;  %v3074_v40 = vadd.f32 %v5039_v45, %v2202_v63  ;;  %v3076_v53 = vadd.f32 %v5043_v57, %v2395_v30  ;;  %v2432_v16 = vadd.f32 %v2431_v37, %v6195_v62  ;;  %v2625_v17 = vadd.f32 %v2624_v22, %v6196_v12  ;;  %v6208_v27 = vld [vmem:[#allocation104_spill] sm:$0xff]  ;;  %v6209_v37 = vld [vmem:[#allocation105_spill] sm:$0xff] }
 0x32d   : > { %3331 = vst [vmem:[%s5050_s8 + $0x7d0] sm:$0xff] %v3075_v19  ;;  %v2433_v61 = vpop.f32.mrf.mxu0  ;;  %v2626_v58 = vpop.f32.mrf.mxu1 }
 0x32e   : > { %3330 = vst [vmem:[%s5050_s8 + $0x7c8] sm:$0xff] %v3074_v40  ;;  %3332 = vst [vmem:[%s5050_s8 + $0x7d8] sm:$0xff] %v3076_v53  ;;  %v2829_v60 = vadd.f32 %v5469_v26, %v2432_v16  ;;  %v2831_v59 = vadd.f32 %v5471_v54, %v2625_v17  ;;  %v2434_v32 = vadd.f32 %v2433_v61, %v6197_v55  ;;  %v6210_v40 = vld [vmem:[#allocation106_spill] sm:$0xff]  ;;  %v6211_v61 = vld [vmem:[#allocation107_spill] sm:$0xff] }
 0x32f   : > { %v2627_v45 = vadd.f32 %v2626_v58, %v6198_v6  ;;  %v2435_v18 = vpop.f32.mrf.mxu0  ;;  %v2628_v57 = vpop.f32.mrf.mxu1 }
 0x330   : > { %3085 = vst [vmem:[%s5050_s8 + $0x20] sm:$0xff] %v2829_v60  ;;  %3087 = vst [vmem:[%s5050_s8 + $0x30] sm:$0xff] %v2831_v59  ;;  %v2830_v34 = vadd.f32 %v5479_v39, %v2434_v32  ;;  %v2436_v15 = vadd.f32 %v2435_v18, %v6199_v7  ;;  %v2629_v10 = vadd.f32 %v2628_v57, %v6200_v20  ;;  %v6212_v60 = vld [vmem:[#allocation108_spill] sm:$0xff]  ;;  %v6213_v18 = vld [vmem:[#allocation109_spill] sm:$0xff] }
 0x331   : > { %v2832_v25 = vadd.f32 %v5481_v24, %v2627_v45  ;;  %v2437_v33 = vpop.f32.mrf.mxu0  ;;  %v2630_v11 = vpop.f32.mrf.mxu1 }
 0x332   : > { %3086 = vst [vmem:[%s5050_s8 + $0x28] sm:$0xff] %v2830_v34  ;;  %v2837_v38 = vadd.f32 %v5469_v26, %v2436_v15  ;;  %v2839_v47 = vadd.f32 %v5471_v54, %v2629_v10  ;;  %v2438_v21 = vadd.f32 %v2437_v33, %v6201_v48  ;;  %v2631_v51 = vadd.f32 %v2630_v11, %v6202_v46  ;;  %v6214_v34 = vld [vmem:[#allocation110_spill] sm:$0xff]  ;;  %v6215_v33 = vld [vmem:[#allocation111_spill] sm:$0xff] }
 0x333   : > { %3088 = vst [vmem:[%s5050_s8 + $0x38] sm:$0xff] %v2832_v25  ;;  %v2441_v4 = vpop.f32.mrf.mxu0  ;;  %v2634_v23 = vpop.f32.mrf.mxu1 }
 0x334   : > { %3093 = vst [vmem:[%s5050_s8 + $0x60] sm:$0xff] %v2837_v38  ;;  %3095 = vst [vmem:[%s5050_s8 + $0x70] sm:$0xff] %v2839_v47  ;;  %v2838_v29 = vadd.f32 %v5479_v39, %v2438_v21  ;;  %v2840_v41 = vadd.f32 %v5481_v24, %v2631_v51  ;;  %v2442_v2 = vadd.f32 %v2441_v4, %v6203_v13  ;;  %v6216_v38 = vld [vmem:[#allocation112_spill] sm:$0xff]  ;;  %v6217_v4 = vld [vmem:[#allocation113_spill] sm:$0xff] }
 0x335   : > { %v2635_v36 = vadd.f32 %v2634_v23, %v6204_v50  ;;  %v2443_v52 = vpop.f32.mrf.mxu0  ;;  %v2636_v31 = vpop.f32.mrf.mxu1 }
 0x336   : > { %3094 = vst [vmem:[%s5050_s8 + $0x68] sm:$0xff] %v2838_v29  ;;  %3096 = vst [vmem:[%s5050_s8 + $0x78] sm:$0xff] %v2840_v41  ;;  %v2845_v8 = vadd.f32 %v5469_v26, %v2442_v2  ;;  %v2444_v42 = vadd.f32 %v2443_v52, %v6205_v49  ;;  %v2637_v28 = vadd.f32 %v2636_v31, %v6206_v3  ;;  %v6218_v29 = vld [vmem:[#allocation114_spill] sm:$0xff]  ;;  %v6219_v52 = vld [vmem:[#allocation115_spill] sm:$0xff] }
 0x337   : > { %v2847_v56 = vadd.f32 %v5471_v54, %v2635_v36  ;;  %v2445_v5 = vpop.f32.mrf.mxu0  ;;  %v2638_v9 = vpop.f32.mrf.mxu1 }
 0x338   : > { %3101 = vst [vmem:[%s5050_s8 + $0xa0] sm:$0xff] %v2845_v8  ;;  %v2846_v35 = vadd.f32 %v5479_v39, %v2444_v42  ;;  %v2848_v44 = vadd.f32 %v5481_v24, %v2637_v28  ;;  %v2446_v14 = vadd.f32 %v2445_v5, %v6207_v43  ;;  %v2639_v19 = vadd.f32 %v2638_v9, %v6208_v27  ;;  %v6220_v8 = vld [vmem:[#allocation116_spill] sm:$0xff]  ;;  %v6221_v5 = vld [vmem:[#allocation117_spill] sm:$0xff] }
 0x339   : > { %3103 = vst [vmem:[%s5050_s8 + $0xb0] sm:$0xff] %v2847_v56  ;;  %v2447_v1 = vpop.f32.mrf.mxu0  ;;  %v2640_v63 = vpop.f32.mrf.mxu1 }
 0x33a   : > { %3102 = vst [vmem:[%s5050_s8 + $0xa8] sm:$0xff] %v2846_v35  ;;  %3104 = vst [vmem:[%s5050_s8 + $0xb8] sm:$0xff] %v2848_v44  ;;  %v2853_v0 = vadd.f32 %v5469_v26, %v2446_v14  ;;  %v2855_v30 = vadd.f32 %v5471_v54, %v2639_v19  ;;  %v2448_v22 = vadd.f32 %v2447_v1, %v6209_v37  ;;  %v6222_v35 = vld [vmem:[#allocation118_spill] sm:$0xff]  ;;  %v6223_v1 = vld [vmem:[#allocation119_spill] sm:$0xff] }
 0x33b   : > { %v2641_v53 = vadd.f32 %v2640_v63, %v6210_v40  ;;  %v2451_v62 = vpop.f32.mrf.mxu0  ;;  %v2644_v16 = vpop.f32.mrf.mxu1 }
 0x33c   : > { %3109 = vst [vmem:[%s5050_s8 + $0xe0] sm:$0xff] %v2853_v0  ;;  %3111 = vst [vmem:[%s5050_s8 + $0xf0] sm:$0xff] %v2855_v30  ;;  %v2854_v12 = vadd.f32 %v5479_v39, %v2448_v22  ;;  %v2452_v58 = vadd.f32 %v2451_v62, %v6211_v61  ;;  %v2645_v59 = vadd.f32 %v2644_v16, %v6212_v60  ;;  %v6224_v0 = vld [vmem:[#allocation120_spill] sm:$0xff]  ;;  %v6225_v62 = vld [vmem:[#allocation121_spill] sm:$0xff] }
 0x33d   : > { %v2856_v17 = vadd.f32 %v5481_v24, %v2641_v53  ;;  %v2453_v55 = vpop.f32.mrf.mxu0  ;;  %v2646_v32 = vpop.f32.mrf.mxu1 }
 0x33e   : > { %3110 = vst [vmem:[%s5050_s8 + $0xe8] sm:$0xff] %v2854_v12  ;;  %v2861_v6 = vadd.f32 %v5469_v26, %v2452_v58  ;;  %v2863_v45 = vadd.f32 %v5471_v54, %v2645_v59  ;;  %v2454_v57 = vadd.f32 %v2453_v55, %v6213_v18  ;;  %v2647_v25 = vadd.f32 %v2646_v32, %v6214_v34  ;;  %v6226_v12 = vld [vmem:[#allocation122_spill] sm:$0xff]  ;;  %v6227_v55 = vld [vmem:[#allocation123_spill] sm:$0xff] }
 0x33f   : > { %3112 = vst [vmem:[%s5050_s8 + $0xf8] sm:$0xff] %v2856_v17  ;;  %v2455_v7 = vpop.f32.mrf.mxu0  ;;  %v2648_v15 = vpop.f32.mrf.mxu1 }
 0x340   : > { %3117 = vst [vmem:[%s5050_s8 + $0x120] sm:$0xff] %v2861_v6  ;;  %3119 = vst [vmem:[%s5050_s8 + $0x130] sm:$0xff] %v2863_v45  ;;  %v2862_v20 = vadd.f32 %v5479_v39, %v2454_v57  ;;  %v2864_v10 = vadd.f32 %v5481_v24, %v2647_v25  ;;  %v2456_v11 = vadd.f32 %v2455_v7, %v6215_v33  ;;  %v6228_v6 = vld [vmem:[#allocation124_spill] sm:$0xff]  ;;  %v6229_v7 = vld [vmem:[#allocation125_spill] sm:$0xff] }
 0x341   : > { %v2649_v47 = vadd.f32 %v2648_v15, %v6216_v38  ;;  %v2457_v48 = vpop.f32.mrf.mxu0  ;;  %v2650_v21 = vpop.f32.mrf.mxu1 }
 0x342   : > { %3118 = vst [vmem:[%s5050_s8 + $0x128] sm:$0xff] %v2862_v20  ;;  %3120 = vst [vmem:[%s5050_s8 + $0x138] sm:$0xff] %v2864_v10  ;;  %v2869_v46 = vadd.f32 %v5469_v26, %v2456_v11  ;;  %v2458_v23 = vadd.f32 %v2457_v48, %v6217_v4  ;;  %v2651_v41 = vadd.f32 %v2650_v21, %v6218_v29  ;;  %v6230_v20 = vld [vmem:[#allocation126_spill] sm:$0xff]  ;;  %v6231_v48 = vld [vmem:[#allocation127_spill] sm:$0xff] }
 0x343   : > { %v2871_v51 = vadd.f32 %v5471_v54, %v2649_v47  ;;  %v2461_v13 = vpop.f32.mrf.mxu0  ;;  %v2654_v2 = vpop.f32.mrf.mxu1 }
 0x344   : > { %3125 = vst [vmem:[%s5050_s8 + $0x160] sm:$0xff] %v2869_v46  ;;  %v2870_v50 = vadd.f32 %v5479_v39, %v2458_v23  ;;  %v2872_v36 = vadd.f32 %v5481_v24, %v2651_v41  ;;  %v2462_v31 = vadd.f32 %v2461_v13, %v6219_v52  ;;  %v2655_v56 = vadd.f32 %v2654_v2, %v6220_v8  ;;  %v6232_v46 = vld [vmem:[#allocation128_spill] sm:$0xff]  ;;  %v6233_v13 = vld [vmem:[#allocation129_spill] sm:$0xff] }
 0x345   : > { %3127 = vst [vmem:[%s5050_s8 + $0x170] sm:$0xff] %v2871_v51  ;;  %v2463_v49 = vpop.f32.mrf.mxu0  ;;  %v2656_v42 = vpop.f32.mrf.mxu1 }
 0x346   : > { %3126 = vst [vmem:[%s5050_s8 + $0x168] sm:$0xff] %v2870_v50  ;;  %3128 = vst [vmem:[%s5050_s8 + $0x178] sm:$0xff] %v2872_v36  ;;  %v2877_v3 = vadd.f32 %v5469_v26, %v2462_v31  ;;  %v2879_v28 = vadd.f32 %v5471_v54, %v2655_v56  ;;  %v2464_v9 = vadd.f32 %v2463_v49, %v6221_v5  ;;  %v6234_v50 = vld [vmem:[#allocation130_spill] sm:$0xff]  ;;  %v6235_v49 = vld [vmem:[#allocation131_spill] sm:$0xff] }
 0x347   : > { %v2657_v44 = vadd.f32 %v2656_v42, %v6222_v35  ;;  %v2465_v43 = vpop.f32.mrf.mxu0  ;;  %v2658_v14 = vpop.f32.mrf.mxu1 }
 0x348   : > { %3133 = vst [vmem:[%s5050_s8 + $0x1a0] sm:$0xff] %v2877_v3  ;;  %3135 = vst [vmem:[%s5050_s8 + $0x1b0] sm:$0xff] %v2879_v28  ;;  %v2878_v27 = vadd.f32 %v5479_v39, %v2464_v9  ;;  %v2466_v63 = vadd.f32 %v2465_v43, %v6223_v1  ;;  %v2659_v30 = vadd.f32 %v2658_v14, %v6224_v0  ;;  %v6236_v3 = vld [vmem:[#allocation132_spill] sm:$0xff]  ;;  %v6237_v43 = vld [vmem:[#allocation133_spill] sm:$0xff] }
 0x349   : > { %v2880_v19 = vadd.f32 %v5481_v24, %v2657_v44  ;;  %v2467_v37 = vpop.f32.mrf.mxu0  ;;  %v2660_v22 = vpop.f32.mrf.mxu1 }
 0x34a   : > { %3134 = vst [vmem:[%s5050_s8 + $0x1a8] sm:$0xff] %v2878_v27  ;;  %v2885_v40 = vadd.f32 %v5469_v26, %v2466_v63  ;;  %v2887_v53 = vadd.f32 %v5471_v54, %v2659_v30  ;;  %v2468_v16 = vadd.f32 %v2467_v37, %v6225_v62  ;;  %v2661_v17 = vadd.f32 %v2660_v22, %v6226_v12  ;;  %v6238_v27 = vld [vmem:[#allocation134_spill] sm:$0xff]  ;;  %v6239_v37 = vld [vmem:[#allocation135_spill] sm:$0xff] }
 0x34b   : > { %3136 = vst [vmem:[%s5050_s8 + $0x1b8] sm:$0xff] %v2880_v19  ;;  %v2471_v61 = vpop.f32.mrf.mxu0  ;;  %v2664_v58 = vpop.f32.mrf.mxu1 }
 0x34c   : > { %3141 = vst [vmem:[%s5050_s8 + $0x1e0] sm:$0xff] %v2885_v40  ;;  %3143 = vst [vmem:[%s5050_s8 + $0x1f0] sm:$0xff] %v2887_v53  ;;  %v2886_v60 = vadd.f32 %v5479_v39, %v2468_v16  ;;  %v2888_v59 = vadd.f32 %v5481_v24, %v2661_v17  ;;  %v2472_v32 = vadd.f32 %v2471_v61, %v6227_v55  ;;  %v6240_v40 = vld [vmem:[#allocation136_spill] sm:$0xff]  ;;  %v6241_v61 = vld [vmem:[#allocation137_spill] sm:$0xff] }
 0x34d   : > { %v2665_v45 = vadd.f32 %v2664_v58, %v6228_v6  ;;  %v2473_v18 = vpop.f32.mrf.mxu0  ;;  %v2666_v57 = vpop.f32.mrf.mxu1 }
 0x34e   : > { %3142 = vst [vmem:[%s5050_s8 + $0x1e8] sm:$0xff] %v2886_v60  ;;  %3144 = vst [vmem:[%s5050_s8 + $0x1f8] sm:$0xff] %v2888_v59  ;;  %v2893_v34 = vadd.f32 %v5469_v26, %v2472_v32  ;;  %v2474_v15 = vadd.f32 %v2473_v18, %v6229_v7  ;;  %v2667_v10 = vadd.f32 %v2666_v57, %v6230_v20  ;;  %v6242_v60 = vld [vmem:[#allocation138_spill] sm:$0xff]  ;;  %v6243_v18 = vld [vmem:[#allocation139_spill] sm:$0xff] }
 0x34f   : > { %v2895_v25 = vadd.f32 %v5471_v54, %v2665_v45  ;;  %v2475_v33 = vpop.f32.mrf.mxu0  ;;  %v2668_v11 = vpop.f32.mrf.mxu1 }
 0x350   : > { %3149 = vst [vmem:[%s5050_s8 + $0x220] sm:$0xff] %v2893_v34  ;;  %v2894_v38 = vadd.f32 %v5479_v39, %v2474_v15  ;;  %v2896_v47 = vadd.f32 %v5481_v24, %v2667_v10  ;;  %v2476_v21 = vadd.f32 %v2475_v33, %v6231_v48  ;;  %v2669_v51 = vadd.f32 %v2668_v11, %v6232_v46  ;;  %v6244_v34 = vld [vmem:[#allocation140_spill] sm:$0xff]  ;;  %v6245_v33 = vld [vmem:[#allocation141_spill] sm:$0xff] }
 0x351   : > { %3151 = vst [vmem:[%s5050_s8 + $0x230] sm:$0xff] %v2895_v25  ;;  %v2477_v4 = vpop.f32.mrf.mxu0  ;;  %v2670_v23 = vpop.f32.mrf.mxu1 }
 0x352   : > { %3150 = vst [vmem:[%s5050_s8 + $0x228] sm:$0xff] %v2894_v38  ;;  %3152 = vst [vmem:[%s5050_s8 + $0x238] sm:$0xff] %v2896_v47  ;;  %v2901_v29 = vadd.f32 %v5469_v26, %v2476_v21  ;;  %v2903_v41 = vadd.f32 %v5471_v54, %v2669_v51  ;;  %v2478_v2 = vadd.f32 %v2477_v4, %v6233_v13  ;;  %v6246_v38 = vld [vmem:[#allocation142_spill] sm:$0xff]  ;;  %v6247_v4 = vld [vmem:[#allocation143_spill] sm:$0xff] }
 0x353   : > { %v2671_v36 = vadd.f32 %v2670_v23, %v6234_v50  ;;  %v2481_v52 = vpop.f32.mrf.mxu0  ;;  %v2674_v31 = vpop.f32.mrf.mxu1 }
 0x354   : > { %3157 = vst [vmem:[%s5050_s8 + $0x260] sm:$0xff] %v2901_v29  ;;  %3159 = vst [vmem:[%s5050_s8 + $0x270] sm:$0xff] %v2903_v41  ;;  %v2902_v8 = vadd.f32 %v5479_v39, %v2478_v2  ;;  %v2482_v42 = vadd.f32 %v2481_v52, %v6235_v49  ;;  %v2675_v28 = vadd.f32 %v2674_v31, %v6236_v3  ;;  %v6248_v29 = vld [vmem:[#allocation144_spill] sm:$0xff]  ;;  %v6249_v52 = vld [vmem:[#allocation145_spill] sm:$0xff] }
 0x355   : > { %v2904_v56 = vadd.f32 %v5481_v24, %v2671_v36  ;;  %v2483_v5 = vpop.f32.mrf.mxu0  ;;  %v2676_v9 = vpop.f32.mrf.mxu1 }
 0x356   : > { %3158 = vst [vmem:[%s5050_s8 + $0x268] sm:$0xff] %v2902_v8  ;;  %v2909_v35 = vadd.f32 %v5469_v26, %v2482_v42  ;;  %v2911_v44 = vadd.f32 %v5471_v54, %v2675_v28  ;;  %v2484_v14 = vadd.f32 %v2483_v5, %v6237_v43  ;;  %v2677_v19 = vadd.f32 %v2676_v9, %v6238_v27  ;;  %v6250_v8 = vld [vmem:[#allocation146_spill] sm:$0xff]  ;;  %v6251_v5 = vld [vmem:[#allocation147_spill] sm:$0xff] }
 0x357   : > { %3160 = vst [vmem:[%s5050_s8 + $0x278] sm:$0xff] %v2904_v56  ;;  %v2485_v1 = vpop.f32.mrf.mxu0  ;;  %v2678_v63 = vpop.f32.mrf.mxu1 }
 0x358   : > { %3165 = vst [vmem:[%s5050_s8 + $0x2a0] sm:$0xff] %v2909_v35  ;;  %3167 = vst [vmem:[%s5050_s8 + $0x2b0] sm:$0xff] %v2911_v44  ;;  %v2910_v0 = vadd.f32 %v5479_v39, %v2484_v14  ;;  %v2912_v30 = vadd.f32 %v5481_v24, %v2677_v19  ;;  %v2486_v22 = vadd.f32 %v2485_v1, %v6239_v37  ;;  %v6252_v35 = vld [vmem:[#allocation148_spill] sm:$0xff]  ;;  %v6253_v1 = vld [vmem:[#allocation149_spill] sm:$0xff] }
 0x359   : > { %v2679_v53 = vadd.f32 %v2678_v63, %v6240_v40  ;;  %v2487_v62 = vpop.f32.mrf.mxu0  ;;  %v2680_v16 = vpop.f32.mrf.mxu1 }
 0x35a   : > { %3166 = vst [vmem:[%s5050_s8 + $0x2a8] sm:$0xff] %v2910_v0  ;;  %3168 = vst [vmem:[%s5050_s8 + $0x2b8] sm:$0xff] %v2912_v30  ;;  %v2917_v12 = vadd.f32 %v5469_v26, %v2486_v22  ;;  %v2488_v58 = vadd.f32 %v2487_v62, %v6241_v61  ;;  %v2681_v59 = vadd.f32 %v2680_v16, %v6242_v60  ;;  %v6254_v0 = vld [vmem:[#allocation150_spill] sm:$0xff]  ;;  %v6255_v62 = vld [vmem:[#allocation151_spill] sm:$0xff] }
 0x35b   : > { %v2919_v17 = vadd.f32 %v5471_v54, %v2679_v53  ;;  %v2491_v55 = vpop.f32.mrf.mxu0  ;;  %v2684_v32 = vpop.f32.mrf.mxu1 }
 0x35c   : > { %3173 = vst [vmem:[%s5050_s8 + $0x2e0] sm:$0xff] %v2917_v12  ;;  %v2918_v6 = vadd.f32 %v5479_v39, %v2488_v58  ;;  %v2920_v45 = vadd.f32 %v5481_v24, %v2681_v59  ;;  %v2492_v57 = vadd.f32 %v2491_v55, %v6243_v18  ;;  %v2685_v25 = vadd.f32 %v2684_v32, %v6244_v34  ;;  %v6256_v12 = vld [vmem:[#allocation152_spill] sm:$0xff]  ;;  %v6257_v55 = vld [vmem:[#allocation153_spill] sm:$0xff] }
 0x35d   : > { %3175 = vst [vmem:[%s5050_s8 + $0x2f0] sm:$0xff] %v2919_v17  ;;  %v2493_v7 = vpop.f32.mrf.mxu0  ;;  %v2686_v15 = vpop.f32.mrf.mxu1 }
 0x35e   : > { %3174 = vst [vmem:[%s5050_s8 + $0x2e8] sm:$0xff] %v2918_v6  ;;  %3176 = vst [vmem:[%s5050_s8 + $0x2f8] sm:$0xff] %v2920_v45  ;;  %v2925_v20 = vadd.f32 %v5469_v26, %v2492_v57  ;;  %v2927_v10 = vadd.f32 %v5471_v54, %v2685_v25  ;;  %v2494_v11 = vadd.f32 %v2493_v7, %v6245_v33  ;;  %v6258_v6 = vld [vmem:[#allocation154_spill] sm:$0xff]  ;;  %v6259_v7 = vld [vmem:[#allocation155_spill] sm:$0xff] }
 0x35f   : > { %v2687_v47 = vadd.f32 %v2686_v15, %v6246_v38  ;;  %v2495_v48 = vpop.f32.mrf.mxu0  ;;  %v2688_v21 = vpop.f32.mrf.mxu1 }
 0x360   : > { %3181 = vst [vmem:[%s5050_s8 + $0x320] sm:$0xff] %v2925_v20  ;;  %3183 = vst [vmem:[%s5050_s8 + $0x330] sm:$0xff] %v2927_v10  ;;  %v2926_v46 = vadd.f32 %v5479_v39, %v2494_v11  ;;  %v2496_v23 = vadd.f32 %v2495_v48, %v6247_v4  ;;  %v2689_v41 = vadd.f32 %v2688_v21, %v6248_v29  ;;  %v6260_v20 = vld [vmem:[#allocation156_spill] sm:$0xff]  ;;  %v6261_v48 = vld [vmem:[#allocation157_spill] sm:$0xff] }
 0x361   : > { %v2928_v51 = vadd.f32 %v5481_v24, %v2687_v47  ;;  %v2497_v13 = vpop.f32.mrf.mxu0  ;;  %v2690_v2 = vpop.f32.mrf.mxu1 }
 0x362   : > { %3182 = vst [vmem:[%s5050_s8 + $0x328] sm:$0xff] %v2926_v46  ;;  %v2933_v50 = vadd.f32 %v5469_v26, %v2496_v23  ;;  %v2935_v36 = vadd.f32 %v5471_v54, %v2689_v41  ;;  %v2498_v31 = vadd.f32 %v2497_v13, %v6249_v52  ;;  %v2691_v56 = vadd.f32 %v2690_v2, %v6250_v8  ;;  %v6262_v46 = vld [vmem:[#allocation158_spill] sm:$0xff]  ;;  %v6263_v13 = vld [vmem:[#allocation159_spill] sm:$0xff] }
 0x363   : > { %3184 = vst [vmem:[%s5050_s8 + $0x338] sm:$0xff] %v2928_v51  ;;  %v2501_v49 = vpop.f32.mrf.mxu0  ;;  %v2694_v42 = vpop.f32.mrf.mxu1 }
 0x364   : > { %3189 = vst [vmem:[%s5050_s8 + $0x360] sm:$0xff] %v2933_v50  ;;  %3191 = vst [vmem:[%s5050_s8 + $0x370] sm:$0xff] %v2935_v36  ;;  %v2934_v3 = vadd.f32 %v5479_v39, %v2498_v31  ;;  %v2936_v28 = vadd.f32 %v5481_v24, %v2691_v56  ;;  %v2502_v9 = vadd.f32 %v2501_v49, %v6251_v5  ;;  %v6264_v50 = vld [vmem:[#allocation160_spill] sm:$0xff]  ;;  %v6265_v49 = vld [vmem:[#allocation161_spill] sm:$0xff] }
 0x365   : > { %v2695_v44 = vadd.f32 %v2694_v42, %v6252_v35  ;;  %v2503_v43 = vpop.f32.mrf.mxu0  ;;  %v2696_v14 = vpop.f32.mrf.mxu1 }
 0x366   : > { %3190 = vst [vmem:[%s5050_s8 + $0x368] sm:$0xff] %v2934_v3  ;;  %3192 = vst [vmem:[%s5050_s8 + $0x378] sm:$0xff] %v2936_v28  ;;  %v2941_v27 = vadd.f32 %v5469_v26, %v2502_v9  ;;  %v2504_v63 = vadd.f32 %v2503_v43, %v6253_v1  ;;  %v2697_v30 = vadd.f32 %v2696_v14, %v6254_v0  ;;  %v6266_v3 = vld [vmem:[#allocation162_spill] sm:$0xff]  ;;  %v6267_v43 = vld [vmem:[#allocation163_spill] sm:$0xff] }
 0x367   : > { %v2943_v19 = vadd.f32 %v5471_v54, %v2695_v44  ;;  %v2505_v37 = vpop.f32.mrf.mxu0  ;;  %v2698_v22 = vpop.f32.mrf.mxu1 }
 0x368   : > { %3197 = vst [vmem:[%s5050_s8 + $0x3a0] sm:$0xff] %v2941_v27  ;;  %v2942_v40 = vadd.f32 %v5479_v39, %v2504_v63  ;;  %v2944_v53 = vadd.f32 %v5481_v24, %v2697_v30  ;;  %v2506_v16 = vadd.f32 %v2505_v37, %v6255_v62  ;;  %v2699_v17 = vadd.f32 %v2698_v22, %v6256_v12  ;;  %v6268_v27 = vld [vmem:[#allocation164_spill] sm:$0xff]  ;;  %v6269_v37 = vld [vmem:[#allocation165_spill] sm:$0xff] }
 0x369   : > { %3199 = vst [vmem:[%s5050_s8 + $0x3b0] sm:$0xff] %v2943_v19  ;;  %v2507_v61 = vpop.f32.mrf.mxu0  ;;  %v2700_v58 = vpop.f32.mrf.mxu1 }
 0x36a   : > { %3198 = vst [vmem:[%s5050_s8 + $0x3a8] sm:$0xff] %v2942_v40  ;;  %3200 = vst [vmem:[%s5050_s8 + $0x3b8] sm:$0xff] %v2944_v53  ;;  %v2949_v60 = vadd.f32 %v5469_v26, %v2506_v16  ;;  %v2951_v59 = vadd.f32 %v5471_v54, %v2699_v17  ;;  %v2508_v32 = vadd.f32 %v2507_v61, %v6257_v55  ;;  %v6270_v40 = vld [vmem:[#allocation166_spill] sm:$0xff]  ;;  %v6271_v61 = vld [vmem:[#allocation167_spill] sm:$0xff] }
 0x36b   : > { %v2701_v45 = vadd.f32 %v2700_v58, %v6258_v6  ;;  %v2511_v18 = vpop.f32.mrf.mxu0  ;;  %v2704_v57 = vpop.f32.mrf.mxu1 }
 0x36c   : > { %3205 = vst [vmem:[%s5050_s8 + $0x3e0] sm:$0xff] %v2949_v60  ;;  %3207 = vst [vmem:[%s5050_s8 + $0x3f0] sm:$0xff] %v2951_v59  ;;  %v2950_v34 = vadd.f32 %v5479_v39, %v2508_v32  ;;  %v2512_v15 = vadd.f32 %v2511_v18, %v6259_v7  ;;  %v2705_v10 = vadd.f32 %v2704_v57, %v6260_v20  ;;  %v6272_v60 = vld [vmem:[#allocation168_spill] sm:$0xff]  ;;  %v6273_v18 = vld [vmem:[#allocation169_spill] sm:$0xff] }
 0x36d   : > { %v2952_v25 = vadd.f32 %v5481_v24, %v2701_v45  ;;  %v2513_v33 = vpop.f32.mrf.mxu0  ;;  %v2706_v11 = vpop.f32.mrf.mxu1 }
 0x36e   : > { %3206 = vst [vmem:[%s5050_s8 + $0x3e8] sm:$0xff] %v2950_v34  ;;  %v2957_v38 = vadd.f32 %v5469_v26, %v2512_v15  ;;  %v2959_v47 = vadd.f32 %v5471_v54, %v2705_v10  ;;  %v2514_v21 = vadd.f32 %v2513_v33, %v6261_v48  ;;  %v2707_v51 = vadd.f32 %v2706_v11, %v6262_v46  ;;  %v6274_v34 = vld [vmem:[#allocation170_spill] sm:$0xff]  ;;  %v6275_v33 = vld [vmem:[#allocation171_spill] sm:$0xff] }
 0x36f   : > { %3208 = vst [vmem:[%s5050_s8 + $0x3f8] sm:$0xff] %v2952_v25  ;;  %v2515_v4 = vpop.f32.mrf.mxu0  ;;  %v2708_v23 = vpop.f32.mrf.mxu1 }
 0x370   : > { %3213 = vst [vmem:[%s5050_s8 + $0x420] sm:$0xff] %v2957_v38  ;;  %3215 = vst [vmem:[%s5050_s8 + $0x430] sm:$0xff] %v2959_v47  ;;  %v2958_v29 = vadd.f32 %v5479_v39, %v2514_v21  ;;  %v2960_v41 = vadd.f32 %v5481_v24, %v2707_v51  ;;  %v2516_v2 = vadd.f32 %v2515_v4, %v6263_v13  ;;  %v6276_v38 = vld [vmem:[#allocation172_spill] sm:$0xff]  ;;  %v6277_v4 = vld [vmem:[#allocation173_spill] sm:$0xff] }
 0x371   : > { %v2709_v36 = vadd.f32 %v2708_v23, %v6264_v50  ;;  %v2517_v52 = vpop.f32.mrf.mxu0  ;;  %v2710_v31 = vpop.f32.mrf.mxu1 }
 0x372   : > { %3214 = vst [vmem:[%s5050_s8 + $0x428] sm:$0xff] %v2958_v29  ;;  %3216 = vst [vmem:[%s5050_s8 + $0x438] sm:$0xff] %v2960_v41  ;;  %v2965_v8 = vadd.f32 %v5469_v26, %v2516_v2  ;;  %v2518_v42 = vadd.f32 %v2517_v52, %v6265_v49  ;;  %v2711_v28 = vadd.f32 %v2710_v31, %v6266_v3  ;;  %v6278_v29 = vld [vmem:[#allocation174_spill] sm:$0xff]  ;;  %v6279_v52 = vld [vmem:[#allocation175_spill] sm:$0xff] }
 0x373   : > { %v2967_v56 = vadd.f32 %v5471_v54, %v2709_v36  ;;  %v2521_v5 = vpop.f32.mrf.mxu0  ;;  %v2714_v9 = vpop.f32.mrf.mxu1 }
 0x374   : > { %3221 = vst [vmem:[%s5050_s8 + $0x460] sm:$0xff] %v2965_v8  ;;  %v2966_v35 = vadd.f32 %v5479_v39, %v2518_v42  ;;  %v2968_v44 = vadd.f32 %v5481_v24, %v2711_v28  ;;  %v2522_v14 = vadd.f32 %v2521_v5, %v6267_v43  ;;  %v2715_v19 = vadd.f32 %v2714_v9, %v6268_v27  ;;  %v6280_v8 = vld [vmem:[#allocation176_spill] sm:$0xff]  ;;  %v6281_v5 = vld [vmem:[#allocation177_spill] sm:$0xff] }
 0x375   : > { %3223 = vst [vmem:[%s5050_s8 + $0x470] sm:$0xff] %v2967_v56  ;;  %v2523_v1 = vpop.f32.mrf.mxu0  ;;  %v2716_v63 = vpop.f32.mrf.mxu1 }
 0x376   : > { %3222 = vst [vmem:[%s5050_s8 + $0x468] sm:$0xff] %v2966_v35  ;;  %3224 = vst [vmem:[%s5050_s8 + $0x478] sm:$0xff] %v2968_v44  ;;  %v2973_v0 = vadd.f32 %v5469_v26, %v2522_v14  ;;  %v2975_v30 = vadd.f32 %v5471_v54, %v2715_v19  ;;  %v2524_v22 = vadd.f32 %v2523_v1, %v6269_v37  ;;  %v6282_v35 = vld [vmem:[#allocation178_spill] sm:$0xff]  ;;  %v6283_v1 = vld [vmem:[#allocation179_spill] sm:$0xff] }
 0x377   : > { %v2717_v53 = vadd.f32 %v2716_v63, %v6270_v40  ;;  %v2525_v62 = vpop.f32.mrf.mxu0  ;;  %v2718_v16 = vpop.f32.mrf.mxu1 }
 0x378   : > { %3229 = vst [vmem:[%s5050_s8 + $0x4a0] sm:$0xff] %v2973_v0  ;;  %3231 = vst [vmem:[%s5050_s8 + $0x4b0] sm:$0xff] %v2975_v30  ;;  %v2974_v12 = vadd.f32 %v5479_v39, %v2524_v22  ;;  %v2526_v58 = vadd.f32 %v2525_v62, %v6271_v61  ;;  %v2719_v59 = vadd.f32 %v2718_v16, %v6272_v60  ;;  %v6284_v0 = vld [vmem:[#allocation180_spill] sm:$0xff]  ;;  %v6285_v62 = vld [vmem:[#allocation181_spill] sm:$0xff] }
 0x379   : > { %v2976_v17 = vadd.f32 %v5481_v24, %v2717_v53  ;;  %v2527_v55 = vpop.f32.mrf.mxu0  ;;  %v2720_v32 = vpop.f32.mrf.mxu1 }
 0x37a   : > { %3230 = vst [vmem:[%s5050_s8 + $0x4a8] sm:$0xff] %v2974_v12  ;;  %v2981_v6 = vadd.f32 %v5469_v26, %v2526_v58  ;;  %v2983_v45 = vadd.f32 %v5471_v54, %v2719_v59  ;;  %v2528_v57 = vadd.f32 %v2527_v55, %v6273_v18  ;;  %v2721_v25 = vadd.f32 %v2720_v32, %v6274_v34  ;;  %v6286_v12 = vld [vmem:[#allocation182_spill] sm:$0xff]  ;;  %v6287_v55 = vld [vmem:[#allocation183_spill] sm:$0xff] }
 0x37b   : > { %3232 = vst [vmem:[%s5050_s8 + $0x4b8] sm:$0xff] %v2976_v17  ;;  %v2531_v7 = vpop.f32.mrf.mxu0  ;;  %v2724_v15 = vpop.f32.mrf.mxu1 }
 0x37c   : > { %3237 = vst [vmem:[%s5050_s8 + $0x4e0] sm:$0xff] %v2981_v6  ;;  %3239 = vst [vmem:[%s5050_s8 + $0x4f0] sm:$0xff] %v2983_v45  ;;  %v2982_v20 = vadd.f32 %v5479_v39, %v2528_v57  ;;  %v2984_v10 = vadd.f32 %v5481_v24, %v2721_v25  ;;  %v2532_v11 = vadd.f32 %v2531_v7, %v6275_v33  ;;  %v6288_v6 = vld [vmem:[#allocation184_spill] sm:$0xff]  ;;  %v6289_v7 = vld [vmem:[#allocation185_spill] sm:$0xff] }
 0x37d   : > { %v2725_v47 = vadd.f32 %v2724_v15, %v6276_v38  ;;  %v2533_v48 = vpop.f32.mrf.mxu0  ;;  %v2726_v21 = vpop.f32.mrf.mxu1 }
 0x37e   : > { %3238 = vst [vmem:[%s5050_s8 + $0x4e8] sm:$0xff] %v2982_v20  ;;  %3240 = vst [vmem:[%s5050_s8 + $0x4f8] sm:$0xff] %v2984_v10  ;;  %v2989_v46 = vadd.f32 %v5469_v26, %v2532_v11  ;;  %v2534_v23 = vadd.f32 %v2533_v48, %v6277_v4  ;;  %v2727_v41 = vadd.f32 %v2726_v21, %v6278_v29  ;;  %v6290_v20 = vld [vmem:[#allocation186_spill] sm:$0xff]  ;;  %v6291_v48 = vld [vmem:[#allocation187_spill] sm:$0xff] }
 0x37f   : > { %v2991_v51 = vadd.f32 %v5471_v54, %v2725_v47  ;;  %v2535_v13 = vpop.f32.mrf.mxu0  ;;  %v2728_v2 = vpop.f32.mrf.mxu1 }
 0x380   : > { %3245 = vst [vmem:[%s5050_s8 + $0x520] sm:$0xff] %v2989_v46  ;;  %v2990_v50 = vadd.f32 %v5479_v39, %v2534_v23  ;;  %v2992_v36 = vadd.f32 %v5481_v24, %v2727_v41  ;;  %v2536_v31 = vadd.f32 %v2535_v13, %v6279_v52  ;;  %v2729_v56 = vadd.f32 %v2728_v2, %v6280_v8  ;;  %v6292_v46 = vld [vmem:[#allocation188_spill] sm:$0xff]  ;;  %v6293_v13 = vld [vmem:[#allocation189_spill] sm:$0xff] }
 0x381   : > { %3247 = vst [vmem:[%s5050_s8 + $0x530] sm:$0xff] %v2991_v51  ;;  %v2537_v49 = vpop.f32.mrf.mxu0  ;;  %v2730_v42 = vpop.f32.mrf.mxu1 }
 0x382   : > { %3246 = vst [vmem:[%s5050_s8 + $0x528] sm:$0xff] %v2990_v50  ;;  %3248 = vst [vmem:[%s5050_s8 + $0x538] sm:$0xff] %v2992_v36  ;;  %v2997_v3 = vadd.f32 %v5469_v26, %v2536_v31  ;;  %v2999_v28 = vadd.f32 %v5471_v54, %v2729_v56  ;;  %v2538_v9 = vadd.f32 %v2537_v49, %v6281_v5  ;;  %v6294_v50 = vld [vmem:[#allocation190_spill] sm:$0xff]  ;;  %v6295_v49 = vld [vmem:[#allocation191_spill] sm:$0xff] }
 0x383   : > { %v2731_v44 = vadd.f32 %v2730_v42, %v6282_v35  ;;  %v2541_v43 = vpop.f32.mrf.mxu0  ;;  %v2734_v14 = vpop.f32.mrf.mxu1 }
 0x384   : > { %3253 = vst [vmem:[%s5050_s8 + $0x560] sm:$0xff] %v2997_v3  ;;  %3255 = vst [vmem:[%s5050_s8 + $0x570] sm:$0xff] %v2999_v28  ;;  %v2998_v27 = vadd.f32 %v5479_v39, %v2538_v9  ;;  %v2542_v63 = vadd.f32 %v2541_v43, %v6283_v1  ;;  %v2735_v30 = vadd.f32 %v2734_v14, %v6284_v0  ;;  %v6296_v3 = vld [vmem:[#allocation192_spill] sm:$0xff]  ;;  %v6297_v43 = vld [vmem:[#allocation193_spill] sm:$0xff] }
 0x385   : > { %v3000_v19 = vadd.f32 %v5481_v24, %v2731_v44  ;;  %v2543_v37 = vpop.f32.mrf.mxu0  ;;  %v2736_v22 = vpop.f32.mrf.mxu1 }
 0x386   : > { %3254 = vst [vmem:[%s5050_s8 + $0x568] sm:$0xff] %v2998_v27  ;;  %v3005_v40 = vadd.f32 %v5469_v26, %v2542_v63  ;;  %v3007_v53 = vadd.f32 %v5471_v54, %v2735_v30  ;;  %v2544_v16 = vadd.f32 %v2543_v37, %v6285_v62  ;;  %v2737_v17 = vadd.f32 %v2736_v22, %v6286_v12  ;;  %v6298_v27 = vld [vmem:[#allocation194_spill] sm:$0xff]  ;;  %v6299_v37 = vld [vmem:[#allocation195_spill] sm:$0xff] }
 0x387   : > { %3256 = vst [vmem:[%s5050_s8 + $0x578] sm:$0xff] %v3000_v19  ;;  %v2545_v61 = vpop.f32.mrf.mxu0  ;;  %v2738_v58 = vpop.f32.mrf.mxu1 }
 0x388   : > { %3261 = vst [vmem:[%s5050_s8 + $0x5a0] sm:$0xff] %v3005_v40  ;;  %3263 = vst [vmem:[%s5050_s8 + $0x5b0] sm:$0xff] %v3007_v53  ;;  %v3006_v60 = vadd.f32 %v5479_v39, %v2544_v16  ;;  %v3008_v59 = vadd.f32 %v5481_v24, %v2737_v17  ;;  %v2546_v32 = vadd.f32 %v2545_v61, %v6287_v55  ;;  %v6300_v40 = vld [vmem:[#allocation196_spill] sm:$0xff]  ;;  %v6301_v61 = vld [vmem:[#allocation197_spill] sm:$0xff] }
 0x389   : > { %v2739_v45 = vadd.f32 %v2738_v58, %v6288_v6  ;;  %v2547_v18 = vpop.f32.mrf.mxu0  ;;  %v2740_v57 = vpop.f32.mrf.mxu1 }
 0x38a   : > { %3262 = vst [vmem:[%s5050_s8 + $0x5a8] sm:$0xff] %v3006_v60  ;;  %3264 = vst [vmem:[%s5050_s8 + $0x5b8] sm:$0xff] %v3008_v59  ;;  %v3013_v34 = vadd.f32 %v5469_v26, %v2546_v32  ;;  %v2548_v15 = vadd.f32 %v2547_v18, %v6289_v7  ;;  %v2741_v10 = vadd.f32 %v2740_v57, %v6290_v20  ;;  %v6302_v60 = vld [vmem:[#allocation198_spill] sm:$0xff]  ;;  %v6303_v18 = vld [vmem:[#allocation199_spill] sm:$0xff] }
 0x38b   : > { %v3015_v25 = vadd.f32 %v5471_v54, %v2739_v45  ;;  %v2551_v33 = vpop.f32.mrf.mxu0  ;;  %v2744_v11 = vpop.f32.mrf.mxu1 }
 0x38c   : > { %3269 = vst [vmem:[%s5050_s8 + $0x5e0] sm:$0xff] %v3013_v34  ;;  %v3014_v38 = vadd.f32 %v5479_v39, %v2548_v15  ;;  %v3016_v47 = vadd.f32 %v5481_v24, %v2741_v10  ;;  %v2552_v21 = vadd.f32 %v2551_v33, %v6291_v48  ;;  %v2745_v51 = vadd.f32 %v2744_v11, %v6292_v46  ;;  %v6304_v34 = vld [vmem:[#allocation200_spill] sm:$0xff]  ;;  %v6305_v33 = vld [vmem:[#allocation201_spill] sm:$0xff] }
 0x38d   : > { %3271 = vst [vmem:[%s5050_s8 + $0x5f0] sm:$0xff] %v3015_v25  ;;  %v2553_v4 = vpop.f32.mrf.mxu0  ;;  %v2746_v23 = vpop.f32.mrf.mxu1 }
 0x38e   : > { %3270 = vst [vmem:[%s5050_s8 + $0x5e8] sm:$0xff] %v3014_v38  ;;  %3272 = vst [vmem:[%s5050_s8 + $0x5f8] sm:$0xff] %v3016_v47  ;;  %v3021_v29 = vadd.f32 %v5469_v26, %v2552_v21  ;;  %v3023_v41 = vadd.f32 %v5471_v54, %v2745_v51  ;;  %v2554_v2 = vadd.f32 %v2553_v4, %v6293_v13  ;;  %v6306_v38 = vld [vmem:[#allocation202_spill] sm:$0xff]  ;;  %v6307_v4 = vld [vmem:[#allocation203_spill] sm:$0xff] }
 0x38f   : > { %v2747_v36 = vadd.f32 %v2746_v23, %v6294_v50  ;;  %v2555_v52 = vpop.f32.mrf.mxu0  ;;  %v2748_v31 = vpop.f32.mrf.mxu1 }
 0x390   : > { %3277 = vst [vmem:[%s5050_s8 + $0x620] sm:$0xff] %v3021_v29  ;;  %3279 = vst [vmem:[%s5050_s8 + $0x630] sm:$0xff] %v3023_v41  ;;  %v3022_v8 = vadd.f32 %v5479_v39, %v2554_v2  ;;  %v2556_v42 = vadd.f32 %v2555_v52, %v6295_v49  ;;  %v2749_v28 = vadd.f32 %v2748_v31, %v6296_v3  ;;  %v6308_v29 = vld [vmem:[#allocation204_spill] sm:$0xff]  ;;  %v6309_v52 = vld [vmem:[#allocation205_spill] sm:$0xff] }
 0x391   : > { %v3024_v56 = vadd.f32 %v5481_v24, %v2747_v36  ;;  %v2557_v5 = vpop.f32.mrf.mxu0  ;;  %v2750_v9 = vpop.f32.mrf.mxu1 }
 0x392   : > { %3278 = vst [vmem:[%s5050_s8 + $0x628] sm:$0xff] %v3022_v8  ;;  %v3029_v35 = vadd.f32 %v5469_v26, %v2556_v42  ;;  %v3031_v44 = vadd.f32 %v5471_v54, %v2749_v28  ;;  %v2558_v14 = vadd.f32 %v2557_v5, %v6297_v43  ;;  %v2751_v19 = vadd.f32 %v2750_v9, %v6298_v27  ;;  %v6310_v8 = vld [vmem:[#allocation206_spill] sm:$0xff]  ;;  %v6311_v5 = vld [vmem:[#allocation207_spill] sm:$0xff] }
 0x393   : > { %3280 = vst [vmem:[%s5050_s8 + $0x638] sm:$0xff] %v3024_v56  ;;  %v2561_v1 = vpop.f32.mrf.mxu0  ;;  %v2754_v63 = vpop.f32.mrf.mxu1 }
 0x394   : > { %3285 = vst [vmem:[%s5050_s8 + $0x660] sm:$0xff] %v3029_v35  ;;  %3287 = vst [vmem:[%s5050_s8 + $0x670] sm:$0xff] %v3031_v44  ;;  %v3030_v0 = vadd.f32 %v5479_v39, %v2558_v14  ;;  %v3032_v30 = vadd.f32 %v5481_v24, %v2751_v19  ;;  %v2562_v22 = vadd.f32 %v2561_v1, %v6299_v37  ;;  %v6312_v35 = vld [vmem:[#allocation208_spill] sm:$0xff]  ;;  %v6313_v1 = vld [vmem:[#allocation209_spill] sm:$0xff] }
 0x395   : > { %v2755_v53 = vadd.f32 %v2754_v63, %v6300_v40  ;;  %v2563_v62 = vpop.f32.mrf.mxu0  ;;  %v2756_v16 = vpop.f32.mrf.mxu1 }
 0x396   : > { %3286 = vst [vmem:[%s5050_s8 + $0x668] sm:$0xff] %v3030_v0  ;;  %3288 = vst [vmem:[%s5050_s8 + $0x678] sm:$0xff] %v3032_v30  ;;  %v3037_v12 = vadd.f32 %v5469_v26, %v2562_v22  ;;  %v2564_v58 = vadd.f32 %v2563_v62, %v6301_v61  ;;  %v2757_v59 = vadd.f32 %v2756_v16, %v6302_v60  ;;  %v6314_v0 = vld [vmem:[#allocation210_spill] sm:$0xff]  ;;  %v6315_v62 = vld [vmem:[#allocation211_spill] sm:$0xff] }
 0x397   : > { %v3039_v17 = vadd.f32 %v5471_v54, %v2755_v53  ;;  %v2565_v55 = vpop.f32.mrf.mxu0  ;;  %v2758_v32 = vpop.f32.mrf.mxu1 }
 0x398   : > { %3293 = vst [vmem:[%s5050_s8 + $0x6a0] sm:$0xff] %v3037_v12  ;;  %v3038_v6 = vadd.f32 %v5479_v39, %v2564_v58  ;;  %v3040_v45 = vadd.f32 %v5481_v24, %v2757_v59  ;;  %v2566_v57 = vadd.f32 %v2565_v55, %v6303_v18  ;;  %v2759_v25 = vadd.f32 %v2758_v32, %v6304_v34  ;;  %v6316_v12 = vld [vmem:[#allocation212_spill] sm:$0xff]  ;;  %v6317_v55 = vld [vmem:[#allocation213_spill] sm:$0xff] }
 0x399   : > { %3295 = vst [vmem:[%s5050_s8 + $0x6b0] sm:$0xff] %v3039_v17  ;;  %v2567_v7 = vpop.f32.mrf.mxu0  ;;  %v2760_v15 = vpop.f32.mrf.mxu1 }
 0x39a   : > { %3294 = vst [vmem:[%s5050_s8 + $0x6a8] sm:$0xff] %v3038_v6  ;;  %3296 = vst [vmem:[%s5050_s8 + $0x6b8] sm:$0xff] %v3040_v45  ;;  %v3045_v20 = vadd.f32 %v5469_v26, %v2566_v57  ;;  %v3047_v10 = vadd.f32 %v5471_v54, %v2759_v25  ;;  %v2568_v11 = vadd.f32 %v2567_v7, %v6305_v33  ;;  %v6318_v6 = vld [vmem:[#allocation214_spill] sm:$0xff]  ;;  %v6319_v7 = vld [vmem:[#allocation215_spill] sm:$0xff] }
 0x39b   : > { %v2761_v47 = vadd.f32 %v2760_v15, %v6306_v38  ;;  %v2571_v48 = vpop.f32.mrf.mxu0  ;;  %v2764_v21 = vpop.f32.mrf.mxu1 }
 0x39c   : > { %3301 = vst [vmem:[%s5050_s8 + $0x6e0] sm:$0xff] %v3045_v20  ;;  %3303 = vst [vmem:[%s5050_s8 + $0x6f0] sm:$0xff] %v3047_v10  ;;  %v3046_v46 = vadd.f32 %v5479_v39, %v2568_v11  ;;  %v2572_v23 = vadd.f32 %v2571_v48, %v6307_v4  ;;  %v2765_v41 = vadd.f32 %v2764_v21, %v6308_v29  ;;  %v6320_v20 = vld [vmem:[#allocation216_spill] sm:$0xff]  ;;  %v6321_v48 = vld [vmem:[#allocation217_spill] sm:$0xff] }
 0x39d   : > { %v3048_v51 = vadd.f32 %v5481_v24, %v2761_v47  ;;  %v2573_v13 = vpop.f32.mrf.mxu0  ;;  %v2766_v2 = vpop.f32.mrf.mxu1 }
 0x39e   : > { %3302 = vst [vmem:[%s5050_s8 + $0x6e8] sm:$0xff] %v3046_v46  ;;  %v3053_v50 = vadd.f32 %v5469_v26, %v2572_v23  ;;  %v3055_v36 = vadd.f32 %v5471_v54, %v2765_v41  ;;  %v2574_v31 = vadd.f32 %v2573_v13, %v6309_v52  ;;  %v2767_v56 = vadd.f32 %v2766_v2, %v6310_v8  ;;  %v6322_v46 = vld [vmem:[#allocation218_spill] sm:$0xff] }
 0x39f   : > { %3304 = vst [vmem:[%s5050_s8 + $0x6f8] sm:$0xff] %v3048_v51  ;;  %v2575_v49 = vpop.f32.mrf.mxu0  ;;  %v2768_v42 = vpop.f32.mrf.mxu1 }
 0x3a0   : > { %3309 = vst [vmem:[%s5050_s8 + $0x720] sm:$0xff] %v3053_v50  ;;  %3311 = vst [vmem:[%s5050_s8 + $0x730] sm:$0xff] %v3055_v36  ;;  %v3054_v3 = vadd.f32 %v5479_v39, %v2574_v31  ;;  %v3056_v28 = vadd.f32 %v5481_v24, %v2767_v56  ;;  %v2576_v9 = vadd.f32 %v2575_v49, %v6311_v5 }
 0x3a1   : > { %v2769_v44 = vadd.f32 %v2768_v42, %v6312_v35  ;;  %v2577_v43 = vpop.f32.mrf.mxu0  ;;  %v2770_v14 = vpop.f32.mrf.mxu1 }
 0x3a2   : > { %3310 = vst [vmem:[%s5050_s8 + $0x728] sm:$0xff] %v3054_v3  ;;  %3312 = vst [vmem:[%s5050_s8 + $0x738] sm:$0xff] %v3056_v28  ;;  %v3061_v27 = vadd.f32 %v5469_v26, %v2576_v9  ;;  %v2578_v63 = vadd.f32 %v2577_v43, %v6313_v1  ;;  %v2771_v30 = vadd.f32 %v2770_v14, %v6314_v0 }
 0x3a3   : > { %v3063_v19 = vadd.f32 %v5471_v54, %v2769_v44  ;;  %v2581_v37 = vpop.f32.mrf.mxu0  ;;  %v2774_v22 = vpop.f32.mrf.mxu1 }
 0x3a4   : > { %3317 = vst [vmem:[%s5050_s8 + $0x760] sm:$0xff] %v3061_v27  ;;  %v3062_v40 = vadd.f32 %v5479_v39, %v2578_v63  ;;  %v3064_v53 = vadd.f32 %v5481_v24, %v2771_v30  ;;  %v2582_v16 = vadd.f32 %v2581_v37, %v6315_v62  ;;  %v2775_v17 = vadd.f32 %v2774_v22, %v6316_v12 }
 0x3a5   : > { %3319 = vst [vmem:[%s5050_s8 + $0x770] sm:$0xff] %v3063_v19  ;;  %v2583_v61 = vpop.f32.mrf.mxu0  ;;  %v2776_v58 = vpop.f32.mrf.mxu1 }
 0x3a6   : > { %3318 = vst [vmem:[%s5050_s8 + $0x768] sm:$0xff] %v3062_v40  ;;  %3320 = vst [vmem:[%s5050_s8 + $0x778] sm:$0xff] %v3064_v53  ;;  %v3069_v60 = vadd.f32 %v5469_v26, %v2582_v16  ;;  %v3071_v59 = vadd.f32 %v5471_v54, %v2775_v17  ;;  %v2584_v32 = vadd.f32 %v2583_v61, %v6317_v55 }
 0x3a7   : > { %v2777_v45 = vadd.f32 %v2776_v58, %v6318_v6  ;;  %v2585_v18 = vpop.f32.mrf.mxu0  ;;  %v2778_v57 = vpop.f32.mrf.mxu1 }
 0x3a8   : > { %3325 = vst [vmem:[%s5050_s8 + $0x7a0] sm:$0xff] %v3069_v60  ;;  %3327 = vst [vmem:[%s5050_s8 + $0x7b0] sm:$0xff] %v3071_v59  ;;  %v3070_v34 = vadd.f32 %v5479_v39, %v2584_v32  ;;  %v2586_v15 = vadd.f32 %v2585_v18, %v6319_v7  ;;  %v2779_v10 = vadd.f32 %v2778_v57, %v6320_v20 }
 0x3a9   : > { %v3072_v25 = vadd.f32 %v5481_v24, %v2777_v45  ;;  %v2587_v33 = vpop.f32.mrf.mxu0  ;;  %v2780_v11 = vpop.f32.mrf.mxu1 }
 0x3aa   : > { %3326 = vst [vmem:[%s5050_s8 + $0x7a8] sm:$0xff] %v3070_v34  ;;  %v3077_v38 = vadd.f32 %v5469_v26, %v2586_v15  ;;  %v3079_v47 = vadd.f32 %v5471_v54, %v2779_v10  ;;  %v2588_v21 = vadd.f32 %v2587_v33, %v6321_v48  ;;  %v2781_v51 = vadd.f32 %v2780_v11, %v6322_v46 }
 0x3ab   : > { %3328 = vst [vmem:[%s5050_s8 + $0x7b8] sm:$0xff] %v3072_v25 }
 0x3ac   : > { %3333 = vst [vmem:[%s5050_s8 + $0x7e0] sm:$0xff] %v3077_v38  ;;  %3335 = vst [vmem:[%s5050_s8 + $0x7f0] sm:$0xff] %v3079_v47  ;;  %v3078_v4 = vadd.f32 %v5479_v39, %v2588_v21  ;;  %v3080_v23 = vadd.f32 %v5481_v24, %v2781_v51 }
 0x3ae   : > { %3334 = vst [vmem:[%s5050_s8 + $0x7e8] sm:$0xff] %v3078_v4  ;;  %3336 = vst [vmem:[%s5050_s8 + $0x7f8] sm:$0xff] %v3080_v23 }
 0x3af PF: > { %s17_s24 = sadd.s32 1, %s3707_s24  }
 0x3b0   : > { %p14_p4 = scmp.ge.s32.totalorder %s17_s24, 4  }
 0x3b2   :  { %16 = sbr.rel (!%p14_p4) target bundleno = 1 (0x1), region = 78 }

</bundles_post_ra>
